<compile_context>
chip_gen: v5e
topology: v5e:2x2
jax: 0.10.0
libtpu: 0.0.40
codegen_flags: <defaults>
</compile_context>

<pallas_src>
import functools

import jax
import jax.numpy as jnp
from jax.experimental import pallas as pl
from jax.experimental.pallas import tpu as pltpu


# ----------------------------- Pallas kernel ---------------------------------
def _pooling_attention_kernel(x_ref, pools_ref, bias_ref, wq_ref, wkv_ref,
                              gamma_ref, beta_ref, bproj_ref, o_ref,
                              *, num_heads, eps):
    """One grid step handles a (b_blk, n_blk) tile of query tokens.

    x_ref:     (b_blk, n_blk, C) f32   query tokens
    pools_ref: (b_blk, P_pad, C) f32   zero-padded pooled tokens (pre-LayerNorm)
    bias_ref:  (1, P_pad)        f32   additive mask row (-1e30 on padded columns)
    wq_ref:    (C, C)            bf16  Wq with the attention scale folded in
    wkv_ref:   (C, (1+H)*C)      bf16  [Wk | Wv_0 @ Wp_0 | ... | Wv_{H-1} @ Wp_{H-1}]
    gamma/beta/bproj: (1, C)     f32   LayerNorm affine / output-projection bias
    o_ref:     (b_blk, n_blk, C) f32   written exactly once per grid step
    """
    b_blk, n_blk, c = x_ref.shape
    hd = c // num_heads

    wq = wq_ref[...]
    wkv = wkv_ref[...]
    gamma = gamma_ref[...]
    beta = beta_ref[...]
    bias = bias_ref[...]
    bproj = bproj_ref[...]

    for b in range(b_blk):                                   # static unroll (b_blk <= B)
        x = x_ref[b]                                         # (n_blk, C) f32
        p = pools_ref[b]                                     # (P_pad, C) f32

        # LayerNorm over channels of the pooled tokens (f32 elementwise). Padded
        # rows become `beta`; they are removed from the softmax by the bias row.
        mu = jnp.mean(p, axis=-1, keepdims=True)
        var = jnp.mean(jnp.square(p - mu), axis=-1, keepdims=True)
        pn = (p - mu) * jax.lax.rsqrt(var + eps) * gamma + beta

        # Projections: bf16 MXU operands, f32 accumulation. q already carries the
        # 1/sqrt(hd) attention scale; kv yields k and the per-head v~_h = v_h @ Wp_h.
        q = jnp.dot(x.astype(jnp.bfloat16), wq,
                    preferred_element_type=jnp.float32)                       # (n_blk, C)
        kv = jnp.dot(pn.astype(jnp.bfloat16), wkv,
                     preferred_element_type=jnp.float32)                      # (P_pad, (1+H)*C)

        out = None
        for h in range(num_heads):                                            # static unroll
            qh = q[:, h * hd:(h + 1) * hd].astype(jnp.bfloat16)               # (n_blk, hd)
            kh = kv[:, h * hd:(h + 1) * hd].astype(jnp.bfloat16)              # (P_pad, hd)
            vth = kv[:, (1 + h) * c:(2 + h) * c].astype(jnp.bfloat16)         # (P_pad, C)

            # scores: (n_blk, P_pad) = q_h @ k_h^T  (+ padded-column mask row)
            s = jax.lax.dot_general(qh, kh, (((1,), (1,)), ((), ())),
                                    preferred_element_type=jnp.float32)
            s = s + bias
            s = s - jnp.max(s, axis=-1, keepdims=True)
            e = jnp.exp(s)                                                    # f32
            denom = jnp.sum(e, axis=-1, keepdims=True)                        # (n_blk, 1)

            # Deferred normalization: unnormalized PV matmul, then one EUP
            # reciprocal and a narrow (n_blk, C) multiply.
            part = jnp.dot(e.astype(jnp.bfloat16), vth,
                           preferred_element_type=jnp.float32)                # (n_blk, C)
            part = part * pl.reciprocal(denom, approx=True)
            out = part if out is None else out + part

        o_ref[b] = out + bproj


# ------------------------------- JAX glue -------------------------------------
def adaptive_avg_pool2d(x, out_hw):
    # x: (B, C, H, W); output sizes divide H, W evenly for the shapes used here,
    # so adaptive_avg_pool2d is identical to a plain average pool.
    B, C, H, W = x.shape
    oh, ow = out_hw
    x = x.reshape(B, C, oh, H // oh, ow, W // ow)
    return x.mean(axis=(3, 5))


def depthwise_conv3x3(x, w, b):
    # x: (B, C, h, w), w: (C, 1, 3, 3), b: (C,) -- Conv2d(C, C, 3, padding=1, groups=C)
    y = jax.lax.conv_general_dilated(
        x, w, window_strides=(1, 1), padding=((1, 1), (1, 1)),
        dimension_numbers=("NCHW", "OIHW", "NCHW"),
        feature_group_count=x.shape[1])
    return y + b[None, :, None, None]


def _multi_tensorcore_chip():
    """v7x exposes 2 TensorCores per chip to the Pallas grid; v5e/v6e have 1."""
    try:
        kind = jax.devices()[0].device_kind.lower()
    except Exception:
        return False
    return ("v7" in kind) or ("7x" in kind)


def init_params(key, dim, pool_ratios):
    ks = jax.random.split(key, 8 + 2 * len(pool_ratios))
    s = 0.05
    params = dict(
        wq=s * jax.random.normal(ks[0], (dim, dim), jnp.float32),
        wk=s * jax.random.normal(ks[1], (dim, dim), jnp.float32),
        wv=s * jax.random.normal(ks[2], (dim, dim), jnp.float32),
        wproj=s * jax.random.normal(ks[3], (dim, dim), jnp.float32),
        bproj=s * jax.random.normal(ks[4], (dim,), jnp.float32),
        gamma=1.0 + 0.1 * jax.random.normal(ks[5], (dim,), jnp.float32),
        beta=0.1 * jax.random.normal(ks[6], (dim,), jnp.float32),
        d_convs=[],
    )
    for i in range(len(pool_ratios)):
        cw = s * jax.random.normal(ks[7 + 2 * i], (dim, 1, 3, 3), jnp.float32)
        cb = s * jax.random.normal(ks[8 + 2 * i], (dim,), jnp.float32)
        params["d_convs"].append((cw, cb))
    return params


def pooling_attention_forward(x, H, W, params, *, num_heads, pool_ratios):
    B, N, C = x.shape
    hd = C // num_heads
    scale = hd ** -0.5

    # TODO(synk): pooling pyramid + depthwise 3x3 convs stay as plain-JAX (XLA)
    # glue; the tensors are tiny and memory-bound, not worth a Pallas kernel.
    x_ = jnp.transpose(x, (0, 2, 1)).reshape(B, C, H, W)
    pools = []
    for pr, (cw, cb) in zip(pool_ratios, params["d_convs"]):
        oh, ow = int(round(H / pr)), int(round(W / pr))
        pool = adaptive_avg_pool2d(x_, (oh, ow))
        pool = pool + depthwise_conv3x3(pool, cw, cb)
        pools.append(pool.reshape(B, C, -1))
    pools = jnp.concatenate(pools, axis=2)          # (B, C, P)
    pools = jnp.transpose(pools, (0, 2, 1))         # (B, P, C)
    P = pools.shape[1]

    # Pad the pooled-token axis to a multiple of 128 lanes (dense score vregs).
    P_pad = max(128, ((P + 127) // 128) * 128)
    pools_pad = jnp.pad(pools, ((0, 0), (0, P_pad - P), (0, 0)))

    # Resident additive-mask row for the padded pooled-token columns.
    col = jnp.arange(P_pad, dtype=jnp.int32).reshape(1, P_pad)
    bias_row = jnp.where(col < P, 0.0, -1e30).astype(jnp.float32)

    # Host-side weight prep (bf16 MXU operands, f32 accumulation in-kernel):
    #   - fold the attention scale into Wq,
    #   - fold the output projection into per-head V weights and fuse with Wk:
    #     (attn_h @ v_h) @ Wp_h == attn_h @ (pn @ (Wv_h @ Wp_h)).
    wq_scaled = (params["wq"] * scale).astype(jnp.bfloat16)                 # (C, C)
    wv_tilde = [params["wv"][:, h * hd:(h + 1) * hd]
                @ params["wproj"][h * hd:(h + 1) * hd, :]
                for h in range(num_heads)]                                  # each (C, C)
    wkv = jnp.concatenate([params["wk"]] + wv_tilde,
                          axis=1).astype(jnp.bfloat16)                      # (C, (1+H)*C)
    gamma = params["gamma"].reshape(1, C).astype(jnp.float32)
    beta = params["beta"].reshape(1, C).astype(jnp.float32)
    bproj = params["bproj"].reshape(1, C).astype(jnp.float32)

    # Generation-aware grid shaping: collapse the batch grid on single-TC chips
    # (v5e/v6e); keep per-batch parallel steps on v7x (2 TCs), split N when B == 1.
    if _multi_tensorcore_chip():
        b_blk = 1
        n_blk = N // 2 if (B < 2 and N % 16 == 0) else N
    else:
        b_blk, n_blk = B, N
    grid = (B // b_blk, N // n_blk)

    kernel = functools.partial(_pooling_attention_kernel,
                               num_heads=num_heads, eps=1e-5)
    out = pl.pallas_call(
        kernel,
        out_shape=jax.ShapeDtypeStruct((B, N, C), jnp.float32),
        grid_spec=pltpu.PrefetchScalarGridSpec(
            num_scalar_prefetch=0,
            grid=grid,
            in_specs=[
                pl.BlockSpec((b_blk, n_blk, C), lambda i, j: (i, j, 0)),       # x
                pl.BlockSpec((b_blk, P_pad, C), lambda i, j: (i, 0, 0)),       # pooled tokens
                # grid-invariant blocks: DMA'd once, resident across all steps
                pl.BlockSpec((1, P_pad), lambda i, j: (0, 0)),                 # mask row
                pl.BlockSpec((C, C), lambda i, j: (0, 0)),                     # Wq * scale (bf16)
                pl.BlockSpec((C, (1 + num_heads) * C), lambda i, j: (0, 0)),   # [Wk | Wv~_h] (bf16)
                pl.BlockSpec((1, C), lambda i, j: (0, 0)),                     # gamma
                pl.BlockSpec((1, C), lambda i, j: (0, 0)),                     # beta
                pl.BlockSpec((1, C), lambda i, j: (0, 0)),                     # bproj
            ],
            out_specs=pl.BlockSpec((b_blk, n_blk, C), lambda i, j: (i, j, 0)),
        ),
        compiler_params=pltpu.CompilerParams(
            dimension_semantics=("parallel", "parallel")),
    )(x, pools_pad, bias_row, wq_scaled, wkv, gamma, beta, bproj)
    return out


# --------------------------- pure-JAX reference --------------------------------
def reference_forward(x, H, W, params, *, num_heads, pool_ratios):
    B, N, C = x.shape
    hd = C // num_heads
    scale = hd ** -0.5
    q = (x @ params["wq"]).reshape(B, N, num_heads, hd).transpose(0, 2, 1, 3)
    x_ = jnp.transpose(x, (0, 2, 1)).reshape(B, C, H, W)
    pools = []
    for pr, (cw, cb) in zip(pool_ratios, params["d_convs"]):
        oh, ow = int(round(H / pr)), int(round(W / pr))
        pool = adaptive_avg_pool2d(x_, (oh, ow))
        pool = pool + depthwise_conv3x3(pool, cw, cb)
        pools.append(pool.reshape(B, C, -1))
    pools = jnp.concatenate(pools, axis=2).transpose(0, 2, 1)   # (B, P, C)
    mu = pools.mean(-1, keepdims=True)
    var = ((pools - mu) ** 2).mean(-1, keepdims=True)
    pools = (pools - mu) / jnp.sqrt(var + 1e-5) * params["gamma"] + params["beta"]
    k = (pools @ params["wk"]).reshape(B, -1, num_heads, hd).transpose(0, 2, 1, 3)
    v = (pools @ params["wv"]).reshape(B, -1, num_heads, hd).transpose(0, 2, 1, 3)
    attn = jnp.einsum("bhnd,bhpd->bhnp", q, k) * scale
    attn = jax.nn.softmax(attn, axis=-1)
    out = jnp.einsum("bhnp,bhpd->bhnd", attn, v)
    out = out.transpose(0, 2, 1, 3).reshape(B, N, C)
    return out @ params["wproj"] + params["bproj"]


# ----------------------------------- main --------------------------------------
if __name__ == "__main__":
    B, dim, num_heads = 2, 32, 2
    H = W = 12
    N = H * W                      # 144 tokens
    pool_ratios = [1, 2, 3, 6]     # pooled sizes 12,6,4,2 -> P = 144+36+16+4 = 200

    key = jax.random.PRNGKey(0)
    kx, kp = jax.random.split(key)
    x = jax.random.normal(kx, (B, N, dim), jnp.float32)
    params = init_params(kp, dim, pool_ratios)

    out = pooling_attention_forward(x, H, W, params,
                                    num_heads=num_heads, pool_ratios=pool_ratios)
    out = jax.block_until_ready(out)

    ref = reference_forward(x, H, W, params,
                            num_heads=num_heads, pool_ratios=pool_ratios)
    ref = jax.block_until_ready(ref)

    assert out.shape == (B, N, dim)
    # bf16 MXU operands (f32 accumulation) -> slightly looser tolerance than pure f32.
    assert jnp.allclose(out, ref, atol=3e-3, rtol=3e-3), (
        f"max abs err {float(jnp.max(jnp.abs(out - ref)))}")
    print("KERNEL_OK")
</pallas_src>

<mosaic_0001>
module attributes {stable_mosaic.version = 11 : i64} {
  func.func @_pooling_attention_kernel(%arg0: i32, %arg1: i32, %arg2: memref<2x144x32xf32, #tpu.memory_space<vmem>>, %arg3: memref<2x256x32xf32, #tpu.memory_space<vmem>>, %arg4: memref<1x256xf32, #tpu.memory_space<vmem>>, %arg5: memref<32x32xbf16, #tpu.memory_space<vmem>>, %arg6: memref<32x96xbf16, #tpu.memory_space<vmem>>, %arg7: memref<1x32xf32, #tpu.memory_space<vmem>>, %arg8: memref<1x32xf32, #tpu.memory_space<vmem>>, %arg9: memref<1x32xf32, #tpu.memory_space<vmem>>, %arg10: memref<2x144x32xf32, #tpu.memory_space<vmem>>) attributes {dimension_semantics = [#tpu.dimension_semantics<parallel>, #tpu.dimension_semantics<parallel>], iteration_bounds = array<i64: 1, 1>, scalar_prefetch = 0 : i64, scratch_operands = 0 : i64, tpu.core_type = #tpu.core_type<tc>, window_params = [{transform_indices = @transform_0, window_bounds = array<i64: 2, 144, 32>}, {transform_indices = @transform_1, window_bounds = array<i64: 2, 256, 32>}, {pipeline_mode = #tpu.pipeline_mode<synchronous>, transform_indices = @transform_2, window_bounds = array<i64: 1, 256>}, {pipeline_mode = #tpu.pipeline_mode<synchronous>, transform_indices = @transform_3, window_bounds = array<i64: 32, 32>}, {pipeline_mode = #tpu.pipeline_mode<synchronous>, transform_indices = @transform_4, window_bounds = array<i64: 32, 96>}, {pipeline_mode = #tpu.pipeline_mode<synchronous>, transform_indices = @transform_5, window_bounds = array<i64: 1, 32>}, {pipeline_mode = #tpu.pipeline_mode<synchronous>, transform_indices = @transform_6, window_bounds = array<i64: 1, 32>}, {pipeline_mode = #tpu.pipeline_mode<synchronous>, transform_indices = @transform_7, window_bounds = array<i64: 1, 32>}, {transform_indices = @transform_8, window_bounds = array<i64: 2, 144, 32>}]} {
    %c0 = arith.constant 0 : index
    %c0_0 = arith.constant 0 : index
    %0 = vector.load %arg5[%c0, %c0_0] : memref<32x32xbf16, #tpu.memory_space<vmem>>, vector<32x32xbf16>
    %c0_1 = arith.constant 0 : index
    %c0_2 = arith.constant 0 : index
    %1 = vector.load %arg6[%c0_1, %c0_2] : memref<32x96xbf16, #tpu.memory_space<vmem>>, vector<32x96xbf16>
    %c0_3 = arith.constant 0 : index
    %c0_4 = arith.constant 0 : index
    %2 = vector.load %arg7[%c0_3, %c0_4] : memref<1x32xf32, #tpu.memory_space<vmem>>, vector<1x32xf32>
    %c0_5 = arith.constant 0 : index
    %c0_6 = arith.constant 0 : index
    %3 = vector.load %arg8[%c0_5, %c0_6] : memref<1x32xf32, #tpu.memory_space<vmem>>, vector<1x32xf32>
    %c0_7 = arith.constant 0 : index
    %c0_8 = arith.constant 0 : index
    %4 = vector.load %arg4[%c0_7, %c0_8] : memref<1x256xf32, #tpu.memory_space<vmem>>, vector<1x256xf32>
    %c0_9 = arith.constant 0 : index
    %c0_10 = arith.constant 0 : index
    %5 = vector.load %arg9[%c0_9, %c0_10] : memref<1x32xf32, #tpu.memory_space<vmem>>, vector<1x32xf32>
    %c0_11 = arith.constant 0 : index
    %c0_12 = arith.constant 0 : index
    %c0_13 = arith.constant 0 : index
    %6 = vector.load %arg2[%c0_11, %c0_12, %c0_13] : memref<2x144x32xf32, #tpu.memory_space<vmem>>, vector<1x144x32xf32>
    %7 = vector.shape_cast %6 : vector<1x144x32xf32> to vector<144x32xf32>
    %c0_14 = arith.constant 0 : index
    %c0_15 = arith.constant 0 : index
    %c0_16 = arith.constant 0 : index
    %8 = vector.load %arg3[%c0_14, %c0_15, %c0_16] : memref<2x256x32xf32, #tpu.memory_space<vmem>>, vector<1x256x32xf32>
    %9 = vector.shape_cast %8 : vector<1x256x32xf32> to vector<256x32xf32>
    %cst = arith.constant dense<0.000000e+00> : vector<256xf32>
    %10 = vector.multi_reduction <add>, %9, %cst [1] : vector<256x32xf32> to vector<256xf32>
    %11 = vector.shape_cast %10 : vector<256xf32> to vector<256x1xf32>
    %cst_17 = arith.constant 3.200000e+01 : f32
    %12 = vector.broadcast %cst_17 : f32 to vector<256x1xf32>
    %13 = arith.divf %11, %12 : vector<256x1xf32>
    %14 = vector.broadcast %13 : vector<256x1xf32> to vector<256x32xf32>
    %15 = arith.subf %9, %14 : vector<256x32xf32>
    %16 = arith.mulf %15, %15 : vector<256x32xf32>
    %cst_18 = arith.constant dense<0.000000e+00> : vector<256xf32>
    %17 = vector.multi_reduction <add>, %16, %cst_18 [1] : vector<256x32xf32> to vector<256xf32>
    %18 = vector.shape_cast %17 : vector<256xf32> to vector<256x1xf32>
    %cst_19 = arith.constant 3.200000e+01 : f32
    %19 = vector.broadcast %cst_19 : f32 to vector<256x1xf32>
    %20 = arith.divf %18, %19 : vector<256x1xf32>
    %21 = vector.broadcast %13 : vector<256x1xf32> to vector<256x32xf32>
    %22 = arith.subf %9, %21 : vector<256x32xf32>
    %cst_20 = arith.constant 9.99999974E-6 : f32
    %23 = vector.broadcast %cst_20 : f32 to vector<256x1xf32>
    %24 = arith.addf %20, %23 : vector<256x1xf32>
    %25 = math.rsqrt %24 : vector<256x1xf32>
    %26 = vector.broadcast %25 : vector<256x1xf32> to vector<256x32xf32>
    %27 = arith.mulf %22, %26 : vector<256x32xf32>
    %28 = vector.broadcast %2 : vector<1x32xf32> to vector<256x32xf32>
    %29 = arith.mulf %27, %28 : vector<256x32xf32>
    %30 = vector.broadcast %3 : vector<1x32xf32> to vector<256x32xf32>
    %31 = arith.addf %29, %30 : vector<256x32xf32>
    %32 = arith.truncf %7 : vector<144x32xf32> to vector<144x32xbf16>
    %cst_21 = arith.constant dense<0.000000e+00> : vector<144x32xf32>
    %33 = tpu.matmul %32, %0, %cst_21 {dimension_numbers = #tpu.dot_dimension_numbers<[1], [0], [0], [1], [0, 0, 1, 1], [], []>} : vector<144x32xbf16>, vector<32x32xbf16>, vector<144x32xf32> -> vector<144x32xf32>
    %34 = arith.truncf %31 : vector<256x32xf32> to vector<256x32xbf16>
    %cst_22 = arith.constant dense<0.000000e+00> : vector<256x96xf32>
    %35 = tpu.matmul %34, %1, %cst_22 {dimension_numbers = #tpu.dot_dimension_numbers<[1], [0], [0], [1], [0, 0, 1, 1], [], []>} : vector<256x32xbf16>, vector<32x96xbf16>, vector<256x96xf32> -> vector<256x96xf32>
    %36 = vector.extract_strided_slice %33 {offsets = [0, 0], sizes = [144, 16], strides = [1, 1]} : vector<144x32xf32> to vector<144x16xf32>
    %37 = arith.truncf %36 : vector<144x16xf32> to vector<144x16xbf16>
    %38 = vector.extract_strided_slice %35 {offsets = [0, 0], sizes = [256, 16], strides = [1, 1]} : vector<256x96xf32> to vector<256x16xf32>
    %39 = arith.truncf %38 : vector<256x16xf32> to vector<256x16xbf16>
    %40 = vector.extract_strided_slice %35 {offsets = [0, 32], sizes = [256, 32], strides = [1, 1]} : vector<256x96xf32> to vector<256x32xf32>
    %41 = arith.truncf %40 : vector<256x32xf32> to vector<256x32xbf16>
    %cst_23 = arith.constant dense<0.000000e+00> : vector<144x256xf32>
    %42 = tpu.matmul %37, %39, %cst_23 {dimension_numbers = #tpu.dot_dimension_numbers<[1], [1], [0], [0], [0, 0, 1, 0], [], []>} : vector<144x16xbf16>, vector<256x16xbf16>, vector<144x256xf32> -> vector<144x256xf32>
    %43 = vector.broadcast %4 : vector<1x256xf32> to vector<144x256xf32>
    %44 = arith.addf %42, %43 : vector<144x256xf32>
    %cst_24 = arith.constant dense<0xFF800000> : vector<144xf32>
    %45 = vector.multi_reduction <maximumf>, %44, %cst_24 [1] : vector<144x256xf32> to vector<144xf32>
    %46 = vector.shape_cast %45 : vector<144xf32> to vector<144x1xf32>
    %47 = vector.broadcast %46 : vector<144x1xf32> to vector<144x256xf32>
    %48 = arith.subf %44, %47 : vector<144x256xf32>
    %49 = math.exp %48 : vector<144x256xf32>
    %cst_25 = arith.constant dense<0.000000e+00> : vector<144xf32>
    %50 = vector.multi_reduction <add>, %49, %cst_25 [1] : vector<144x256xf32> to vector<144xf32>
    %51 = vector.shape_cast %50 : vector<144xf32> to vector<144x1xf32>
    %52 = arith.truncf %49 : vector<144x256xf32> to vector<144x256xbf16>
    %cst_26 = arith.constant dense<0.000000e+00> : vector<144x32xf32>
    %53 = tpu.matmul %52, %41, %cst_26 {dimension_numbers = #tpu.dot_dimension_numbers<[1], [0], [0], [1], [0, 0, 1, 1], [], []>} : vector<144x256xbf16>, vector<256x32xbf16>, vector<144x32xf32> -> vector<144x32xf32>
    %54 = tpu.reciprocal %51 {approx = true} : vector<144x1xf32> -> vector<144x1xf32>
    %55 = vector.broadcast %54 : vector<144x1xf32> to vector<144x32xf32>
    %56 = arith.mulf %53, %55 : vector<144x32xf32>
    %57 = vector.extract_strided_slice %33 {offsets = [0, 16], sizes = [144, 16], strides = [1, 1]} : vector<144x32xf32> to vector<144x16xf32>
    %58 = arith.truncf %57 : vector<144x16xf32> to vector<144x16xbf16>
    %59 = vector.extract_strided_slice %35 {offsets = [0, 16], sizes = [256, 16], strides = [1, 1]} : vector<256x96xf32> to vector<256x16xf32>
    %60 = arith.truncf %59 : vector<256x16xf32> to vector<256x16xbf16>
    %61 = vector.extract_strided_slice %35 {offsets = [0, 64], sizes = [256, 32], strides = [1, 1]} : vector<256x96xf32> to vector<256x32xf32>
    %62 = arith.truncf %61 : vector<256x32xf32> to vector<256x32xbf16>
    %cst_27 = arith.constant dense<0.000000e+00> : vector<144x256xf32>
    %63 = tpu.matmul %58, %60, %cst_27 {dimension_numbers = #tpu.dot_dimension_numbers<[1], [1], [0], [0], [0, 0, 1, 0], [], []>} : vector<144x16xbf16>, vector<256x16xbf16>, vector<144x256xf32> -> vector<144x256xf32>
    %64 = vector.broadcast %4 : vector<1x256xf32> to vector<144x256xf32>
    %65 = arith.addf %63, %64 : vector<144x256xf32>
    %cst_28 = arith.constant dense<0xFF800000> : vector<144xf32>
    %66 = vector.multi_reduction <maximumf>, %65, %cst_28 [1] : vector<144x256xf32> to vector<144xf32>
    %67 = vector.shape_cast %66 : vector<144xf32> to vector<144x1xf32>
    %68 = vector.broadcast %67 : vector<144x1xf32> to vector<144x256xf32>
    %69 = arith.subf %65, %68 : vector<144x256xf32>
    %70 = math.exp %69 : vector<144x256xf32>
    %cst_29 = arith.constant dense<0.000000e+00> : vector<144xf32>
    %71 = vector.multi_reduction <add>, %70, %cst_29 [1] : vector<144x256xf32> to vector<144xf32>
    %72 = vector.shape_cast %71 : vector<144xf32> to vector<144x1xf32>
    %73 = arith.truncf %70 : vector<144x256xf32> to vector<144x256xbf16>
    %cst_30 = arith.constant dense<0.000000e+00> : vector<144x32xf32>
    %74 = tpu.matmul %73, %62, %cst_30 {dimension_numbers = #tpu.dot_dimension_numbers<[1], [0], [0], [1], [0, 0, 1, 1], [], []>} : vector<144x256xbf16>, vector<256x32xbf16>, vector<144x32xf32> -> vector<144x32xf32>
    %75 = tpu.reciprocal %72 {approx = true} : vector<144x1xf32> -> vector<144x1xf32>
    %76 = vector.broadcast %75 : vector<144x1xf32> to vector<144x32xf32>
    %77 = arith.mulf %74, %76 : vector<144x32xf32>
    %78 = arith.addf %56, %77 : vector<144x32xf32>
    %79 = vector.broadcast %5 : vector<1x32xf32> to vector<144x32xf32>
    %80 = arith.addf %78, %79 : vector<144x32xf32>
    %c0_31 = arith.constant 0 : index
    %c0_32 = arith.constant 0 : index
    %c0_33 = arith.constant 0 : index
    %81 = vector.load %arg10[%c0_31, %c0_32, %c0_33] : memref<2x144x32xf32, #tpu.memory_space<vmem>>, vector<1x144x32xf32>
    %82 = vector.shape_cast %81 : vector<1x144x32xf32> to vector<144x32xf32>
    %83 = vector.shape_cast %80 : vector<144x32xf32> to vector<1x144x32xf32>
    tpu.vector_store %arg10[%c0_31, %c0_32, %c0_33], %83 {strides = array<i32>} : memref<2x144x32xf32, #tpu.memory_space<vmem>>, vector<1x144x32xf32>,
    %c1 = arith.constant 1 : index
    %c0_34 = arith.constant 0 : index
    %c0_35 = arith.constant 0 : index
    %84 = vector.load %arg2[%c1, %c0_34, %c0_35] : memref<2x144x32xf32, #tpu.memory_space<vmem>>, vector<1x144x32xf32>
    %85 = vector.shape_cast %84 : vector<1x144x32xf32> to vector<144x32xf32>
    %c1_36 = arith.constant 1 : index
    %c0_37 = arith.constant 0 : index
    %c0_38 = arith.constant 0 : index
    %86 = vector.load %arg3[%c1_36, %c0_37, %c0_38] : memref<2x256x32xf32, #tpu.memory_space<vmem>>, vector<1x256x32xf32>
    %87 = vector.shape_cast %86 : vector<1x256x32xf32> to vector<256x32xf32>
    %cst_39 = arith.constant dense<0.000000e+00> : vector<256xf32>
    %88 = vector.multi_reduction <add>, %87, %cst_39 [1] : vector<256x32xf32> to vector<256xf32>
    %89 = vector.shape_cast %88 : vector<256xf32> to vector<256x1xf32>
    %cst_40 = arith.constant 3.200000e+01 : f32
    %90 = vector.broadcast %cst_40 : f32 to vector<256x1xf32>
    %91 = arith.divf %89, %90 : vector<256x1xf32>
    %92 = vector.broadcast %91 : vector<256x1xf32> to vector<256x32xf32>
    %93 = arith.subf %87, %92 : vector<256x32xf32>
    %94 = arith.mulf %93, %93 : vector<256x32xf32>
    %cst_41 = arith.constant dense<0.000000e+00> : vector<256xf32>
    %95 = vector.multi_reduction <add>, %94, %cst_41 [1] : vector<256x32xf32> to vector<256xf32>
    %96 = vector.shape_cast %95 : vector<256xf32> to vector<256x1xf32>
    %cst_42 = arith.constant 3.200000e+01 : f32
    %97 = vector.broadcast %cst_42 : f32 to vector<256x1xf32>
    %98 = arith.divf %96, %97 : vector<256x1xf32>
    %99 = vector.broadcast %91 : vector<256x1xf32> to vector<256x32xf32>
    %100 = arith.subf %87, %99 : vector<256x32xf32>
    %cst_43 = arith.constant 9.99999974E-6 : f32
    %101 = vector.broadcast %cst_43 : f32 to vector<256x1xf32>
    %102 = arith.addf %98, %101 : vector<256x1xf32>
    %103 = math.rsqrt %102 : vector<256x1xf32>
    %104 = vector.broadcast %103 : vector<256x1xf32> to vector<256x32xf32>
    %105 = arith.mulf %100, %104 : vector<256x32xf32>
    %106 = vector.broadcast %2 : vector<1x32xf32> to vector<256x32xf32>
    %107 = arith.mulf %105, %106 : vector<256x32xf32>
    %108 = vector.broadcast %3 : vector<1x32xf32> to vector<256x32xf32>
    %109 = arith.addf %107, %108 : vector<256x32xf32>
    %110 = arith.truncf %85 : vector<144x32xf32> to vector<144x32xbf16>
    %cst_44 = arith.constant dense<0.000000e+00> : vector<144x32xf32>
    %111 = tpu.matmul %110, %0, %cst_44 {dimension_numbers = #tpu.dot_dimension_numbers<[1], [0], [0], [1], [0, 0, 1, 1], [], []>} : vector<144x32xbf16>, vector<32x32xbf16>, vector<144x32xf32> -> vector<144x32xf32>
    %112 = arith.truncf %109 : vector<256x32xf32> to vector<256x32xbf16>
    %cst_45 = arith.constant dense<0.000000e+00> : vector<256x96xf32>
    %113 = tpu.matmul %112, %1, %cst_45 {dimension_numbers = #tpu.dot_dimension_numbers<[1], [0], [0], [1], [0, 0, 1, 1], [], []>} : vector<256x32xbf16>, vector<32x96xbf16>, vector<256x96xf32> -> vector<256x96xf32>
    %114 = vector.extract_strided_slice %111 {offsets = [0, 0], sizes = [144, 16], strides = [1, 1]} : vector<144x32xf32> to vector<144x16xf32>
    %115 = arith.truncf %114 : vector<144x16xf32> to vector<144x16xbf16>
    %116 = vector.extract_strided_slice %113 {offsets = [0, 0], sizes = [256, 16], strides = [1, 1]} : vector<256x96xf32> to vector<256x16xf32>
    %117 = arith.truncf %116 : vector<256x16xf32> to vector<256x16xbf16>
    %118 = vector.extract_strided_slice %113 {offsets = [0, 32], sizes = [256, 32], strides = [1, 1]} : vector<256x96xf32> to vector<256x32xf32>
    %119 = arith.truncf %118 : vector<256x32xf32> to vector<256x32xbf16>
    %cst_46 = arith.constant dense<0.000000e+00> : vector<144x256xf32>
    %120 = tpu.matmul %115, %117, %cst_46 {dimension_numbers = #tpu.dot_dimension_numbers<[1], [1], [0], [0], [0, 0, 1, 0], [], []>} : vector<144x16xbf16>, vector<256x16xbf16>, vector<144x256xf32> -> vector<144x256xf32>
    %121 = vector.broadcast %4 : vector<1x256xf32> to vector<144x256xf32>
    %122 = arith.addf %120, %121 : vector<144x256xf32>
    %cst_47 = arith.constant dense<0xFF800000> : vector<144xf32>
    %123 = vector.multi_reduction <maximumf>, %122, %cst_47 [1] : vector<144x256xf32> to vector<144xf32>
    %124 = vector.shape_cast %123 : vector<144xf32> to vector<144x1xf32>
    %125 = vector.broadcast %124 : vector<144x1xf32> to vector<144x256xf32>
    %126 = arith.subf %122, %125 : vector<144x256xf32>
    %127 = math.exp %126 : vector<144x256xf32>
    %cst_48 = arith.constant dense<0.000000e+00> : vector<144xf32>
    %128 = vector.multi_reduction <add>, %127, %cst_48 [1] : vector<144x256xf32> to vector<144xf32>
    %129 = vector.shape_cast %128 : vector<144xf32> to vector<144x1xf32>
    %130 = arith.truncf %127 : vector<144x256xf32> to vector<144x256xbf16>
    %cst_49 = arith.constant dense<0.000000e+00> : vector<144x32xf32>
    %131 = tpu.matmul %130, %119, %cst_49 {dimension_numbers = #tpu.dot_dimension_numbers<[1], [0], [0], [1], [0, 0, 1, 1], [], []>} : vector<144x256xbf16>, vector<256x32xbf16>, vector<144x32xf32> -> vector<144x32xf32>
    %132 = tpu.reciprocal %129 {approx = true} : vector<144x1xf32> -> vector<144x1xf32>
    %133 = vector.broadcast %132 : vector<144x1xf32> to vector<144x32xf32>
    %134 = arith.mulf %131, %133 : vector<144x32xf32>
    %135 = vector.extract_strided_slice %111 {offsets = [0, 16], sizes = [144, 16], strides = [1, 1]} : vector<144x32xf32> to vector<144x16xf32>
    %136 = arith.truncf %135 : vector<144x16xf32> to vector<144x16xbf16>
    %137 = vector.extract_strided_slice %113 {offsets = [0, 16], sizes = [256, 16], strides = [1, 1]} : vector<256x96xf32> to vector<256x16xf32>
    %138 = arith.truncf %137 : vector<256x16xf32> to vector<256x16xbf16>
    %139 = vector.extract_strided_slice %113 {offsets = [0, 64], sizes = [256, 32], strides = [1, 1]} : vector<256x96xf32> to vector<256x32xf32>
    %140 = arith.truncf %139 : vector<256x32xf32> to vector<256x32xbf16>
    %cst_50 = arith.constant dense<0.000000e+00> : vector<144x256xf32>
    %141 = tpu.matmul %136, %138, %cst_50 {dimension_numbers = #tpu.dot_dimension_numbers<[1], [1], [0], [0], [0, 0, 1, 0], [], []>} : vector<144x16xbf16>, vector<256x16xbf16>, vector<144x256xf32> -> vector<144x256xf32>
    %142 = vector.broadcast %4 : vector<1x256xf32> to vector<144x256xf32>
    %143 = arith.addf %141, %142 : vector<144x256xf32>
    %cst_51 = arith.constant dense<0xFF800000> : vector<144xf32>
    %144 = vector.multi_reduction <maximumf>, %143, %cst_51 [1] : vector<144x256xf32> to vector<144xf32>
    %145 = vector.shape_cast %144 : vector<144xf32> to vector<144x1xf32>
    %146 = vector.broadcast %145 : vector<144x1xf32> to vector<144x256xf32>
    %147 = arith.subf %143, %146 : vector<144x256xf32>
    %148 = math.exp %147 : vector<144x256xf32>
    %cst_52 = arith.constant dense<0.000000e+00> : vector<144xf32>
    %149 = vector.multi_reduction <add>, %148, %cst_52 [1] : vector<144x256xf32> to vector<144xf32>
    %150 = vector.shape_cast %149 : vector<144xf32> to vector<144x1xf32>
    %151 = arith.truncf %148 : vector<144x256xf32> to vector<144x256xbf16>
    %cst_53 = arith.constant dense<0.000000e+00> : vector<144x32xf32>
    %152 = tpu.matmul %151, %140, %cst_53 {dimension_numbers = #tpu.dot_dimension_numbers<[1], [0], [0], [1], [0, 0, 1, 1], [], []>} : vector<144x256xbf16>, vector<256x32xbf16>, vector<144x32xf32> -> vector<144x32xf32>
    %153 = tpu.reciprocal %150 {approx = true} : vector<144x1xf32> -> vector<144x1xf32>
    %154 = vector.broadcast %153 : vector<144x1xf32> to vector<144x32xf32>
    %155 = arith.mulf %152, %154 : vector<144x32xf32>
    %156 = arith.addf %134, %155 : vector<144x32xf32>
    %157 = vector.broadcast %5 : vector<1x32xf32> to vector<144x32xf32>
    %158 = arith.addf %156, %157 : vector<144x32xf32>
    %c1_54 = arith.constant 1 : index
    %c0_55 = arith.constant 0 : index
    %c0_56 = arith.constant 0 : index
    %159 = vector.load %arg10[%c1_54, %c0_55, %c0_56] : memref<2x144x32xf32, #tpu.memory_space<vmem>>, vector<1x144x32xf32>
    %160 = vector.shape_cast %159 : vector<1x144x32xf32> to vector<144x32xf32>
    %161 = vector.shape_cast %158 : vector<144x32xf32> to vector<1x144x32xf32>
    tpu.vector_store %arg10[%c1_54, %c0_55, %c0_56], %161 {strides = array<i32>} : memref<2x144x32xf32, #tpu.memory_space<vmem>>, vector<1x144x32xf32>,
    return
  }
  func.func @transform_0(%arg0: i32, %arg1: i32) -> (i32, i32, i32) {
    %c0_i32 = arith.constant 0 : i32
    %c0_i32_0 = arith.constant 0 : i32
    return %arg0, %arg1, %c0_i32 : i32, i32, i32
  }
  func.func @transform_1(%arg0: i32, %arg1: i32) -> (i32, i32, i32) {
    %c0_i32 = arith.constant 0 : i32
    %c0_i32_0 = arith.constant 0 : i32
    %c0_i32_1 = arith.constant 0 : i32
    return %arg0, %c0_i32, %c0_i32_0 : i32, i32, i32
  }
  func.func @transform_2(%arg0: i32, %arg1: i32) -> (i32, i32) {
    %c0_i32 = arith.constant 0 : i32
    %c0_i32_0 = arith.constant 0 : i32
    %c0_i32_1 = arith.constant 0 : i32
    return %c0_i32, %c0_i32_0 : i32, i32
  }
  func.func @transform_3(%arg0: i32, %arg1: i32) -> (i32, i32) {
    %c0_i32 = arith.constant 0 : i32
    %c0_i32_0 = arith.constant 0 : i32
    %c0_i32_1 = arith.constant 0 : i32
    return %c0_i32, %c0_i32_0 : i32, i32
  }
  func.func @transform_4(%arg0: i32, %arg1: i32) -> (i32, i32) {
    %c0_i32 = arith.constant 0 : i32
    %c0_i32_0 = arith.constant 0 : i32
    %c0_i32_1 = arith.constant 0 : i32
    return %c0_i32, %c0_i32_0 : i32, i32
  }
  func.func @transform_5(%arg0: i32, %arg1: i32) -> (i32, i32) {
    %c0_i32 = arith.constant 0 : i32
    %c0_i32_0 = arith.constant 0 : i32
    %c0_i32_1 = arith.constant 0 : i32
    return %c0_i32, %c0_i32_0 : i32, i32
  }
  func.func @transform_6(%arg0: i32, %arg1: i32) -> (i32, i32) {
    %c0_i32 = arith.constant 0 : i32
    %c0_i32_0 = arith.constant 0 : i32
    %c0_i32_1 = arith.constant 0 : i32
    return %c0_i32, %c0_i32_0 : i32, i32
  }
  func.func @transform_7(%arg0: i32, %arg1: i32) -> (i32, i32) {
    %c0_i32 = arith.constant 0 : i32
    %c0_i32_0 = arith.constant 0 : i32
    %c0_i32_1 = arith.constant 0 : i32
    return %c0_i32, %c0_i32_0 : i32, i32
  }
  func.func @transform_8(%arg0: i32, %arg1: i32) -> (i32, i32, i32) {
    %c0_i32 = arith.constant 0 : i32
    %c0_i32_0 = arith.constant 0 : i32
    return %arg0, %arg1, %c0_i32 : i32, i32, i32
  }
}

</mosaic_0001>

<bundles_post_ra>
// kernel: tpu_custom_call.1
= control target key start
LH: loop header
LB: loop body
LE: loop exit
PB: predicated region body
PF: predicated region fallthrough
CT: control target
= control target key end

     0   :  { %vm92_vm0 = vcmask 261120   ;;  %v5755_v16 = vmov 32.0   ;;  %s5756_s11 = smov 112   ;;  %s5757_s23 = smov 96   ;;  %s10754_s1 = inlined_call_operand.vmem [shape: f32[2,256,32], index: 1, kind: input, shape index: {}]   ;;  %s10755_s5 = inlined_call_operand.vmem [shape: f32[1,32], index: 5, kind: input, shape index: {}]   ;;  %s10756_s6 = inlined_call_operand.vmem [shape: f32[1,32], index: 6, kind: input, shape index: {}]   ;;  %s10757_s4 = inlined_call_operand.vmem [shape: bf16[32,96], index: 4, kind: input, shape index: {}]   ;;  %s10758_s3 = inlined_call_operand.vmem [shape: bf16[32,32], index: 3, kind: input, shape index: {}]   ;;  %s10759_s0 = inlined_call_operand.vmem [shape: f32[2,144,32], index: 0, kind: input, shape index: {}]   ;;  %s10760_s2 = inlined_call_operand.vmem [shape: f32[1,256], index: 2, kind: input, shape index: {}]   ;;  %s10761_s7 = inlined_call_operand.vmem [shape: f32[1,32], index: 7, kind: input, shape index: {}]   ;;  %s10762_s8 = inlined_call_operand.vmem [shape: f32[2,144,32], index: 8, kind: output, shape index: {}]  }
   0x1   :  { %v62_v0 = vld [vmem:[%s10754_s1 + $0x10] sm:$0xff]  ;;  %v60_v1 = vld [vmem:[%s10754_s1] sm:$0xff]  ;;  %v63_v6 = vld [vmem:[%s10754_s1 + $0x18] sm:$0xff]  ;;  %5183 = vrcp.f32 %v5755_v16 }
   0x2   :  { %v99_v2 = vsel %vm92_vm0, %v62_v0, 0.0  ;;  %v93_v3 = vsel %vm92_vm0, %v60_v1, 0.0  ;;  %v64_v4 = vld [vmem:[%s10754_s1 + $0x20] sm:$0xff]  ;;  %v61_v7 = vld [vmem:[%s10754_s1 + $0x8] sm:$0xff]  ;;  %v102_v9 = vsel %vm92_vm0, %v63_v6, 0.0  ;;  %v66_v12 = vld [vmem:[%s10754_s1 + $0x30] sm:$0xff] }
   0x3   :  { %100 = vadd.xlane.f32.xlu1 %v99_v2  ;;  %94 = vadd.xlane.f32.xlu0 %v93_v3  ;;  %v105_v5 = vsel %vm92_vm0, %v64_v4, 0.0  ;;  %v65_v8 = vld [vmem:[%s10754_s1 + $0x28] sm:$0xff]  ;;  %v96_v10 = vsel %vm92_vm0, %v61_v7, 0.0  ;;  %v111_v13 = vsel %vm92_vm0, %v66_v12, 0.0  ;;  %v5835_v14 = vld [vmem:[%s10754_s1 + $0x58] sm:$0xff]  ;;  %v5878_v49 = vld [vmem:[%s10754_s1 + $0x40] sm:$0xff] }
   0x4   :  { %106 = vadd.xlane.f32.xlu2 %v105_v5  ;;  %v108_v11 = vsel %vm92_vm0, %v65_v8, 0.0  ;;  %v126_v15 = vsel %vm92_vm0, %v5835_v14, 0.0  ;;  %v5854_v36 = vld [vmem:[%s10754_s1 + $0x38] sm:$0xff]  ;;  %v117_v53 = vsel %vm92_vm0, %v5878_v49, 0.0  ;;  %v5894_v58 = vld [vmem:[%s10754_s1 + $0x60] sm:$0xff]  ;;  %v5899_v59 = vld [vmem:[%s10754_s1 + $0x48] sm:$0xff] }
   0x5   :  { %v114_v42 = vsel %vm92_vm0, %v5854_v36, 0.0  ;;  %v129_v61 = vsel %vm92_vm0, %v5894_v58, 0.0  ;;  %v120_v63 = vsel %vm92_vm0, %v5899_v59, 0.0  ;;  %v5918_v2 = vld [vmem:[%s10754_s1 + $0x50] sm:$0xff] }
   0x6   :  { %v123_v5 = vsel %vm92_vm0, %v5918_v2, 0.0 }
   0x7   :  { %v5184_v17 = vpop.eup %5183 }
   0x8   :  { %v190_v18 = vmul.f32 32.0, %v5184_v17  ;;  %vm194_vm1 = vweird.f32 %v5184_v17 }
   0xa   :  { %v191_v19 = vsub.f32 1.0, %v190_v18 }
   0xb   :  { %103 = vadd.xlane.f32.xlu1 %v102_v9  ;;  %97 = vadd.xlane.f32.xlu0 %v96_v10  ;;  %v5936_v10 = vld [vmem:[%s10754_s1 + $0x70] sm:$0xff] }
   0xc   :  { %109 = vadd.xlane.f32.xlu2 %v108_v11  ;;  %v192_v20 = vmul.f32 %v5184_v17, %v191_v19  ;;  %v5170_v19 = vld [vmem:[%s10757_s4] sm:$0xff] }
   0xe   :  { %v193_v21 = vadd.f32 %v5184_v17, %v192_v20 }
  0x10   :  { %v5839_v22 = vsel %vm194_vm1, %v5184_v17, %v193_v21  ;;  %v5171_v17 = vld [vmem:[%s10757_s4 + $0x8] sm:$0xff] }
  0x11   :  { %1058 = vmatpush.bf16.msra.mxu1 %v5171_v17 }
  0x14   :  { %112 = vadd.xlane.f32.xlu2 %v111_v13 }
  0x15   :  { %1059 = vmatpush.bf16.msra.mxu1 %v5170_v19 }
  0x1c   :  { %127 = vadd.xlane.f32.xlu2 %v126_v15 }
  0x76   :  { %v101_v23 = vpop.xlane.xlu1 %100  ;;  %v95_v24 = vpop.xlane.xlu0 %94 }
  0x77   :  { %v196_v25 = vmul.f32 %v5839_v22, %v95_v24  ;;  %v107_v26 = vpop.xlane.xlu2 %106  ;;  %v198_v35 = vmul.f32 %v5839_v22, %v101_v23 }
  0x78   :  { %v200_v34 = vmul.f32 %v5839_v22, %v107_v26 }
  0x79   :  { %v5842_v27 = vsub.f32 %v60_v1, %v196_v25  ;;  %v5868_v44 = vsub.f32 %v62_v0, %v198_v35  ;;  %v5913_v1 = vld [vmem:[%s10754_s1 + $0x88] sm:$0xff] }
  0x7a   :  { %v5860_v40 = vsub.f32 %v64_v4, %v200_v34  ;;  %v144_v4 = vsel %vm92_vm0, %v5913_v1, 0.0 }
  0x7b   :  { %v260_v28 = vmul.f32 %v5842_v27, %v5842_v27  ;;  %v262_v50 = vmul.f32 %v5868_v44, %v5868_v44 }
  0x7c   :  { %v264_v48 = vmul.f32 %v5860_v40, %v5860_v40 }
  0x7d   :  { %v292_v29 = vsel %vm92_vm0, %v260_v28, 0.0  ;;  %v298_v54 = vsel %vm92_vm0, %v262_v50, 0.0 }
  0x7e   :  { %v104_v30 = vpop.xlane.xlu1 %103  ;;  %293 = vadd.xlane.f32.xlu0 %v292_v29  ;;  %v98_v31 = vpop.xlane.xlu0 %97  ;;  %v304_v52 = vsel %vm92_vm0, %v264_v48, 0.0 }
  0x7f   :  { %v199_v32 = vmul.f32 %v5839_v22, %v104_v30  ;;  %v197_v33 = vmul.f32 %v5839_v22, %v98_v31  ;;  %v110_v39 = vpop.xlane.xlu2 %109 }
  0x80   :  { %v201_v47 = vmul.f32 %v5839_v22, %v110_v39 }
  0x81   :  { %v5856_v37 = vsub.f32 %v63_v6, %v199_v32  ;;  %v5858_v38 = vsub.f32 %v61_v7, %v197_v33  ;;  %v5928_v6 = vld [vmem:[%s10754_s1 + $0x68] sm:$0xff] }
  0x82   :  { %v5882_v51 = vsub.f32 %v65_v8, %v201_v47  ;;  %v132_v7 = vsel %vm92_vm0, %v5928_v6, 0.0 }
  0x83   :  { %v263_v41 = vmul.f32 %v5856_v37, %v5856_v37  ;;  %v261_v43 = vmul.f32 %v5858_v38, %v5858_v38 }
  0x84   :  { %v265_v57 = vmul.f32 %v5882_v51, %v5882_v51 }
  0x85   :  { %v301_v45 = vsel %vm92_vm0, %v263_v41, 0.0  ;;  %v295_v46 = vsel %vm92_vm0, %v261_v43, 0.0 }
  0x86   :  { %302 = vadd.xlane.f32.xlu2 %v301_v45  ;;  %115 = vadd.xlane.f32.xlu0 %v114_v42  ;;  %v307_v62 = vsel %vm92_vm0, %v265_v57, 0.0 }
  0x87   :  { %296 = vadd.xlane.f32.xlu1 %v295_v46  ;;  %v113_v55 = vpop.xlane.xlu2 %112 }
  0x88   :  { %v202_v56 = vmul.f32 %v5839_v22, %v113_v55 }
  0x8a   :  { %v5901_v60 = vsub.f32 %v66_v12, %v202_v56  ;;  %v135_v12 = vsel %vm92_vm0, %v5936_v10, 0.0 }
  0x8c   :  { %v266_v0 = vmul.f32 %v5901_v60, %v5901_v60 }
  0x8e   :  { %305 = vadd.xlane.f32.xlu2 %v304_v52  ;;  %118 = vadd.xlane.f32.xlu0 %v117_v53  ;;  %v310_v3 = vsel %vm92_vm0, %v266_v0, 0.0 }
  0x8f   :  { %299 = vadd.xlane.f32.xlu1 %v298_v54  ;;  %v128_v8 = vpop.xlane.xlu2 %127 }
  0x90   :  { %v207_v9 = vmul.f32 %v5839_v22, %v128_v8 }
  0x92   :  { %v5939_v11 = vsub.f32 %v5835_v14, %v207_v9 }
  0x94   :  { %v271_v13 = vmul.f32 %v5939_v11, %v5939_v11 }
  0x96   :  { %130 = vadd.xlane.f32.xlu2 %v129_v61  ;;  %308 = vadd.xlane.f32.xlu0 %v307_v62  ;;  %v325_v15 = vsel %vm92_vm0, %v271_v13, 0.0 }
  0x97   :  { %121 = vadd.xlane.f32.xlu1 %v120_v63 }
  0x9e   :  { %311 = vadd.xlane.f32.xlu0 %v310_v3  ;;  %145 = vadd.xlane.f32.xlu2 %v144_v4 }
  0x9f   :  { %124 = vadd.xlane.f32.xlu1 %v123_v5 }
  0xa6   :  { %133 = vadd.xlane.f32.xlu0 %v132_v7 }
  0xae   :  { %136 = vadd.xlane.f32.xlu0 %v135_v12 }
  0xb6   :  { %326 = vadd.xlane.f32.xlu0 %v325_v15 }
  0xf1   :  { %v294_v16 = vpop.xlane.xlu0 %293 }
  0xf2   :  { %v388_v18 = vmul.f32 %v294_v16, %v5839_v22 }
  0xf4   :  { %v420_v14 = vadd.f32 1e-05, %v388_v18 }
  0xf6   :  { %5185 = vrsqrt.f32 %v420_v14  ;;  %vm458_vm3 = vweird.f32 %v420_v14 }
  0xf9   :  { %v303_v20 = vpop.xlane.xlu2 %302  ;;  %v116_v21 = vpop.xlane.xlu0 %115 }
  0xfa   :  { %v391_v23 = vmul.f32 %v303_v20, %v5839_v22  ;;  %v297_v24 = vpop.xlane.xlu1 %296  ;;  %v203_v25 = vmul.f32 %v5839_v22, %v116_v21 }
  0xfb   :  { %v389_v26 = vmul.f32 %v297_v24, %v5839_v22  ;;  %v6022_v24 = vld [vmem:[%s10755_s5] ss:$0 sm:$0xff] }
  0xfc   :  { %v5186_v28 = vpop.eup %5185  ;;  %v5956_v29 = vadd.f32 1e-05, %v391_v23  ;;  %v5959_v30 = vsub.f32 %v5854_v36, %v203_v25 }
  0xfd   :  { %v453_v31 = vmul.f32 %v5186_v28, %v420_v14  ;;  %v421_v32 = vadd.f32 1e-05, %v389_v26  ;;  %vm459_vm2 = vweird.f32 %v5186_v28 }
  0xfe   :  { %5187 = vrsqrt.f32 %v5956_v29  ;;  %v267_v33 = vmul.f32 %v5959_v30, %v5959_v30  ;;  %vm5982_vm6 = vmor %vm458_vm3, %vm459_vm2  ;;  %vm488_vm8 = vweird.f32 %v5956_v29 }
  0xff   :  { %v454_v34 = vmul.f32 %v5186_v28, %v453_v31  ;;  %5189 = vrsqrt.f32 %v421_v32  ;;  %vm468_vm4 = vweird.f32 %v421_v32 }
 0x100   :  { %v313_v35 = vsel %vm92_vm0, %v267_v33, 0.0 }
 0x101   :  { %v455_v39 = vmul.f32 0.5, %v454_v34  ;;  %v306_v41 = vpop.xlane.xlu2 %305  ;;  %314 = vadd.xlane.f32.xlu1 %v313_v35  ;;  %v119_v42 = vpop.xlane.xlu0 %118 }
 0x102   :  { %v300_v43 = vpop.xlane.xlu1 %299  ;;  %v204_v45 = vmul.f32 %v5839_v22, %v119_v42  ;;  %v392_v52 = vmul.f32 %v306_v41, %v5839_v22 }
 0x103   :  { %v456_v36 = vsub.f32 1.5, %v455_v39  ;;  %v390_v46 = vmul.f32 %v300_v43, %v5839_v22  ;;  %v6042_v43 = vld [vmem:[%s10756_s6] ss:$0 sm:$0xff] }
 0x104   :  { %v5967_v47 = vpop.eup %5187  ;;  %v5970_v48 = vsub.f32 %v5878_v49, %v204_v45  ;;  %v5980_v49 = vadd.f32 1e-05, %v392_v52 }
 0x105   :  { %v5190_v50 = vpop.eup %5189  ;;  %v5973_v53 = vadd.f32 1e-05, %v390_v46  ;;  %v457_v55 = vmul.f32 %v5186_v28, %v456_v36  ;;  %v483_v56 = vmul.f32 %v5967_v47, %v5956_v29  ;;  %vm489_vm9 = vweird.f32 %v5967_v47  ;;  %v6067_v29 = vld [vmem:[%s10754_s1 + $0x80] sm:$0xff] }
 0x106   :  { %v463_v54 = vmul.f32 %v5190_v50, %v421_v32  ;;  %v268_v61 = vmul.f32 %v5970_v48, %v5970_v48  ;;  %vm469_vm5 = vweird.f32 %v5190_v50  ;;  %vm6073_vm12 = vmor %vm488_vm8, %vm489_vm9  ;;  %vm498_vm3 = vweird.f32 %v5980_v49 }
 0x107   :  { %5191 = vrsqrt.f32 %v5973_v53  ;;  %v461_v9 = vsel %vm5982_vm6, %v5186_v28, %v457_v55  ;;  %v484_v12 = vmul.f32 %v5967_v47, %v483_v56  ;;  %vm6002_vm7 = vmor %vm468_vm4, %vm469_vm5  ;;  %vm478_vm10 = vweird.f32 %v5973_v53 }
 0x108   :  { %v464_v57 = vmul.f32 %v5190_v50, %v463_v54  ;;  %v316_v7 = vsel %vm92_vm0, %v268_v61, 0.0  ;;  %5193 = vrsqrt.f32 %v5980_v49  ;;  %v772_v23 = vmul.f32 %v461_v9, %v5842_v27  ;;  %v6055_v54 = vld [vmem:[%s10754_s1 + $0x98] sm:$0xff] }
 0x109   :  { %v131_v62 = vpop.xlane.xlu2 %130  ;;  %v309_v63 = vpop.xlane.xlu0 %308  ;;  %317 = vadd.xlane.f32.xlu1 %v316_v7  ;;  %v150_v0 = vsel %vm92_vm0, %v6055_v54, 0.0  ;;  %v141_v7 = vsel %vm92_vm0, %v6067_v29, 0.0 }
 0x10a   :  { %v465_v3 = vmul.f32 0.5, %v464_v57  ;;  %v208_v4 = vmul.f32 %v5839_v22, %v131_v62  ;;  %v122_v5 = vpop.xlane.xlu1 %121  ;;  %v393_v8 = vmul.f32 %v309_v63, %v5839_v22  ;;  %v807_v42 = vmul.f32 %v6022_v24, %v772_v23 }
 0x10b   :  { %v205_v13 = vmul.f32 %v5839_v22, %v122_v5 }
 0x10c   :  { %v466_v15 = vsub.f32 1.5, %v465_v3  ;;  %v5994_v16 = vsub.f32 %v5894_v58, %v208_v4  ;;  %v5996_v17 = vadd.f32 1e-05, %v393_v8  ;;  %v6013_v58 = vld [vmem:[%s10754_s1 + $0x78] sm:$0xff]  ;;  %v842_v61 = vadd.f32 %v6042_v43, %v807_v42 }
 0x10d   :  { %v5998_v18 = vpop.eup %5191  ;;  %v6008_v19 = vsub.f32 %v5899_v59, %v205_v13  ;;  %v485_v59 = vmul.f32 0.5, %v484_v12  ;;  %v138_v27 = vsel %vm92_vm0, %v6013_v58, 0.0 }
 0x10e   :  { %v467_v20 = vmul.f32 %v5190_v50, %v466_v15  ;;  %v473_v21 = vmul.f32 %v5998_v18, %v5973_v53  ;;  %5195 = vrsqrt.f32 %v5996_v17  ;;  %v272_v25 = vmul.f32 %v5994_v16, %v5994_v16  ;;  %v6044_v45 = vpop.eup %5193 }
 0x10f   :  { %v269_v31 = vmul.f32 %v6008_v19, %v6008_v19  ;;  %v486_v36 = vsub.f32 1.5, %v485_v59  ;;  %vm479_vm11 = vweird.f32 %v5998_v18  ;;  %vm499_vm15 = vweird.f32 %v6044_v45 }
 0x110   :  { %v471_v26 = vsel %vm6002_vm7, %v5190_v50, %v467_v20  ;;  %v474_v28 = vmul.f32 %v5998_v18, %v473_v21  ;;  %v328_v32 = vsel %vm92_vm0, %v272_v25, 0.0  ;;  %vm6083_vm13 = vmor %vm478_vm10, %vm479_vm11  ;;  %v6106_v21 = vld [vmem:[%s10754_s1 + $0xa0] sm:$0xff]  ;;  %v6112_v25 = vld [vmem:[%s10754_s1 + $0x90] sm:$0xff]  ;;  %vm508_vm1 = vweird.f32 %v5996_v17 }
 0x111   :  { %v6034_v33 = vpop.xlane.xlu0 %311  ;;  %v773_v34 = vmul.f32 %v471_v26, %v5858_v38  ;;  %329 = vadd.xlane.f32.xlu0 %v328_v32  ;;  %v319_v39 = vsel %vm92_vm0, %v269_v31, 0.0  ;;  %139 = vadd.xlane.f32.xlu1 %v138_v27  ;;  %v487_v53 = vmul.f32 %v5967_v47, %v486_v36  ;;  %v147_v31 = vsel %vm92_vm0, %v6112_v25, 0.0  ;;  %v146_v32 = vpop.xlane.xlu2 %145  ;;  %v6129_v36 = vld [vmem:[%s10754_s1 + $0xc8] sm:$0xff]  ;;  %vm500_vm4 = vmor %vm498_vm3, %vm499_vm15 }
 0x112   :  { %v475_v35 = vmul.f32 0.5, %v474_v28  ;;  %v125_v41 = vpop.xlane.xlu1 %124  ;;  %320 = vadd.xlane.f32.xlu2 %v319_v39  ;;  %v153_v28 = vsel %vm92_vm0, %v6106_v21, 0.0  ;;  %v213_v42 = vmul.f32 %v5839_v22, %v146_v32 }
 0x113   :  { %v206_v46 = vmul.f32 %v5839_v22, %v125_v41  ;;  %v808_v38 = vmul.f32 %v6022_v24, %v773_v34  ;;  %v491_v14 = vsel %vm6073_vm12, %v5967_v47, %v487_v53 }
 0x114   :  { %v6048_v50 = vpop.eup %5195  ;;  %v476_v52 = vsub.f32 1.5, %v475_v35  ;;  %v775_v26 = vmul.f32 %v491_v14, %v5856_v37  ;;  %v6151_v53 = vsub.f32 %v5913_v1, %v213_v42 }
 0x115   :  { %v503_v55 = vmul.f32 %v6048_v50, %v5996_v17  ;;  %v6062_v56 = vsub.f32 %v5918_v2, %v206_v46  ;;  %v843_v62 = vadd.f32 %v6042_v43, %v808_v38  ;;  %v493_v2 = vmul.f32 %v6044_v45, %v5980_v49  ;;  %v6171_v49 = vld [vmem:[%s10754_s1 + $0xc0] sm:$0xff] }
 0x116   :  { %v477_v57 = vmul.f32 %v5998_v18, %v476_v52  ;;  %v810_v41 = vmul.f32 %v6022_v24, %v775_v26  ;;  %vm509_vm14 = vweird.f32 %v6048_v50  ;;  %v277_v1 = vmul.f32 %v6151_v53, %v6151_v53 }
 0x117   :  { %v270_v3 = vmul.f32 %v6062_v56, %v6062_v56  ;;  %v976_v5 = vpack.c.bf16 %v843_v62, %v842_v61  ;;  %v504_v9 = vmul.f32 %v6048_v50, %v503_v55  ;;  %v494_v20 = vmul.f32 %v6044_v45, %v493_v2  ;;  %v6140_v55 = vld [vmem:[%s10754_s1 + $0xb8] sm:$0xff]  ;;  %vm510_vm2 = vmor %vm508_vm1, %vm509_vm14 }
 0x118   :  { %v481_v8 = vsel %vm6083_vm13, %v5998_v18, %v477_v57  ;;  %v845_v57 = vadd.f32 %v6042_v43, %v810_v41  ;;  %v168_v61 = vsel %vm92_vm0, %v6129_v36, 0.0 }
 0x119   :  { %v322_v12 = vsel %vm92_vm0, %v270_v3, 0.0  ;;  %v134_v13 = vpop.xlane.xlu0 %133  ;;  %4987 = vmatmul.msk.bf16.vlgmr.msra.gmra.mxu1 %vm92_vm0, %v976_v5  ;;  %151 = vadd.xlane.f32.xlu0 %v150_v0  ;;  %v774_v23 = vmul.f32 %v481_v8, %v5868_v44  ;;  %v505_v59 = vmul.f32 0.5, %v504_v9  ;;  %v162_v0 = vsel %vm92_vm0, %v6140_v55, 0.0  ;;  %v6166_v5 = vld [vmem:[%s10754_s1 + $0xa8] sm:$0xff] }
 0x11a   :  { %v209_v15 = vmul.f32 %v5839_v22, %v134_v13  ;;  %323 = vadd.xlane.f32.xlu2 %v322_v12  ;;  %142 = vadd.xlane.f32.xlu1 %v141_v7  ;;  %v156_v7 = vsel %vm92_vm0, %v6166_v5, 0.0 }
 0x11b   :  { %v809_v27 = vmul.f32 %v6022_v24, %v774_v23  ;;  %v506_v34 = vsub.f32 1.5, %v505_v59 }
 0x11c   :  { %v6101_v18 = vsub.f32 %v5928_v6, %v209_v15  ;;  %v495_v6 = vmul.f32 0.5, %v494_v20  ;;  %v394_v20 = vmul.f32 %v6034_v33, %v5839_v22  ;;  %v5169_v33 = vld [vmem:[%s10758_s3 + $0x8] sm:$0xff] }
 0x11d   :  { %v844_v38 = vadd.f32 %v6042_v43, %v809_v27  ;;  %v507_v52 = vmul.f32 %v6048_v50, %v506_v34  ;;  %5172 = vmatpush.bf16.msra.mxu2 %v5169_v33  ;;  %928 = vmatpush.bf16.msra.mxu0 %v5169_v33 }
 0x11e   :  { %v273_v47 = vmul.f32 %v6101_v18, %v6101_v18  ;;  %v496_v37 = vsub.f32 1.5, %v495_v6  ;;  %v426_v23 = vadd.f32 1e-05, %v394_v20  ;;  %5173 = vmatpush.bf16.msra.mxu3 %v5169_v33 }
 0x11f   :  { %v977_v63 = vpack.c.bf16 %v845_v57, %v844_v38  ;;  %v511_v3 = vsel %vm510_vm2, %v6048_v50, %v507_v52 }
 0x120   :  { %v331_v44 = vsel %vm92_vm0, %v273_v47, 0.0  ;;  %v497_v62 = vmul.f32 %v6044_v45, %v496_v37  ;;  %v777_v4 = vmul.f32 %v511_v3, %v5882_v51  ;;  %v165_v51 = vsel %vm92_vm0, %v6171_v49, 0.0 }
 0x121   :  { %v137_v35 = vpop.xlane.xlu0 %136  ;;  %154 = vadd.xlane.f32.xlu0 %v153_v28  ;;  %5197 = vrsqrt.f32 %v426_v23  ;;  %vm518_vm6 = vweird.f32 %v426_v23 }
 0x122   :  { %v210_v39 = vmul.f32 %v5839_v22, %v137_v35  ;;  %148 = vadd.xlane.f32.xlu2 %v147_v31  ;;  %332 = vadd.xlane.f32.xlu1 %v331_v44  ;;  %v501_v17 = vsel %vm500_vm4, %v6044_v45, %v497_v62  ;;  %v343_v45 = vsel %vm92_vm0, %v277_v1, 0.0  ;;  %v812_v8 = vmul.f32 %v6022_v24, %v777_v4 }
 0x123   :  { %v776_v50 = vmul.f32 %v501_v17, %v5860_v40  ;;  %v6185_v40 = vld [vmem:[%s10754_s1 + $0xb0] sm:$0xff] }
 0x124   :  { %v6132_v46 = vsub.f32 %v5936_v10, %v210_v39  ;;  %v847_v12 = vadd.f32 %v6042_v43, %v812_v8  ;;  %v159_v14 = vsel %vm92_vm0, %v6185_v40, 0.0 }
 0x125   :  { %v811_v9 = vmul.f32 %v6022_v24, %v776_v50 }
 0x126   :  { %v274_v10 = vmul.f32 %v6132_v46, %v6132_v46 }
 0x127   :  { %v846_v13 = vadd.f32 %v6042_v43, %v811_v9  ;;  %v5198_v59 = vpop.eup %5197 }
 0x128   :  { %v334_v2 = vsel %vm92_vm0, %v274_v10, 0.0  ;;  %v513_v47 = vmul.f32 %v5198_v59, %v426_v23  ;;  %vm519_vm5 = vweird.f32 %v5198_v59 }
 0x129   :  { %4988 = vmatmul.msk.bf16.gmra.mxu1 %vm92_vm0, %v977_v63  ;;  %169 = vadd.xlane.f32.xlu0 %v168_v61  ;;  %v978_v15 = vpack.c.bf16 %v847_v12, %v846_v13  ;;  %v327_v27 = vpop.xlane.xlu0 %326  ;;  %v5168_v61 = vld [vmem:[%s10758_s3] sm:$0xff]  ;;  %vm6206_vm7 = vmor %vm518_vm6, %vm519_vm5 }
 0x12a   :  { %335 = vadd.xlane.f32.xlu1 %v334_v2  ;;  %163 = vadd.xlane.f32.xlu2 %v162_v0  ;;  %v514_v26 = vmul.f32 %v5198_v59, %v513_v47  ;;  %v399_v34 = vmul.f32 %v327_v27, %v5839_v22  ;;  %v46_v2 = vld [vmem:[%s10759_s0 + $0x20] sm:$0xff]  ;;  %v47_v0 = vld [vmem:[%s10759_s0 + $0x28] sm:$0xff] }
 0x12b   :  { %5174 = vmatpush.bf16.msra.mxu2 %v5168_v61  ;;  %929 = vmatpush.bf16.msra.mxu0 %v5168_v61  ;;  %v876_v17 = vpack.c.bf16 %v47_v0, %v46_v2 }
 0x12c   :  { %v515_v44 = vmul.f32 0.5, %v514_v26  ;;  %v6201_v52 = vadd.f32 1e-05, %v399_v34  ;;  %5175 = vmatpush.bf16.msra.mxu3 %v5168_v61 }
 0x12e   :  { %v516_v32 = vsub.f32 1.5, %v515_v44  ;;  %4972 = vmatmul.msk.bf16.vlgmr.msra.gmra.mxu2 %vm92_vm0, %v876_v17  ;;  %v48_v17 = vld [vmem:[%s10759_s0 + $0x30] sm:$0xff]  ;;  %vm568_vm4 = vweird.f32 %v6201_v52 }
 0x130   :  { %v517_v37 = vmul.f32 %v5198_v59, %v516_v32 }
 0x131   :  { %344 = vadd.xlane.f32.xlu0 %v343_v45 }
 0x132   :  { %157 = vadd.xlane.f32.xlu1 %v156_v7  ;;  %166 = vadd.xlane.f32.xlu2 %v165_v51  ;;  %v521_v62 = vsel %vm6206_vm7, %v5198_v59, %v517_v37 }
 0x133   :  { %v778_v8 = vmul.f32 %v521_v62, %v5901_v60 }
 0x135   :  { %v813_v20 = vmul.f32 %v6022_v24, %v778_v8 }
 0x139   :  { %4989 = vmatmul.msk.bf16.gmra.mxu1 %vm92_vm0, %v978_v15 }
 0x13a   :  { %160 = vadd.xlane.f32.xlu1 %v159_v14 }
 0x174   :  { %v315_v6 = vpop.xlane.xlu1 %314 }
 0x175   :  { %v395_v28 = vmul.f32 %v315_v6, %v5839_v22 }
 0x177   :  { %v427_v31 = vadd.f32 1e-05, %v395_v28 }
 0x179   :  { %5199 = vrsqrt.f32 %v427_v31  ;;  %vm528_vm9 = vweird.f32 %v427_v31 }
 0x17c   :  { %v318_v35 = vpop.xlane.xlu1 %317 }
 0x17d   :  { %v396_v41 = vmul.f32 %v318_v35, %v5839_v22 }
 0x17f   :  { %v5200_v39 = vpop.eup %5199  ;;  %v6199_v38 = vadd.f32 1e-05, %v396_v41 }
 0x180   :  { %v523_v42 = vmul.f32 %v5200_v39, %v427_v31  ;;  %vm529_vm8 = vweird.f32 %v5200_v39 }
 0x181   :  { %5201 = vrsqrt.f32 %v6199_v38  ;;  %vm530_vm10 = vmor %vm528_vm9, %vm529_vm8  ;;  %vm538_vm12 = vweird.f32 %v6199_v38 }
 0x182   :  { %v524_v57 = vmul.f32 %v5200_v39, %v523_v42  ;;  %5203 = vrsqrt.f32 %v6201_v52 }
 0x184   :  { %v525_v63 = vmul.f32 0.5, %v524_v57  ;;  %v330_v3 = vpop.xlane.xlu0 %329  ;;  %v140_v50 = vpop.xlane.xlu1 %139 }
 0x185   :  { %v321_v4 = vpop.xlane.xlu2 %320  ;;  %v211_v7 = vmul.f32 %v5839_v22, %v140_v50 }
 0x186   :  { %v526_v1 = vsub.f32 1.5, %v525_v63  ;;  %v397_v45 = vmul.f32 %v321_v4, %v5839_v22  ;;  %v51_v4 = vld [vmem:[%s10759_s0 + $0x48] sm:$0xff] }
 0x187   :  { %v6224_v9 = vpop.eup %5201  ;;  %v6229_v13 = vsub.f32 %v6013_v58, %v211_v7 }
 0x188   :  { %v527_v51 = vmul.f32 %v5200_v39, %v526_v1  ;;  %v6226_v12 = vadd.f32 1e-05, %v397_v45  ;;  %v533_v14 = vmul.f32 %v6224_v9, %v6199_v38  ;;  %v6237_v23 = vpop.eup %5203  ;;  %vm539_vm11 = vweird.f32 %v6224_v9  ;;  %v49_v1 = vld [vmem:[%s10759_s0 + $0x38] sm:$0xff] }
 0x189   :  { %v275_v60 = vmul.f32 %v6229_v13, %v6229_v13  ;;  %v563_v32 = vmul.f32 %v6237_v23, %v6201_v52  ;;  %vm6278_vm13 = vmor %vm538_vm12, %vm539_vm11  ;;  %v877_v45 = vpack.c.bf16 %v49_v1, %v48_v17  ;;  %vm569_vm5 = vweird.f32 %v6237_v23  ;;  %v6345_v17 = vld [vmem:[%s10754_s1 + $0xd0] sm:$0xff]  ;;  %v50_v1 = vld [vmem:[%s10759_s0 + $0x40] sm:$0xff] }
 0x18a   :  { %v531_v15 = vsel %vm530_vm10, %v5200_v39, %v527_v51  ;;  %5205 = vrsqrt.f32 %v6226_v12  ;;  %v534_v59 = vmul.f32 %v6224_v9, %v533_v14  ;;  %v400_v39 = vmul.f32 %v330_v3, %v5839_v22  ;;  %vm6383_vm7 = vmor %vm568_vm4, %vm569_vm5 }
 0x18b   :  { %v779_v47 = vmul.f32 %v531_v15, %v5959_v30  ;;  %v337_v58 = vsel %vm92_vm0, %v275_v60, 0.0  ;;  %v848_v30 = vadd.f32 %v6042_v43, %v813_v20  ;;  %v564_v2 = vmul.f32 %v6237_v23, %v563_v32  ;;  %4973 = vmatmul.msk.bf16.gmra.mxu2 %vm92_vm0, %v877_v45  ;;  %v42_v32 = vld [vmem:[%s10759_s0] sm:$0xff] }
 0x18c   :  { %v152_v26 = vpop.xlane.xlu0 %151  ;;  %v535_v6 = vmul.f32 0.5, %v534_v59  ;;  %338 = vadd.xlane.f32.xlu2 %v337_v58  ;;  %v6267_v3 = vadd.f32 1e-05, %v400_v39  ;;  %vm548_vm14 = vweird.f32 %v6226_v12 }
 0x18d   :  { %v324_v28 = vpop.xlane.xlu2 %323  ;;  %v143_v31 = vpop.xlane.xlu1 %142  ;;  %v215_v44 = vmul.f32 %v5839_v22, %v152_v26  ;;  %v814_v27 = vmul.f32 %v6022_v24, %v779_v47  ;;  %v565_v47 = vmul.f32 0.5, %v564_v2 }
 0x18e   :  { %v398_v34 = vmul.f32 %v324_v28, %v5839_v22  ;;  %v212_v35 = vmul.f32 %v5839_v22, %v143_v31  ;;  %v536_v33 = vsub.f32 1.5, %v535_v6  ;;  %vm578_vm8 = vweird.f32 %v6267_v3 }
 0x18f   :  { %v6251_v41 = vsub.f32 %v6055_v54, %v215_v44  ;;  %v849_v37 = vadd.f32 %v6042_v43, %v814_v27  ;;  %v566_v39 = vsub.f32 1.5, %v565_v47  ;;  %v171_v47 = vsel %vm92_vm0, %v6345_v17, 0.0 }
 0x190   :  { %v5206_v42 = vpop.eup %5205  ;;  %v6254_v57 = vadd.f32 1e-05, %v398_v34  ;;  %v6257_v61 = vsub.f32 %v6067_v29, %v212_v35  ;;  %v537_v10 = vmul.f32 %v6224_v9, %v536_v33 }
 0x191   :  { %v543_v62 = vmul.f32 %v5206_v42, %v6226_v12  ;;  %v979_v63 = vpack.c.bf16 %v849_v37, %v848_v30  ;;  %v279_v29 = vmul.f32 %v6251_v41, %v6251_v41  ;;  %vm549_vm15 = vweird.f32 %v5206_v42 }
 0x192   :  { %5207 = vrsqrt.f32 %v6254_v57  ;;  %v276_v54 = vmul.f32 %v6257_v61, %v6257_v61  ;;  %v541_v7 = vsel %vm6278_vm13, %v6224_v9, %v537_v10  ;;  %vm6300_vm1 = vmor %vm548_vm14, %vm549_vm15  ;;  %vm558_vm2 = vweird.f32 %v6254_v57 }
 0x193   :  { %v544_v0 = vmul.f32 %v5206_v42, %v543_v62  ;;  %4990 = vmatmul.msk.bf16.gmra.mxu1 %vm92_vm0, %v979_v63  ;;  %v349_v14 = vsel %vm92_vm0, %v279_v29, 0.0  ;;  %5209 = vrsqrt.f32 %v6267_v3  ;;  %v780_v44 = vmul.f32 %v541_v7, %v5970_v48 }
 0x194   :  { %v340_v38 = vsel %vm92_vm0, %v276_v54, 0.0  ;;  %v155_v50 = vpop.xlane.xlu0 %154  ;;  %350 = vadd.xlane.f32.xlu1 %v349_v14 }
 0x195   :  { %v545_v8 = vmul.f32 0.5, %v544_v0  ;;  %v149_v51 = vpop.xlane.xlu2 %148  ;;  %341 = vadd.xlane.f32.xlu2 %v340_v38  ;;  %v333_v15 = vpop.xlane.xlu1 %332  ;;  %v216_v60 = vmul.f32 %v5839_v22, %v155_v50  ;;  %v815_v62 = vmul.f32 %v6022_v24, %v780_v44  ;;  %v567_v50 = vmul.f32 %v6237_v23, %v566_v39 }
 0x196   :  { %v214_v20 = vmul.f32 %v5839_v22, %v149_v51  ;;  %v401_v59 = vmul.f32 %v333_v15, %v5839_v22  ;;  %v6369_v51 = vld [vmem:[%s10754_s1 + $0xd8] sm:$0xff] }
 0x197   :  { %v546_v58 = vsub.f32 1.5, %v545_v8  ;;  %v6293_v26 = vsub.f32 %v6106_v21, %v216_v60  ;;  %v850_v7 = vadd.f32 %v6042_v43, %v815_v62  ;;  %v174_v44 = vsel %vm92_vm0, %v6369_v51, 0.0 }
 0x198   :  { %v6295_v9 = vpop.eup %5207  ;;  %v6306_v28 = vsub.f32 %v6112_v25, %v214_v20  ;;  %v6308_v31 = vadd.f32 1e-05, %v401_v59  ;;  %v43_v25 = vld [vmem:[%s10759_s0 + $0x8] sm:$0xff]  ;;  %v571_v52 = vsel %vm6383_vm7, %v6237_v23, %v567_v50 }
 0x199   :  { %v547_v21 = vmul.f32 %v5206_v42, %v546_v58  ;;  %v553_v27 = vmul.f32 %v6295_v9, %v6254_v57  ;;  %v280_v12 = vmul.f32 %v6293_v26, %v6293_v26  ;;  %v874_v33 = vpack.c.bf16 %v43_v25, %v42_v32  ;;  %v6336_v54 = vpop.eup %5209 }
 0x19a   :  { %5211 = vrsqrt.f32 %v6308_v31  ;;  %v278_v48 = vmul.f32 %v6306_v28, %v6306_v28  ;;  %vm559_vm3 = vweird.f32 %v6295_v9  ;;  %v573_v15 = vmul.f32 %v6336_v54, %v6267_v3 }
 0x19b   :  { %v551_v34 = vsel %vm6300_vm1, %v5206_v42, %v547_v21  ;;  %v554_v35 = vmul.f32 %v6295_v9, %v553_v27  ;;  %v352_v30 = vsel %vm92_vm0, %v280_v12, 0.0  ;;  %4970 = vmatmul.msk.bf16.vlgmr.msra.gmra.mxu0 %vm92_vm0, %v874_v33  ;;  %vm6360_vm6 = vmor %vm558_vm2, %vm559_vm3  ;;  %v878_v58 = vpack.c.bf16 %v51_v4, %v50_v1  ;;  %v45_v33 = vld [vmem:[%s10759_s0 + $0x18] sm:$0xff] }
 0x19c   :  { %v346_v37 = vsel %vm92_vm0, %v278_v48, 0.0  ;;  %v781_v10 = vmul.f32 %v551_v34, %v6008_v19  ;;  %353 = vadd.xlane.f32.xlu1 %v352_v30  ;;  %v574_v21 = vmul.f32 %v6336_v54, %v573_v15  ;;  %v44_v30 = vld [vmem:[%s10759_s0 + $0x10] sm:$0xff]  ;;  %vm579_vm9 = vweird.f32 %v6336_v54 }
 0x19d   :  { %v555_v63 = vmul.f32 0.5, %v554_v35  ;;  %347 = vadd.xlane.f32.xlu0 %v346_v37  ;;  %v6333_v2 = vpop.xlane.xlu1 %335  ;;  %v164_v42 = vpop.xlane.xlu2 %163  ;;  %4974 = vmatmul.msk.bf16.gmra.mxu2 %vm92_vm0, %v878_v58  ;;  %v783_v37 = vmul.f32 %v571_v52, %v5939_v11  ;;  %vm6460_vm11 = vmor %vm578_vm8, %vm579_vm9  ;;  %vm588_vm12 = vweird.f32 %v6308_v31 }
 0x19e   :  { %v816_v0 = vmul.f32 %v6022_v24, %v781_v10  ;;  %v219_v19 = vmul.f32 %v5839_v22, %v164_v42  ;;  %v575_v10 = vmul.f32 0.5, %v574_v21 }
 0x19f   :  { %v556_v29 = vsub.f32 1.5, %v555_v63  ;;  %v818_v4 = vmul.f32 %v6022_v24, %v783_v37 }
 0x1a0   :  { %v6353_v38 = vpop.eup %5211  ;;  %v851_v8 = vadd.f32 %v6042_v43, %v816_v0  ;;  %v6377_v60 = vsub.f32 %v6140_v55, %v219_v19  ;;  %v576_v50 = vsub.f32 1.5, %v575_v10 }
 0x1a1   :  { %v557_v14 = vmul.f32 %v6295_v9, %v556_v29  ;;  %v583_v57 = vmul.f32 %v6353_v38, %v6308_v31  ;;  %vm589_vm10 = vweird.f32 %v6353_v38 }
 0x1a2   :  { %v980_v59 = vpack.c.bf16 %v851_v8, %v850_v7  ;;  %v283_v12 = vmul.f32 %v6377_v60, %v6377_v60  ;;  %vm590_vm13 = vmor %vm588_vm12, %vm589_vm10 }
 0x1a3   :  { %v561_v6 = vsel %vm6360_vm6, %v6295_v9, %v557_v14  ;;  %v584_v55 = vmul.f32 %v6353_v38, %v583_v57  ;;  %v170_v9 = vpop.xlane.xlu0 %169  ;;  %v52_v14 = vld [vmem:[%s10759_s0 + $0x50] sm:$0xff]  ;;  %v53_v57 = vld [vmem:[%s10759_s0 + $0x58] sm:$0xff] }
 0x1a4   :  { %4991 = vmatmul.msk.bf16.gmra.mxu1 %vm92_vm0, %v980_v59  ;;  %175 = vadd.xlane.f32.xlu1 %v174_v44  ;;  %v782_v34 = vmul.f32 %v561_v6, %v6062_v56  ;;  %v221_v23 = vmul.f32 %v5839_v22, %v170_v9  ;;  %v6419_v56 = vld [vmem:[%s10754_s1 + $0xe0] sm:$0xff]  ;;  %v361_v62 = vsel %vm92_vm0, %v283_v12, 0.0  ;;  %v853_v59 = vadd.f32 %v6042_v43, %v818_v4  ;;  %v6485_v12 = vld [vmem:[%s10754_s1 + $0xe8] sm:$0xff] }
 0x1a5   :  { %172 = vadd.xlane.f32.xlu0 %v171_v47  ;;  %v158_v27 = vpop.xlane.xlu1 %157  ;;  %v167_v32 = vpop.xlane.xlu2 %166  ;;  %v585_v35 = vmul.f32 0.5, %v584_v55  ;;  %v177_v1 = vsel %vm92_vm0, %v6419_v56, 0.0  ;;  %v577_v47 = vmul.f32 %v6336_v54, %v576_v50  ;;  %v879_v44 = vpack.c.bf16 %v53_v57, %v52_v14 }
 0x1a6   :  { %v217_v25 = vmul.f32 %v5839_v22, %v158_v27  ;;  %v220_v48 = vmul.f32 %v5839_v22, %v167_v32  ;;  %v817_v0 = vmul.f32 %v6022_v24, %v782_v34  ;;  %v6430_v29 = vsub.f32 %v6129_v36, %v221_v23  ;;  %v6498_v34 = vld [vmem:[%s10754_s1 + $0xf0] sm:$0xff] }
 0x1a7   :  { %v586_v19 = vsub.f32 1.5, %v585_v35  ;;  %v581_v31 = vsel %vm6460_vm11, %v6336_v54, %v577_v47  ;;  %v183_v23 = vsel %vm92_vm0, %v6498_v34, 0.0 }
 0x1a8   :  { %v6414_v39 = vsub.f32 %v6166_v5, %v217_v25  ;;  %v6424_v63 = vsub.f32 %v6171_v49, %v220_v48  ;;  %v875_v5 = vpack.c.bf16 %v45_v33, %v44_v30  ;;  %v852_v36 = vadd.f32 %v6042_v43, %v817_v0 }
 0x1a9   :  { %v587_v8 = vmul.f32 %v6353_v38, %v586_v19  ;;  %v285_v15 = vmul.f32 %v6430_v29, %v6430_v29  ;;  %v784_v32 = vmul.f32 %v581_v31, %v5994_v16  ;;  %v402_v30 = vmul.f32 %v6333_v2, %v5839_v22  ;;  %v54_v2 = vld [vmem:[%s10759_s0 + $0x60] sm:$0xff] }
 0x1aa   :  { %v281_v42 = vmul.f32 %v6414_v39, %v6414_v39  ;;  %v284_v7 = vmul.f32 %v6424_v63, %v6424_v63  ;;  %v981_v6 = vpack.c.bf16 %v853_v59, %v852_v36 }
 0x1ab   :  { %4971 = vmatmul.msk.bf16.gmra.mxu0 %vm92_vm0, %v875_v5  ;;  %v591_v52 = vsel %vm590_vm13, %v6353_v38, %v587_v8  ;;  %v367_v21 = vsel %vm92_vm0, %v285_v15, 0.0  ;;  %v6480_v38 = vld [vmem:[%s10754_s1 + $0xf8] sm:$0xff]  ;;  %v819_v25 = vmul.f32 %v6022_v24, %v784_v32  ;;  %v434_v33 = vadd.f32 1e-05, %v402_v30  ;;  %v345_v37 = vpop.xlane.xlu0 %344 }
 0x1ac   :  { %v355_v11 = vsel %vm92_vm0, %v281_v42, 0.0  ;;  %178 = vadd.xlane.f32.xlu1 %v177_v1  ;;  %v364_v55 = vsel %vm92_vm0, %v284_v7, 0.0  ;;  %v785_v27 = vmul.f32 %v591_v52, %v6101_v18  ;;  %v186_v54 = vsel %vm92_vm0, %v6480_v38, 0.0 }
 0x1ad   :  { %362 = vadd.xlane.f32.xlu0 %v361_v62  ;;  %356 = vadd.xlane.f32.xlu2 %v355_v11  ;;  %v161_v49 = vpop.xlane.xlu1 %160  ;;  %v180_v18 = vsel %vm92_vm0, %v6485_v12, 0.0  ;;  %v854_v16 = vadd.f32 %v6042_v43, %v819_v25  ;;  %5213 = vrsqrt.f32 %v434_v33  ;;  %v405_v62 = vmul.f32 %v345_v37, %v5839_v22  ;;  %v6529_v25 = vpop.f32.mrf.mxu1 }
 0x1ae   :  { %v218_v45 = vmul.f32 %v5839_v22, %v161_v49  ;;  %4975 = vmatmul.msk.bf16.gmra.mxu2 %vm92_vm0, %v879_v44  ;;  %v820_v9 = vmul.f32 %v6022_v24, %v785_v27  ;;  %v55_v49 = vld [vmem:[%s10759_s0 + $0x68] sm:$0xff]  ;;  %vm598_vm15 = vweird.f32 %v434_v33 }
 0x1af   :  { %v6507_v0 = vadd.f32 1e-05, %v405_v62  ;;  %v880_v36 = vpack.c.bf16 %v55_v49, %v54_v2 }
 0x1b0   :  { %v6454_v20 = vsub.f32 %v6185_v40, %v218_v45  ;;  %v855_v48 = vadd.f32 %v6042_v43, %v820_v9 }
 0x1b1   :  { %5215 = vrsqrt.f32 %v6507_v0  ;;  %4976 = vmatmul.msk.bf16.vlgmr.msra.gmra.mxu3 %vm92_vm0, %v880_v36  ;;  %vm628_vm5 = vweird.f32 %v6507_v0 }
 0x1b2   :  { %v282_v40 = vmul.f32 %v6454_v20, %v6454_v20  ;;  %v982_v35 = vpack.c.bf16 %v855_v48, %v854_v16 }
 0x1b3   :  { %v5214_v10 = vpop.eup %5213 }
 0x1b4   :  { %4992 = vmatmul.msk.bf16.gmra.mxu1 %vm92_vm0, %v981_v6  ;;  %v358_v3 = vsel %vm92_vm0, %v282_v40, 0.0  ;;  %368 = vadd.xlane.f32.xlu1 %v367_v21  ;;  %v593_v42 = vmul.f32 %v5214_v10, %v434_v33  ;;  %vm599_vm14 = vweird.f32 %v5214_v10 }
 0x1b5   :  { %365 = vadd.xlane.f32.xlu0 %v364_v55  ;;  %359 = vadd.xlane.f32.xlu2 %v358_v3  ;;  %vm600_vm1 = vmor %vm598_vm15, %vm599_vm14 }
 0x1b6   :  { %v594_v5 = vmul.f32 %v5214_v10, %v593_v42 }
 0x1b7   :  { %v6511_v50 = vpop.eup %5215 }
 0x1b8   :  { %v595_v11 = vmul.f32 0.5, %v594_v5  ;;  %v623_v8 = vmul.f32 %v6511_v50, %v6507_v0  ;;  %vm629_vm6 = vweird.f32 %v6511_v50 }
 0x1b9   :  { %vm6562_vm9 = vmor %vm628_vm5, %vm629_vm6 }
 0x1ba   :  { %v596_v45 = vsub.f32 1.5, %v595_v11  ;;  %v624_v55 = vmul.f32 %v6511_v50, %v623_v8 }
 0x1bc   :  { %v597_v59 = vmul.f32 %v5214_v10, %v596_v45  ;;  %v625_v31 = vmul.f32 0.5, %v624_v55 }
 0x1bd   :  { %187 = vadd.xlane.f32.xlu0 %v186_v54  ;;  %181 = vadd.xlane.f32.xlu2 %v180_v18 }
 0x1be   :  { %v601_v44 = vsel %vm600_vm1, %v5214_v10, %v597_v59  ;;  %v57_v10 = vld [vmem:[%s10759_s0 + $0x78] sm:$0xff] }
 0x1bf   :  { %v786_v18 = vmul.f32 %v601_v44, %v6132_v46  ;;  %v56_v46 = vld [vmem:[%s10759_s0 + $0x70] sm:$0xff] }
 0x1c0   :  { %v881_v42 = vpack.c.bf16 %v57_v10, %v56_v46  ;;  %v59_v46 = vld [vmem:[%s10759_s0 + $0x88] sm:$0xff] }
 0x1c1   :  { %v821_v37 = vmul.f32 %v6022_v24, %v786_v18 }
 0x1c2   :  { %4977 = vmatmul.msk.bf16.gmra.mxu3 %vm92_vm0, %v881_v42 }
 0x1c3   :  { %v856_v36 = vadd.f32 %v6042_v43, %v821_v37 }
 0x1c4   :  { %4993 = vmatmul.msk.bf16.gmra.mxu1 %vm92_vm0, %v982_v35 }
 0x1c5   :  { %184 = vadd.xlane.f32.xlu2 %v183_v23  ;;  %v626_v23 = vsub.f32 1.5, %v625_v31 }
 0x1c7   :  { %v627_v11 = vmul.f32 %v6511_v50, %v626_v23 }
 0x1ff   :  { %v339_v19 = vpop.xlane.xlu2 %338 }
 0x200   :  { %v403_v1 = vmul.f32 %v339_v19, %v5839_v22 }
 0x202   :  { %v435_v4 = vadd.f32 1e-05, %v403_v1 }
 0x204   :  { %5217 = vrsqrt.f32 %v435_v4  ;;  %vm608_vm3 = vweird.f32 %v435_v4 }
 0x207   :  { %v351_v14 = vpop.xlane.xlu1 %350 }
 0x208   :  { %v342_v7 = vpop.xlane.xlu2 %341  ;;  %v407_v58 = vmul.f32 %v351_v14, %v5839_v22 }
 0x209   :  { %v404_v15 = vmul.f32 %v342_v7, %v5839_v22 }
 0x20a   :  { %v5218_v57 = vpop.eup %5217  ;;  %v6525_v52 = vadd.f32 1e-05, %v407_v58 }
 0x20b   :  { %v436_v47 = vadd.f32 1e-05, %v404_v15  ;;  %v603_v6 = vmul.f32 %v5218_v57, %v435_v4  ;;  %vm609_vm2 = vweird.f32 %v5218_v57 }
 0x20c   :  { %vm610_vm4 = vmor %vm608_vm3, %vm609_vm2  ;;  %vm648_vm13 = vweird.f32 %v6525_v52 }
 0x20d   :  { %5219 = vrsqrt.f32 %v436_v47  ;;  %v604_v40 = vmul.f32 %v5218_v57, %v603_v6  ;;  %vm618_vm8 = vweird.f32 %v436_v47 }
 0x20e   :  { %5221 = vrsqrt.f32 %v6525_v52 }
 0x20f   :  { %v605_v21 = vmul.f32 0.5, %v604_v40  ;;  %v354_v27 = vpop.xlane.xlu1 %353  ;;  %v6579_v40 = vpop.f32.mrf.mxu2 }
 0x210   :  { %v348_v3 = vpop.xlane.xlu0 %347  ;;  %v408_v8 = vmul.f32 %v354_v27, %v5839_v22  ;;  %v631_v27 = vsel %vm6562_vm9, %v6511_v50, %v627_v11  ;;  %v58_v50 = vld [vmem:[%s10759_s0 + $0x80] sm:$0xff] }
 0x211   :  { %v406_v32 = vmul.f32 %v348_v3, %v5839_v22  ;;  %v606_v54 = vsub.f32 1.5, %v605_v21 }
 0x212   :  { %v6588_v31 = vadd.f32 1e-05, %v408_v8 }
 0x213   :  { %v5220_v9 = vpop.eup %5219  ;;  %v6532_v48 = vadd.f32 1e-05, %v406_v32  ;;  %v607_v16 = vmul.f32 %v5218_v57, %v606_v54 }
 0x214   :  { %v613_v35 = vmul.f32 %v5220_v9, %v436_v47  ;;  %v6544_v1 = vpop.eup %5221  ;;  %vm619_vm7 = vweird.f32 %v5220_v9  ;;  %vm658_vm2 = vweird.f32 %v6588_v31 }
 0x215   :  { %5223 = vrsqrt.f32 %v6532_v48  ;;  %v611_v30 = vsel %vm610_vm4, %v5218_v57, %v607_v16  ;;  %v643_v58 = vmul.f32 %v6544_v1, %v6525_v52  ;;  %vm6575_vm10 = vmor %vm618_vm8, %vm619_vm7  ;;  %vm638_vm11 = vweird.f32 %v6532_v48 }
 0x216   :  { %v614_v33 = vmul.f32 %v5220_v9, %v613_v35  ;;  %v787_v62 = vmul.f32 %v611_v30, %v6229_v13  ;;  %5225 = vrsqrt.f32 %v6588_v31  ;;  %vm649_vm14 = vweird.f32 %v6544_v1 }
 0x217   :  { %v176_v4 = vpop.xlane.xlu1 %175  ;;  %v644_v32 = vmul.f32 %v6544_v1, %v643_v58  ;;  %vm6646_vm1 = vmor %vm648_vm13, %vm649_vm14 }
 0x218   :  { %v615_v5 = vmul.f32 0.5, %v614_v33  ;;  %v173_v19 = vpop.xlane.xlu0 %172  ;;  %v822_v49 = vmul.f32 %v6022_v24, %v787_v62  ;;  %v223_v13 = vmul.f32 %v5839_v22, %v176_v4  ;;  %v789_v62 = vmul.f32 %v631_v27, %v6151_v53 }
 0x219   :  { %v222_v2 = vmul.f32 %v5839_v22, %v173_v19  ;;  %v645_v42 = vmul.f32 0.5, %v644_v32  ;;  %v882_v19 = vpack.c.bf16 %v59_v46, %v58_v50 }
 0x21a   :  { %v616_v45 = vsub.f32 1.5, %v615_v5  ;;  %v857_v14 = vadd.f32 %v6042_v43, %v822_v49  ;;  %v6571_v6 = vsub.f32 %v6369_v51, %v223_v13  ;;  %v6619_v49 = vpop.f32.mrf.mxu2 }
 0x21b   :  { %v6553_v7 = vpop.eup %5223  ;;  %v6557_v15 = vsub.f32 %v6345_v17, %v222_v2  ;;  %v6573_v17 = vpop.f32.mrf.mxu1  ;;  %v646_v53 = vsub.f32 1.5, %v645_v42  ;;  %4978 = vmatmul.msk.bf16.gmra.mxu3 %vm92_vm0, %v882_v19 }
 0x21c   :  { %v617_v59 = vmul.f32 %v5220_v9, %v616_v45  ;;  %v633_v47 = vmul.f32 %v6553_v7, %v6532_v48  ;;  %v983_v0 = vpack.c.bf16 %v857_v14, %v856_v36  ;;  %v287_v3 = vmul.f32 %v6571_v6, %v6571_v6  ;;  %v6625_v8 = vpop.eup %5225  ;;  %v6679_v42 = vpop.f32.mrf.mxu0 }
 0x21d   :  { %v286_v51 = vmul.f32 %v6557_v15, %v6557_v15  ;;  %v824_v45 = vmul.f32 %v6022_v24, %v789_v62  ;;  %vm639_vm12 = vweird.f32 %v6553_v7  ;;  %v647_v55 = vmul.f32 %v6544_v1, %v646_v53 }
 0x21e   :  { %v621_v44 = vsel %vm6575_vm10, %v5220_v9, %v617_v59  ;;  %v634_v21 = vmul.f32 %v6553_v7, %v633_v47  ;;  %4994 = vmatmul.msk.bf16.gmra.mxu1 %vm92_vm0, %v983_v0  ;;  %v373_v18 = vsel %vm92_vm0, %v287_v3, 0.0  ;;  %vm6635_vm15 = vmor %vm638_vm11, %vm639_vm12  ;;  %v653_v0 = vmul.f32 %v6625_v8, %v6588_v31  ;;  %v6706_v59 = vld [vmem:[%s10756_s6] ss:$0 sm:$0xff] }
 0x21f   :  { %v370_v9 = vsel %vm92_vm0, %v286_v51, 0.0  ;;  %374 = vadd.xlane.f32.xlu2 %v373_v18  ;;  %v179_v23 = vpop.xlane.xlu1 %178  ;;  %v788_v30 = vmul.f32 %v621_v44, %v6257_v61  ;;  %v859_v47 = vadd.f32 %v6042_v43, %v824_v45  ;;  %v651_v32 = vsel %vm6646_vm1, %v6544_v1, %v647_v55 }
 0x220   :  { %v357_v54 = vpop.xlane.xlu2 %356  ;;  %v363_v16 = vpop.xlane.xlu0 %362  ;;  %371 = vadd.xlane.f32.xlu1 %v370_v9  ;;  %v635_v33 = vmul.f32 0.5, %v634_v21  ;;  %v224_v37 = vmul.f32 %v5839_v22, %v179_v23  ;;  %v791_v50 = vmul.f32 %v651_v32, %v6251_v41  ;;  %vm659_vm3 = vweird.f32 %v6625_v8 }
 0x221   :  { %v409_v35 = vmul.f32 %v357_v54, %v5839_v22  ;;  %v823_v5 = vmul.f32 %v6022_v24, %v788_v30  ;;  %v411_v58 = vmul.f32 %v363_v16, %v5839_v22  ;;  %v654_v54 = vmul.f32 %v6625_v8, %v653_v0  ;;  %vm6726_vm5 = vmor %vm658_vm2, %vm659_vm3 }
 0x222   :  { %v6611_v61 = vsub.f32 %v6419_v56, %v224_v37  ;;  %v636_v11 = vsub.f32 1.5, %v635_v33  ;;  %v6668_v23 = vpop.f32.mrf.mxu2 }
 0x223   :  { %v6607_v10 = vadd.f32 1e-05, %v409_v35  ;;  %v6617_v2 = vpop.f32.mrf.mxu1  ;;  %v858_v57 = vadd.f32 %v6042_v43, %v823_v5  ;;  %v6656_v27 = vadd.f32 1e-05, %v411_v58  ;;  %v655_v46 = vmul.f32 0.5, %v654_v54 }
 0x224   :  { %v288_v4 = vmul.f32 %v6611_v61, %v6611_v61  ;;  %v637_v24 = vmul.f32 %v6553_v7, %v636_v11 }
 0x225   :  { %5227 = vrsqrt.f32 %v6607_v10  ;;  %v984_v3 = vpack.c.bf16 %v859_v47, %v858_v57  ;;  %v656_v45 = vsub.f32 1.5, %v655_v46  ;;  %vm668_vm6 = vweird.f32 %v6607_v10 }
 0x226   :  { %v376_v13 = vsel %vm92_vm0, %v288_v4, 0.0  ;;  %v641_v51 = vsel %vm6635_vm15, %v6553_v7, %v637_v24  ;;  %vm688_vm8 = vweird.f32 %v6656_v27 }
 0x227   :  { %377 = vadd.xlane.f32.xlu0 %v376_v13  ;;  %v790_v30 = vmul.f32 %v641_v51, %v6306_v28  ;;  %v369_v62 = vpop.xlane.xlu1 %368  ;;  %v6686_v28 = vld [vmem:[%s10755_s5] ss:$0 sm:$0xff] }
 0x228   :  { %v360_v56 = vpop.xlane.xlu2 %359  ;;  %v366_v36 = vpop.xlane.xlu0 %365  ;;  %v826_v4 = vmul.f32 %v6686_v28, %v791_v50  ;;  %v413_v53 = vmul.f32 %v369_v62, %v5839_v22 }
 0x229   :  { %v410_v14 = vmul.f32 %v360_v56, %v5839_v22 }
 0x22a   :  { %v861_v44 = vadd.f32 %v6706_v59, %v826_v4 }
 0x22b   :  { %v6633_v48 = vpop.eup %5227  ;;  %v6650_v21 = vadd.f32 1e-05, %v410_v14  ;;  %v6663_v16 = vpop.f32.mrf.mxu1  ;;  %v412_v14 = vmul.f32 %v366_v36, %v5839_v22 }
 0x22c   :  { %v663_v52 = vmul.f32 %v6633_v48, %v6607_v10  ;;  %vm669_vm4 = vweird.f32 %v6633_v48 }
 0x22d   :  { %5229 = vrsqrt.f32 %v6650_v21  ;;  %vm670_vm7 = vmor %vm668_vm6, %vm669_vm4  ;;  %v6735_v32 = vadd.f32 1e-05, %v412_v14  ;;  %vm678_vm12 = vweird.f32 %v6650_v21 }
 0x22e   :  { %v664_v43 = vmul.f32 %v6633_v48, %v663_v52  ;;  %4995 = vmatmul.msk.bf16.gmra.mxu1 %vm92_vm0, %v984_v3  ;;  %5231 = vrsqrt.f32 %v6656_v27  ;;  %v6718_v52 = vpop.f32.mrf.mxu2  ;;  %v657_v3 = vmul.f32 %v6625_v8, %v656_v45 }
 0x22f   :  { %vm698_vm1 = vweird.f32 %v6735_v32 }
 0x230   :  { %v182_v18 = vpop.xlane.xlu2 %181  ;;  %v188_v9 = vpop.xlane.xlu0 %187  ;;  %v665_v33 = vmul.f32 0.5, %v664_v43  ;;  %v6733_v43 = vadd.f32 1e-05, %v413_v53 }
 0x231   :  { %v225_v7 = vmul.f32 %v5839_v22, %v182_v18  ;;  %v227_v35 = vmul.f32 %v5839_v22, %v188_v9 }
 0x232   :  { %v666_v19 = vsub.f32 1.5, %v665_v33  ;;  %5233 = vrsqrt.f32 %v6733_v43  ;;  %vm708_vm14 = vweird.f32 %v6733_v43 }
 0x233   :  { %v6673_v1 = vsub.f32 %v6485_v12, %v225_v7  ;;  %v6676_v37 = vsub.f32 %v6480_v38, %v227_v35  ;;  %v825_v12 = vmul.f32 %v6686_v28, %v790_v30  ;;  %v6689_v11 = vpop.eup %5229  ;;  %v6713_v36 = vpop.f32.mrf.mxu1  ;;  %v661_v35 = vsel %vm6726_vm5, %v6625_v8, %v657_v3 }
 0x234   :  { %v6698_v13 = vpop.eup %5231  ;;  %v667_v47 = vmul.f32 %v6633_v48, %v666_v19  ;;  %v673_v55 = vmul.f32 %v6689_v11, %v6650_v21  ;;  %v933_v7 = vpop.f32.mrf.mxu0  ;;  %5235 = vrsqrt.f32 %v6735_v32  ;;  %v792_v50 = vmul.f32 %v661_v35, %v6293_v26 }
 0x235   :  { %v289_v5 = vmul.f32 %v6673_v1, %v6673_v1  ;;  %v291_v41 = vmul.f32 %v6676_v37, %v6676_v37  ;;  %v860_v58 = vadd.f32 %v6706_v59, %v825_v12  ;;  %vm689_vm9 = vweird.f32 %v6698_v13 }
 0x236   :  { %v671_v31 = vsel %vm670_vm7, %v6633_v48, %v667_v47  ;;  %v674_v9 = vmul.f32 %v6689_v11, %v673_v55  ;;  %vm679_vm10 = vweird.f32 %v6689_v11  ;;  %vm6770_vm11 = vmor %vm688_vm8, %vm689_vm9  ;;  %v6787_v21 = vpack.c.bf16 %v6619_v49, %v6579_v40 }
 0x237   :  { %v379_v38 = vsel %vm92_vm0, %v289_v5, 0.0  ;;  %v385_v24 = vsel %vm92_vm0, %v291_v41, 0.0  ;;  %v985_v54 = vpack.c.bf16 %v861_v44, %v860_v58  ;;  %v793_v48 = vmul.f32 %v671_v31, %v6414_v39  ;;  %v951_v5 = vpop.f32.mrf.mxu2  ;;  %vm680_vm13 = vmor %vm678_vm12, %vm679_vm10 }
 0x238   :  { %v185_v56 = vpop.xlane.xlu2 %184  ;;  %380 = vadd.xlane.f32.xlu1 %v379_v38  ;;  %386 = vadd.xlane.f32.xlu0 %v385_v24  ;;  %v675_v33 = vmul.f32 0.5, %v674_v9  ;;  %v6754_v19 = vpop.eup %5233  ;;  %v827_v41 = vmul.f32 %v6686_v28, %v792_v50  ;;  %v6776_v24 = vpack.c.bf16 %v933_v7, %v6679_v42  ;;  %v6799_v40 = vpack.c.bf16 %v6718_v52, %v6668_v23 }
 0x239   :  { %v226_v57 = vmul.f32 %v5839_v22, %v185_v56  ;;  %v828_v12 = vmul.f32 %v6686_v28, %v793_v48  ;;  %v703_v53 = vmul.f32 %v6754_v19, %v6733_v43  ;;  %vm709_vm15 = vweird.f32 %v6754_v19 }
 0x23a   :  { %v676_v8 = vsub.f32 1.5, %v675_v33  ;;  %v6756_v38 = vpop.eup %5235  ;;  %v862_v14 = vadd.f32 %v6706_v59, %v827_v41  ;;  %vm710_vm3 = vmor %vm708_vm14, %vm709_vm15  ;;  %vm1171_vm9 = vcmask 130048  }
 0x23b   :  { %v6716_v0 = vsub.f32 %v6498_v34, %v226_v57  ;;  %v683_v34 = vmul.f32 %v6698_v13, %v6656_v27  ;;  %v6751_v62 = vpop.f32.mrf.mxu1  ;;  %v863_v26 = vadd.f32 %v6706_v59, %v828_v12  ;;  %v693_v56 = vmul.f32 %v6756_v38, %v6735_v32 }
 0x23c   :  { %v936_v39 = vpop.f32.mrf.mxu0  ;;  %v677_v45 = vmul.f32 %v6689_v11, %v676_v8  ;;  %v704_v44 = vmul.f32 %v6754_v19, %v703_v53  ;;  %vm699_vm2 = vweird.f32 %v6756_v38  ;;  %v6853_v53 = vld [vmem:[%s10754_s1 + $0x108] sm:$0xff] }
 0x23d   :  { %v290_v18 = vmul.f32 %v6716_v0, %v6716_v0  ;;  %v684_v30 = vmul.f32 %v6698_v13, %v683_v34  ;;  %v986_v47 = vpack.c.bf16 %v863_v26, %v862_v14  ;;  %v694_v3 = vmul.f32 %v6756_v38, %v693_v56  ;;  %vm700_vm4 = vmor %vm698_vm1, %vm699_vm2  ;;  %v6860_v14 = vld [vmem:[%s10754_s1 + $0x118] sm:$0xff] }
 0x23e   :  { %4996 = vmatmul.msk.bf16.gmra.mxu1 %vm92_vm0, %v985_v54  ;;  %v681_v55 = vsel %vm680_vm13, %v6689_v11, %v677_v45  ;;  %v705_v34 = vmul.f32 0.5, %v704_v44  ;;  %v2577_v56 = vsel %vm92_vm0, %v6853_v53, 0.0  ;;  %v2583_v27 = vsel %vm92_vm0, %v6860_v14, 0.0 }
 0x23f   :  { %v382_v10 = vsel %vm92_vm0, %v290_v18, 0.0  ;;  %v685_v46 = vmul.f32 0.5, %v684_v30  ;;  %v953_v42 = vpop.f32.mrf.mxu2  ;;  %v794_v11 = vmul.f32 %v681_v55, %v6454_v20  ;;  %v695_v54 = vmul.f32 0.5, %v694_v3  ;;  %v6876_v3 = vld [vmem:[%s10754_s1 + $0x110] sm:$0xff] }
 0x240   :  { %383 = vadd.xlane.f32.xlu2 %v382_v10  ;;  %v706_v9 = vsub.f32 1.5, %v705_v34  ;;  %v6821_v33 = vpack.c.bf16 %v953_v42, %v951_v5  ;;  %v961_v42 = vpop.f32.mrf.mxu3  ;;  %v6883_v34 = vld [vmem:[%s10754_s1 + $0x128] sm:$0xff] }
 0x241   :  { %v686_v4 = vsub.f32 1.5, %v685_v46  ;;  %v829_v49 = vmul.f32 %v6686_v28, %v794_v11  ;;  %v696_v7 = vsub.f32 1.5, %v695_v54 }
 0x242   :  { %v707_v52 = vmul.f32 %v6754_v19, %v706_v9 }
 0x243   :  { %v687_v57 = vmul.f32 %v6698_v13, %v686_v4  ;;  %v6778_v58 = vpop.f32.mrf.mxu1  ;;  %v864_v23 = vadd.f32 %v6706_v59, %v829_v49  ;;  %v697_v35 = vmul.f32 %v6756_v38, %v696_v7  ;;  %v2589_v7 = vsel %vm92_vm0, %v6883_v34, 0.0 }
 0x244   :  { %v938_v18 = vpop.f32.mrf.mxu0  ;;  %v711_v48 = vsel %vm710_vm3, %v6754_v19, %v707_v52 }
 0x245   :  { %v691_v51 = vsel %vm6770_vm11, %v6698_v13, %v687_v57  ;;  %v6802_v10 = vpack.c.bf16 %v938_v18, %v936_v39  ;;  %v701_v32 = vsel %vm700_vm4, %v6756_v38, %v697_v35  ;;  %v797_v46 = vmul.f32 %v711_v48, %v6430_v29  ;;  %v6846_v29 = vld [vmem:[%s10754_s1 + $0x100] sm:$0xff] }
 0x246   :  { %v795_v31 = vmul.f32 %v691_v51, %v6377_v60  ;;  %v796_v12 = vmul.f32 %v701_v32, %v6424_v63  ;;  %v2574_v45 = vsel %vm92_vm0, %v6846_v29, 0.0  ;;  %v2580_v51 = vsel %vm92_vm0, %v6876_v3, 0.0 }
 0x247   :  { %v956_v20 = vpop.f32.mrf.mxu2  ;;  %v832_v19 = vmul.f32 %v6686_v28, %v797_v46 }
 0x248   :  { %v830_v60 = vmul.f32 %v6686_v28, %v795_v31  ;;  %v831_v41 = vmul.f32 %v6686_v28, %v796_v12  ;;  %v963_v9 = vpop.f32.mrf.mxu3 }
 0x249   :  { %v867_v38 = vadd.f32 %v6706_v59, %v832_v19 }
 0x24a   :  { %v865_v43 = vadd.f32 %v6706_v59, %v830_v60  ;;  %v866_v5 = vadd.f32 %v6706_v59, %v831_v41 }
 0x24b   :  { %v6806_v13 = vpop.f32.mrf.mxu1 }
 0x24c   :  { %1806 = vrot.lane.b32.xlu0 %v6776_v24, %s5756_s11  ;;  %v987_v30 = vpack.c.bf16 %v865_v43, %v864_v23  ;;  %v988_v26 = vpack.c.bf16 %v867_v38, %v866_v5  ;;  %v6893_v38 = vpack.c.bf16 %v963_v9, %v961_v42 }
 0x24e   :  { %4997 = vmatmul.msk.bf16.gmra.mxu1 %vm92_vm0, %v986_v47  ;;  %v6869_v47 = vld [vmem:[%s10754_s1 + $0x120] sm:$0xff] }
 0x24f   :  { %v958_v8 = vpop.f32.mrf.mxu2  ;;  %v2586_v55 = vsel %vm92_vm0, %v6869_v47, 0.0 }
 0x250   :  { %v6832_v4 = vpack.c.bf16 %v958_v8, %v956_v20  ;;  %v966_v43 = vpop.f32.mrf.mxu3 }
 0x251   :  { %1810 = vrot.lane.b32.xlu1 %v6787_v21, %s5756_s11 }
 0x253   :  { %v6826_v50 = vpop.f32.mrf.mxu1 }
 0x254   :  { %1812 = vrot.lane.b32.xlu0 %v6799_v40, %s5756_s11 }
 0x258   :  { %1808 = vrot.lane.b32.xlu2 %v6802_v10, %s5756_s11 }
 0x25b   :  { %v6838_v39 = vpop.f32.mrf.mxu1 }
 0x25e   :  { %4998 = vmatmul.msk.bf16.gmra.mxu1 %vm92_vm0, %v987_v30 }
 0x260   :  { %1814 = vrot.lane.b32.xlu2 %v6821_v33, %s5756_s11 }
 0x263   :  { %v6841_v63 = vpop.f32.mrf.mxu1 }
 0x268   :  { %1816 = vrot.lane.b32.xlu2 %v6832_v4, %s5756_s11 }
 0x26b   :  { %v6862_v57 = vpop.f32.mrf.mxu1 }
 0x26e   :  { %4999 = vmatmul.msk.bf16.gmra.mxu1 %vm92_vm0, %v988_v26 }
 0x273   :  { %v1091_v44 = vpop.f32.mrf.mxu1 }
 0x27b   :  { %2575 = vadd.xlane.f32.xlu1 %v2574_v45  ;;  %v1093_v11 = vpop.f32.mrf.mxu1 }
 0x27e   :  { %2578 = vadd.xlane.f32.xlu0 %v2577_v56  ;;  %v968_v56 = vpop.f32.mrf.mxu3 }
 0x27f   :  { %v6905_v9 = vpack.c.bf16 %v968_v56, %v966_v43 }
 0x283   :  { %2584 = vadd.xlane.f32.xlu1 %v2583_v27 }
 0x28b   :  { %2587 = vadd.xlane.f32.xlu1 %v2586_v55 }
 0x291   :  { %2581 = vadd.xlane.f32.xlu2 %v2580_v51 }
 0x292   :  { %v375_v54 = vpop.xlane.xlu2 %374  ;;  %1818 = vrot.lane.b32.xlu0 %v6893_v38, %s5756_s11 }
 0x293   :  { %v372_v18 = vpop.xlane.xlu1 %371  ;;  %v415_v31 = vmul.f32 %v375_v54, %v5839_v22 }
 0x294   :  { %v414_v49 = vmul.f32 %v372_v18, %v5839_v22 }
 0x295   :  { %v447_v60 = vadd.f32 1e-05, %v415_v31 }
 0x296   :  { %v446_v20 = vadd.f32 1e-05, %v414_v49 }
 0x297   :  { %5237 = vrsqrt.f32 %v447_v60  ;;  %vm728_vm5 = vweird.f32 %v447_v60 }
 0x298   :  { %5239 = vrsqrt.f32 %v446_v20  ;;  %vm718_vm7 = vweird.f32 %v446_v20 }
 0x299   :  { %2590 = vadd.xlane.f32.xlu2 %v2589_v7  ;;  %v6907_v7 = vpack.c.bf16 %v1093_v11, %v1091_v44 }
 0x29a   :  { %v378_v23 = vpop.xlane.xlu0 %377 }
 0x29b   :  { %v1096_v52 = vpop.f32.mrf.mxu1  ;;  %v416_v35 = vmul.f32 %v378_v23, %v5839_v22 }
 0x29d   :  { %v5238_v30 = vpop.eup %5237  ;;  %v6890_v48 = vadd.f32 1e-05, %v416_v35 }
 0x29e   :  { %v5240_v32 = vpop.eup %5239  ;;  %v723_v46 = vmul.f32 %v5238_v30, %v447_v60  ;;  %vm729_vm6 = vweird.f32 %v5238_v30  ;;  %v971_v43 = vpop.f32.mrf.mxu3 }
 0x29f   :  { %v713_v12 = vmul.f32 %v5240_v32, %v446_v20  ;;  %5241 = vrsqrt.f32 %v6890_v48  ;;  %vm719_vm8 = vweird.f32 %v5240_v32  ;;  %vm730_vm10 = vmor %vm728_vm5, %vm729_vm6  ;;  %vm738_vm12 = vweird.f32 %v6890_v48 }
 0x2a0   :  { %v724_v8 = vmul.f32 %v5238_v30, %v723_v46  ;;  %vm720_vm11 = vmor %vm718_vm7, %vm719_vm8 }
 0x2a1   :  { %v714_v41 = vmul.f32 %v5240_v32, %v713_v12 }
 0x2a2   :  { %v725_v19 = vmul.f32 0.5, %v724_v8 }
 0x2a3   :  { %v1098_v5 = vpop.f32.mrf.mxu1  ;;  %v715_v26 = vmul.f32 0.5, %v714_v41 }
 0x2a4   :  { %v6895_v45 = vpack.c.bf16 %v1098_v5, %v1096_v52  ;;  %v726_v27 = vsub.f32 1.5, %v725_v19  ;;  %1820 = vrot.lane.b32.xlu1 %v6905_v9, %s5756_s11  ;;  %v6924_v5 = vpack.c.bf16 %v6862_v57, %v6841_v63 }
 0x2a5   :  { %v6899_v55 = vpop.eup %5241  ;;  %v716_v51 = vsub.f32 1.5, %v715_v26 }
 0x2a6   :  { %10878 = vst [vmem:[#allocation2_spill] sm:$0xff] %v6895_v45  ;;  %v1221_v54 = vsel %vm1171_vm9, %v6895_v45, 0  ;;  %v727_v42 = vmul.f32 %v5238_v30, %v726_v27  ;;  %v733_v18 = vmul.f32 %v6899_v55, %v6890_v48  ;;  %vm739_vm13 = vweird.f32 %v6899_v55 }
 0x2a7   :  { %1247 = vmatpush.bf16.xpose.msrb.mxu2 %v1221_v54  ;;  %v717_v31 = vmul.f32 %v5240_v32, %v716_v51  ;;  %v973_v54 = vpop.f32.mrf.mxu3  ;;  %v1215_v57 = vsel %vm1171_vm9, %v6924_v5, 0  ;;  %vm740_vm14 = vmor %vm738_vm12, %vm739_vm13 }
 0x2a8   :  { %v731_v49 = vsel %vm730_vm10, %v5238_v30, %v727_v42  ;;  %v734_v23 = vmul.f32 %v6899_v55, %v733_v18 }
 0x2a9   :  { %v799_v60 = vmul.f32 %v731_v49, %v6571_v6  ;;  %v721_v20 = vsel %vm720_vm11, %v5240_v32, %v717_v31  ;;  %v1218_v32 = vsel %vm1171_vm9, %v6907_v7, 0  ;;  %v6930_v31 = vpack.c.bf16 %v973_v54, %v971_v43 }
 0x2aa   :  { %v798_v35 = vmul.f32 %v721_v20, %v6557_v15  ;;  %v735_v11 = vmul.f32 0.5, %v734_v23  ;;  %v6939_v23 = vpack.c.bf16 %v6838_v39, %v6826_v50 }
 0x2ab   :  { %v381_v52 = vpop.xlane.xlu1 %380  ;;  %v387_v12 = vpop.xlane.xlu0 %386  ;;  %v834_v30 = vmul.f32 %v6686_v28, %v799_v60 }
 0x2ac   :  { %v417_v46 = vmul.f32 %v381_v52, %v5839_v22  ;;  %v419_v44 = vmul.f32 %v387_v12, %v5839_v22  ;;  %v833_v6 = vmul.f32 %v6686_v28, %v798_v35  ;;  %v736_v26 = vsub.f32 1.5, %v735_v11  ;;  %1822 = vrot.lane.b32.xlu1 %v6930_v31, %s5756_s11 }
 0x2ad   :  { %v869_v15 = vadd.f32 %v6706_v59, %v834_v30 }
 0x2ae   :  { %v449_v8 = vadd.f32 1e-05, %v417_v46  ;;  %v451_v41 = vadd.f32 1e-05, %v419_v44  ;;  %v868_v19 = vadd.f32 %v6706_v59, %v833_v6  ;;  %v737_v49 = vmul.f32 %v6899_v55, %v736_v26 }
 0x2af   :  { %1248 = vmatpush.bf16.xpose.msrb.mxu2 %v1218_v32  ;;  %v1212_v44 = vsel %vm1171_vm9, %v6939_v23, 0 }
 0x2b0   :  { %5243 = vrsqrt.f32 %v449_v8  ;;  %v989_v56 = vpack.c.bf16 %v869_v15, %v868_v19  ;;  %v741_v52 = vsel %vm740_vm14, %v6899_v55, %v737_v49  ;;  %vm748_vm1 = vweird.f32 %v449_v8 }
 0x2b1   :  { %5245 = vrsqrt.f32 %v451_v41  ;;  %v800_v43 = vmul.f32 %v741_v52, %v6611_v61  ;;  %v6949_v19 = vpack.c.bf16 %v6806_v13, %v6778_v58  ;;  %vm768_vm3 = vweird.f32 %v451_v41 }
 0x2b2   :  { %5000 = vmatmul.msk.bf16.gmra.mxu1 %vm92_vm0, %v989_v56  ;;  %v6969_v52 = vpack.c.bf16 %v6663_v16, %v6617_v2 }
 0x2b3   :  { %v384_v27 = vpop.xlane.xlu2 %383  ;;  %v835_v15 = vmul.f32 %v6686_v28, %v800_v43  ;;  %v1209_v58 = vsel %vm1171_vm9, %v6949_v19, 0 }
 0x2b4   :  { %v418_v51 = vmul.f32 %v384_v27, %v5839_v22  ;;  %10880 = vst [vmem:[#allocation4_spill] sm:$0xff] %v6969_v52 }
 0x2b5   :  { %v870_v27 = vadd.f32 %v6706_v59, %v835_v15 }
 0x2b6   :  { %v5244_v42 = vpop.eup %5243  ;;  %v450_v18 = vadd.f32 1e-05, %v418_v51 }
 0x2b7   :  { %v743_v63 = vmul.f32 %v5244_v42, %v449_v8  ;;  %v5246_v60 = vpop.eup %5245  ;;  %1249 = vmatpush.bf16.xpose.msrb.mxu2 %v1215_v57  ;;  %vm749_vm15 = vweird.f32 %v5244_v42 }
 0x2b8   :  { %5247 = vrsqrt.f32 %v450_v18  ;;  %v763_v20 = vmul.f32 %v5246_v60, %v451_v41  ;;  %vm750_vm2 = vmor %vm748_vm1, %vm749_vm15  ;;  %vm769_vm4 = vweird.f32 %v5246_v60  ;;  %vm758_vm7 = vweird.f32 %v450_v18 }
 0x2b9   :  { %v744_v48 = vmul.f32 %v5244_v42, %v743_v63  ;;  %vm770_vm6 = vmor %vm768_vm3, %vm769_vm4 }
 0x2ba   :  { %v764_v46 = vmul.f32 %v5246_v60, %v763_v20 }
 0x2bb   :  { %v745_v35 = vmul.f32 0.5, %v744_v48 }
 0x2bc   :  { %v765_v11 = vmul.f32 0.5, %v764_v46 }
 0x2bd   :  { %v746_v12 = vsub.f32 1.5, %v745_v35  ;;  %v6971_v35 = vpop.f32.mrf.mxu1 }
 0x2be   :  { %v5248_v30 = vpop.eup %5247  ;;  %v766_v61 = vsub.f32 1.5, %v765_v11  ;;  %v6986_v16 = vpop.permute.xlu0 %1806 }
 0x2bf   :  { %v747_v6 = vmul.f32 %v5244_v42, %v746_v12  ;;  %v753_v32 = vmul.f32 %v5248_v30, %v450_v18  ;;  %1250 = vmatpush.bf16.xpose.msrb.mxu2 %v1212_v44  ;;  %vm759_vm5 = vweird.f32 %v5248_v30  ;;  %v6994_v12 = vpop.permute.xlu2 %1808 }
 0x2c0   :  { %v767_v54 = vmul.f32 %v5246_v60, %v766_v61  ;;  %vm760_vm8 = vmor %vm758_vm7, %vm759_vm5 }
 0x2c1   :  { %v751_v50 = vsel %vm750_vm2, %v5244_v42, %v747_v6  ;;  %v754_v39 = vmul.f32 %v5248_v30, %v753_v32  ;;  %v6959_v42 = vpack.c.bf16 %v6751_v62, %v6713_v36 }
 0x2c2   :  { %v801_v55 = vmul.f32 %v751_v50, %v6673_v1  ;;  %v771_v49 = vsel %vm770_vm6, %v5246_v60, %v767_v54 }
 0x2c3   :  { %v755_v26 = vmul.f32 0.5, %v754_v39  ;;  %10879 = vst [vmem:[#allocation3_spill] sm:$0xff] %v6959_v42  ;;  %v803_v57 = vmul.f32 %v771_v49, %v6676_v37  ;;  %v1206_v18 = vsel %vm1171_vm9, %v6959_v42, 0  ;;  %v1203_v37 = vsel %vm1171_vm9, %v6969_v52, 0  ;;  %v7048_v49 = vld [vmem:[%s10754_s1 + $0x138] sm:$0xff] }
 0x2c4   :  { %v836_v8 = vmul.f32 %v6686_v28, %v801_v55 }
 0x2c5   :  { %v756_v56 = vsub.f32 1.5, %v755_v26  ;;  %v838_v20 = vmul.f32 %v6686_v28, %v803_v57  ;;  %v6982_v60 = vpop.f32.mrf.mxu1  ;;  %v7021_v26 = vld [vmem:[%s10754_s1 + $0x130] sm:$0xff] }
 0x2c6   :  { %v871_v51 = vadd.f32 %v6706_v59, %v836_v8 }
 0x2c7   :  { %v757_v1 = vmul.f32 %v5248_v30, %v756_v56  ;;  %1251 = vmatpush.bf16.xpose.msrb.mxu2 %v1209_v58  ;;  %v7004_v6 = vpop.permute.xlu2 %1814 }
 0x2c8   :  { %v990_v13 = vpack.c.bf16 %v871_v51, %v870_v27  ;;  %v2592_v51 = vsel %vm92_vm0, %v7021_v26, 0.0 }
 0x2c9   :  { %v761_v41 = vsel %vm760_vm8, %v5248_v30, %v757_v1  ;;  %v6996_v30 = vpop.permute.xlu0 %1812 }
 0x2ca   :  { %5001 = vmatmul.msk.bf16.gmra.mxu1 %vm92_vm0, %v990_v13  ;;  %v802_v63 = vmul.f32 %v761_v41, %v6716_v0  ;;  %v873_v0 = vadd.f32 %v6706_v59, %v838_v20  ;;  %v7040_v13 = vld [vmem:[%s10754_s1 + $0x168] sm:$0xff] }
 0x2cc   :  { %v837_v48 = vmul.f32 %v6686_v28, %v802_v63  ;;  %v6980_v28 = vpack.c.bf16 %v6573_v17, %v6529_v25  ;;  %v2613_v63 = vsel %vm92_vm0, %v7040_v13, 0.0 }
 0x2cd   :  { %v6990_v46 = vpop.f32.mrf.mxu1 }
 0x2ce   :  { %v872_v36 = vadd.f32 %v6706_v59, %v837_v48  ;;  %10881 = vst [vmem:[#allocation5_spill] sm:$0xff] %v6980_v28  ;;  %v1200_v2 = vsel %vm1171_vm9, %v6980_v28, 0  ;;  %v6988_v59 = vpop.permute.xlu1 %1810 }
 0x2cf   :  { %1252 = vmatpush.bf16.xpose.msrb.mxu2 %v1206_v18  ;;  %v7033_v54 = vpop.permute.xlu2 %1816  ;;  %v2595_v18 = vsel %vm92_vm0, %v7048_v49, 0.0 }
 0x2d0   :  { %v991_v62 = vpack.c.bf16 %v873_v0, %v872_v36 }
 0x2d5   :  { %v6999_v43 = vpop.f32.mrf.mxu1 }
 0x2d7   :  { %1253 = vmatpush.bf16.xpose.msrb.mxu2 %v1203_v37 }
 0x2da   :  { %5002 = vmatmul.msk.bf16.gmra.mxu1 %vm92_vm0, %v991_v62 }
 0x2dd   :  { %v7027_v56 = vpop.f32.mrf.mxu1 }
 0x2df   :  { %1254 = vmatpush.bf16.xpose.msrb.mxu2 %v1200_v2 }
 0x2e5   :  { %v7056_v20 = vpop.f32.mrf.mxu1 }
 0x2e6   :  { %5003 = vmatmul.msk.bf16.vlgmr.msrb.gmra.mxu2 %vm1171_vm9, %v6776_v24 }
 0x2ed   :  { %v1116_v2 = vpop.f32.mrf.mxu1 }
 0x2ee   :  { %v2576_v25 = vpop.xlane.xlu1 %2575 }
 0x2ef   :  { %v2670_v17 = vmul.f32 %v2576_v25, %v5839_v22  ;;  %v7071_v25 = vld [vmem:[%s10754_s1 + $0x140] sm:$0xff] }
 0x2f1   :  { %v7002_v44 = vsub.f32 %v6846_v29, %v2670_v17  ;;  %v2579_v11 = vpop.xlane.xlu0 %2578  ;;  %v2598_v17 = vsel %vm92_vm0, %v7071_v25, 0.0 }
 0x2f2   :  { %v2671_v50 = vmul.f32 %v2579_v11, %v5839_v22 }
 0x2f3   :  { %v2734_v32 = vmul.f32 %v7002_v44, %v7002_v44 }
 0x2f4   :  { %v7011_v55 = vsub.f32 %v6853_v53, %v2671_v50  ;;  %v7081_v50 = vld [vmem:[%s10754_s1 + $0x148] sm:$0xff] }
 0x2f5   :  { %v2766_v39 = vsel %vm92_vm0, %v2734_v32, 0.0  ;;  %v1118_v32 = vpop.f32.mrf.mxu1 }
 0x2f6   :  { %v2585_v15 = vpop.xlane.xlu1 %2584  ;;  %2767 = vadd.xlane.f32.xlu2 %v2766_v39  ;;  %5004 = vmatmul.msk.bf16.gmra.mxu2 %vm1171_vm9, %v6802_v10  ;;  %v2735_v29 = vmul.f32 %v7011_v55, %v7011_v55  ;;  %v2601_v39 = vsel %vm92_vm0, %v7081_v50, 0.0 }
 0x2f7   :  { %v2673_v61 = vmul.f32 %v2585_v15, %v5839_v22 }
 0x2f8   :  { %v2769_v53 = vsel %vm92_vm0, %v2735_v29, 0.0 }
 0x2f9   :  { %v7024_v8 = vsub.f32 %v6860_v14, %v2673_v61  ;;  %2770 = vadd.xlane.f32.xlu0 %v2769_v53  ;;  %v7090_v61 = vpack.c.bf16 %v6982_v60, %v6971_v35 }
 0x2fb   :  { %v2737_v27 = vmul.f32 %v7024_v8, %v7024_v8  ;;  %10882 = vst [vmem:[#allocation6_spill] sm:$0xff] %v7090_v61 }
 0x2fd   :  { %v2775_v1 = vsel %vm92_vm0, %v2737_v27, 0.0  ;;  %v1121_v53 = vpop.f32.mrf.mxu1 }
 0x2fe   :  { %2776 = vadd.xlane.f32.xlu1 %v2775_v1  ;;  %v2588_v58 = vpop.xlane.xlu1 %2587  ;;  %2593 = vadd.xlane.f32.xlu2 %v2592_v51  ;;  %v7097_v51 = vpack.c.bf16 %v1118_v32, %v1116_v2 }
 0x2ff   :  { %v2674_v14 = vmul.f32 %v2588_v58, %v5839_v22 }
 0x301   :  { %v7043_v41 = vsub.f32 %v6869_v47, %v2674_v14  ;;  %v7110_v14 = vld [vmem:[%s10754_s1 + $0x150] sm:$0xff] }
 0x303   :  { %v2738_v57 = vmul.f32 %v7043_v41, %v7043_v41 }
 0x304   :  { %v2582_v48 = vpop.xlane.xlu2 %2581 }
 0x305   :  { %v2778_v47 = vsel %vm92_vm0, %v2738_v57, 0.0  ;;  %v2672_v36 = vmul.f32 %v2582_v48, %v5839_v22 }
 0x306   :  { %2614 = vadd.xlane.f32.xlu1 %v2613_v63  ;;  %2779 = vadd.xlane.f32.xlu0 %v2778_v47  ;;  %v2604_v63 = vsel %vm92_vm0, %v7110_v14, 0.0 }
 0x307   :  { %2596 = vadd.xlane.f32.xlu2 %v2595_v18  ;;  %v7061_v0 = vsub.f32 %v6876_v3, %v2672_v36  ;;  %5005 = vmatmul.msk.bf16.gmra.mxu2 %vm1171_vm9, %v6787_v21  ;;  %v7119_v18 = vld [vmem:[%s10754_s1 + $0x158] sm:$0xff] }
 0x308   :  { %v2607_v48 = vsel %vm92_vm0, %v7119_v18, 0.0 }
 0x309   :  { %v2736_v37 = vmul.f32 %v7061_v0, %v7061_v0 }
 0x30b   :  { %v2772_v62 = vsel %vm92_vm0, %v2736_v37, 0.0 }
 0x30c   :  { %v2591_v3 = vpop.xlane.xlu2 %2590 }
 0x30d   :  { %v2675_v11 = vmul.f32 %v2591_v3, %v5839_v22 }
 0x30e   :  { %2605 = vadd.xlane.f32.xlu0 %v2604_v63 }
 0x30f   :  { %2773 = vadd.xlane.f32.xlu2 %v2772_v62  ;;  %v7086_v15 = vsub.f32 %v6883_v34, %v2675_v11  ;;  %v1123_v34 = vpop.f32.mrf.mxu1 }
 0x311   :  { %v2739_v29 = vmul.f32 %v7086_v15, %v7086_v15 }
 0x313   :  { %v2781_v27 = vsel %vm92_vm0, %v2739_v29, 0.0 }
 0x317   :  { %2599 = vadd.xlane.f32.xlu2 %v2598_v17  ;;  %5006 = vmatmul.msk.bf16.gmra.mxu2 %vm1171_vm9, %v6799_v40 }
 0x31f   :  { %2602 = vadd.xlane.f32.xlu2 %v2601_v39  ;;  %1840 = vrot.lane.b32.xlu1 %v7090_v61, %s5756_s11 }
 0x327   :  { %2782 = vadd.xlane.f32.xlu2 %v2781_v27  ;;  %1846 = vrot.lane.b32.xlu1 %v7097_v51, %s5756_s11  ;;  %v7145_v27 = vpack.c.bf16 %v1123_v34, %v1121_v53 }
 0x328   :  { %5007 = vmatmul.msk.bf16.gmra.mxu2 %vm1171_vm9, %v6821_v33 }
 0x32f   :  { %v1126_v35 = vpop.f32.mrf.mxu1  ;;  %2608 = vadd.xlane.f32.xlu2 %v2607_v48 }
 0x337   :  { %v1128_v60 = vpop.f32.mrf.mxu1 }
 0x338   :  { %5008 = vmatmul.msk.bf16.gmra.mxu2 %vm1171_vm9, %v6832_v4  ;;  %v7137_v3 = vpack.c.bf16 %v1128_v60, %v1126_v35  ;;  %v1236_v60 = vsel %vm1171_vm9, %v7145_v27, 0 }
 0x33a   :  { %10885 = vst [vmem:[#allocation9_spill] sm:$0xff] %v7137_v3  ;;  %v1239_v39 = vsel %vm1171_vm9, %v7137_v3, 0 }
 0x347   :  { %v1131_v1 = vpop.f32.mrf.mxu1 }
 0x348   :  { %5009 = vmatmul.msk.bf16.gmra.mxu2 %vm1171_vm9, %v6893_v38 }
 0x34f   :  { %v1133_v58 = vpop.f32.mrf.mxu1 }
 0x350   :  { %v7129_v62 = vpack.c.bf16 %v1133_v58, %v1131_v1 }
 0x352   :  { %10884 = vst [vmem:[#allocation8_spill] sm:$0xff] %v7129_v62  ;;  %v1242_v17 = vsel %vm1171_vm9, %v7129_v62, 0 }
 0x357   :  { %v1136_v57 = vpop.f32.mrf.mxu1 }
 0x358   :  { %5010 = vmatmul.msk.bf16.gmra.mxu2 %vm1171_vm9, %v6905_v9 }
 0x35f   :  { %v1138_v47 = vpop.f32.mrf.mxu1 }
 0x360   :  { %v7123_v36 = vpack.c.bf16 %v1138_v47, %v1136_v57 }
 0x362   :  { %10883 = vst [vmem:[#allocation7_spill] sm:$0xff] %v7123_v36  ;;  %1854 = vrot.lane.b32.xlu1 %v7123_v36, %s5756_s11  ;;  %v1245_v37 = vsel %vm1171_vm9, %v7123_v36, 0 }
 0x363   :  { %1301 = vmatpush.bf16.xpose.msrb.mxu3 %v1245_v37  ;;  %v1233_v37 = vsel %vm1171_vm9, %v7097_v51, 0 }
 0x368   :  { %5011 = vmatmul.msk.bf16.gmra.mxu2 %vm1171_vm9, %v6930_v31 }
 0x369   :  { %v7133_v2 = vpop.xlane.xlu2 %2767 }
 0x36b   :  { %1302 = vmatpush.bf16.xpose.msrb.mxu3 %v1242_v17  ;;  %v7177_v17 = vld [vmem:[%s10754_s1 + $0x170] sm:$0xff] }
 0x371   :  { %v2594_v11 = vpop.xlane.xlu2 %2593 }
 0x372   :  { %v2676_v32 = vmul.f32 %v2594_v11, %v5839_v22  ;;  %v2616_v11 = vsel %vm92_vm0, %v7177_v17, 0.0 }
 0x373   :  { %1303 = vmatpush.bf16.xpose.msrb.mxu3 %v1239_v39 }
 0x374   :  { %v7143_v29 = vsub.f32 %v7021_v26, %v2676_v32  ;;  %v7156_v26 = vld [vmem:[%s10754_s1 + $0x160] sm:$0xff] }
 0x375   :  { %v2610_v34 = vsel %vm92_vm0, %v7156_v26, 0.0 }
 0x376   :  { %v2740_v1 = vmul.f32 %v7143_v29, %v7143_v29 }
 0x378   :  { %v2784_v58 = vsel %vm92_vm0, %v2740_v1, 0.0 }
 0x379   :  { %2785 = vadd.xlane.f32.xlu0 %v2784_v58 }
 0x37a   :  { %v2597_v35 = vpop.xlane.xlu2 %2596 }
 0x37b   :  { %v2677_v63 = vmul.f32 %v2597_v35, %v5839_v22  ;;  %1304 = vmatpush.bf16.xpose.msrb.mxu3 %v1236_v60 }
 0x37d   :  { %v7159_v53 = vsub.f32 %v7048_v49, %v2677_v63  ;;  %v7172_v49 = vpack.c.bf16 %v7056_v20, %v7027_v56  ;;  %v7189_v56 = vpack.c.bf16 %v6999_v43, %v6990_v46 }
 0x37f   :  { %v2741_v57 = vmul.f32 %v7159_v53, %v7159_v53  ;;  %v1230_v39 = vsel %vm1171_vm9, %v7172_v49, 0  ;;  %v1227_v63 = vsel %vm1171_vm9, %v7189_v56, 0 }
 0x381   :  { %2611 = vadd.xlane.f32.xlu0 %v2610_v34  ;;  %v2787_v48 = vsel %vm92_vm0, %v2741_v57, 0.0  ;;  %v1224_v57 = vsel %vm1171_vm9, %v7090_v61, 0 }
 0x382   :  { %2788 = vadd.xlane.f32.xlu2 %v2787_v48  ;;  %v7166_v47 = vpop.xlane.xlu2 %2773  ;;  %v7205_v48 = vpop.permute.xlu1 %1820 }
 0x383   :  { %1305 = vmatpush.bf16.xpose.msrb.mxu3 %v1233_v37 }
 0x38a   :  { %v2600_v32 = vpop.xlane.xlu2 %2599 }
 0x38b   :  { %v2678_v1 = vmul.f32 %v2600_v32, %v5839_v22  ;;  %1306 = vmatpush.bf16.xpose.msrb.mxu3 %v1230_v39 }
 0x38c   :  { %2617 = vadd.xlane.f32.xlu1 %v2616_v11  ;;  %v7233_v11 = vpop.permute.xlu0 %1818 }
 0x38d   :  { %v7185_v58 = vsub.f32 %v7071_v25, %v2678_v1 }
 0x38f   :  { %10886 = vst [vmem:[#allocation10_spill] sm:$0xff] %v7185_v58  ;;  %v2742_v20 = vmul.f32 %v7185_v58, %v7185_v58 }
 0x391   :  { %v2790_v35 = vsel %vm92_vm0, %v2742_v20, 0.0 }
 0x392   :  { %2791 = vadd.xlane.f32.xlu2 %v2790_v35  ;;  %v2603_v60 = vpop.xlane.xlu2 %2602 }
 0x393   :  { %v2679_v34 = vmul.f32 %v2603_v60, %v5839_v22  ;;  %1307 = vmatpush.bf16.xpose.msrb.mxu3 %v1227_v63 }
 0x394   :  { %v7239_v39 = vpop.xlane.xlu0 %2770 }
 0x395   :  { %v7198_v25 = vsub.f32 %v7081_v50, %v2679_v34  ;;  %v7211_v50 = vpop.permute.xlu1 %1822 }
 0x397   :  { %10887 = vst [vmem:[#allocation11_spill] sm:$0xff] %v7198_v25  ;;  %v2743_v46 = vmul.f32 %v7198_v25, %v7198_v25 }
 0x399   :  { %v2793_v43 = vsel %vm92_vm0, %v2743_v46, 0.0 }
 0x39a   :  { %2794 = vadd.xlane.f32.xlu0 %v2793_v43  ;;  %v7248_v60 = vpop.xlane.xlu2 %2782 }
 0x39b   :  { %1308 = vmatpush.bf16.xpose.msrb.mxu3 %v1224_v57  ;;  %v7266_v57 = vld [vmem:[%s10754_s1 + $0x180] sm:$0xff] }
 0x39c   :  { %v7243_v1 = vpop.xlane.xlu0 %2779 }
 0x39d   :  { %v7219_v37 = vpop.xlane.xlu1 %2776 }
 0x3a2   :  { %5012 = vmatmul.msk.bf16.vlgmr.msrb.gmra.mxu3 %vm1171_vm9, %v6776_v24  ;;  %v2609_v43 = vpop.xlane.xlu2 %2608 }
 0x3a4   :  { %v2606_v63 = vpop.xlane.xlu0 %2605 }
 0x3a5   :  { %1836 = vrot.lane.b32.xlu1 %v6907_v7, %s5756_s11  ;;  %v7227_v24 = vpop.xlane.xlu1 %2614  ;;  %v2680_v34 = vmul.f32 %v2606_v63, %v5839_v22 }
 0x3a6   :  { %v2683_v36 = vmul.f32 %v7227_v24, %v5839_v22 }
 0x3a7   :  { %v7257_v46 = vsub.f32 %v7110_v14, %v2680_v34  ;;  %v2622_v14 = vsel %vm92_vm0, %v7266_v57, 0.0 }
 0x3a9   :  { %10888 = vst [vmem:[#allocation12_spill] sm:$0xff] %v7257_v46 }
 0x3aa   :  { %1842 = vrot.lane.b32.xlu2 %v7189_v56, %s5756_s11 }
 0x3ad   :  { %1834 = vrot.lane.b32.xlu1 %v6924_v5, %s5756_s11  ;;  %v7235_v32 = vpop.permute.xlu1 %1840 }
 0x3ae   :  { %1844 = vrot.lane.b32.xlu0 %v7172_v49, %s5756_s11 }
 0x3b2   :  { %1848 = vrot.lane.b32.xlu2 %v7145_v27, %s5756_s11  ;;  %5013 = vmatmul.msk.bf16.gmra.mxu3 %vm1171_vm9, %v6802_v10 }
 0x3b5   :  { %v7241_v10 = vpop.permute.xlu1 %1846 }
 0x3b6   :  { %1850 = vrot.lane.b32.xlu0 %v7137_v3, %s5756_s11 }
 0x3ba   :  { %1852 = vrot.lane.b32.xlu2 %v7129_v62, %s5756_s11 }
 0x3be   :  { %1838 = vrot.lane.b32.xlu0 %v6895_v45, %s5756_s11 }
 0x3c2   :  { %5014 = vmatmul.msk.bf16.gmra.mxu3 %vm1171_vm9, %v6787_v21  ;;  %v7254_v21 = vld [vmem:[%s10754_s1 + $0x178] sm:$0xff] }
 0x3d2   :  { %5015 = vmatmul.msk.bf16.gmra.mxu3 %vm1171_vm9, %v6799_v40  ;;  %v2619_v40 = vsel %vm92_vm0, %v7254_v21, 0.0 }
 0x3d4   :  { %v1855_v20 = vpop.permute.xlu1 %1854 }
 0x3d5   :  { %v1929_v35 = vsel %vm1171_vm9, %v1855_v20, 0  ;;  %v2744_v20 = vmul.f32 %v7257_v46, %v7257_v46 }
 0x3d6   :  { %1985 = vmatpush.bf16.xpose.msrb.mxu1 %v1929_v35  ;;  %v2681_v35 = vmul.f32 %v2609_v43, %v5839_v22 }
 0x3d7   :  { %v2796_v63 = vsel %vm92_vm0, %v2744_v20, 0.0 }
 0x3d8   :  { %v7275_v34 = vsub.f32 %v7119_v18, %v2681_v35  ;;  %v7294_v18 = vld [vmem:[%s10754_s1 + $0x198] sm:$0xff] }
 0x3da   :  { %10889 = vst [vmem:[#allocation13_spill] sm:$0xff] %v7275_v34  ;;  %v2745_v43 = vmul.f32 %v7275_v34, %v7275_v34 }
 0x3dc   :  { %v2799_v20 = vsel %vm92_vm0, %v2745_v43, 0.0 }
 0x3e2   :  { %5016 = vmatmul.msk.bf16.gmra.mxu3 %vm1171_vm9, %v6821_v33  ;;  %v7280_v33 = vld [vmem:[%s10754_s1 + $0x190] sm:$0xff] }
 0x3e3   :  { %2620 = vadd.xlane.f32.xlu2 %v2619_v40  ;;  %v2628_v61 = vsel %vm92_vm0, %v7280_v33, 0.0 }
 0x3e8   :  { %2623 = vadd.xlane.f32.xlu0 %v2622_v14 }
 0x3eb   :  { %2797 = vadd.xlane.f32.xlu2 %v2796_v63  ;;  %v2631_v63 = vsel %vm92_vm0, %v7294_v18, 0.0 }
 0x3ec   :  { %v7282_v40 = vpop.xlane.xlu0 %2785 }
 0x3f0   :  { %2629 = vadd.xlane.f32.xlu0 %v2628_v61  ;;  %v7302_v61 = vld [vmem:[%s10754_s1 + $0x188] sm:$0xff] }
 0x3f2   :  { %5017 = vmatmul.msk.bf16.gmra.mxu3 %vm1171_vm9, %v6832_v4  ;;  %v2625_v4 = vsel %vm92_vm0, %v7302_v61, 0.0 }
 0x3f3   :  { %2800 = vadd.xlane.f32.xlu2 %v2799_v20 }
 0x3f4   :  { %v2612_v35 = vpop.xlane.xlu0 %2611 }
 0x3f5   :  { %v2682_v14 = vmul.f32 %v2612_v35, %v5839_v22  ;;  %v7312_v46 = vpop.xlane.xlu2 %2788 }
 0x3f7   :  { %v7305_v43 = vsub.f32 %v7156_v26, %v2682_v14 }
 0x3f8   :  { %2632 = vadd.xlane.f32.xlu0 %v2631_v63 }
 0x3f9   :  { %10890 = vst [vmem:[#allocation14_spill] sm:$0xff] %v7305_v43  ;;  %v2746_v20 = vmul.f32 %v7305_v43, %v7305_v43 }
 0x3fb   :  { %2626 = vadd.xlane.f32.xlu2 %v2625_v4  ;;  %v2802_v35 = vsel %vm92_vm0, %v2746_v20, 0.0 }
 0x3fc   :  { %2803 = vadd.xlane.f32.xlu1 %v2802_v35 }
 0x3ff   :  { %v2618_v43 = vpop.xlane.xlu1 %2617 }
 0x402   :  { %5018 = vmatmul.msk.bf16.gmra.mxu3 %vm1171_vm9, %v6893_v38 }
 0x405   :  { %v7316_v34 = vpop.xlane.xlu2 %2791 }
 0x40c   :  { %1828 = vrot.lane.b32.xlu0 %v6959_v42, %s5756_s11 }
 0x40d   :  { %v1843_v26 = vpop.permute.xlu2 %1842  ;;  %v7326_v63 = vpop.xlane.xlu0 %2794 }
 0x412   :  { %5019 = vmatmul.msk.bf16.gmra.mxu3 %vm1171_vm9, %v6905_v9 }
 0x413   :  { %1832 = vrot.lane.b32.xlu2 %v6939_v23, %s5756_s11 }
 0x415   :  { %v1849_v14 = vpop.permute.xlu2 %1848  ;;  %1830 = vrot.lane.b32.xlu1 %v6949_v19, %s5756_s11 }
 0x416   :  { %v1920_v25 = vsel %vm1171_vm9, %v1849_v14, 0 }
 0x41d   :  { %v1853_v4 = vpop.permute.xlu2 %1852 }
 0x41e   :  { %v1926_v38 = vsel %vm1171_vm9, %v1853_v4, 0  ;;  %v7337_v4 = vsub.f32 %v7040_v13, %v2683_v36 }
 0x41f   :  { %1986 = vmatpush.bf16.xpose.msrb.mxu1 %v1926_v38  ;;  %v1837_v38 = vpop.permute.xlu1 %1836 }
 0x420   :  { %v1845_v20 = vpop.permute.xlu0 %1844  ;;  %v1902_v24 = vsel %vm1171_vm9, %v1837_v38, 0  ;;  %v7364_v38 = vld [vmem:[%s10754_s1 + $0x1b0] sm:$0xff] }
 0x422   :  { %5020 = vmatmul.msk.bf16.gmra.mxu3 %vm1171_vm9, %v6930_v31  ;;  %v2684_v31 = vmul.f32 %v2618_v43, %v5839_v22  ;;  %v1914_v43 = vsel %vm1171_vm9, %v1845_v20, 0  ;;  %v1911_v20 = vsel %vm1171_vm9, %v1843_v26, 0  ;;  %v5748_v26 = vld [vmem:[%s10757_s4] sm:$0xff] }
 0x428   :  { %v1851_v35 = vpop.permute.xlu0 %1850 }
 0x429   :  { %v1923_v9 = vsel %vm1171_vm9, %v1851_v35, 0  ;;  %v2747_v35 = vmul.f32 %v7337_v4, %v7337_v4 }
 0x42a   :  { %1987 = vmatpush.bf16.xpose.msrb.mxu1 %v1923_v9  ;;  %v7343_v9 = vsub.f32 %v7177_v17, %v2684_v31  ;;  %v2640_v31 = vsel %vm92_vm0, %v7364_v38, 0.0 }
 0x42b   :  { %v2805_v13 = vsel %vm92_vm0, %v2747_v35, 0.0  ;;  %v7371_v35 = vld [vmem:[%s10754_s1 + $0x1a8] sm:$0xff] }
 0x42c   :  { %10891 = vst [vmem:[#allocation15_spill] sm:$0xff] %v7343_v9  ;;  %v2748_v17 = vmul.f32 %v7343_v9, %v7343_v9 }
 0x42e   :  { %v2808_v14 = vsel %vm92_vm0, %v2748_v17, 0.0 }
 0x430   :  { %v1839_v42 = vpop.permute.xlu0 %1838 }
 0x431   :  { %v1905_v58 = vsel %vm1171_vm9, %v1839_v42, 0  ;;  %v1917_v42 = vsel %vm1171_vm9, %v7241_v10, 0 }
 0x432   :  { %1931 = vmatpush.bf16.xpose.msra.mxu3 %v1905_v58  ;;  %1988 = vmatpush.bf16.xpose.msrb.mxu1 %v1920_v25  ;;  %v7351_v58 = vld [vmem:[%s10754_s1 + $0x1a0] sm:$0xff]  ;;  %v1835_v25 = vpop.permute.xlu1 %1834 }
 0x433   :  { %v2634_v36 = vsel %vm92_vm0, %v7351_v58, 0.0  ;;  %v1899_v10 = vsel %vm1171_vm9, %v1835_v25, 0 }
 0x43a   :  { %1932 = vmatpush.bf16.xpose.msra.mxu3 %v1902_v24  ;;  %1989 = vmatpush.bf16.xpose.msrb.mxu1 %v1917_v42  ;;  %v2637_v24 = vsel %vm92_vm0, %v7371_v35, 0.0  ;;  %v1908_v42 = vsel %vm1171_vm9, %v7235_v32, 0 }
 0x43c   :  { %2806 = vadd.xlane.f32.xlu2 %v2805_v13  ;;  %v5747_v13 = vld [vmem:[%s10757_s4 + $0x8] sm:$0xff] }
 0x43f   :  { %2635 = vadd.xlane.f32.xlu1 %v2634_v36 }
 0x442   :  { %1933 = vmatpush.bf16.xpose.msra.mxu3 %v1899_v10  ;;  %1990 = vmatpush.bf16.xpose.msrb.mxu1 %v1914_v43 }
 0x444   :  { %2809 = vadd.xlane.f32.xlu2 %v2808_v14 }
 0x447   :  { %2641 = vadd.xlane.f32.xlu1 %v2640_v31 }
 0x44a   :  { %1991 = vmatpush.bf16.xpose.msrb.mxu1 %v1911_v20 }
 0x44c   :  { %2638 = vadd.xlane.f32.xlu2 %v2637_v24 }
 0x452   :  { %1992 = vmatpush.bf16.xpose.msrb.mxu1 %v1908_v42 }
 0x456   :  { %v2621_v36 = vpop.xlane.xlu2 %2620 }
 0x457   :  { %v2685_v17 = vmul.f32 %v2621_v36, %v5839_v22 }
 0x459   :  { %v7386_v25 = vsub.f32 %v7254_v21, %v2685_v17  ;;  %5030 = vmatmul.msk.bf16.vlgmr.msrb.gmra.mxu1 %vm1171_vm9, %v6986_v16 }
 0x45a   :  { %3502 = vmatpush.bf16.msra.mxu1 %v5747_v13 }
 0x45b   :  { %v2624_v32 = vpop.xlane.xlu0 %2623  ;;  %v2749_v10 = vmul.f32 %v7386_v25, %v7386_v25 }
 0x45c   :  { %v2686_v43 = vmul.f32 %v2624_v32, %v5839_v22 }
 0x45d   :  { %v2811_v14 = vsel %vm92_vm0, %v2749_v10, 0.0 }
 0x45e   :  { %3503 = vmatpush.bf16.msra.mxu1 %v5748_v26  ;;  %v7395_v31 = vsub.f32 %v7266_v57, %v2686_v43  ;;  %2812 = vadd.xlane.f32.xlu0 %v2811_v14  ;;  %v7397_v20 = vpop.xlane.xlu2 %2797  ;;  %v7415_v26 = vld [vmem:[%s10754_s1 + $0x1b8] sm:$0xff] }
 0x460   :  { %10892 = vst [vmem:[#allocation16_spill] sm:$0xff] %v7395_v31  ;;  %v2750_v21 = vmul.f32 %v7395_v31, %v7395_v31 }
 0x462   :  { %v2814_v42 = vsel %vm92_vm0, %v2750_v21, 0.0 }
 0x463   :  { %v2630_v24 = vpop.xlane.xlu0 %2629 }
 0x464   :  { %v2688_v13 = vmul.f32 %v2630_v24, %v5839_v22  ;;  %1826 = vrot.lane.b32.xlu2 %v6969_v52, %s5756_s11 }
 0x466   :  { %v7406_v36 = vsub.f32 %v7280_v33, %v2688_v13  ;;  %2815 = vadd.xlane.f32.xlu0 %v2814_v42  ;;  %v7408_v57 = vpop.xlane.xlu2 %2800  ;;  %v2643_v33 = vsel %vm92_vm0, %v7415_v26, 0.0 }
 0x468   :  { %10893 = vst [vmem:[#allocation17_spill] sm:$0xff] %v7406_v36  ;;  %v2752_v17 = vmul.f32 %v7406_v36, %v7406_v36 }
 0x469   :  { %5031 = vmatmul.msk.bf16.gmra.mxu1 %vm1171_vm9, %v6994_v12 }
 0x46a   :  { %v2820_v32 = vsel %vm92_vm0, %v2752_v17, 0.0 }
 0x46b   :  { %2821 = vadd.xlane.f32.xlu1 %v2820_v32  ;;  %v2633_v10 = vpop.xlane.xlu0 %2632  ;;  %v7435_v32 = vld [vmem:[%s10754_s1 + $0x1c8] sm:$0xff] }
 0x46c   :  { %1824 = vrot.lane.b32.xlu2 %v6980_v28, %s5756_s11  ;;  %v2689_v43 = vmul.f32 %v2633_v10, %v5839_v22  ;;  %10895 = vst [vmem:[#allocation19_spill] sm:$0xff] %v7435_v32 }
 0x46e   :  { %v7426_v14 = vsub.f32 %v7294_v18, %v2689_v43  ;;  %2644 = vadd.xlane.f32.xlu0 %v2643_v33  ;;  %v2627_v21 = vpop.xlane.xlu2 %2626  ;;  %v2649_v18 = vsel %vm92_vm0, %v7435_v32, 0.0 }
 0x46f   :  { %v7441_v10 = vpop.xlane.xlu1 %2803  ;;  %v2687_v43 = vmul.f32 %v2627_v21, %v5839_v22 }
 0x470   :  { %10894 = vst [vmem:[#allocation18_spill] sm:$0xff] %v7426_v14  ;;  %v2753_v24 = vmul.f32 %v7426_v14, %v7426_v14  ;;  %v2865_v14 = vmul.f32 %v7219_v37, %v5839_v22 }
 0x472   :  { %v2823_v42 = vsel %vm92_vm0, %v2753_v24, 0.0  ;;  %v7513_v32 = vadd.f32 1e-05, %v2865_v14  ;;  %v7523_v14 = vld [vmem:[%s10754_s1 + $0x1d0] sm:$0xff] }
 0x474   :  { %vm2962_vm1 = vweird.f32 %v7513_v32 }
 0x476   :  { %2824 = vadd.xlane.f32.xlu0 %v2823_v42  ;;  %v1833_v13 = vpop.permute.xlu2 %1832  ;;  %v7448_v42 = vsub.f32 %v7302_v61, %v2687_v43 }
 0x477   :  { %v1896_v17 = vsel %vm1171_vm9, %v1833_v13, 0 }
 0x478   :  { %1934 = vmatpush.bf16.xpose.msra.mxu3 %v1896_v17  ;;  %10896 = vst [vmem:[#allocation20_spill] sm:$0xff] %v7448_v42 }
 0x479   :  { %5032 = vmatmul.msk.bf16.gmra.mxu1 %vm1171_vm9, %v6988_v59 }
 0x47e   :  { %2650 = vadd.xlane.f32.xlu0 %v2649_v18  ;;  %v1829_v13 = vpop.permute.xlu0 %1828  ;;  %v2751_v18 = vmul.f32 %v7448_v42, %v7448_v42 }
 0x47f   :  { %v1890_v17 = vsel %vm1171_vm9, %v1829_v13, 0  ;;  %v2863_v13 = vmul.f32 %v7239_v39, %v5839_v22 }
 0x480   :  { %v2817_v21 = vsel %vm92_vm0, %v2751_v18, 0.0  ;;  %v2862_v18 = vmul.f32 %v7133_v2, %v5839_v22  ;;  %v7493_v2 = vld [vmem:[%s10754_s1 + $0x1d8] sm:$0xff] }
 0x487   :  { %v1831_v33 = vpop.permute.xlu1 %1830 }
 0x488   :  { %v1893_v24 = vsel %vm1171_vm9, %v1831_v33, 0  ;;  %v7459_v33 = vld [vmem:[%s10754_s1 + $0x1c0] sm:$0xff] }
 0x489   :  { %5033 = vmatmul.msk.bf16.gmra.mxu1 %vm1171_vm9, %v6996_v30  ;;  %1935 = vmatpush.bf16.xpose.msra.mxu3 %v1893_v24  ;;  %v2646_v61 = vsel %vm92_vm0, %v7459_v33, 0.0 }
 0x48a   :  { %2647 = vadd.xlane.f32.xlu1 %v2646_v61  ;;  %v2895_v61 = vadd.f32 1e-05, %v2863_v13 }
 0x48c   :  { %5249 = vrsqrt.f32 %v2895_v61  ;;  %vm2942_vm10 = vweird.f32 %v2895_v61 }
 0x491   :  { %1936 = vmatpush.bf16.xpose.msra.mxu3 %v1890_v17 }
 0x492   :  { %1633 = vrot.lane.b32.xlu0 %v7129_v62, %s5757_s23  ;;  %v7485_v62 = vadd.f32 1e-05, %v2862_v18 }
 0x494   :  { %5251 = vrsqrt.f32 %v7485_v62  ;;  %vm2932_vm14 = vweird.f32 %v7485_v62 }
 0x495   :  { %2818 = vadd.xlane.f32.xlu2 %v2817_v21 }
 0x499   :  { %5034 = vmatmul.msk.bf16.gmra.mxu1 %vm1171_vm9, %v7004_v6 }
 0x49a   :  { %1631 = vrot.lane.b32.xlu0 %v7137_v3, %s5757_s23 }
 0x4a9   :  { %5035 = vmatmul.msk.bf16.gmra.mxu1 %vm1171_vm9, %v7033_v54 }
 0x4ad   :  { %1619 = vrot.lane.b32.xlu2 %v6895_v45, %s5757_s23 }
 0x4af   :  { %v7471_v43 = vpop.xlane.xlu2 %2806 }
 0x4b2   :  { %v2636_v24 = vpop.xlane.xlu1 %2635 }
 0x4b3   :  { %v2690_v17 = vmul.f32 %v2636_v24, %v5839_v22  ;;  %v2655_v24 = vsel %vm92_vm0, %v7493_v2, 0.0 }
 0x4b5   :  { %v7479_v21 = vsub.f32 %v7351_v58, %v2690_v17  ;;  %v5250_v17 = vpop.eup %5249 }
 0x4b6   :  { %vm2943_vm11 = vweird.f32 %v5250_v17 }
 0x4b7   :  { %10897 = vst [vmem:[#allocation21_spill] sm:$0xff] %v7479_v21  ;;  %v7481_v3 = vpop.xlane.xlu2 %2809  ;;  %v2754_v45 = vmul.f32 %v7479_v21, %v7479_v21  ;;  %v2937_v21 = vmul.f32 %v5250_v17, %v2895_v61  ;;  %vm7538_vm12 = vmor %vm2942_vm10, %vm2943_vm11 }
 0x4b9   :  { %5036 = vmatmul.msk.bf16.gmra.mxu1 %vm1171_vm9, %v7233_v11  ;;  %v2826_v39 = vsel %vm92_vm0, %v2754_v45, 0.0  ;;  %v5252_v45 = vpop.eup %5251 }
 0x4ba   :  { %2827 = vadd.xlane.f32.xlu1 %v2826_v39  ;;  %v2864_v39 = vmul.f32 %v7166_v47, %v5839_v22  ;;  %v2927_v31 = vmul.f32 %v5252_v45, %v7485_v62  ;;  %vm2933_vm13 = vweird.f32 %v5252_v45 }
 0x4bb   :  { %vm2934_vm15 = vmor %vm2932_vm14, %vm2933_vm13 }
 0x4bc   :  { %v7510_v42 = vadd.f32 1e-05, %v2864_v39  ;;  %v2928_v47 = vmul.f32 %v5252_v45, %v2927_v31  ;;  %v5749_v31 = vld [vmem:[%s10758_s3 + $0x8] sm:$0xff] }
 0x4be   :  { %5253 = vrsqrt.f32 %v7510_v42  ;;  %vm2952_vm5 = vweird.f32 %v7510_v42 }
 0x4bf   :  { %v2639_v58 = vpop.xlane.xlu2 %2638  ;;  %5255 = vrsqrt.f32 %v7513_v32 }
 0x4c0   :  { %v2691_v13 = vmul.f32 %v2639_v58, %v5839_v22 }
 0x4c2   :  { %v7500_v18 = vsub.f32 %v7371_v35, %v2691_v13  ;;  %2656 = vadd.xlane.f32.xlu1 %v2655_v24  ;;  %v2938_v24 = vmul.f32 %v5250_v17, %v2937_v21 }
 0x4c4   :  { %10898 = vst [vmem:[#allocation22_spill] sm:$0xff] %v7500_v18  ;;  %v2755_v36 = vmul.f32 %v7500_v18, %v7500_v18  ;;  %v2939_v37 = vmul.f32 0.5, %v2938_v24  ;;  %v7525_v21 = vpop.eup %5253 }
 0x4c5   :  { %v7530_v24 = vpop.eup %5255  ;;  %vm2953_vm3 = vweird.f32 %v7525_v21 }
 0x4c6   :  { %v2829_v58 = vsel %vm92_vm0, %v2755_v36, 0.0  ;;  %v2929_v36 = vmul.f32 0.5, %v2928_v47  ;;  %v2940_v18 = vsub.f32 1.5, %v2939_v37  ;;  %v2652_v47 = vsel %vm92_vm0, %v7523_v14, 0.0  ;;  %vm2954_vm6 = vmor %vm2952_vm5, %vm2953_vm3 }
 0x4c7   :  { %2830 = vadd.xlane.f32.xlu0 %v2829_v58  ;;  %v1827_v35 = vpop.permute.xlu2 %1826  ;;  %vm2963_vm2 = vweird.f32 %v7530_v24 }
 0x4c8   :  { %v1887_v13 = vsel %vm1171_vm9, %v1827_v35, 0  ;;  %v2930_v35 = vsub.f32 1.5, %v2929_v36  ;;  %v2941_v37 = vmul.f32 %v5250_v17, %v2940_v18  ;;  %v2866_v36 = vmul.f32 %v7243_v1, %v5839_v22  ;;  %v5750_v18 = vld [vmem:[%s10758_s3] sm:$0xff]  ;;  %vm7607_vm4 = vmor %vm2962_vm1, %vm2963_vm2 }
 0x4c9   :  { %1937 = vmatpush.bf16.xpose.msra.mxu3 %v1887_v13  ;;  %5037 = vmatmul.msk.bf16.gmra.mxu1 %vm1171_vm9, %v7205_v48  ;;  %v2867_v13 = vmul.f32 %v7248_v60, %v5839_v22 }
 0x4ca   :  { %v2945_v1 = vsel %vm7538_vm12, %v5250_v17, %v2941_v37 }
 0x4cb   :  { %v7551_v9 = vadd.f32 1e-05, %v2867_v13 }
 0x4cd   :  { %5257 = vrsqrt.f32 %v7551_v9  ;;  %vm2982_vm7 = vweird.f32 %v7551_v9 }
 0x4cf   :  { %v1825_v39 = vpop.permute.xlu2 %1824 }
 0x4d0   :  { %v1884_v58 = vsel %vm1171_vm9, %v1825_v39, 0  ;;  %v2947_v39 = vmul.f32 %v7525_v21, %v7510_v42 }
 0x4d1   :  { %1938 = vmatpush.bf16.xpose.msra.mxu3 %v1884_v58  ;;  %v2931_v58 = vmul.f32 %v5252_v45, %v2930_v35 }
 0x4d2   :  { %v2948_v35 = vmul.f32 %v7525_v21, %v2947_v39 }
 0x4d3   :  { %v7580_v61 = vpop.eup %5257 }
 0x4d4   :  { %vm2983_vm8 = vweird.f32 %v7580_v61 }
 0x4d5   :  { %vm7659_vm12 = vmor %vm2982_vm7, %vm2983_vm8 }
 0x4d6   :  { %v7546_v60 = vpop.f32.mrf.mxu1  ;;  %2653 = vadd.xlane.f32.xlu2 %v2652_v47  ;;  %v2935_v47 = vsel %vm2934_vm15, %v5252_v45, %v2931_v58  ;;  %v7583_v58 = vpop.xlane.xlu0 %2812 }
 0x4d7   :  { %10901 = vst [vmem:[#allocation23_spill] sm:$0xff] %v7546_v60  ;;  %v7559_v60 = vadd.f32 1e-05, %v2866_v36  ;;  %v3246_v62 = vmul.f32 %v2935_v47, %v7002_v44  ;;  %v2869_v47 = vmul.f32 %v7312_v46, %v5839_v22 }
 0x4d8   :  { %5021 = vmatmul.msk.bf16.vlgmr.msra.gmra.mxu3 %vm1171_vm9, %v6986_v16  ;;  %v2949_v16 = vmul.f32 0.5, %v2948_v35 }
 0x4d9   :  { %3384 = vmatpush.bf16.msrb.mxu3 %v5749_v31  ;;  %v2957_v31 = vmul.f32 %v7530_v24, %v7513_v32  ;;  %5038 = vmatmul.msk.bf16.gmra.mxu1 %vm1171_vm9, %v7211_v50  ;;  %5259 = vrsqrt.f32 %v7559_v60  ;;  %v2868_v32 = vmul.f32 %v7282_v40, %v5839_v22  ;;  %vm2972_vm10 = vweird.f32 %v7559_v60 }
 0x4da   :  { %v2950_v39 = vsub.f32 1.5, %v2949_v16 }
 0x4db   :  { %v2958_v13 = vmul.f32 %v7530_v24, %v2957_v31  ;;  %1617 = vrot.lane.b32.xlu0 %v6907_v7, %s5757_s23  ;;  %1629 = vrot.lane.b32.xlu1 %v7145_v27, %s5757_s23 }
 0x4dd   :  { %3385 = vmatpush.bf16.msrb.mxu3 %v5750_v18  ;;  %v3247_v18 = vmul.f32 %v2945_v1, %v7011_v55  ;;  %v2959_v17 = vmul.f32 0.5, %v2958_v13  ;;  %v7577_v55 = vld [vmem:[%s10755_s5] ss:$0 sm:$0xff]  ;;  %v2951_v13 = vmul.f32 %v7525_v21, %v2950_v39 }
 0x4de   :  { %v7572_v37 = vpop.f32.mrf.mxu1  ;;  %v3278_v36 = vmul.f32 %v7577_v55, %v3246_v62  ;;  %v7590_v1 = vld [vmem:[%s10756_s6] ss:$0 sm:$0xff] }
 0x4df   :  { %10902 = vst [vmem:[#allocation24_spill] sm:$0xff] %v7572_v37  ;;  %v3279_v45 = vmul.f32 %v7577_v55, %v3247_v18  ;;  %v2960_v44 = vsub.f32 1.5, %v2959_v17  ;;  %v7585_v31 = vpop.eup %5259  ;;  %v2977_v18 = vmul.f32 %v7580_v61, %v7551_v9  ;;  %v7616_v37 = vadd.f32 1e-05, %v2869_v47 }
 0x4e0   :  { %v3310_v16 = vadd.f32 %v7590_v1, %v3278_v36  ;;  %v2967_v46 = vmul.f32 %v7585_v31, %v7559_v60  ;;  %v2955_v36 = vsel %vm2954_vm6, %v7525_v21, %v2951_v13  ;;  %v7633_v21 = vpop.xlane.xlu0 %2815  ;;  %vm2973_vm11 = vweird.f32 %v7585_v31 }
 0x4e1   :  { %v3311_v35 = vadd.f32 %v7590_v1, %v3279_v45  ;;  %v2961_v62 = vmul.f32 %v7530_v24, %v2960_v44  ;;  %v2978_v40 = vmul.f32 %v7580_v61, %v2977_v18  ;;  %v7622_v44 = vadd.f32 1e-05, %v2868_v32  ;;  %vm2974_vm13 = vmor %vm2972_vm10, %vm2973_vm11 }
 0x4e2   :  { %v3248_v47 = vmul.f32 %v2955_v36, %v7061_v0  ;;  %5261 = vrsqrt.f32 %v7616_v37  ;;  %vm3002_vm1 = vweird.f32 %v7616_v37 }
 0x4e3   :  { %1627 = vrot.lane.b32.xlu0 %v7097_v51, %s5757_s23  ;;  %v3432_v39 = vpack.c.bf16 %v3311_v35, %v3310_v16  ;;  %v2965_v42 = vsel %vm7607_vm4, %v7530_v24, %v2961_v62  ;;  %v2968_v35 = vmul.f32 %v7585_v31, %v2967_v46  ;;  %v7629_v16 = vpop.f32.mrf.mxu3  ;;  %v2979_v13 = vmul.f32 0.5, %v2978_v40 }
 0x4e4   :  { %5263 = vrsqrt.f32 %v7622_v44  ;;  %v3280_v24 = vmul.f32 %v7577_v55, %v3248_v47  ;;  %vm2992_vm3 = vweird.f32 %v7622_v44 }
 0x4e5   :  { %v2969_v18 = vmul.f32 0.5, %v2968_v35  ;;  %v2980_v62 = vsub.f32 1.5, %v2979_v13 }
 0x4e6   :  { %v7614_v45 = vpop.f32.mrf.mxu1  ;;  %v3312_v36 = vadd.f32 %v7590_v1, %v3280_v24 }
 0x4e7   :  { %10905 = vst [vmem:[#allocation25_spill] sm:$0xff] %v7614_v45  ;;  %v2970_v46 = vsub.f32 1.5, %v2969_v18  ;;  %v2981_v40 = vmul.f32 %v7580_v61, %v2980_v62 }
 0x4e8   :  { %5022 = vmatmul.msk.bf16.gmra.mxu3 %vm1171_vm9, %v6994_v12  ;;  %v3249_v12 = vmul.f32 %v2965_v42, %v7024_v8  ;;  %v7642_v17 = vpop.eup %5261  ;;  %v2645_v47 = vpop.xlane.xlu0 %2644 }
 0x4e9   :  { %5098 = vmatmul.msk.bf16.vlgmr.msra.gmra.mxu1 %vm92_vm0, %v3432_v39  ;;  %v2871_v39 = vmul.f32 %v7326_v63, %v5839_v22  ;;  %v2997_v42 = vmul.f32 %v7642_v17, %v7616_v37  ;;  %v2870_v63 = vmul.f32 %v7316_v34, %v5839_v22  ;;  %v2971_v60 = vmul.f32 %v7585_v31, %v2970_v46  ;;  %v7740_v37 = vld [vmem:[%s10754_s1 + $0x1e8] sm:$0xff] }
 0x4ea   :  { %v3281_v0 = vmul.f32 %v7577_v55, %v3249_v12  ;;  %v7647_v8 = vpop.eup %5263  ;;  %v2693_v18 = vmul.f32 %v2645_v47, %v5839_v22  ;;  %v2985_v34 = vsel %vm7659_vm12, %v7580_v61, %v2981_v40  ;;  %vm3003_vm14 = vweird.f32 %v7642_v17 }
 0x4eb   :  { %v7657_v35 = vpop.f32.mrf.mxu3  ;;  %v2987_v12 = vmul.f32 %v7647_v8, %v7622_v44  ;;  %v7672_v24 = vadd.f32 1e-05, %v2871_v39  ;;  %v7682_v46 = vadd.f32 1e-05, %v2870_v63  ;;  %v2975_v47 = vsel %vm2974_vm13, %v7585_v31, %v2971_v60  ;;  %vm7726_vm2 = vmor %vm3002_vm1, %vm3003_vm14 }
 0x4ec   :  { %v3313_v13 = vadd.f32 %v7590_v1, %v3281_v0  ;;  %v2998_v0 = vmul.f32 %v7642_v17, %v2997_v42  ;;  %v3251_v61 = vmul.f32 %v2985_v34, %v7086_v15  ;;  %v3250_v42 = vmul.f32 %v2975_v47, %v7043_v41 }
 0x4ed   :  { %v2988_v39 = vmul.f32 %v7647_v8, %v2987_v12  ;;  %5265 = vrsqrt.f32 %v7672_v24  ;;  %vm2993_vm15 = vweird.f32 %v7647_v8  ;;  %vm3022_vm5 = vweird.f32 %v7672_v24 }
 0x4ee   :  { %v7637_v32 = vpop.f32.mrf.mxu1  ;;  %1615 = vrot.lane.b32.xlu2 %v6924_v5, %s5757_s23  ;;  %v3433_v62 = vpack.c.bf16 %v3313_v13, %v3312_v36  ;;  %v7688_v36 = vsub.f32 %v7415_v26, %v2693_v18  ;;  %v2999_v40 = vmul.f32 0.5, %v2998_v0  ;;  %5267 = vrsqrt.f32 %v7682_v46  ;;  %vm2994_vm4 = vmor %vm2992_vm3, %vm2993_vm15 }
 0x4ef   :  { %10906 = vst [vmem:[#allocation26_spill] sm:$0xff] %v7637_v32  ;;  %v3283_v26 = vmul.f32 %v7577_v55, %v3251_v61  ;;  %v3282_v13 = vmul.f32 %v7577_v55, %v3250_v42  ;;  %vm3012_vm10 = vweird.f32 %v7682_v46 }
 0x4f0   :  { %v2757_v31 = vmul.f32 %v7688_v36, %v7688_v36  ;;  %v3000_v63 = vsub.f32 1.5, %v2999_v40 }
 0x4f1   :  { %v3315_v34 = vadd.f32 %v7590_v1, %v3283_v26  ;;  %v3314_v61 = vadd.f32 %v7590_v1, %v3282_v13 }
 0x4f2   :  { %v2835_v12 = vsel %vm92_vm0, %v2757_v31, 0.0  ;;  %v3001_v0 = vmul.f32 %v7642_v17, %v3000_v63  ;;  %v7735_v31 = vld [vmem:[%s10754_s1 + $0x1e0] sm:$0xff] }
 0x4f3   :  { %v7694_v9 = vpop.f32.mrf.mxu3  ;;  %v7701_v15 = vpop.eup %5265 }
 0x4f4   :  { %v7707_v18 = vpop.eup %5267  ;;  %v3017_v47 = vmul.f32 %v7701_v15, %v7672_v24  ;;  %v3005_v26 = vsel %vm7726_vm2, %v7642_v17, %v3001_v0  ;;  %vm3023_vm6 = vweird.f32 %v7701_v15  ;;  %v2874_v24 = vmul.f32 %v7441_v10, %v5839_v22 }
 0x4f5   :  { %v3253_v0 = vmul.f32 %v3005_v26, %v7159_v53  ;;  %vm7788_vm7 = vmor %vm3022_vm5, %vm3023_vm6  ;;  %vm3013_vm8 = vweird.f32 %v7707_v18 }
 0x4f6   :  { %1613 = vrot.lane.b32.xlu2 %v6939_v23, %s5757_s23  ;;  %v7678_v32 = vpop.f32.mrf.mxu1  ;;  %v3018_v63 = vmul.f32 %v7701_v15, %v3017_v47  ;;  %vm3014_vm11 = vmor %vm3012_vm10, %vm3013_vm8 }
 0x4f7   :  { %10909 = vst [vmem:[#allocation27_spill] sm:$0xff] %v7678_v32 }
 0x4f8   :  { %5023 = vmatmul.msk.bf16.gmra.mxu3 %vm1171_vm9, %v6988_v59  ;;  %v2989_v59 = vmul.f32 0.5, %v2988_v39  ;;  %v2872_v39 = vmul.f32 %v7397_v20, %v5839_v22 }
 0x4f9   :  { %5099 = vmatmul.msk.bf16.gmra.mxu1 %vm92_vm0, %v3433_v62  ;;  %v2873_v62 = vmul.f32 %v7408_v57, %v5839_v22  ;;  %v3007_v57 = vmul.f32 %v7707_v18, %v7682_v46 }
 0x4fa   :  { %v2990_v60 = vsub.f32 1.5, %v2989_v59  ;;  %v3434_v59 = vpack.c.bf16 %v3315_v34, %v3314_v61  ;;  %v2661_v34 = vsel %vm92_vm0, %v7740_v37, 0.0  ;;  %v3285_v61 = vmul.f32 %v7577_v55, %v3253_v0 }
 0x4fb   :  { %v7730_v20 = vadd.f32 1e-05, %v2873_v62  ;;  %v7747_v13 = vpop.f32.mrf.mxu3  ;;  %v3008_v17 = vmul.f32 %v7707_v18, %v3007_v57  ;;  %v2658_v62 = vsel %vm92_vm0, %v7735_v31, 0.0 }
 0x4fc   :  { %v2991_v40 = vmul.f32 %v7647_v8, %v2990_v60 }
 0x4fd   :  { %5269 = vrsqrt.f32 %v7730_v20  ;;  %vm3042_vm14 = vweird.f32 %v7730_v20 }
 0x4fe   :  { %1625 = vrot.lane.b32.xlu2 %v7172_v49, %s5757_s23  ;;  %v7704_v41 = vpop.f32.mrf.mxu1  ;;  %v2995_v44 = vsel %vm2994_vm4, %v7647_v8, %v2991_v40  ;;  %v3009_v8 = vmul.f32 0.5, %v3008_v17 }
 0x4ff   :  { %10910 = vst [vmem:[#allocation28_spill] sm:$0xff] %v7704_v41 }
 0x503   :  { %v7773_v53 = vpop.eup %5269 }
 0x504   :  { %vm3043_vm12 = vweird.f32 %v7773_v53 }
 0x505   :  { %2836 = vadd.xlane.f32.xlu1 %v2835_v12  ;;  %v7755_v12 = vadd.f32 1e-05, %v2872_v39  ;;  %v3252_v39 = vmul.f32 %v2995_v44, %v7143_v29  ;;  %v7778_v29 = vpop.f32.mrf.mxu3  ;;  %v3317_v44 = vadd.f32 %v7590_v1, %v3285_v61  ;;  %vm7852_vm15 = vmor %vm3042_vm14, %vm3043_vm12 }
 0x506   :  { %1611 = vrot.lane.b32.xlu2 %v6949_v19, %s5757_s23  ;;  %v7766_v47 = vpop.f32.mrf.mxu1 }
 0x507   :  { %10913 = vst [vmem:[#allocation29_spill] sm:$0xff] %v7766_v47  ;;  %5271 = vrsqrt.f32 %v7755_v12  ;;  %v3284_v42 = vmul.f32 %v7577_v55, %v3252_v39  ;;  %vm3032_vm1 = vweird.f32 %v7755_v12 }
 0x508   :  { %v7749_v60 = vpop.xlane.xlu2 %2818  ;;  %5024 = vmatmul.msk.bf16.gmra.mxu3 %vm1171_vm9, %v6996_v30  ;;  %v3019_v30 = vmul.f32 0.5, %v3018_v63  ;;  %v2875_v63 = vmul.f32 %v7471_v43, %v5839_v22 }
 0x509   :  { %5100 = vmatmul.msk.bf16.gmra.mxu1 %vm92_vm0, %v3434_v59  ;;  %v3010_v59 = vsub.f32 1.5, %v3009_v8  ;;  %v3316_v0 = vadd.f32 %v7590_v1, %v3284_v42 }
 0x50a   :  { %v3020_v40 = vsub.f32 1.5, %v3019_v30  ;;  %v7801_v8 = vadd.f32 1e-05, %v2875_v63  ;;  %v10917_v63 = vld [vmem:[#allocation11_spill] sm:$0xff] }
 0x50b   :  { %v3011_v30 = vmul.f32 %v7707_v18, %v3010_v59  ;;  %v3435_v61 = vpack.c.bf16 %v3317_v44, %v3316_v0 }
 0x50c   :  { %v3021_v17 = vmul.f32 %v7701_v15, %v3020_v40  ;;  %5273 = vrsqrt.f32 %v7801_v8 }
 0x50d   :  { %2659 = vadd.xlane.f32.xlu0 %v2658_v62  ;;  %2662 = vadd.xlane.f32.xlu1 %v2661_v34  ;;  %v7780_v26 = vpop.eup %5271  ;;  %v3037_v62 = vmul.f32 %v7773_v53, %v7730_v20  ;;  %v3015_v42 = vsel %vm3014_vm11, %v7707_v18, %v3011_v30  ;;  %v7817_v44 = vpop.f32.mrf.mxu3 }
 0x50e   :  { %1623 = vrot.lane.b32.xlu2 %v7189_v56, %s5757_s23  ;;  %v3027_v43 = vmul.f32 %v7780_v26, %v7755_v12  ;;  %v7799_v39 = vpop.f32.mrf.mxu1  ;;  %v3025_v10 = vsel %vm7788_vm7, %v7701_v15, %v3021_v17  ;;  %v10918_v17 = vld [vmem:[#allocation10_spill] sm:$0xff]  ;;  %v7826_v30 = vpop.xlane.xlu0 %2824  ;;  %vm3033_vm13 = vweird.f32 %v7780_v26  ;;  %vm3062_vm7 = vweird.f32 %v7801_v8 }
 0x50f   :  { %10916 = vst [vmem:[#allocation30_spill] sm:$0xff] %v7799_v39  ;;  %v3038_v40 = vmul.f32 %v7773_v53, %v3037_v62  ;;  %v3255_v46 = vmul.f32 %v3025_v10, %v10917_v63  ;;  %v3254_v62 = vmul.f32 %v3015_v42, %v10918_v17  ;;  %v2876_v17 = vmul.f32 %v7481_v3, %v5839_v22  ;;  %vm3034_vm2 = vmor %vm3032_vm1, %vm3033_vm13 }
 0x510   :  { %v1620_v57 = vpop.permute.xlu2 %1619  ;;  %v3028_v59 = vmul.f32 %v7780_v26, %v3027_v43  ;;  %v10920_v43 = vld [vmem:[#allocation3_spill] sm:$0xff] }
 0x511   :  { %1653 = vmatpush.bf16.msrb.mxu0 %v1620_v57  ;;  %v7810_v57 = vadd.f32 1e-05, %v2874_v24  ;;  %v3039_v15 = vmul.f32 0.5, %v3038_v40  ;;  %v3287_v24 = vmul.f32 %v7577_v55, %v3255_v46  ;;  %v3286_v10 = vmul.f32 %v7577_v55, %v3254_v62 }
 0x512   :  { %v3029_v34 = vmul.f32 0.5, %v3028_v59  ;;  %v7824_v18 = vpop.eup %5273  ;;  %v2877_v59 = vmul.f32 %v7583_v58, %v5839_v22  ;;  %v7867_v41 = vadd.f32 1e-05, %v2876_v17  ;;  %v10926_v17 = vld [vmem:[#allocation12_spill] sm:$0xff] }
 0x513   :  { %5275 = vrsqrt.f32 %v7810_v57  ;;  %v3040_v0 = vsub.f32 1.5, %v3039_v15  ;;  %v3319_v63 = vadd.f32 %v7590_v1, %v3287_v24  ;;  %v3057_v15 = vmul.f32 %v7824_v18, %v7801_v8  ;;  %v10921_v24 = vld [vmem:[#allocation7_spill] sm:$0xff] }
 0x514   :  { %v3030_v40 = vsub.f32 1.5, %v3029_v34  ;;  %v3318_v62 = vadd.f32 %v7590_v1, %v3286_v10  ;;  %v7856_v3 = vadd.f32 1e-05, %v2877_v59  ;;  %vm3052_vm3 = vweird.f32 %v7810_v57 }
 0x515   :  { %v3041_v46 = vmul.f32 %v7773_v53, %v3040_v0  ;;  %v7843_v34 = vpop.f32.mrf.mxu3  ;;  %vm3063_vm5 = vweird.f32 %v7824_v18  ;;  %vm3072_vm14 = vweird.f32 %v7867_v41 }
 0x516   :  { %v3031_v39 = vmul.f32 %v7780_v26, %v3030_v40  ;;  %v3436_v47 = vpack.c.bf16 %v3319_v63, %v3318_v62  ;;  %v3058_v40 = vmul.f32 %v7824_v18, %v3057_v15  ;;  %5277 = vrsqrt.f32 %v7856_v3  ;;  %vm3064_vm8 = vmor %vm3062_vm7, %vm3063_vm5 }
 0x517   :  { %v3045_v20 = vsel %vm7852_vm15, %v7773_v53, %v3041_v46  ;;  %v10925_v46 = vld [vmem:[#allocation13_spill] sm:$0xff]  ;;  %5279 = vrsqrt.f32 %v7867_v41  ;;  %vm3082_vm12 = vweird.f32 %v7856_v3 }
 0x518   :  { %5025 = vmatmul.msk.bf16.gmra.mxu3 %vm1171_vm9, %v7004_v6  ;;  %v2642_v6 = vpop.xlane.xlu1 %2641  ;;  %v3035_v12 = vsel %vm3034_vm2, %v7780_v26, %v3031_v39  ;;  %v3059_v15 = vmul.f32 0.5, %v3058_v40  ;;  %v10927_v26 = vld [vmem:[#allocation6_spill] sm:$0xff] }
 0x519   :  { %5101 = vmatmul.msk.bf16.gmra.mxu1 %vm92_vm0, %v3435_v61  ;;  %v7822_v61 = vpop.f32.mrf.mxu1  ;;  %v7831_v42 = vpop.eup %5275  ;;  %v2692_v53 = vmul.f32 %v2642_v6, %v5839_v22  ;;  %v3256_v62 = vmul.f32 %v3035_v12, %v10926_v17 }
 0x51a   :  { %10919 = vst [vmem:[#allocation11_spill] sm:$0xff] %v7822_v61  ;;  %v3047_v58 = vmul.f32 %v7831_v42, %v7810_v57  ;;  %vm3053_vm4 = vweird.f32 %v7831_v42 }
 0x51b   :  { %v7884_v0 = vsub.f32 %v7364_v38, %v2692_v53  ;;  %v3288_v12 = vmul.f32 %v7577_v55, %v3256_v62  ;;  %vm7919_vm6 = vmor %vm3052_vm3, %vm3053_vm4 }
 0x51c   :  { %v3048_v59 = vmul.f32 %v7831_v42, %v3047_v58  ;;  %v7892_v40 = vpop.eup %5277 }
 0x51d   :  { %v7889_v58 = vpop.f32.mrf.mxu3  ;;  %v2756_v38 = vmul.f32 %v7884_v0, %v7884_v0  ;;  %v3077_v62 = vmul.f32 %v7892_v40, %v7856_v3  ;;  %vm3083_vm10 = vweird.f32 %v7892_v40 }
 0x51e   :  { %vm7987_vm13 = vmor %vm3082_vm12, %vm3083_vm10 }
 0x520   :  { %v7858_v10 = vpop.xlane.xlu1 %2821 }
 0x521   :  { %1609 = vrot.lane.b32.xlu0 %v10920_v43, %s5757_s23  ;;  %v7869_v43 = vpop.xlane.xlu0 %2650  ;;  %v7877_v63 = vpop.f32.mrf.mxu1 }
 0x522   :  { %10924 = vst [vmem:[#allocation10_spill] sm:$0xff] %v7877_v63  ;;  %v2878_v63 = vmul.f32 %v7633_v21, %v5839_v22 }
 0x526   :  { %1635 = vrot.lane.b32.xlu1 %v10921_v24, %s5757_s23 }
 0x528   :  { %5026 = vmatmul.msk.bf16.gmra.mxu3 %vm1171_vm9, %v7033_v54  ;;  %v3257_v54 = vmul.f32 %v3045_v20, %v10925_v46  ;;  %v2648_v39 = vpop.xlane.xlu1 %2647  ;;  %v3060_v20 = vsub.f32 1.5, %v3059_v15 }
 0x529   :  { %5102 = vmatmul.msk.bf16.gmra.mxu1 %vm92_vm0, %v3436_v47  ;;  %1607 = vrot.lane.b32.xlu0 %v6969_v52, %s5757_s23  ;;  %v3049_v47 = vmul.f32 0.5, %v3048_v59  ;;  %v2694_v46 = vmul.f32 %v2648_v39, %v5839_v22  ;;  %v7897_v59 = vpop.eup %5279  ;;  %v7901_v53 = vpop.permute.xlu0 %1633  ;;  %v3320_v52 = vadd.f32 %v7590_v1, %v3288_v12 }
 0x52a   :  { %v3289_v6 = vmul.f32 %v7577_v55, %v3257_v54  ;;  %v2879_v54 = vmul.f32 %v7749_v60, %v5839_v22  ;;  %v3061_v39 = vmul.f32 %v7824_v18, %v3060_v20  ;;  %v7913_v57 = vpop.f32.mrf.mxu1  ;;  %v3067_v20 = vmul.f32 %v7897_v59, %v7867_v41  ;;  %v8009_v41 = vld [vmem:[%s10754_s1 + $0x1f8] sm:$0xff] }
 0x52b   :  { %v3050_v17 = vsub.f32 1.5, %v3049_v47  ;;  %v7911_v47 = vsub.f32 %v7459_v33, %v2694_v46  ;;  %10928 = vst [vmem:[#allocation7_spill] sm:$0xff] %v7913_v57  ;;  %v2832_v33 = vsel %vm92_vm0, %v2756_v38, 0.0  ;;  %v7937_v57 = vadd.f32 1e-05, %v2878_v63  ;;  %v7940_v38 = vpop.f32.mrf.mxu3 }
 0x52c   :  { %v3321_v15 = vadd.f32 %v7590_v1, %v3289_v6  ;;  %v7929_v21 = vadd.f32 1e-05, %v2879_v54  ;;  %v3065_v12 = vsel %vm3064_vm8, %v7824_v18, %v3061_v39  ;;  %v3068_v18 = vmul.f32 %v7897_v59, %v3067_v20  ;;  %v10931_v39 = vld [vmem:[#allocation14_spill] sm:$0xff]  ;;  %v7963_v20 = vld [vmem:[%s10754_s1 + $0x1f0] sm:$0xff] }
 0x52d   :  { %v3051_v60 = vmul.f32 %v7831_v42, %v3050_v17  ;;  %v3078_v17 = vmul.f32 %v7892_v40, %v3077_v62  ;;  %v2758_v8 = vmul.f32 %v7911_v47, %v7911_v47  ;;  %v3259_v54 = vmul.f32 %v3065_v12, %v7337_v4 }
 0x52e   :  { %1621 = vrot.lane.b32.xlu1 %v10927_v26, %s5757_s23  ;;  %v3437_v46 = vpack.c.bf16 %v3321_v15, %v3320_v52  ;;  %5281 = vrsqrt.f32 %v7929_v21  ;;  %vm3073_vm11 = vweird.f32 %v7897_v59  ;;  %vm3092_vm1 = vweird.f32 %v7937_v57 }
 0x52f   :  { %v3055_v52 = vsel %vm7919_vm6, %v7831_v42, %v3051_v60  ;;  %v2838_v15 = vsel %vm92_vm0, %v2758_v8, 0.0  ;;  %5283 = vrsqrt.f32 %v7937_v57  ;;  %v3291_v42 = vmul.f32 %v7577_v55, %v3259_v54  ;;  %vm3074_vm15 = vmor %vm3072_vm14, %vm3073_vm11 }
 0x530   :  { %v3258_v63 = vmul.f32 %v3055_v52, %v10931_v39  ;;  %v7955_v6 = vpop.xlane.xlu1 %2827  ;;  %v2881_v52 = vmul.f32 %v7826_v30, %v5839_v22  ;;  %v2664_v39 = vsel %vm92_vm0, %v7963_v20, 0.0  ;;  %vm3102_vm5 = vweird.f32 %v7929_v21 }
 0x531   :  { %v7951_v62 = vpop.permute.xlu0 %1631 }
 0x532   :  { %v3290_v12 = vmul.f32 %v7577_v55, %v3258_v63  ;;  %v2880_v63 = vmul.f32 %v7858_v10, %v5839_v22 }
 0x534   :  { %v7958_v60 = vpop.eup %5281  ;;  %v3322_v30 = vadd.f32 %v7590_v1, %v3290_v12 }
 0x535   :  { %v7966_v8 = vpop.eup %5283  ;;  %vm3103_vm3 = vweird.f32 %v7958_v60 }
 0x536   :  { %1605 = vrot.lane.b32.xlu1 %v6980_v28, %s5757_s23  ;;  %v7991_v28 = vadd.f32 1e-05, %v2881_v52  ;;  %v8003_v52 = vadd.f32 1e-05, %v2880_v63  ;;  %v2667_v63 = vsel %vm92_vm0, %v8009_v41, 0.0  ;;  %vm3093_vm2 = vweird.f32 %v7966_v8  ;;  %vm3104_vm6 = vmor %vm3102_vm5, %vm3103_vm3 }
 0x537   :  { %2833 = vadd.xlane.f32.xlu2 %v2832_v33  ;;  %v3069_v33 = vmul.f32 0.5, %v3068_v18  ;;  %v3323_v18 = vadd.f32 %v7590_v1, %v3291_v42  ;;  %vm8058_vm4 = vmor %vm3092_vm1, %vm3093_vm2 }
 0x538   :  { %5027 = vmatmul.msk.bf16.gmra.mxu3 %vm1171_vm9, %v7233_v11  ;;  %v3079_v11 = vmul.f32 0.5, %v3078_v17  ;;  %v2657_v61 = vpop.xlane.xlu1 %2656  ;;  %5285 = vrsqrt.f32 %v7991_v28  ;;  %vm3122_vm7 = vweird.f32 %v7991_v28  ;;  %vm3112_vm10 = vweird.f32 %v8003_v52 }
 0x539   :  { %5103 = vmatmul.msk.bf16.gmra.mxu1 %vm92_vm0, %v3437_v46  ;;  %v7953_v46 = vpop.f32.mrf.mxu1  ;;  %v3070_v17 = vsub.f32 1.5, %v3069_v33  ;;  %v3438_v10 = vpack.c.bf16 %v3323_v18, %v3322_v30  ;;  %v2697_v45 = vmul.f32 %v2657_v61, %v5839_v22  ;;  %v10936_v30 = vld [vmem:[#allocation15_spill] sm:$0xff]  ;;  %5287 = vrsqrt.f32 %v8003_v52 }
 0x53a   :  { %10932 = vst [vmem:[#allocation13_spill] sm:$0xff] %v7953_v46  ;;  %v3080_v4 = vsub.f32 1.5, %v3079_v11  ;;  %v3097_v11 = vmul.f32 %v7958_v60, %v7929_v21  ;;  %v2831_v33 = vpop.xlane.xlu0 %2830 }
 0x53b   :  { %v3071_v42 = vmul.f32 %v7897_v59, %v3070_v17 }
 0x53c   :  { %v3081_v54 = vmul.f32 %v7892_v40, %v3080_v4  ;;  %v3087_v4 = vmul.f32 %v7966_v8, %v7937_v57  ;;  %v3098_v3 = vmul.f32 %v7958_v60, %v3097_v11  ;;  %v8017_v11 = vsub.f32 %v7493_v2, %v2697_v45 }
 0x53e   :  { %v3085_v12 = vsel %vm7987_vm13, %v7892_v40, %v3081_v54  ;;  %v3075_v40 = vsel %vm3074_vm15, %v7897_v59, %v3071_v42  ;;  %v3088_v46 = vmul.f32 %v7966_v8, %v3087_v4  ;;  %v2761_v45 = vmul.f32 %v8017_v11, %v8017_v11 }
 0x53f   :  { %2839 = vadd.xlane.f32.xlu2 %v2838_v15  ;;  %v7971_v15 = vpop.f32.mrf.mxu3  ;;  %v3261_v54 = vmul.f32 %v3085_v12, %v7386_v25  ;;  %v3260_v59 = vmul.f32 %v3075_v40, %v10936_v30  ;;  %v8033_v12 = vpop.eup %5285 }
 0x540   :  { %v3089_v25 = vmul.f32 0.5, %v3088_v46  ;;  %vm3123_vm8 = vweird.f32 %v8033_v12 }
 0x541   :  { %v7998_v17 = vpop.f32.mrf.mxu1  ;;  %v3293_v2 = vmul.f32 %v7577_v55, %v3261_v54  ;;  %v2695_v54 = vmul.f32 %v7869_v43, %v5839_v22  ;;  %vm8117_vm12 = vmor %vm3122_vm7, %vm3123_vm8 }
 0x542   :  { %10935 = vst [vmem:[#allocation12_spill] sm:$0xff] %v7998_v17  ;;  %v3090_v40 = vsub.f32 1.5, %v3089_v25  ;;  %v2847_v25 = vsel %vm92_vm0, %v2761_v45, 0.0 }
 0x543   :  { %v3325_v30 = vadd.f32 %v7590_v1, %v3293_v2 }
 0x544   :  { %v3091_v43 = vmul.f32 %v7966_v8, %v3090_v40 }
 0x547   :  { %2665 = vadd.xlane.f32.xlu2 %v2664_v39  ;;  %v8026_v4 = vpop.f32.mrf.mxu3 }
 0x548   :  { %5028 = vmatmul.msk.bf16.gmra.mxu3 %vm1171_vm9, %v7205_v48  ;;  %v3099_v48 = vmul.f32 0.5, %v3098_v3 }
 0x549   :  { %5104 = vmatmul.msk.bf16.gmra.mxu1 %vm92_vm0, %v3438_v10  ;;  %v2654_v18 = vpop.xlane.xlu2 %2653  ;;  %v8037_v46 = vpop.f32.mrf.mxu1 }
 0x54a   :  { %v2696_v61 = vmul.f32 %v2654_v18, %v5839_v22  ;;  %v3292_v18 = vmul.f32 %v7577_v55, %v3260_v59  ;;  %10937 = vst [vmem:[#allocation6_spill] sm:$0xff] %v8037_v46  ;;  %v3117_v59 = vmul.f32 %v8033_v12, %v7991_v28 }
 0x54c   :  { %v8020_v39 = vsub.f32 %v7523_v14, %v2696_v61  ;;  %v3100_v14 = vsub.f32 1.5, %v3099_v48  ;;  %v2883_v48 = vmul.f32 %v2831_v33, %v5839_v22  ;;  %v3118_v57 = vmul.f32 %v8033_v12, %v3117_v59 }
 0x54d   :  { %v1618_v42 = vpop.permute.xlu0 %1617 }
 0x54e   :  { %1654 = vmatpush.bf16.msrb.mxu0 %v1618_v42  ;;  %v2760_v10 = vmul.f32 %v8020_v39, %v8020_v39  ;;  %v3101_v42 = vmul.f32 %v7958_v60, %v3100_v14  ;;  %v10940_v14 = vld [vmem:[#allocation19_spill] sm:$0xff]  ;;  %v3119_v59 = vmul.f32 0.5, %v3118_v57 }
 0x54f   :  { %2668 = vadd.xlane.f32.xlu2 %v2667_v63  ;;  %v8040_v63 = vpop.eup %5287  ;;  %v8066_v45 = vsub.f32 %v10940_v14, %v2695_v54  ;;  %v8070_v40 = vpop.f32.mrf.mxu3  ;;  %v3095_v54 = vsel %vm8058_vm4, %v7966_v8, %v3091_v43 }
 0x550   :  { %v2844_v61 = vsel %vm92_vm0, %v2760_v10, 0.0  ;;  %v2882_v10 = vmul.f32 %v7955_v6, %v5839_v22  ;;  %v3107_v2 = vmul.f32 %v8040_v63, %v8003_v52  ;;  %v8068_v6 = vadd.f32 1e-05, %v2883_v48  ;;  %10941 = vst [vmem:[#allocation14_spill] sm:$0xff] %v8070_v40 }
 0x551   :  { %v1616_v3 = vpop.permute.xlu2 %1615  ;;  %vm3113_vm11 = vweird.f32 %v8040_v63 }
 0x552   :  { %1655 = vmatpush.bf16.msrb.mxu0 %v1616_v3  ;;  %v3324_v3 = vadd.f32 %v7590_v1, %v3292_v18  ;;  %v8076_v17 = vadd.f32 1e-05, %v2882_v10  ;;  %v3108_v48 = vmul.f32 %v8040_v63, %v3107_v2  ;;  %5289 = vrsqrt.f32 %v8068_v6  ;;  %v10944_v10 = vld [vmem:[#allocation16_spill] sm:$0xff]  ;;  %vm3114_vm13 = vmor %vm3112_vm10, %vm3113_vm11 }
 0x553   :  { %2845 = vadd.xlane.f32.xlu0 %v2844_v61  ;;  %v3105_v61 = vsel %vm3104_vm6, %v7958_v60, %v3101_v42  ;;  %v2759_v60 = vmul.f32 %v8066_v45, %v8066_v45  ;;  %v8090_v42 = vpop.f32.mrf.mxu1  ;;  %vm3142_vm3 = vweird.f32 %v8068_v6 }
 0x554   :  { %v3439_v18 = vpack.c.bf16 %v3325_v30, %v3324_v3  ;;  %v10942_v30 = vld [vmem:[#allocation20_spill] sm:$0xff]  ;;  %10943 = vst [vmem:[#allocation15_spill] sm:$0xff] %v8090_v42  ;;  %v3262_v3 = vmul.f32 %v3095_v54, %v10944_v10  ;;  %5291 = vrsqrt.f32 %v8076_v17  ;;  %v3109_v43 = vmul.f32 0.5, %v3108_v48 }
 0x555   :  { %v2841_v2 = vsel %vm92_vm0, %v2759_v60, 0.0  ;;  %vm3132_vm14 = vweird.f32 %v8076_v17 }
 0x556   :  { %v3110_v10 = vsub.f32 1.5, %v3109_v43 }
 0x557   :  { %2848 = vadd.xlane.f32.xlu2 %v2847_v25  ;;  %v3263_v25 = vmul.f32 %v3105_v61, %v10942_v30  ;;  %v3120_v61 = vsub.f32 1.5, %v3119_v59  ;;  %v3294_v30 = vmul.f32 %v7577_v55, %v3262_v3  ;;  %v8136_v59 = vpop.permute.xlu1 %1629 }
 0x558   :  { %5029 = vmatmul.msk.bf16.gmra.mxu3 %vm1171_vm9, %v7211_v50  ;;  %v40_v50 = vld [vmem:[%s10760_s2] sm:$0x3]  ;;  %v3111_v43 = vmul.f32 %v8040_v63, %v3110_v10  ;;  %s5758_s2 = smov 64  }
 0x559   :  { %5105 = vmatmul.msk.bf16.gmra.mxu1 %vm92_vm0, %v3439_v18  ;;  %v1614_v21 = vpop.permute.xlu2 %1613  ;;  %v8094_v8 = vperm.slane %v40_v50, 1  ;;  %v8096_v33 = vperm.slane %v40_v50, 0  ;;  %v3295_v14 = vmul.f32 %v7577_v55, %v3263_v25  ;;  %v1256_v18 = vpop.f32.mrf.mxu2  ;;  %v3121_v50 = vmul.f32 %v8033_v12, %v3120_v61  ;;  %v10952_v10 = vld [vmem:[#allocation18_spill] sm:$0xff] }
 0x55a   :  { %1656 = vmatpush.bf16.msrb.mxu0 %v1614_v21  ;;  %v5290_v21 = vpop.eup %5289  ;;  %v3326_v28 = vadd.f32 %v7590_v1, %v3294_v30  ;;  %v3115_v42 = vsel %vm3114_vm13, %v8040_v63, %v3111_v43 }
 0x55b   :  { %10945 = vst [vmem:[#allocation19_spill] sm:$0xff] %v8094_v8  ;;  %v8105_v54 = vadd.f32 %v7629_v16, %v8094_v8  ;;  %v5292_v48 = vpop.eup %5291  ;;  %v8110_v25 = vadd.f32 %v1256_v18, %v8096_v33  ;;  %v3327_v60 = vadd.f32 %v7590_v1, %v3295_v14  ;;  %v3137_v16 = vmul.f32 %v5290_v21, %v8068_v6  ;;  %v8126_v52 = vpop.f32.mrf.mxu1 }
 0x55c   :  { %10946 = vst [vmem:[#allocation20_spill] sm:$0xff] %v8096_v33  ;;  %v3125_v18 = vsel %vm8117_vm12, %v8033_v12, %v3121_v50  ;;  %vm3133_vm15 = vweird.f32 %v5292_v48  ;;  %vm3143_vm1 = vweird.f32 %v5290_v21 }
 0x55d   :  { %10947 = vst [vmem:[#allocation16_spill] sm:$0xff] %v8105_v54  ;;  %v1355_v3 = vmax.f32 %v8110_v25, %v8105_v54  ;;  %v3440_v14 = vpack.c.bf16 %v3327_v60, %v3326_v28  ;;  %v3138_v61 = vmul.f32 %v5290_v21, %v3137_v16  ;;  %v3265_v32 = vmul.f32 %v3125_v18, %v10952_v10  ;;  %v10953_v54 = vld [vmem:[#allocation17_spill] sm:$0xff]  ;;  %vm3134_vm2 = vmor %vm3132_vm14, %vm3133_vm15 }
 0x55e   :  { %10948 = vst [vmem:[#allocation31_spill] sm:$0xff] %v8110_v25  ;;  %vm3144_vm4 = vmor %vm3142_vm3, %vm3143_vm1 }
 0x55f   :  { %10951 = vst [vmem:[#allocation32_spill] sm:$0xff] %v8126_v52  ;;  %v3139_v40 = vmul.f32 0.5, %v3138_v61  ;;  %v3264_v52 = vmul.f32 %v3115_v42, %v10953_v54  ;;  %v3297_v60 = vmul.f32 %v7577_v55, %v3265_v32  ;;  %v1628_v54 = vpop.permute.xlu0 %1627 }
 0x560   :  { %2842 = vadd.xlane.f32.xlu1 %v2841_v2  ;;  %v3127_v2 = vmul.f32 %v5292_v48, %v8076_v17 }
 0x561   :  { %v8100_v57 = vpop.permute.xlu2 %1625  ;;  %v3140_v28 = vsub.f32 1.5, %v3139_v40  ;;  %v3296_v50 = vmul.f32 %v7577_v55, %v3264_v52  ;;  %v3329_v63 = vadd.f32 %v7590_v1, %v3297_v60 }
 0x562   :  { %v3128_v46 = vmul.f32 %v5292_v48, %v3127_v2  ;;  %v10956_v2 = vld [vmem:[#allocation22_spill] sm:$0xff] }
 0x563   :  { %v8138_v12 = vpop.f32.mrf.mxu1  ;;  %v3328_v42 = vadd.f32 %v7590_v1, %v3296_v50 }
 0x564   :  { %v3129_v25 = vmul.f32 0.5, %v3128_v46  ;;  %10954 = vst [vmem:[#allocation18_spill] sm:$0xff] %v8138_v12 }
 0x565   :  { %v3441_v32 = vpack.c.bf16 %v3329_v63, %v3328_v42 }
 0x566   :  { %v3130_v16 = vsub.f32 1.5, %v3129_v25 }
 0x568   :  { %1356 = vmax.xlane.f32.xlu1 %v1355_v3  ;;  %v3141_v3 = vmul.f32 %v5290_v21, %v3140_v28  ;;  %v3131_v46 = vmul.f32 %v5292_v48, %v3130_v16 }
 0x569   :  { %5106 = vmatmul.msk.bf16.gmra.mxu1 %vm92_vm0, %v3440_v14  ;;  %v1612_v30 = vpop.permute.xlu2 %1611  ;;  %v10957_v14 = vld [vmem:[#allocation21_spill] sm:$0xff] }
 0x56a   :  { %1657 = vmatpush.bf16.msrb.mxu0 %v1612_v30  ;;  %v3145_v40 = vsel %vm3144_vm4, %v5290_v21, %v3141_v3  ;;  %v3135_v25 = vsel %vm3134_vm2, %v5292_v48, %v3131_v46  ;;  %v8168_v46 = vpop.f32.mrf.mxu2 }
 0x56b   :  { %v8146_v17 = vpop.f32.mrf.mxu1  ;;  %v3267_v52 = vmul.f32 %v3145_v40, %v10956_v2  ;;  %v3266_v18 = vmul.f32 %v3135_v25, %v10957_v14 }
 0x56c   :  { %10955 = vst [vmem:[#allocation17_spill] sm:$0xff] %v8146_v17 }
 0x56d   :  { %v3299_v61 = vmul.f32 %v7577_v55, %v3267_v52  ;;  %v3298_v21 = vmul.f32 %v7577_v55, %v3266_v18 }
 0x56f   :  { %v3331_v50 = vadd.f32 %v7590_v1, %v3299_v61  ;;  %v3330_v3 = vadd.f32 %v7590_v1, %v3298_v21 }
 0x572   :  { %v8175_v40 = vpop.f32.mrf.mxu2 }
 0x573   :  { %v8161_v16 = vpop.f32.mrf.mxu1 }
 0x574   :  { %10958 = vst [vmem:[#allocation22_spill] sm:$0xff] %v8161_v16 }
 0x578   :  { %v2837_v43 = vpop.xlane.xlu1 %2836 }
 0x579   :  { %5107 = vmatmul.msk.bf16.gmra.mxu1 %vm92_vm0, %v3441_v32  ;;  %v2885_v1 = vmul.f32 %v2837_v43, %v5839_v22  ;;  %v1624_v43 = vpop.permute.xlu2 %1623 }
 0x57a   :  { %v8180_v18 = vpop.f32.mrf.mxu2 }
 0x57b   :  { %v8173_v32 = vpop.f32.mrf.mxu1  ;;  %v2917_v14 = vadd.f32 1e-05, %v2885_v1 }
 0x57c   :  { %10959 = vst [vmem:[#allocation21_spill] sm:$0xff] %v8173_v32 }
 0x57d   :  { %5293 = vrsqrt.f32 %v2917_v14  ;;  %vm3162_vm5 = vweird.f32 %v2917_v14 }
 0x580   :  { %v2660_v30 = vpop.xlane.xlu0 %2659  ;;  %v2663_v10 = vpop.xlane.xlu1 %2662 }
 0x581   :  { %v2698_v6 = vmul.f32 %v2660_v30, %v5839_v22  ;;  %v2699_v60 = vmul.f32 %v2663_v10, %v5839_v22 }
 0x583   :  { %v8155_v28 = vsub.f32 %v7735_v31, %v2698_v6  ;;  %v8158_v48 = vsub.f32 %v7740_v37, %v2699_v60  ;;  %v3442_v31 = vpack.c.bf16 %v3331_v50, %v3330_v3  ;;  %v8178_v2 = vpop.f32.mrf.mxu1  ;;  %v5294_v6 = vpop.eup %5293 }
 0x584   :  { %10960 = vst [vmem:[#allocation33_spill] sm:$0xff] %v8178_v2  ;;  %v8188_v60 = vpop.f32.mrf.mxu2  ;;  %v3157_v21 = vmul.f32 %v5294_v6, %v2917_v14  ;;  %vm3163_vm6 = vweird.f32 %v5294_v6 }
 0x585   :  { %v2762_v63 = vmul.f32 %v8155_v28, %v8155_v28  ;;  %v2763_v42 = vmul.f32 %v8158_v48, %v8158_v48  ;;  %vm3164_vm7 = vmor %vm3162_vm5, %vm3163_vm6 }
 0x587   :  { %v2850_v55 = vsel %vm92_vm0, %v2762_v63, 0.0  ;;  %v2853_v37 = vsel %vm92_vm0, %v2763_v42, 0.0 }
 0x588   :  { %2851 = vadd.xlane.f32.xlu2 %v2850_v55  ;;  %2854 = vadd.xlane.f32.xlu0 %v2853_v37  ;;  %v8197_v37 = vpop.f32.mrf.mxu3 }
 0x589   :  { %5108 = vmatmul.msk.bf16.gmra.mxu1 %vm92_vm0, %v3442_v31 }
 0x58b   :  { %v8186_v10 = vpop.f32.mrf.mxu1 }
 0x58c   :  { %10961 = vst [vmem:[#allocation34_spill] sm:$0xff] %v8186_v10 }
 0x593   :  { %v1610_v25 = vpop.permute.xlu0 %1609 }
 0x594   :  { %1658 = vmatpush.bf16.msrb.mxu0 %v1610_v25 }
 0x598   :  { %v1636_v52 = vpop.permute.xlu1 %1635 }
 0x599   :  { %1707 = vmatpush.bf16.msra.mxu2 %v1636_v52 }
 0x59b   :  { %v1608_v61 = vpop.permute.xlu0 %1607 }
 0x59c   :  { %1659 = vmatpush.bf16.msrb.mxu0 %v1608_v61 }
 0x59d   :  { %1708 = vmatpush.bf16.msra.mxu2 %v7901_v53  ;;  %v3158_v53 = vmul.f32 %v5294_v6, %v3157_v21 }
 0x59f   :  { %v3159_v55 = vmul.f32 0.5, %v3158_v53 }
 0x5a0   :  { %2303 = vrot.lane.b32.xlu2 %v10921_v24, %s5758_s2  ;;  %v1622_v30 = vpop.permute.xlu1 %1621  ;;  %v8192_v24 = vpop.f32.mrf.mxu1 }
 0x5a1   :  { %1709 = vmatpush.bf16.msra.mxu2 %v7951_v62  ;;  %10962 = vst [vmem:[#allocation35_spill] sm:$0xff] %v8192_v24  ;;  %v8195_v62 = vpop.f32.mrf.mxu2  ;;  %v3160_v31 = vsub.f32 1.5, %v3159_v55 }
 0x5a3   :  { %v3161_v25 = vmul.f32 %v5294_v6, %v3160_v31 }
 0x5a5   :  { %1710 = vmatpush.bf16.msra.mxu2 %v8136_v59  ;;  %v3165_v21 = vsel %vm3164_vm7, %v5294_v6, %v3161_v25 }
 0x5a6   :  { %v3269_v14 = vmul.f32 %v3165_v21, %v7688_v36 }
 0x5a8   :  { %v1606_v50 = vpop.permute.xlu1 %1605  ;;  %v8199_v1 = vpop.f32.mrf.mxu1 }
 0x5a9   :  { %1660 = vmatpush.bf16.msrb.mxu0 %v1606_v50  ;;  %1711 = vmatpush.bf16.msra.mxu2 %v1628_v54  ;;  %10963 = vst [vmem:[#allocation36_spill] sm:$0xff] %v8199_v1  ;;  %v8201_v61 = vpop.f32.mrf.mxu2 }
 0x5aa   :  { %v2834_v63 = vpop.xlane.xlu2 %2833 }
 0x5ab   :  { %v2884_v3 = vmul.f32 %v2834_v63, %v5839_v22 }
 0x5ad   :  { %v2916_v42 = vadd.f32 1e-05, %v2884_v3  ;;  %1712 = vmatpush.bf16.msra.mxu2 %v8100_v57 }
 0x5af   :  { %5295 = vrsqrt.f32 %v2916_v42  ;;  %vm3152_vm10 = vweird.f32 %v2916_v42 }
 0x5b0   :  { %v8213_v25 = vpop.f32.mrf.mxu1 }
 0x5b1   :  { %1713 = vmatpush.bf16.msra.mxu2 %v1624_v43  ;;  %10966 = vst [vmem:[#allocation39_spill] sm:$0xff] %v8213_v25  ;;  %v1273_v21 = vpop.f32.mrf.mxu2 }
 0x5b2   :  { %v2840_v59 = vpop.xlane.xlu2 %2839 }
 0x5b3   :  { %v2886_v31 = vmul.f32 %v2840_v59, %v5839_v22 }
 0x5b5   :  { %v5296_v54 = vpop.eup %5295  ;;  %1714 = vmatpush.bf16.msra.mxu2 %v1622_v30  ;;  %v8208_v30 = vpop.f32.mrf.mxu3 }
 0x5b6   :  { %v3147_v52 = vmul.f32 %v5296_v54, %v2916_v42  ;;  %vm3153_vm8 = vweird.f32 %v5296_v54  ;;  %10965 = vst [vmem:[#allocation38_spill] sm:$0xff] %v8208_v30 }
 0x5b7   :  { %vm3154_vm11 = vmor %vm3152_vm10, %vm3153_vm8 }
 0x5b8   :  { %v3148_v57 = vmul.f32 %v5296_v54, %v3147_v52 }
 0x5ba   :  { %v3149_v50 = vmul.f32 0.5, %v3148_v57  ;;  %v2666_v53 = vpop.xlane.xlu2 %2665 }
 0x5bb   :  { %v2700_v43 = vmul.f32 %v2666_v53, %v5839_v22  ;;  %v8227_v53 = vadd.f32 1e-05, %v2886_v31 }
 0x5bc   :  { %v3150_v63 = vsub.f32 1.5, %v3149_v50  ;;  %v8225_v50 = vadd.f32 %v7694_v9, %v8094_v8 }
 0x5bd   :  { %v8206_v3 = vsub.f32 %v7963_v20, %v2700_v43  ;;  %v8220_v20 = vld [vmem:[%s10755_s5] ss:$0 sm:$0xff]  ;;  %v8233_v43 = vadd.f32 %v8175_v40, %v8096_v33  ;;  %5297 = vrsqrt.f32 %v8227_v53  ;;  %vm3172_vm13 = vweird.f32 %v8227_v53 }
 0x5be   :  { %v3151_v55 = vmul.f32 %v5296_v54, %v3150_v63  ;;  %v3301_v42 = vmul.f32 %v8220_v20, %v3269_v14  ;;  %v8241_v14 = vld [vmem:[%s10756_s6] ss:$0 sm:$0xff] }
 0x5bf   :  { %10964 = vst [vmem:[#allocation37_spill] sm:$0xff] %v8206_v3  ;;  %v2764_v6 = vmul.f32 %v8206_v3, %v8206_v3  ;;  %v1361_v31 = vmax.f32 %v8233_v43, %v8225_v50 }
 0x5c0   :  { %v3155_v52 = vsel %vm3154_vm11, %v5296_v54, %v3151_v55  ;;  %v3333_v55 = vadd.f32 %v8241_v14, %v3301_v42  ;;  %v8258_v42 = vadd.f32 %v7778_v29, %v8094_v8 }
 0x5c1   :  { %v3268_v57 = vmul.f32 %v3155_v52, %v7884_v0  ;;  %v2856_v36 = vsel %vm92_vm0, %v2764_v6, 0.0 }
 0x5c2   :  { %2857 = vadd.xlane.f32.xlu0 %v2856_v36  ;;  %v2669_v59 = vpop.xlane.xlu2 %2668 }
 0x5c3   :  { %v2701_v0 = vmul.f32 %v2669_v59, %v5839_v22  ;;  %v3300_v54 = vmul.f32 %v8220_v20, %v3268_v57  ;;  %v8254_v57 = vpop.f32.mrf.mxu1  ;;  %v1276_v59 = vpop.f32.mrf.mxu2 }
 0x5c4   :  { %10969 = vst [vmem:[#allocation42_spill] sm:$0xff] %v8254_v57 }
 0x5c5   :  { %v8236_v63 = vsub.f32 %v8009_v41, %v2701_v0  ;;  %v3332_v9 = vadd.f32 %v8241_v14, %v3300_v54  ;;  %v8250_v41 = vpop.f32.mrf.mxu3  ;;  %v8262_v0 = vadd.f32 %v7889_v58, %v8094_v8 }
 0x5c6   :  { %10968 = vst [vmem:[#allocation41_spill] sm:$0xff] %v8250_v41  ;;  %v2846_v54 = vpop.xlane.xlu0 %2845 }
 0x5c7   :  { %10967 = vst [vmem:[#allocation40_spill] sm:$0xff] %v8236_v63  ;;  %v3443_v6 = vpack.c.bf16 %v3333_v55, %v3332_v9  ;;  %v2765_v40 = vmul.f32 %v8236_v63, %v8236_v63  ;;  %v5298_v9 = vpop.eup %5297  ;;  %v8266_v55 = vadd.f32 %v8188_v60, %v8096_v33 }
 0x5c8   :  { %vm3173_vm12 = vweird.f32 %v5298_v9 }
 0x5c9   :  { %5109 = vmatmul.msk.bf16.gmra.mxu1 %vm92_vm0, %v3443_v6  ;;  %1362 = vmax.xlane.f32.xlu2 %v1361_v31  ;;  %v2859_v52 = vsel %vm92_vm0, %v2765_v40, 0.0  ;;  %v8270_v6 = vadd.f32 %v1273_v21, %v8096_v33  ;;  %v1367_v29 = vmax.f32 %v8266_v55, %v8258_v42  ;;  %v2888_v40 = vmul.f32 %v2846_v54, %v5839_v22  ;;  %vm3174_vm14 = vmor %vm3172_vm13, %vm3173_vm12 }
 0x5ca   :  { %2860 = vadd.xlane.f32.xlu1 %v2859_v52  ;;  %v2849_v36 = vpop.xlane.xlu2 %2848  ;;  %v3167_v52 = vmul.f32 %v5298_v9, %v8227_v53  ;;  %v8284_v21 = vadd.f32 %v7817_v44, %v8094_v8  ;;  %v8290_v54 = vadd.f32 %v7940_v38, %v8094_v8  ;;  %v8301_v44 = vadd.f32 %v1276_v59, %v8096_v33 }
 0x5cb   :  { %v2889_v31 = vmul.f32 %v2849_v36, %v5839_v22  ;;  %v1376_v58 = vmax.f32 %v8270_v6, %v8262_v0  ;;  %v8286_v36 = vadd.f32 1e-05, %v2888_v40  ;;  %v8292_v1 = vpop.f32.mrf.mxu1  ;;  %v8303_v40 = vpop.f32.mrf.mxu2 }
 0x5cc   :  { %10970 = vst [vmem:[#allocation43_spill] sm:$0xff] %v8290_v54  ;;  %v3168_v24 = vmul.f32 %v5298_v9, %v3167_v52 }
 0x5cd   :  { %v8278_v57 = vadd.f32 1e-05, %v2889_v31  ;;  %v8280_v60 = vpop.f32.mrf.mxu3  ;;  %10971 = vst [vmem:[#allocation44_spill] sm:$0xff] %v8292_v1  ;;  %vm3192_vm7 = vweird.f32 %v8286_v36 }
 0x5ce   :  { %10972 = vst [vmem:[#allocation45_spill] sm:$0xff] %v8301_v44  ;;  %v3169_v52 = vmul.f32 0.5, %v3168_v24 }
 0x5cf   :  { %5299 = vrsqrt.f32 %v8278_v57  ;;  %vm3202_vm3 = vweird.f32 %v8278_v57 }
 0x5d0   :  { %5301 = vrsqrt.f32 %v8286_v36  ;;  %v3170_v32 = vsub.f32 1.5, %v3169_v52 }
 0x5d1   :  { %1368 = vmax.xlane.f32.xlu2 %v1367_v29  ;;  %v8297_v29 = vadd.f32 %v8195_v62, %v8096_v33  ;;  %v1379_v62 = vmax.f32 %v8301_v44, %v8290_v54 }
 0x5d2   :  { %1377 = vmax.xlane.f32.xlu1 %v1376_v58  ;;  %v10973_v58 = vld [vmem:[#allocation8_spill] sm:$0xff] }
 0x5d3   :  { %v2843_v25 = vpop.xlane.xlu1 %2842  ;;  %v1370_v38 = vmax.f32 %v8297_v29, %v8284_v21  ;;  %v8314_v10 = vpop.f32.mrf.mxu1 }
 0x5d4   :  { %v2887_v31 = vmul.f32 %v2843_v25, %v5839_v22  ;;  %10975 = vst [vmem:[#allocation46_spill] sm:$0xff] %v8314_v10  ;;  %v8317_v17 = vpop.f32.mrf.mxu2 }
 0x5d5   :  { %v5300_v59 = vpop.eup %5299  ;;  %v8312_v1 = vpop.f32.mrf.mxu3 }
 0x5d6   :  { %2301 = vrot.lane.b32.xlu0 %v10973_v58, %s5758_s2  ;;  %v2919_v25 = vadd.f32 1e-05, %v2887_v31  ;;  %10974 = vst [vmem:[#allocation8_spill] sm:$0xff] %v8312_v1  ;;  %v5302_v16 = vpop.eup %5301  ;;  %v3197_v58 = vmul.f32 %v5300_v59, %v8278_v57  ;;  %v3171_v31 = vmul.f32 %v5298_v9, %v3170_v32  ;;  %vm3203_vm4 = vweird.f32 %v5300_v59 }
 0x5d7   :  { %v3187_v54 = vmul.f32 %v5302_v16, %v8286_v36  ;;  %vm3204_vm5 = vmor %vm3202_vm3, %vm3203_vm4  ;;  %vm3193_vm6 = vweird.f32 %v5302_v16 }
 0x5d8   :  { %5303 = vrsqrt.f32 %v2919_v25  ;;  %v3175_v1 = vsel %vm3174_vm14, %v5298_v9, %v3171_v31  ;;  %vm3182_vm1 = vweird.f32 %v2919_v25  ;;  %vm3194_vm8 = vmor %vm3192_vm7, %vm3193_vm6 }
 0x5d9   :  { %1371 = vmax.xlane.f32.xlu2 %v1370_v38  ;;  %v3198_v38 = vmul.f32 %v5300_v59, %v3197_v58  ;;  %v3188_v52 = vmul.f32 %v5302_v16, %v3187_v54  ;;  %v3270_v30 = vmul.f32 %v3175_v1, %v7911_v47 }
 0x5da   :  { %1380 = vmax.xlane.f32.xlu1 %v1379_v62 }
 0x5db   :  { %v3199_v10 = vmul.f32 0.5, %v3198_v38  ;;  %v8324_v32 = vpop.f32.mrf.mxu1  ;;  %v3189_v63 = vmul.f32 0.5, %v3188_v52  ;;  %v3302_v54 = vmul.f32 %v8220_v20, %v3270_v30 }
 0x5dc   :  { %v8326_v53 = vpop.f32.mrf.mxu2 }
 0x5dd   :  { %v8321_v41 = vpop.f32.mrf.mxu3  ;;  %v3200_v58 = vsub.f32 1.5, %v3199_v10  ;;  %v3190_v31 = vsub.f32 1.5, %v3189_v63  ;;  %v10977_v63 = vld [vmem:[#allocation2_spill] sm:$0xff] }
 0x5de   :  { %v5304_v2 = vpop.eup %5303 }
 0x5df   :  { %v3177_v24 = vmul.f32 %v5304_v2, %v2919_v25  ;;  %vm3183_vm15 = vweird.f32 %v5304_v2  ;;  %v3191_v10 = vmul.f32 %v5302_v16, %v3190_v31 }
 0x5e0   :  { %vm3184_vm2 = vmor %vm3182_vm1, %vm3183_vm15 }
 0x5e1   :  { %v3178_v62 = vmul.f32 %v5304_v2, %v3177_v24  ;;  %v3195_v38 = vsel %vm3194_vm8, %v5302_v16, %v3191_v10  ;;  %v8374_v10 = vadd.f32 %v7747_v13, %v8094_v8 }
 0x5e2   :  { %v3272_v52 = vmul.f32 %v3195_v38, %v8020_v39 }
 0x5e3   :  { %v3179_v44 = vmul.f32 0.5, %v3178_v62 }
 0x5e4   :  { %v8344_v57 = vpop.f32.mrf.mxu2 }
 0x5e5   :  { %v3180_v12 = vsub.f32 1.5, %v3179_v44  ;;  %v8332_v1 = vpop.f32.mrf.mxu3  ;;  %v3201_v44 = vmul.f32 %v5300_v59, %v3200_v58 }
 0x5e7   :  { %v3181_v3 = vmul.f32 %v5304_v2, %v3180_v12  ;;  %v3334_v12 = vadd.f32 %v8241_v14, %v3302_v54  ;;  %v3205_v30 = vsel %vm3204_vm5, %v5300_v59, %v3201_v44  ;;  %v8355_v59 = vadd.f32 %v7657_v35, %v8094_v8 }
 0x5e8   :  { %v3273_v62 = vmul.f32 %v3205_v30, %v8017_v11  ;;  %v3304_v54 = vmul.f32 %v8220_v20, %v3272_v52  ;;  %v8360_v11 = vadd.f32 %v8168_v46, %v8096_v33  ;;  %v8381_v30 = vadd.f32 %v8180_v18, %v8096_v33 }
 0x5e9   :  { %v3185_v24 = vsel %vm3184_vm2, %v5304_v2, %v3181_v3  ;;  %v8338_v3 = vpop.f32.mrf.mxu1 }
 0x5ea   :  { %v3271_v9 = vmul.f32 %v3185_v24, %v8066_v45  ;;  %v10976_v45 = vld [vmem:[#allocation9_spill] sm:$0xff]  ;;  %v3305_v36 = vmul.f32 %v8220_v20, %v3273_v62  ;;  %v1358_v35 = vmax.f32 %v8360_v11, %v8355_v59  ;;  %v1364_v38 = vmax.f32 %v8381_v30, %v8374_v10 }
 0x5ec   :  { %v3303_v47 = vmul.f32 %v8220_v20, %v3271_v9  ;;  %v3337_v31 = vadd.f32 %v8241_v14, %v3305_v36 }
 0x5ed   :  { %v8348_v58 = vpop.f32.mrf.mxu3 }
 0x5ee   :  { %v3335_v25 = vadd.f32 %v8241_v14, %v3303_v47  ;;  %v8367_v47 = vpop.f32.mrf.mxu2 }
 0x5f0   :  { %v3444_v2 = vpack.c.bf16 %v3335_v25, %v3334_v12  ;;  %v3336_v25 = vadd.f32 %v8241_v14, %v3304_v54  ;;  %v8391_v54 = vadd.f32 %v7843_v34, %v8094_v8 }
 0x5f1   :  { %2299 = vrot.lane.b32.xlu2 %v10976_v45, %s5758_s2  ;;  %v8362_v39 = vpop.f32.mrf.mxu1 }
 0x5f2   :  { %5110 = vmatmul.msk.bf16.gmra.mxu1 %vm92_vm0, %v3444_v2  ;;  %v3445_v46 = vpack.c.bf16 %v3337_v31, %v3336_v25 }
 0x5f3   :  { %2287 = vrot.lane.b32.xlu1 %v10977_v63, %s5758_s2 }
 0x5f5   :  { %v8376_v45 = vpop.f32.mrf.mxu3 }
 0x5f6   :  { %v8387_v13 = vpop.f32.mrf.mxu2 }
 0x5f9   :  { %2285 = vrot.lane.b32.xlu2 %v6907_v7, %s5758_s2  ;;  %v8385_v62 = vpop.f32.mrf.mxu1 }
 0x5fb   :  { %v2852_v24 = vpop.xlane.xlu2 %2851  ;;  %v2855_v9 = vpop.xlane.xlu0 %2854 }
 0x5fc   :  { %v2890_v16 = vmul.f32 %v2852_v24, %v5839_v22  ;;  %v2891_v7 = vmul.f32 %v2855_v9, %v5839_v22 }
 0x5fd   :  { %v8397_v31 = vpop.f32.mrf.mxu3 }
 0x5fe   :  { %v2922_v44 = vadd.f32 1e-05, %v2890_v16  ;;  %v2923_v12 = vadd.f32 1e-05, %v2891_v7  ;;  %v8395_v7 = vadd.f32 %v8201_v61, %v8096_v33  ;;  %10978 = vst [vmem:[#allocation9_spill] sm:$0xff] %v8397_v31  ;;  %v1293_v61 = vpop.f32.mrf.mxu2 }
 0x600   :  { %5305 = vrsqrt.f32 %v2922_v44  ;;  %1359 = vmax.xlane.f32.xlu0 %v1358_v35  ;;  %vm3212_vm10 = vweird.f32 %v2922_v44  ;;  %vm3222_vm12 = vweird.f32 %v2923_v12 }
 0x601   :  { %5307 = vrsqrt.f32 %v2923_v12 }
 0x602   :  { %5111 = vmatmul.msk.bf16.gmra.mxu1 %vm92_vm0, %v3445_v46  ;;  %v1373_v46 = vmax.f32 %v8395_v7, %v8391_v54 }
 0x603   :  { %v2304_v2 = vpop.permute.xlu2 %2303 }
 0x604   :  { %2375 = vmatpush.bf16.msrb.mxu2 %v2304_v2 }
 0x605   :  { %v8407_v31 = vpop.f32.mrf.mxu3 }
 0x606   :  { %v5306_v63 = vpop.eup %5305 }
 0x607   :  { %v5308_v52 = vpop.eup %5307  ;;  %v3207_v36 = vmul.f32 %v5306_v63, %v2922_v44  ;;  %vm3213_vm11 = vweird.f32 %v5306_v63 }
 0x608   :  { %v3217_v24 = vmul.f32 %v5308_v52, %v2923_v12  ;;  %1365 = vmax.xlane.f32.xlu0 %v1364_v38  ;;  %vm3223_vm13 = vweird.f32 %v5308_v52  ;;  %vm3214_vm14 = vmor %vm3212_vm10, %vm3213_vm11  ;;  %v8401_v38 = vpop.f32.mrf.mxu1 }
 0x609   :  { %v3208_v9 = vmul.f32 %v5306_v63, %v3207_v36  ;;  %vm3224_vm15 = vmor %vm3222_vm12, %vm3223_vm13 }
 0x60a   :  { %v3218_v18 = vmul.f32 %v5308_v52, %v3217_v24 }
 0x60b   :  { %v3209_v16 = vmul.f32 0.5, %v3208_v9 }
 0x60c   :  { %v3219_v35 = vmul.f32 0.5, %v3218_v18 }
 0x60d   :  { %v3210_v25 = vsub.f32 1.5, %v3209_v16 }
 0x60e   :  { %v3220_v34 = vsub.f32 1.5, %v3219_v35 }
 0x60f   :  { %v3211_v2 = vmul.f32 %v5306_v63, %v3210_v25  ;;  %v8412_v25 = vadd.f32 %v8197_v37, %v8094_v8  ;;  %v8428_v37 = vadd.f32 %v7971_v15, %v8094_v8 }
 0x610   :  { %v3221_v44 = vmul.f32 %v5308_v52, %v3220_v34  ;;  %1374 = vmax.xlane.f32.xlu0 %v1373_v46  ;;  %v8424_v34 = vpop.f32.mrf.mxu2 }
 0x611   :  { %v3215_v36 = vsel %vm3214_vm14, %v5306_v63, %v3211_v2  ;;  %v8432_v2 = vadd.f32 %v8303_v40, %v8096_v33  ;;  %v8449_v40 = vadd.f32 %v8026_v4, %v8094_v8 }
 0x612   :  { %v3274_v24 = vmul.f32 %v3215_v36, %v8155_v28  ;;  %v3225_v9 = vsel %vm3224_vm15, %v5308_v52, %v3221_v44  ;;  %v8417_v28 = vadd.f32 %v8344_v57, %v8096_v33  ;;  %v8436_v57 = vadd.f32 %v8280_v60, %v8094_v8  ;;  %v8440_v36 = vpop.f32.mrf.mxu3 }
 0x613   :  { %v3275_v12 = vmul.f32 %v3225_v9, %v8158_v48  ;;  %v8419_v48 = vpop.f32.mrf.mxu1  ;;  %v1382_v44 = vmax.f32 %v8432_v2, %v8428_v37  ;;  %v8457_v60 = vadd.f32 %v8317_v17, %v8096_v33 }
 0x614   :  { %v3306_v18 = vmul.f32 %v8220_v20, %v3274_v24  ;;  %v1391_v46 = vmax.f32 %v8417_v28, %v8412_v25  ;;  %10979 = vst [vmem:[#allocation2_spill] sm:$0xff] %v8436_v57  ;;  %v8443_v24 = vadd.f32 %v1293_v61, %v8096_v33 }
 0x615   :  { %v3307_v16 = vmul.f32 %v8220_v20, %v3275_v12  ;;  %v8461_v12 = vadd.f32 %v8321_v41, %v8094_v8  ;;  %v8478_v41 = vadd.f32 %v8332_v1, %v8096_v33 }
 0x616   :  { %v3338_v35 = vadd.f32 %v8241_v14, %v3306_v18  ;;  %10980 = vst [vmem:[#allocation47_spill] sm:$0xff] %v8443_v24  ;;  %v1400_v15 = vmax.f32 %v8443_v24, %v8436_v57  ;;  %v1385_v18 = vmax.f32 %v8457_v60, %v8449_v40 }
 0x617   :  { %v3339_v63 = vadd.f32 %v8241_v14, %v3307_v16  ;;  %10982 = vst [vmem:[#allocation49_spill] sm:$0xff] %v8461_v12 }
 0x618   :  { %v1298_v61 = vpop.f32.mrf.mxu2 }
 0x619   :  { %v3446_v52 = vpack.c.bf16 %v3339_v63, %v3338_v35  ;;  %v8466_v4 = vadd.f32 %v1298_v61, %v8096_v33  ;;  %v10985_v35 = vld [vmem:[#allocation23_spill] sm:$0xff] }
 0x61a   :  { %v8468_v16 = vpop.f32.mrf.mxu3  ;;  %v8482_v63 = vadd.f32 %v10985_v35, %v8094_v8 }
 0x61b   :  { %5112 = vmatmul.msk.bf16.gmra.mxu1 %vm92_vm0, %v3446_v52  ;;  %v8451_v9 = vpop.f32.mrf.mxu1  ;;  %10983 = vst [vmem:[#allocation50_spill] sm:$0xff] %v8466_v4 }
 0x61c   :  { %10981 = vst [vmem:[#allocation48_spill] sm:$0xff] %v8451_v9  ;;  %v2039_v52 = vmax.f32 %v8478_v41, %v8482_v63 }
 0x61d   :  { %1392 = vmax.xlane.f32.xlu1 %v1391_v46 }
 0x622   :  { %1383 = vmax.xlane.f32.xlu2 %v1382_v44  ;;  %v8486_v46 = vpop.f32.mrf.mxu3 }
 0x623   :  { %v8474_v17 = vpop.f32.mrf.mxu1  ;;  %10986 = vst [vmem:[#allocation23_spill] sm:$0xff] %v8486_v46 }
 0x624   :  { %2297 = vrot.lane.b32.xlu0 %v7145_v27, %s5758_s2  ;;  %v1406_v27 = vmax.f32 %v8466_v4, %v8461_v12  ;;  %10984 = vst [vmem:[#allocation51_spill] sm:$0xff] %v8474_v17 }
 0x625   :  { %1401 = vmax.xlane.f32.xlu1 %v1400_v15 }
 0x62a   :  { %1386 = vmax.xlane.f32.xlu2 %v1385_v18  ;;  %v8500_v4 = vpop.f32.mrf.mxu3 }
 0x62b   :  { %v8493_v1 = vpop.f32.mrf.mxu1 }
 0x62c   :  { %2295 = vrot.lane.b32.xlu0 %v7097_v51, %s5758_s2  ;;  %v8490_v51 = vpop.xlane.xlu1 %1356  ;;  %10987 = vst [vmem:[#allocation52_spill] sm:$0xff] %v8493_v1 }
 0x62d   :  { %1407 = vmax.xlane.f32.xlu1 %v1406_v27 }
 0x632   :  { %v8516_v1 = vpop.f32.mrf.mxu3 }
 0x633   :  { %10989 = vst [vmem:[#allocation54_spill] sm:$0xff] %v8516_v1 }
 0x634   :  { %2281 = vrot.lane.b32.xlu0 %v6939_v23, %s5758_s2 }
 0x635   :  { %v2858_v44 = vpop.xlane.xlu0 %2857  ;;  %2040 = vmax.xlane.f32.xlu1 %v2039_v52 }
 0x636   :  { %v2892_v15 = vmul.f32 %v2858_v44, %v5839_v22 }
 0x638   :  { %v2924_v61 = vadd.f32 1e-05, %v2892_v15  ;;  %v8502_v15 = vpop.f32.mrf.mxu1 }
 0x639   :  { %10988 = vst [vmem:[#allocation53_spill] sm:$0xff] %v8502_v15 }
 0x63a   :  { %5309 = vrsqrt.f32 %v2924_v61  ;;  %vm3232_vm2 = vweird.f32 %v2924_v61 }
 0x63c   :  { %2293 = vrot.lane.b32.xlu0 %v7172_v49, %s5758_s2  ;;  %v1363_v18 = vpop.xlane.xlu2 %1362 }
 0x63d   :  { %v1413_v27 = vsub.f32 %v8233_v43, %v1363_v18  ;;  %v1414_v35 = vsub.f32 %v8225_v50, %v1363_v18  ;;  %v2861_v12 = vpop.xlane.xlu1 %2860 }
 0x63e   :  { %v2893_v23 = vmul.f32 %v2861_v12, %v5839_v22 }
 0x63f   :  { %v1453_v52 = vmul.f32 1.442695, %v1413_v27  ;;  %v1455_v57 = vmul.f32 1.442695, %v1414_v35 }
 0x640   :  { %v5310_v44 = vpop.eup %5309  ;;  %v2925_v24 = vadd.f32 1e-05, %v2893_v23 }
 0x641   :  { %v3227_v17 = vmul.f32 %v5310_v44, %v2924_v61  ;;  %5311 = vpow2.f32 %v1453_v52  ;;  %vm3233_vm1 = vweird.f32 %v5310_v44 }
 0x642   :  { %5313 = vpow2.f32 %v1455_v57  ;;  %2283 = vrot.lane.b32.xlu2 %v6924_v5, %s5758_s2  ;;  %vm3234_vm3 = vmor %vm3232_vm2, %vm3233_vm1  ;;  %vm3242_vm4 = vweird.f32 %v2925_v24 }
 0x643   :  { %v3228_v49 = vmul.f32 %v5310_v44, %v3227_v17  ;;  %5315 = vrsqrt.f32 %v2925_v24 }
 0x644   :  { %2279 = vrot.lane.b32.xlu0 %v6949_v19, %s5758_s2  ;;  %v1369_v22 = vpop.xlane.xlu2 %1368 }
 0x645   :  { %v3229_v50 = vmul.f32 0.5, %v3228_v49  ;;  %v1417_v43 = vsub.f32 %v8266_v55, %v1369_v22  ;;  %v1418_v12 = vsub.f32 %v8258_v42, %v1369_v22  ;;  %v1378_v18 = vpop.xlane.xlu1 %1377 }
 0x646   :  { %v1423_v27 = vsub.f32 %v8270_v6, %v1378_v18  ;;  %v1424_v35 = vsub.f32 %v8262_v0, %v1378_v18  ;;  %v8522_v6 = vpop.f32.mrf.mxu1 }
 0x647   :  { %v8512_v57 = vpop.eup %5311  ;;  %v3230_v23 = vsub.f32 1.5, %v3229_v50  ;;  %v1461_v5 = vmul.f32 1.442695, %v1417_v43  ;;  %v1463_v17 = vmul.f32 1.442695, %v1418_v12  ;;  %10991 = vst [vmem:[#allocation56_spill] sm:$0xff] %v8522_v6  ;;  %v8625_v6 = vadd.f32 %v8376_v45, %v8096_v33 }
 0x648   :  { %v8514_v52 = vpop.eup %5313  ;;  %v1473_v9 = vmul.f32 1.442695, %v1423_v27  ;;  %v1475_v19 = vmul.f32 1.442695, %v1424_v35  ;;  %v2302_v15 = vpop.permute.xlu0 %2301  ;;  %v8639_v45 = vadd.f32 %v8500_v4, %v8096_v33 }
 0x649   :  { %v5316_v49 = vpop.eup %5315  ;;  %5317 = vpow2.f32 %v1461_v5  ;;  %2376 = vmatpush.bf16.msrb.mxu2 %v2302_v15  ;;  %v8520_v42 = vadd.f32 %v8514_v52, %v8512_v57  ;;  %v3231_v0 = vmul.f32 %v5310_v44, %v3230_v23  ;;  %v10992_v5 = vld [vmem:[#allocation37_spill] sm:$0xff] }
 0x64a   :  { %v3237_v55 = vmul.f32 %v5316_v49, %v2925_v24  ;;  %5319 = vpow2.f32 %v1463_v17  ;;  %vm3243_vm5 = vweird.f32 %v5316_v49 }
 0x64b   :  { %10990 = vst [vmem:[#allocation55_spill] sm:$0xff] %v8520_v42  ;;  %5321 = vpow2.f32 %v1473_v9  ;;  %v3235_v12 = vsel %vm3234_vm3, %v5310_v44, %v3231_v0  ;;  %vm3244_vm6 = vmor %vm3242_vm4, %vm3243_vm5  ;;  %v8543_v44 = vpop.f32.mrf.mxu3 }
 0x64c   :  { %v3238_v22 = vmul.f32 %v5316_v49, %v3237_v55  ;;  %5323 = vpow2.f32 %v1475_v19  ;;  %2291 = vrot.lane.b32.xlu0 %v7189_v56, %s5758_s2  ;;  %v1372_v50 = vpop.xlane.xlu2 %1371  ;;  %v10995_v55 = vld [vmem:[#allocation40_spill] sm:$0xff] }
 0x64d   :  { %v1419_v15 = vsub.f32 %v8297_v29, %v1372_v50  ;;  %v1420_v43 = vsub.f32 %v8284_v21, %v1372_v50  ;;  %v3276_v29 = vmul.f32 %v3235_v12, %v10992_v5 }
 0x64e   :  { %v3239_v18 = vmul.f32 0.5, %v3238_v22  ;;  %2289 = vrot.lane.b32.xlu1 %v10927_v26, %s5758_s2 }
 0x64f   :  { %v8530_v9 = vpop.eup %5317  ;;  %v1465_v61 = vmul.f32 1.442695, %v1419_v15  ;;  %v1467_v27 = vmul.f32 1.442695, %v1420_v43  ;;  %v3308_v50 = vmul.f32 %v8220_v20, %v3276_v29  ;;  %v8551_v15 = vpop.f32.mrf.mxu1 }
 0x650   :  { %v8532_v35 = vpop.eup %5319  ;;  %v3240_v56 = vsub.f32 1.5, %v3239_v18  ;;  %10996 = vst [vmem:[#allocation40_spill] sm:$0xff] %v8551_v15  ;;  %v8566_v29 = vpop.xlane.xlu1 %1380 }
 0x651   :  { %v8534_v23 = vpop.eup %5321  ;;  %5325 = vpow2.f32 %v1465_v61  ;;  %v8539_v21 = vadd.f32 %v8532_v35, %v8530_v9  ;;  %v3340_v61 = vadd.f32 %v8241_v14, %v3308_v50 }
 0x652   :  { %v8541_v24 = vpop.eup %5323  ;;  %v3241_v26 = vmul.f32 %v5316_v49, %v3240_v56  ;;  %5327 = vpow2.f32 %v1467_v27 }
 0x653   :  { %10993 = vst [vmem:[#allocation37_spill] sm:$0xff] %v8539_v21  ;;  %v8547_v17 = vadd.f32 %v8541_v24, %v8534_v23  ;;  %v8564_v5 = vpop.f32.mrf.mxu3  ;;  %v11003_v21 = vld [vmem:[#allocation14_spill] sm:$0xff] }
 0x654   :  { %v3245_v19 = vsel %vm3244_vm6, %v5316_v49, %v3241_v26  ;;  %v2300_v0 = vpop.permute.xlu2 %2299 }
 0x655   :  { %10994 = vst [vmem:[#allocation57_spill] sm:$0xff] %v8547_v17  ;;  %v3277_v22 = vmul.f32 %v3245_v19, %v10995_v55  ;;  %2377 = vmatpush.bf16.msrb.mxu2 %v2300_v0 }
 0x657   :  { %v8553_v43 = vpop.eup %5325  ;;  %v3309_v12 = vmul.f32 %v8220_v20, %v3277_v22  ;;  %v8569_v26 = vpop.f32.mrf.mxu1  ;;  %v10998_v20 = vld [vmem:[#allocation38_spill] sm:$0xff] }
 0x658   :  { %v8556_v18 = vpop.eup %5327  ;;  %v8573_v19 = vadd.f32 %v10998_v20, %v8094_v8 }
 0x659   :  { %v3341_v27 = vadd.f32 %v8241_v14, %v3309_v12  ;;  %v8562_v49 = vadd.f32 %v8556_v18, %v8553_v43  ;;  %v8577_v14 = vadd.f32 %v8367_v47, %v8096_v33  ;;  %v11001_v47 = vld [vmem:[#allocation24_spill] sm:$0xff] }
 0x65a   :  { %v8593_v20 = vadd.f32 %v11001_v47, %v8094_v8  ;;  %v8613_v47 = vadd.f32 %v8407_v31, %v8096_v33 }
 0x65b   :  { %10997 = vst [vmem:[#allocation58_spill] sm:$0xff] %v8562_v49  ;;  %v3447_v56 = vpack.c.bf16 %v3341_v27, %v3340_v61  ;;  %v8579_v55 = vpop.f32.mrf.mxu3  ;;  %v1394_v50 = vmax.f32 %v8577_v14, %v8573_v19  ;;  %v8587_v61 = vadd.f32 %v8348_v58, %v8096_v33  ;;  %v11000_v27 = vld [vmem:[#allocation31_spill] sm:$0xff]  ;;  %v8599_v49 = vadd.f32 %v11003_v21, %v8094_v8 }
 0x65c   :  { %10999 = vst [vmem:[#allocation38_spill] sm:$0xff] %v8579_v55  ;;  %v2286_v12 = vpop.permute.xlu2 %2285  ;;  %v11005_v55 = vld [vmem:[#allocation27_spill] sm:$0xff] }
 0x65d   :  { %5113 = vmatmul.msk.bf16.gmra.mxu1 %vm92_vm0, %v3447_v56  ;;  %v1409_v56 = vsub.f32 %v11000_v27, %v8490_v51  ;;  %v2042_v58 = vmax.f32 %v8587_v61, %v8593_v20  ;;  %v8609_v27 = vadd.f32 %v8326_v53, %v8096_v33  ;;  %11004 = vst [vmem:[#allocation31_spill] sm:$0xff] %v8613_v47 }
 0x65e   :  { %v8619_v1 = vadd.f32 %v11005_v55, %v8094_v8 }
 0x65f   :  { %v8581_v22 = vpop.f32.mrf.mxu1  ;;  %v1388_v21 = vmax.f32 %v8609_v27, %v8599_v49 }
 0x660   :  { %11006 = vst [vmem:[#allocation24_spill] sm:$0xff] %v8619_v1  ;;  %v2051_v31 = vmax.f32 %v8613_v47, %v8619_v1 }
 0x665   :  { %v2288_v0 = vpop.permute.xlu1 %2287 }
 0x666   :  { %2321 = vmatpush.bf16.msra.mxu0 %v2288_v0  ;;  %v11002_v0 = vld [vmem:[#allocation16_spill] sm:$0xff] }
 0x667   :  { %v1410_v17 = vsub.f32 %v11002_v0, %v8490_v51  ;;  %v1445_v51 = vmul.f32 1.442695, %v1409_v56 }
 0x669   :  { %v1447_v0 = vmul.f32 1.442695, %v1410_v17  ;;  %5329 = vpow2.f32 %v1445_v51  ;;  %v11010_v51 = vld [vmem:[#allocation11_spill] sm:$0xff] }
 0x66a   :  { %2322 = vmatpush.bf16.msra.mxu0 %v2286_v12 }
 0x66b   :  { %1395 = vmax.xlane.f32.xlu2 %v1394_v50  ;;  %v8605_v50 = vpop.f32.mrf.mxu3  ;;  %5331 = vpow2.f32 %v1447_v0  ;;  %v8647_v0 = vadd.f32 %v11010_v51, %v8094_v8 }
 0x66d   :  { %v2063_v4 = vmax.f32 %v8639_v45, %v8647_v0 }
 0x66f   :  { %v8601_v12 = vpop.f32.mrf.mxu1  ;;  %v8643_v55 = vpop.eup %5329 }
 0x670   :  { %11009 = vst [vmem:[#allocation14_spill] sm:$0xff] %v8643_v55 }
 0x673   :  { %v1360_v42 = vpop.xlane.xlu0 %1359  ;;  %2043 = vmax.xlane.f32.xlu2 %v2042_v58  ;;  %v11007_v58 = vld [vmem:[#allocation25_spill] sm:$0xff] }
 0x674   :  { %v1411_v15 = vsub.f32 %v8360_v11, %v1360_v42  ;;  %v1412_v53 = vsub.f32 %v8355_v59, %v1360_v42  ;;  %v8631_v46 = vadd.f32 %v11007_v58, %v8094_v8  ;;  %v8641_v42 = vpop.f32.mrf.mxu3 }
 0x676   :  { %v1449_v17 = vmul.f32 1.442695, %v1411_v15  ;;  %v1451_v56 = vmul.f32 1.442695, %v1412_v53  ;;  %1389 = vmax.xlane.f32.xlu0 %v1388_v21  ;;  %11008 = vst [vmem:[#allocation16_spill] sm:$0xff] %v8631_v46  ;;  %v2045_v59 = vmax.f32 %v8625_v6, %v8631_v46 }
 0x677   :  { %v8633_v11 = vpop.f32.mrf.mxu1 }
 0x678   :  { %5333 = vpow2.f32 %v1449_v17  ;;  %2052 = vmax.xlane.f32.xlu1 %v2051_v31  ;;  %v8651_v31 = vpop.eup %5331 }
 0x679   :  { %5335 = vpow2.f32 %v1451_v56  ;;  %11011 = vst [vmem:[#allocation27_spill] sm:$0xff] %v8651_v31 }
 0x67b   :  { %v1366_v15 = vpop.xlane.xlu0 %1365  ;;  %2046 = vmax.xlane.f32.xlu2 %v2045_v59 }
 0x67c   :  { %v1415_v21 = vsub.f32 %v8381_v30, %v1366_v15  ;;  %v1416_v53 = vsub.f32 %v8374_v10, %v1366_v15  ;;  %v8661_v10 = vadd.f32 %v8543_v44, %v8096_v33  ;;  %v11013_v15 = vld [vmem:[#allocation7_spill] sm:$0xff] }
 0x67e   :  { %v5334_v17 = vpop.eup %5333  ;;  %v1457_v56 = vmul.f32 1.442695, %v1415_v21  ;;  %v1459_v58 = vmul.f32 1.442695, %v1416_v53  ;;  %v8665_v21 = vadd.f32 %v11013_v15, %v8094_v8 }
 0x67f   :  { %v5336_v1 = vpop.eup %5335  ;;  %v1571_v59 = vpack.c.bf16 %v5334_v17, %v8643_v55  ;;  %v3570_v51 = vpop.f32.mrf.mxu1  ;;  %v11021_v55 = vld [vmem:[#allocation18_spill] sm:$0xff] }
 0x680   :  { %v1572_v47 = vpack.c.bf16 %v5336_v1, %v8651_v31  ;;  %5337 = vpow2.f32 %v1457_v56  ;;  %2064 = vmax.xlane.f32.xlu1 %v2063_v4  ;;  %v8657_v46 = vadd.f32 %v5336_v1, %v5334_v17  ;;  %v8669_v31 = vpop.f32.mrf.mxu3  ;;  %v2069_v17 = vmax.f32 %v8661_v10, %v8665_v21 }
 0x681   :  { %5339 = vpow2.f32 %v1459_v58  ;;  %1661 = vmatmul.bf16.vlgmr.msrb.gmra.mxu0 %v1571_v59 }
 0x682   :  { %11012 = vst [vmem:[#allocation25_spill] sm:$0xff] %v8657_v46  ;;  %1715 = vmatmul.bf16.vlgmr.msra.gmra.mxu2 %v1572_v47  ;;  %v8702_v46 = vadd.f32 %v11021_v55, %v8094_v8 }
 0x683   :  { %v1375_v30 = vpop.xlane.xlu0 %1374 }
 0x684   :  { %v1421_v53 = vsub.f32 %v8395_v7, %v1375_v30  ;;  %v1422_v56 = vsub.f32 %v8391_v54, %v1375_v30  ;;  %v8679_v54 = vadd.f32 %v8605_v50, %v8096_v33  ;;  %v11016_v7 = vld [vmem:[#allocation3_spill] sm:$0xff]  ;;  %v11017_v30 = vld [vmem:[#allocation6_spill] sm:$0xff] }
 0x686   :  { %v5338_v1 = vpop.eup %5337  ;;  %v1469_v4 = vmul.f32 1.442695, %v1421_v53  ;;  %v1471_v58 = vmul.f32 1.442695, %v1422_v56  ;;  %v8685_v53 = vadd.f32 %v11017_v30, %v8094_v8  ;;  %v11020_v30 = vld [vmem:[#allocation5_spill] sm:$0xff] }
 0x687   :  { %v5340_v44 = vpop.eup %5339  ;;  %v3572_v47 = vpop.f32.mrf.mxu1 }
 0x688   :  { %5341 = vpow2.f32 %v1469_v4  ;;  %2070 = vmax.xlane.f32.xlu1 %v2069_v17  ;;  %v8673_v59 = vadd.f32 %v5340_v44, %v5338_v1  ;;  %v8675_v15 = vpack.c.bf16 %v3572_v47, %v3570_v51  ;;  %11018 = vst [vmem:[#allocation3_spill] sm:$0xff] %v8685_v53  ;;  %v2078_v17 = vmax.f32 %v8679_v54, %v8685_v53 }
 0x689   :  { %5343 = vpow2.f32 %v1471_v58  ;;  %v1573_v51 = vpack.c.bf16 %v5338_v1, %v8512_v57  ;;  %v1574_v50 = vpack.c.bf16 %v5340_v44, %v8514_v52 }
 0x68a   :  { %11014 = vst [vmem:[#allocation11_spill] sm:$0xff] %v8673_v59  ;;  %2277 = vrot.lane.b32.xlu0 %v11016_v7, %s5758_s2  ;;  %v1980_v59 = vpop.f32.mrf.mxu3 }
 0x68b   :  { %11015 = vst [vmem:[#allocation7_spill] sm:$0xff] %v8675_v15  ;;  %v8696_v7 = vadd.f32 %v1980_v59, %v8096_v33 }
 0x68d   :  { %v2087_v1 = vmax.f32 %v8696_v7, %v8702_v46 }
 0x68e   :  { %v5342_v56 = vpop.eup %5341 }
 0x68f   :  { %v5344_v4 = vpop.eup %5343 }
 0x690   :  { %2079 = vmax.xlane.f32.xlu1 %v2078_v17  ;;  %v8690_v58 = vpop.xlane.xlu1 %1392  ;;  %v8693_v47 = vadd.f32 %v5344_v4, %v5342_v56 }
 0x691   :  { %1666 = vmatmul.bf16.gmra.mxu0 %v1573_v51 }
 0x692   :  { %11019 = vst [vmem:[#allocation6_spill] sm:$0xff] %v8693_v47  ;;  %1720 = vmatmul.bf16.gmra.mxu2 %v1574_v50  ;;  %v1575_v47 = vpack.c.bf16 %v8553_v43, %v8530_v9 }
 0x693   :  { %2273 = vrot.lane.b32.xlu2 %v11020_v30, %s5758_s2 }
 0x695   :  { %v1384_v57 = vpop.xlane.xlu2 %1383 }
 0x696   :  { %v1427_v52 = vsub.f32 %v8432_v2, %v1384_v57  ;;  %v1428_v44 = vsub.f32 %v8428_v37, %v1384_v57  ;;  %v2298_v17 = vpop.permute.xlu0 %2297  ;;  %v1576_v37 = vpack.c.bf16 %v8556_v18, %v8532_v35  ;;  %v11023_v35 = vld [vmem:[#allocation41_spill] sm:$0xff] }
 0x697   :  { %2378 = vmatpush.bf16.msrb.mxu2 %v2298_v17  ;;  %v8730_v18 = vadd.f32 %v11023_v35, %v8094_v8  ;;  %v8768_v35 = vpack.c.bf16 %v8419_v48, %v8401_v38 }
 0x698   :  { %v1481_v59 = vmul.f32 1.442695, %v1427_v52  ;;  %v1483_v51 = vmul.f32 1.442695, %v1428_v44  ;;  %2088 = vmax.xlane.f32.xlu1 %v2087_v1  ;;  %v8708_v50 = vpop.xlane.xlu1 %1401 }
 0x69a   :  { %5345 = vpow2.f32 %v1481_v59 }
 0x69b   :  { %5347 = vpow2.f32 %v1483_v51 }
 0x69d   :  { %v8710_v30 = vpop.xlane.xlu2 %1386 }
 0x69e   :  { %v2296_v55 = vpop.permute.xlu0 %2295 }
 0x69f   :  { %2379 = vmatpush.bf16.msrb.mxu2 %v2296_v55  ;;  %v8734_v55 = vpack.c.bf16 %v8385_v62, %v8362_v39  ;;  %v3575_v62 = vpop.f32.mrf.mxu1 }
 0x6a0   :  { %v8714_v53 = vpop.eup %5345  ;;  %v8716_v2 = vpop.xlane.xlu1 %1407 }
 0x6a1   :  { %v8720_v57 = vpop.eup %5347  ;;  %1671 = vmatmul.bf16.gmra.mxu0 %v1575_v47 }
 0x6a2   :  { %1725 = vmatmul.bf16.gmra.mxu2 %v1576_v37  ;;  %v8724_v1 = vadd.f32 %v8720_v57, %v8714_v53  ;;  %v1577_v37 = vpack.c.bf16 %v8534_v23, %v5342_v56 }
 0x6a4   :  { %11022 = vst [vmem:[#allocation5_spill] sm:$0xff] %v8724_v1 }
 0x6a5   :  { %v2284_v52 = vpop.permute.xlu2 %2283 }
 0x6a6   :  { %v2282_v44 = vpop.permute.xlu0 %2281  ;;  %2323 = vmatpush.bf16.msra.mxu0 %v2284_v52 }
 0x6a7   :  { %v3577_v48 = vpop.f32.mrf.mxu1 }
 0x6a8   :  { %v2041_v17 = vpop.xlane.xlu1 %2040 }
 0x6a9   :  { %v2093_v9 = vsub.f32 %v8478_v41, %v2041_v17  ;;  %v2094_v43 = vsub.f32 %v8482_v63, %v2041_v17  ;;  %v8739_v41 = vadd.f32 %v8387_v13, %v8096_v33  ;;  %v11024_v63 = vld [vmem:[#allocation45_spill] sm:$0xff]  ;;  %v11025_v17 = vld [vmem:[#allocation43_spill] sm:$0xff] }
 0x6aa   :  { %2324 = vmatpush.bf16.msra.mxu0 %v2282_v44  ;;  %v1425_v52 = vsub.f32 %v11024_v63, %v8566_v29  ;;  %v1578_v44 = vpack.c.bf16 %v8541_v24, %v5344_v4 }
 0x6ab   :  { %v2129_v59 = vmul.f32 1.442695, %v2093_v9  ;;  %v2131_v51 = vmul.f32 1.442695, %v2094_v43  ;;  %v1426_v9 = vsub.f32 %v11025_v17, %v8566_v29  ;;  %v1397_v39 = vmax.f32 %v8739_v41, %v8730_v18  ;;  %v11027_v29 = vld [vmem:[#allocation8_spill] sm:$0xff] }
 0x6ac   :  { %v1477_v56 = vmul.f32 1.442695, %v1425_v52  ;;  %v8760_v4 = vadd.f32 %v11027_v29, %v8094_v8  ;;  %v8788_v52 = vadd.f32 %v8564_v5, %v8096_v33 }
 0x6ad   :  { %5349 = vpow2.f32 %v2129_v59  ;;  %v1479_v43 = vmul.f32 1.442695, %v1426_v9  ;;  %v8764_v59 = vadd.f32 %v8440_v36, %v8096_v33  ;;  %v8792_v9 = vpack.c.bf16 %v3577_v48, %v3575_v62  ;;  %v11034_v48 = vld [vmem:[#allocation17_spill] sm:$0xff] }
 0x6ae   :  { %5351 = vpow2.f32 %v2131_v51  ;;  %v2294_v47 = vpop.permute.xlu0 %2293 }
 0x6af   :  { %2380 = vmatpush.bf16.msrb.mxu2 %v2294_v47  ;;  %v8772_v47 = vadd.f32 %v8424_v34, %v8096_v33  ;;  %5353 = vpow2.f32 %v1477_v56  ;;  %11031 = vst [vmem:[#allocation43_spill] sm:$0xff] %v8792_v9  ;;  %v11032_v56 = vld [vmem:[#allocation13_spill] sm:$0xff] }
 0x6b0   :  { %5355 = vpow2.f32 %v1479_v43  ;;  %v8798_v43 = vadd.f32 %v11032_v56, %v8094_v8 }
 0x6b1   :  { %4055 = vrot.lane.b32.xlu1 %v8734_v55, %s5757_s23  ;;  %1676 = vmatmul.bf16.gmra.mxu0 %v1577_v37  ;;  %v11028_v37 = vld [vmem:[#allocation28_spill] sm:$0xff]  ;;  %v1403_v36 = vmax.f32 %v8772_v47, %v8760_v4 }
 0x6b2   :  { %1730 = vmatmul.bf16.gmra.mxu2 %v1578_v44  ;;  %v8776_v63 = vadd.f32 %v11028_v37, %v8094_v8  ;;  %v2072_v5 = vmax.f32 %v8788_v52, %v8798_v43 }
 0x6b3   :  { %v8750_v23 = vpop.eup %5349 }
 0x6b4   :  { %v8752_v13 = vpop.eup %5351  ;;  %1398 = vmax.xlane.f32.xlu0 %v1397_v39  ;;  %v2054_v38 = vmax.f32 %v8764_v59, %v8776_v63 }
 0x6b5   :  { %v8756_v24 = vadd.f32 %v8752_v13, %v8750_v23  ;;  %v8784_v34 = vpop.eup %5353 }
 0x6b6   :  { %v2280_v51 = vpop.permute.xlu0 %2279  ;;  %11029 = vst [vmem:[#allocation41_spill] sm:$0xff] %v8784_v34  ;;  %v8790_v17 = vpop.eup %5355  ;;  %v1579_v39 = vpack.c.bf16 %v8714_v53, %v8784_v34  ;;  %v8808_v53 = vadd.f32 %v8641_v42, %v8096_v33 }
 0x6b7   :  { %11026 = vst [vmem:[#allocation18_spill] sm:$0xff] %v8756_v24  ;;  %2325 = vmatpush.bf16.msra.mxu0 %v2280_v51  ;;  %v1580_v29 = vpack.c.bf16 %v8720_v57, %v8790_v17  ;;  %v11033_v51 = vld [vmem:[#allocation15_spill] sm:$0xff] }
 0x6b8   :  { %11030 = vst [vmem:[#allocation45_spill] sm:$0xff] %v8790_v17  ;;  %v8812_v37 = vadd.f32 %v11033_v51, %v8094_v8 }
 0x6b9   :  { %4276 = vrot.lane.b32.xlu1 %v8768_v35, %s5756_s11 }
 0x6ba   :  { %v2081_v57 = vmax.f32 %v8808_v53, %v8812_v37 }
 0x6bc   :  { %1404 = vmax.xlane.f32.xlu0 %v1403_v36  ;;  %2055 = vmax.xlane.f32.xlu2 %v2054_v38  ;;  %v1982_v36 = vpop.f32.mrf.mxu3 }
 0x6bd   :  { %v8817_v38 = vadd.f32 %v1982_v36, %v8096_v33  ;;  %v1429_v36 = vsub.f32 %v8457_v60, %v8710_v30 }
 0x6be   :  { %v2292_v44 = vpop.permute.xlu0 %2291 }
 0x6bf   :  { %2381 = vmatpush.bf16.msrb.mxu2 %v2292_v44  ;;  %v8821_v44 = vadd.f32 %v11034_v48, %v8094_v8  ;;  %v1485_v1 = vmul.f32 1.442695, %v1429_v36 }
 0x6c0   :  { %v2290_v62 = vpop.permute.xlu1 %2289 }
 0x6c1   :  { %4290 = vrot.lane.b32.xlu1 %v8792_v9, %s5756_s11  ;;  %1681 = vmatmul.bf16.gmra.mxu0 %v1579_v39  ;;  %v11035_v39 = vld [vmem:[#allocation4_spill] sm:$0xff]  ;;  %v2090_v42 = vmax.f32 %v8817_v38, %v8821_v44 }
 0x6c2   :  { %1735 = vmatmul.bf16.gmra.mxu2 %v1580_v29 }
 0x6c3   :  { %2382 = vmatpush.bf16.msrb.mxu2 %v2290_v62 }
 0x6c4   :  { %2073 = vmax.xlane.f32.xlu2 %v2072_v5 }
 0x6cc   :  { %2082 = vmax.xlane.f32.xlu2 %v2081_v57 }
 0x6d0   :  { %2275 = vrot.lane.b32.xlu0 %v11035_v39, %s5758_s2  ;;  %v1430_v39 = vsub.f32 %v8449_v40, %v8710_v30  ;;  %v8845_v40 = vpack.c.bf16 %v8338_v3, %v8324_v32  ;;  %v3680_v32 = vsel %vm1171_vm9, %v8792_v9, 0 }
 0x6d2   :  { %v1487_v60 = vmul.f32 1.442695, %v1430_v39 }
 0x6d4   :  { %2091 = vmax.xlane.f32.xlu2 %v2090_v42 }
 0x6da   :  { %v3580_v56 = vpop.f32.mrf.mxu1 }
 0x6de   :  { %v1396_v29 = vpop.xlane.xlu2 %1395 }
 0x6df   :  { %v1435_v5 = vsub.f32 %v8577_v14, %v1396_v29  ;;  %v1436_v62 = vsub.f32 %v8573_v19, %v1396_v29 }
 0x6e1   :  { %v1497_v51 = vmul.f32 1.442695, %v1435_v5  ;;  %v1499_v57 = vmul.f32 1.442695, %v1436_v62 }
 0x6e2   :  { %v3582_v48 = vpop.f32.mrf.mxu1 }
 0x6e3   :  { %5357 = vpow2.f32 %v1497_v51  ;;  %v8831_v24 = vpack.c.bf16 %v3582_v48, %v3580_v56 }
 0x6e4   :  { %5359 = vpow2.f32 %v1499_v57 }
 0x6e5   :  { %11036 = vst [vmem:[#allocation8_spill] sm:$0xff] %v8831_v24  ;;  %v3683_v42 = vsel %vm1171_vm9, %v8831_v24, 0  ;;  %5361 = vpow2.f32 %v1485_v1 }
 0x6e6   :  { %3739 = vmatpush.bf16.xpose.msra.mxu2 %v3683_v42  ;;  %v2044_v14 = vpop.xlane.xlu2 %2043 }
 0x6e7   :  { %v2095_v19 = vsub.f32 %v8587_v61, %v2044_v14  ;;  %v2096_v29 = vsub.f32 %v8593_v20, %v2044_v14 }
 0x6e9   :  { %v8839_v5 = vpop.eup %5357  ;;  %v2133_v62 = vmul.f32 1.442695, %v2095_v19  ;;  %v2135_v56 = vmul.f32 1.442695, %v2096_v29  ;;  %v1390_v51 = vpop.xlane.xlu0 %1389  ;;  %v11041_v29 = vld [vmem:[#allocation9_spill] sm:$0xff] }
 0x6ea   :  { %v8841_v57 = vpop.eup %5359  ;;  %v1431_v30 = vsub.f32 %v8609_v27, %v1390_v51  ;;  %v1432_v36 = vsub.f32 %v8599_v49, %v1390_v51 }
 0x6eb   :  { %5363 = vpow2.f32 %v2133_v62  ;;  %v8849_v61 = vpop.xlane.xlu1 %2052  ;;  %v8853_v20 = vadd.f32 %v8841_v57, %v8839_v5  ;;  %v8859_v3 = vpop.eup %5361 }
 0x6ec   :  { %5365 = vpow2.f32 %v2135_v56  ;;  %v1489_v48 = vmul.f32 1.442695, %v1431_v30  ;;  %v1491_v39 = vmul.f32 1.442695, %v1432_v36  ;;  %4053 = vrot.lane.b32.xlu2 %v8845_v40, %s5757_s23  ;;  %11038 = vst [vmem:[#allocation13_spill] sm:$0xff] %v8859_v3  ;;  %v3677_v56 = vsel %vm1171_vm9, %v8675_v15, 0 }
 0x6ed   :  { %11037 = vst [vmem:[#allocation28_spill] sm:$0xff] %v8853_v20  ;;  %5367 = vpow2.f32 %v1487_v60  ;;  %v8875_v60 = vadd.f32 %v11041_v29, %v8096_v33  ;;  %v11042_v30 = vld [vmem:[#allocation26_spill] sm:$0xff]  ;;  %v1434_v29 = vsub.f32 %v8412_v25, %v8690_v58 }
 0x6ee   :  { %5369 = vpow2.f32 %v1489_v48  ;;  %3740 = vmatpush.bf16.xpose.msra.mxu2 %v3680_v32  ;;  %v8884_v36 = vadd.f32 %v11042_v30, %v8094_v8  ;;  %v1433_v48 = vsub.f32 %v8417_v28, %v8690_v58  ;;  %v8897_v30 = vpack.c.bf16 %v8633_v11, %v8601_v12  ;;  %v11044_v11 = vld [vmem:[#allocation29_spill] sm:$0xff] }
 0x6ef   :  { %5371 = vpow2.f32 %v1491_v39  ;;  %v1495_v28 = vmul.f32 1.442695, %v1434_v29 }
 0x6f0   :  { %v1493_v20 = vmul.f32 1.442695, %v1433_v48  ;;  %v3674_v12 = vsel %vm1171_vm9, %v8897_v30, 0 }
 0x6f1   :  { %v8861_v49 = vpop.eup %5363 }
 0x6f2   :  { %v8863_v27 = vpop.eup %5365  ;;  %5373 = vpow2.f32 %v1493_v20  ;;  %v11047_v20 = vld [vmem:[#allocation23_spill] sm:$0xff] }
 0x6f3   :  { %v8865_v1 = vpop.eup %5367  ;;  %v8867_v42 = vpop.xlane.xlu1 %2064  ;;  %v8871_v14 = vadd.f32 %v8863_v27, %v8861_v49  ;;  %5375 = vpow2.f32 %v1495_v28 }
 0x6f4   :  { %11039 = vst [vmem:[#allocation15_spill] sm:$0xff] %v8865_v1  ;;  %v5370_v19 = vpop.eup %5369  ;;  %4272 = vrot.lane.b32.xlu2 %v8845_v40, %s5756_s11 }
 0x6f5   :  { %11040 = vst [vmem:[#allocation17_spill] sm:$0xff] %v8871_v14  ;;  %v5372_v62 = vpop.eup %5371  ;;  %v1581_v51 = vpack.c.bf16 %v5370_v19, %v8859_v3  ;;  %v2048_v14 = vmax.f32 %v8875_v60, %v8884_v36 }
 0x6f6   :  { %3741 = vmatpush.bf16.xpose.msra.mxu2 %v3677_v56  ;;  %v1582_v39 = vpack.c.bf16 %v5372_v62, %v8865_v1  ;;  %v8889_v32 = vadd.f32 %v5372_v62, %v5370_v19  ;;  %v8901_v19 = vadd.f32 %v8468_v16, %v8096_v33  ;;  %v11060_v1 = vld [vmem:[#allocation53_spill] sm:$0xff] }
 0x6f7   :  { %1686 = vmatmul.bf16.gmra.mxu0 %v1581_v51 }
 0x6f8   :  { %11043 = vst [vmem:[#allocation4_spill] sm:$0xff] %v8889_v32  ;;  %1740 = vmatmul.bf16.gmra.mxu2 %v1582_v39  ;;  %v8921_v29 = vpop.eup %5373  ;;  %v11068_v32 = vld [vmem:[#allocation51_spill] sm:$0xff] }
 0x6f9   :  { %11046 = vst [vmem:[#allocation26_spill] sm:$0xff] %v8921_v29 }
 0x6fa   :  { %2049 = vmax.xlane.f32.xlu0 %v2048_v14  ;;  %v8911_v14 = vadd.f32 %v11044_v11, %v8094_v8 }
 0x6fb   :  { %v2071_v56 = vpop.xlane.xlu1 %2070 }
 0x6fc   :  { %v2113_v62 = vsub.f32 %v8661_v10, %v2071_v56  ;;  %v2114_v25 = vsub.f32 %v8665_v21, %v2071_v56  ;;  %v2278_v58 = vpop.permute.xlu0 %2277  ;;  %4292 = vrot.lane.b32.xlu2 %v8831_v24, %s5756_s11  ;;  %v2057_v10 = vmax.f32 %v8901_v19, %v8911_v14  ;;  %v8917_v21 = vpack.c.bf16 %v8581_v22, %v8569_v26 }
 0x6fd   :  { %2326 = vmatpush.bf16.msra.mxu0 %v2278_v58  ;;  %v8925_v56 = vadd.f32 %v11047_v20, %v8096_v33  ;;  %v1583_v26 = vpack.c.bf16 %v8839_v5, %v8921_v29  ;;  %v11049_v58 = vld [vmem:[#allocation30_spill] sm:$0xff] }
 0x6fe   :  { %v2169_v51 = vmul.f32 1.442695, %v2113_v62  ;;  %v2171_v16 = vmul.f32 1.442695, %v2114_v25  ;;  %3742 = vmatpush.bf16.xpose.msra.mxu2 %v3674_v12  ;;  %v1662_v48 = vpop.f32.mrf.mxu0  ;;  %11045 = vst [vmem:[#allocation9_spill] sm:$0xff] %v8917_v21  ;;  %v8927_v62 = vpop.eup %5375  ;;  %v3671_v25 = vsel %vm1171_vm9, %v8917_v21, 0  ;;  %v8937_v12 = vadd.f32 %v11049_v58, %v8094_v8 }
 0x6ff   :  { %11048 = vst [vmem:[#allocation29_spill] sm:$0xff] %v8927_v62  ;;  %v11053_v58 = vld [vmem:[#allocation56_spill] sm:$0xff] }
 0x700   :  { %5377 = vpow2.f32 %v2169_v51  ;;  %v2060_v5 = vmax.f32 %v8925_v56, %v8937_v12 }
 0x701   :  { %5379 = vpow2.f32 %v2171_v16  ;;  %v1584_v16 = vpack.c.bf16 %v8841_v57, %v8927_v62 }
 0x702   :  { %2058 = vmax.xlane.f32.xlu0 %v2057_v10 }
 0x703   :  { %v8919_v39 = vpop.xlane.xlu1 %2079 }
 0x705   :  { %v1716_v28 = vpop.f32.mrf.mxu2 }
 0x706   :  { %v8933_v22 = vpop.eup %5377  ;;  %v8939_v11 = vadd.f32 %v1716_v28, %v1662_v48  ;;  %3743 = vmatpush.bf16.xpose.msra.mxu2 %v3671_v25  ;;  %v8941_v51 = vpop.f32.mrf.mxu0  ;;  %v11054_v48 = vld [vmem:[#allocation40_spill] sm:$0xff] }
 0x707   :  { %11051 = vst [vmem:[#allocation30_spill] sm:$0xff] %v8941_v51  ;;  %v8945_v10 = vpop.eup %5379  ;;  %1691 = vmatmul.bf16.gmra.mxu0 %v1583_v26  ;;  %v8955_v28 = vpack.c.bf16 %v11054_v48, %v11053_v58 }
 0x708   :  { %11050 = vst [vmem:[#allocation23_spill] sm:$0xff] %v8939_v11  ;;  %1745 = vmatmul.bf16.gmra.mxu2 %v1584_v16  ;;  %v8951_v20 = vadd.f32 %v8945_v10, %v8933_v22  ;;  %v11056_v11 = vld [vmem:[#allocation54_spill] sm:$0xff] }
 0x709   :  { %11055 = vst [vmem:[#allocation56_spill] sm:$0xff] %v8955_v28  ;;  %v8959_v57 = vadd.f32 %v11056_v11, %v8096_v33  ;;  %v3668_v16 = vsel %vm1171_vm9, %v8955_v28, 0 }
 0x70a   :  { %11052 = vst [vmem:[#allocation59_spill] sm:$0xff] %v8951_v20  ;;  %2061 = vmax.xlane.f32.xlu0 %v2060_v5  ;;  %v11058_v20 = vld [vmem:[#allocation10_spill] sm:$0xff] }
 0x70b   :  { %v2089_v25 = vpop.xlane.xlu1 %2088  ;;  %v8969_v29 = vadd.f32 %v11058_v20, %v8094_v8 }
 0x70c   :  { %v2125_v26 = vsub.f32 %v8696_v7, %v2089_v25  ;;  %v2126_v51 = vsub.f32 %v8702_v46, %v2089_v25  ;;  %v11059_v7 = vld [vmem:[#allocation52_spill] sm:$0xff]  ;;  %v11062_v25 = vld [vmem:[#allocation38_spill] sm:$0xff] }
 0x70d   :  { %v8963_v62 = vpop.f32.mrf.mxu2  ;;  %v2066_v11 = vmax.f32 %v8959_v57, %v8969_v29  ;;  %v8975_v46 = vpack.c.bf16 %v11060_v1, %v11059_v7 }
 0x70e   :  { %11057 = vst [vmem:[#allocation40_spill] sm:$0xff] %v8963_v62  ;;  %v2193_v58 = vmul.f32 1.442695, %v2125_v26  ;;  %v2195_v5 = vmul.f32 1.442695, %v2126_v51  ;;  %3744 = vmatpush.bf16.xpose.msra.mxu2 %v3668_v16  ;;  %v1667_v48 = vpop.f32.mrf.mxu0  ;;  %v8979_v62 = vadd.f32 %v11062_v25, %v8096_v33  ;;  %v11063_v16 = vld [vmem:[#allocation12_spill] sm:$0xff] }
 0x70f   :  { %11061 = vst [vmem:[#allocation54_spill] sm:$0xff] %v8975_v46  ;;  %v3665_v51 = vsel %vm1171_vm9, %v8975_v46, 0  ;;  %v8987_v3 = vadd.f32 %v11063_v16, %v8094_v8  ;;  %v11067_v25 = vld [vmem:[#allocation48_spill] sm:$0xff] }
 0x710   :  { %5381 = vpow2.f32 %v2193_v58  ;;  %v9003_v17 = vpack.c.bf16 %v11068_v32, %v11067_v25  ;;  %v11073_v25 = vld [vmem:[#allocation2_spill] sm:$0xff] }
 0x711   :  { %5383 = vpow2.f32 %v2195_v5  ;;  %v1440_v34 = vsub.f32 %v11073_v25, %v8708_v50 }
 0x712   :  { %2067 = vmax.xlane.f32.xlu0 %v2066_v11  ;;  %v2075_v11 = vmax.f32 %v8979_v62, %v8987_v3  ;;  %11069 = vst [vmem:[#allocation38_spill] sm:$0xff] %v9003_v17  ;;  %v3662_v16 = vsel %vm1171_vm9, %v9003_v17, 0 }
 0x715   :  { %v1721_v20 = vpop.f32.mrf.mxu2 }
 0x716   :  { %v8983_v26 = vpop.eup %5381  ;;  %v8989_v58 = vadd.f32 %v1721_v20, %v1667_v48  ;;  %3745 = vmatpush.bf16.xpose.msra.mxu2 %v3665_v51  ;;  %v8991_v1 = vpop.f32.mrf.mxu0  ;;  %v9007_v48 = vadd.f32 %v8669_v31, %v8096_v33 }
 0x717   :  { %11065 = vst [vmem:[#allocation52_spill] sm:$0xff] %v8991_v1  ;;  %v8993_v5 = vpop.eup %5383  ;;  %v9009_v20 = vpop.xlane.xlu2 %2046  ;;  %v11071_v1 = vld [vmem:[#allocation32_spill] sm:$0xff] }
 0x718   :  { %11064 = vst [vmem:[#allocation10_spill] sm:$0xff] %v8989_v58  ;;  %v8999_v7 = vadd.f32 %v8993_v5, %v8983_v26  ;;  %v9017_v58 = vadd.f32 %v11071_v1, %v8094_v8  ;;  %v1507_v1 = vmul.f32 1.442695, %v1440_v34 }
 0x71a   :  { %11066 = vst [vmem:[#allocation53_spill] sm:$0xff] %v8999_v7  ;;  %2076 = vmax.xlane.f32.xlu0 %v2075_v11  ;;  %v2084_v32 = vmax.f32 %v9007_v48, %v9017_v58  ;;  %v11072_v11 = vld [vmem:[#allocation47_spill] sm:$0xff] }
 0x71b   :  { %v1439_v31 = vsub.f32 %v11072_v11, %v8708_v50 }
 0x71d   :  { %v9011_v51 = vpop.f32.mrf.mxu2  ;;  %v1505_v9 = vmul.f32 1.442695, %v1439_v31 }
 0x71e   :  { %11070 = vst [vmem:[#allocation12_spill] sm:$0xff] %v9011_v51  ;;  %3746 = vmatpush.bf16.xpose.msra.mxu2 %v3662_v16  ;;  %v1672_v7 = vpop.f32.mrf.mxu0 }
 0x71f   :  { %v9025_v24 = vpop.permute.xlu2 %2273  ;;  %5385 = vpow2.f32 %v1505_v9 }
 0x720   :  { %5387 = vpow2.f32 %v1507_v1  ;;  %v11079_v1 = vld [vmem:[#allocation50_spill] sm:$0xff] }
 0x722   :  { %2085 = vmax.xlane.f32.xlu0 %v2084_v32 }
 0x725   :  { %v1726_v51 = vpop.f32.mrf.mxu2 }
 0x726   :  { %v9027_v17 = vadd.f32 %v1726_v51, %v1672_v7  ;;  %v9029_v46 = vpop.f32.mrf.mxu0  ;;  %v9035_v7 = vpop.eup %5385 }
 0x727   :  { %11075 = vst [vmem:[#allocation51_spill] sm:$0xff] %v9029_v46  ;;  %v1399_v16 = vpop.xlane.xlu0 %1398  ;;  %v9041_v9 = vpop.eup %5387 }
 0x728   :  { %11074 = vst [vmem:[#allocation48_spill] sm:$0xff] %v9027_v17  ;;  %v1437_v21 = vsub.f32 %v8739_v41, %v1399_v16  ;;  %v1438_v28 = vsub.f32 %v8730_v18, %v1399_v16  ;;  %v1443_v16 = vsub.f32 %v11079_v1, %v8716_v2  ;;  %v11080_v17 = vld [vmem:[#allocation49_spill] sm:$0xff] }
 0x729   :  { %11077 = vst [vmem:[#allocation47_spill] sm:$0xff] %v9035_v7 }
 0x72a   :  { %v1501_v11 = vmul.f32 1.442695, %v1437_v21  ;;  %v1503_v32 = vmul.f32 1.442695, %v1438_v28  ;;  %11078 = vst [vmem:[#allocation2_spill] sm:$0xff] %v9041_v9 }
 0x72c   :  { %5389 = vpow2.f32 %v1501_v11 }
 0x72d   :  { %5391 = vpow2.f32 %v1503_v32  ;;  %v9033_v50 = vpop.f32.mrf.mxu2 }
 0x72e   :  { %11076 = vst [vmem:[#allocation32_spill] sm:$0xff] %v9033_v50  ;;  %v1677_v21 = vpop.f32.mrf.mxu0 }
 0x72f   :  { %v1405_v31 = vpop.xlane.xlu0 %1404  ;;  %v2056_v25 = vpop.xlane.xlu2 %2055 }
 0x730   :  { %v1441_v34 = vsub.f32 %v8772_v47, %v1405_v31  ;;  %v1442_v51 = vsub.f32 %v8760_v4, %v1405_v31  ;;  %v2103_v41 = vsub.f32 %v8764_v59, %v2056_v25  ;;  %v2104_v18 = vsub.f32 %v8776_v63, %v2056_v25  ;;  %v11081_v59 = vld [vmem:[#allocation33_spill] sm:$0xff]  ;;  %v11082_v31 = vld [vmem:[#allocation34_spill] sm:$0xff] }
 0x731   :  { %v1444_v47 = vsub.f32 %v11080_v17, %v8716_v2  ;;  %v9050_v63 = vpack.c.bf16 %v11082_v31, %v11081_v59 }
 0x732   :  { %v5390_v28 = vpop.eup %5389  ;;  %v1509_v11 = vmul.f32 1.442695, %v1441_v34  ;;  %v1511_v32 = vmul.f32 1.442695, %v1442_v51  ;;  %v2149_v50 = vmul.f32 1.442695, %v2103_v41 }
 0x733   :  { %v5392_v46 = vpop.eup %5391  ;;  %v2151_v15 = vmul.f32 1.442695, %v2104_v18  ;;  %v1585_v4 = vpack.c.bf16 %v9035_v7, %v5390_v28  ;;  %11083 = vst [vmem:[#allocation50_spill] sm:$0xff] %v9050_v63  ;;  %v1513_v51 = vmul.f32 1.442695, %v1443_v16  ;;  %v11087_v16 = vld [vmem:[#allocation22_spill] sm:$0xff] }
 0x734   :  { %5393 = vpow2.f32 %v1509_v11  ;;  %v1586_v25 = vpack.c.bf16 %v9041_v9, %v5392_v46  ;;  %v9053_v8 = vadd.f32 %v5392_v46, %v5390_v28  ;;  %v1515_v2 = vmul.f32 1.442695, %v1444_v47  ;;  %v11163_v7 = vld [vmem:[#allocation9_spill] sm:$0xff] }
 0x735   :  { %5395 = vpow2.f32 %v1511_v32  ;;  %v1731_v34 = vpop.f32.mrf.mxu2  ;;  %1696 = vmatmul.bf16.gmra.mxu0 %v1585_v4  ;;  %v11088_v4 = vld [vmem:[#allocation21_spill] sm:$0xff] }
 0x736   :  { %11084 = vst [vmem:[#allocation49_spill] sm:$0xff] %v9053_v8  ;;  %5397 = vpow2.f32 %v2149_v50  ;;  %v9055_v41 = vadd.f32 %v1731_v34, %v1677_v21  ;;  %1750 = vmatmul.bf16.gmra.mxu2 %v1586_v25  ;;  %4045 = vrot.lane.b32.xlu0 %v9050_v63, %s5757_s23  ;;  %v9061_v50 = vpop.f32.mrf.mxu0  ;;  %v9067_v59 = vpack.c.bf16 %v11088_v4, %v11087_v16  ;;  %v5039_v34 = vld [vmem:[%s10759_s0 + $0x90] sm:$0xff]  ;;  %v11094_v16 = vld [vmem:[#allocation35_spill] sm:$0xff] }
 0x737   :  { %5399 = vpow2.f32 %v2151_v15  ;;  %v2074_v17 = vpop.xlane.xlu2 %2073  ;;  %11086 = vst [vmem:[#allocation34_spill] sm:$0xff] %v9061_v50  ;;  %v11095_v4 = vld [vmem:[#allocation36_spill] sm:$0xff] }
 0x738   :  { %11085 = vst [vmem:[#allocation33_spill] sm:$0xff] %v9055_v41  ;;  %v2115_v18 = vsub.f32 %v8788_v52, %v2074_v17  ;;  %v2116_v1 = vsub.f32 %v8798_v43, %v2074_v17  ;;  %5401 = vpow2.f32 %v1513_v51  ;;  %v5040_v51 = vld [vmem:[%s10759_s0 + $0x98] sm:$0xff]  ;;  %v9101_v41 = vpack.c.bf16 %v11095_v4, %v11094_v16  ;;  %v9117_v16 = vpop.permute.xlu1 %4055 }
 0x739   :  { %5403 = vpow2.f32 %v1515_v2  ;;  %v3342_v17 = vpack.c.bf16 %v5040_v51, %v5039_v34 }
 0x73a   :  { %v5394_v46 = vpop.eup %5393  ;;  %v2173_v28 = vmul.f32 1.442695, %v2115_v18  ;;  %v2175_v11 = vmul.f32 1.442695, %v2116_v1 }
 0x73b   :  { %v5396_v32 = vpop.eup %5395  ;;  %5089 = vmatmul.msk.bf16.vlgmr.msrb.gmra.mxu3 %vm92_vm0, %v3342_v17  ;;  %v3659_v17 = vsel %vm1171_vm9, %v8768_v35, 0 }
 0x73c   :  { %v9063_v21 = vpop.eup %5397  ;;  %5405 = vpow2.f32 %v2173_v28  ;;  %v9069_v15 = vadd.f32 %v5396_v32, %v5394_v46 }
 0x73d   :  { %v9071_v52 = vpop.eup %5399  ;;  %5407 = vpow2.f32 %v2175_v11  ;;  %v9073_v43 = vpop.f32.mrf.mxu2 }
 0x73e   :  { %11089 = vst [vmem:[#allocation22_spill] sm:$0xff] %v9069_v15  ;;  %4043 = vrot.lane.b32.xlu0 %v9067_v59, %s5757_s23  ;;  %v9079_v47 = vadd.f32 %v9071_v52, %v9063_v21  ;;  %v9083_v25 = vpop.eup %5401  ;;  %v1682_v34 = vpop.f32.mrf.mxu0 }
 0x73f   :  { %11090 = vst [vmem:[#allocation21_spill] sm:$0xff] %v9073_v43  ;;  %v9081_v31 = vpop.xlane.xlu2 %2082  ;;  %v9091_v2 = vpop.eup %5403  ;;  %v1587_v11 = vpack.c.bf16 %v9083_v25, %v5394_v46 }
 0x740   :  { %11091 = vst [vmem:[#allocation60_spill] sm:$0xff] %v9079_v47  ;;  %v1588_v43 = vpack.c.bf16 %v9091_v2, %v5396_v32 }
 0x741   :  { %11092 = vst [vmem:[#allocation61_spill] sm:$0xff] %v9083_v25 }
 0x742   :  { %11093 = vst [vmem:[#allocation62_spill] sm:$0xff] %v9091_v2  ;;  %v9093_v18 = vpop.eup %5405  ;;  %v2276_v1 = vpop.permute.xlu0 %2275 }
 0x743   :  { %v9095_v28 = vpop.eup %5407  ;;  %2327 = vmatpush.bf16.msra.mxu0 %v2276_v1 }
 0x744   :  { %v9106_v50 = vadd.f32 %v9095_v28, %v9093_v18 }
 0x745   :  { %v1736_v51 = vpop.f32.mrf.mxu2  ;;  %1701 = vmatmul.bf16.gmra.mxu0 %v1587_v11 }
 0x746   :  { %11096 = vst [vmem:[#allocation35_spill] sm:$0xff] %v9106_v50  ;;  %v9108_v47 = vadd.f32 %v1736_v51, %v1682_v34  ;;  %1755 = vmatmul.bf16.gmra.mxu2 %v1588_v43  ;;  %4047 = vrot.lane.b32.xlu0 %v9101_v41, %s5757_s23  ;;  %v11098_v34 = vld [vmem:[#allocation39_spill] sm:$0xff]  ;;  %v11099_v43 = vld [vmem:[#allocation42_spill] sm:$0xff] }
 0x747   :  { %2328 = vmatpush.bf16.msra.mxu0 %v9025_v24  ;;  %v2092_v46 = vpop.xlane.xlu2 %2091  ;;  %v9121_v51 = vpack.c.bf16 %v11099_v43, %v11098_v34  ;;  %v3656_v24 = vsel %vm1171_vm9, %v8734_v55, 0 }
 0x748   :  { %11097 = vst [vmem:[#allocation36_spill] sm:$0xff] %v9108_v47  ;;  %v2127_v32 = vsub.f32 %v8817_v38, %v2092_v46  ;;  %v2128_v1 = vsub.f32 %v8821_v44, %v2092_v46  ;;  %v4277_v46 = vpop.permute.xlu1 %4276 }
 0x749   :  { %11100 = vst [vmem:[#allocation39_spill] sm:$0xff] %v9121_v51  ;;  %v4343_v43 = vsel %vm1171_vm9, %v4277_v46, 0  ;;  %v3647_v46 = vsel %vm1171_vm9, %v9121_v51, 0 }
 0x74a   :  { %v2197_v11 = vmul.f32 1.442695, %v2127_v32  ;;  %v2199_v4 = vmul.f32 1.442695, %v2128_v1  ;;  %v11101_v32 = vld [vmem:[#allocation44_spill] sm:$0xff]  ;;  %v11102_v1 = vld [vmem:[#allocation46_spill] sm:$0xff] }
 0x74b   :  { %3685 = vmatpush.bf16.xpose.msrb.mxu0 %v3659_v17  ;;  %v2255_v17 = vpack.c.bf16 %v8861_v49, %v8750_v23  ;;  %v9135_v34 = vpack.c.bf16 %v11102_v1, %v11101_v32  ;;  %v3653_v23 = vsel %vm1171_vm9, %v8845_v40, 0  ;;  %v5042_v49 = vld [vmem:[%s10759_s0 + $0xa8] sm:$0xff]  ;;  %v11104_v32 = vld [vmem:[#allocation16_spill] sm:$0xff] }
 0x74c   :  { %5409 = vpow2.f32 %v2197_v11  ;;  %v2256_v11 = vpack.c.bf16 %v8863_v27, %v8752_v13  ;;  %v5041_v13 = vld [vmem:[%s10759_s0 + $0xa0] sm:$0xff]  ;;  %v2098_v1 = vsub.f32 %v11104_v32, %v9009_v20 }
 0x74d   :  { %5411 = vpow2.f32 %v2199_v4  ;;  %v3343_v27 = vpack.c.bf16 %v5042_v49, %v5041_v13 }
 0x74e   :  { %4049 = vrot.lane.b32.xlu0 %v9121_v51, %s5757_s23  ;;  %v2139_v13 = vmul.f32 1.442695, %v2098_v1  ;;  %v9182_v1 = vpop.f32.mrf.mxu2 }
 0x74f   :  { %5090 = vmatmul.msk.bf16.gmra.mxu3 %vm92_vm0, %v3343_v27  ;;  %11106 = vst [vmem:[#allocation46_spill] sm:$0xff] %v9182_v1 }
 0x752   :  { %v9127_v38 = vpop.eup %5409 }
 0x753   :  { %3686 = vmatpush.bf16.xpose.msrb.mxu0 %v3656_v24  ;;  %v9129_v44 = vpop.eup %5411  ;;  %v3650_v24 = vsel %vm1171_vm9, %v9135_v34, 0 }
 0x754   :  { %v9141_v4 = vadd.f32 %v9129_v44, %v9127_v38 }
 0x755   :  { %2329 = vmatmul.bf16.vlgmr.msra.gmra.mxu0 %v2255_v17  ;;  %v2097_v17 = vsub.f32 %v8625_v6, %v9009_v20  ;;  %v9177_v20 = vpop.f32.mrf.mxu0 }
 0x756   :  { %11103 = vst [vmem:[#allocation42_spill] sm:$0xff] %v9141_v4  ;;  %2383 = vmatmul.bf16.vlgmr.msrb.gmra.mxu2 %v2256_v11  ;;  %4051 = vrot.lane.b32.xlu0 %v9135_v34, %s5757_s23 }
 0x757   :  { %4369 = vmatpush.bf16.xpose.msrb.mxu2 %v4343_v43  ;;  %v2137_v11 = vmul.f32 1.442695, %v2097_v17  ;;  %v5043_v43 = vld [vmem:[%s10759_s0 + $0xb0] sm:$0xff]  ;;  %11105 = vst [vmem:[#allocation44_spill] sm:$0xff] %v9177_v20 }
 0x759   :  { %5413 = vpow2.f32 %v2137_v11 }
 0x75a   :  { %5415 = vpow2.f32 %v2139_v13  ;;  %v3641_v13 = vsel %vm1171_vm9, %v9050_v63, 0 }
 0x75b   :  { %3687 = vmatpush.bf16.xpose.msrb.mxu0 %v3653_v23  ;;  %v5044_v23 = vld [vmem:[%s10759_s0 + $0xb8] sm:$0xff] }
 0x75c   :  { %v3344_v27 = vpack.c.bf16 %v5044_v23, %v5043_v43 }
 0x75e   :  { %4274 = vrot.lane.b32.xlu0 %v8734_v55, %s5756_s11 }
 0x75f   :  { %5091 = vmatmul.msk.bf16.gmra.mxu3 %vm92_vm0, %v3344_v27 }
 0x763   :  { %3688 = vmatpush.bf16.xpose.msrb.mxu0 %v3650_v24 }
 0x766   :  { %4057 = vrot.lane.b32.xlu0 %v8768_v35, %s5757_s23 }
 0x76b   :  { %3689 = vmatpush.bf16.xpose.msrb.mxu0 %v3647_v46  ;;  %v3644_v46 = vsel %vm1171_vm9, %v9101_v41, 0 }
 0x76d   :  { %v2050_v49 = vpop.xlane.xlu0 %2049 }
 0x76e   :  { %v2099_v24 = vsub.f32 %v8875_v60, %v2050_v49  ;;  %v2100_v6 = vsub.f32 %v8884_v36, %v2050_v49  ;;  %4270 = vrot.lane.b32.xlu0 %v9135_v34, %s5756_s11  ;;  %v9184_v36 = vpop.eup %5413 }
 0x76f   :  { %11107 = vst [vmem:[#allocation16_spill] sm:$0xff] %v9184_v36  ;;  %v9190_v49 = vpop.eup %5415 }
 0x770   :  { %v2141_v17 = vmul.f32 1.442695, %v2099_v24  ;;  %v2143_v32 = vmul.f32 1.442695, %v2100_v6  ;;  %11108 = vst [vmem:[#allocation63_spill] sm:$0xff] %v9190_v49  ;;  %v11109_v24 = vld [vmem:[#allocation31_spill] sm:$0xff] }
 0x771   :  { %v2101_v6 = vsub.f32 %v11109_v24, %v8849_v61 }
 0x772   :  { %5417 = vpow2.f32 %v2141_v17 }
 0x773   :  { %3690 = vmatpush.bf16.xpose.msrb.mxu0 %v3644_v46  ;;  %5419 = vpow2.f32 %v2143_v32  ;;  %v2145_v4 = vmul.f32 1.442695, %v2101_v6 }
 0x774   :  { %v1687_v11 = vpop.f32.mrf.mxu0 }
 0x775   :  { %v2059_v60 = vpop.xlane.xlu0 %2058 }
 0x776   :  { %v2105_v43 = vsub.f32 %v8901_v19, %v2059_v60  ;;  %v2106_v23 = vsub.f32 %v8911_v14, %v2059_v60  ;;  %4286 = vrot.lane.b32.xlu0 %v8897_v30, %s5756_s11  ;;  %v11110_v19 = vld [vmem:[#allocation24_spill] sm:$0xff] }
 0x777   :  { %v2102_v14 = vsub.f32 %v11110_v19, %v8849_v61  ;;  %v5046_v61 = vld [vmem:[%s10759_s0 + $0xc8] sm:$0xff] }
 0x778   :  { %v5418_v27 = vpop.eup %5417  ;;  %v2153_v46 = vmul.f32 1.442695, %v2105_v43  ;;  %v2155_v17 = vmul.f32 1.442695, %v2106_v23  ;;  %v5045_v43 = vld [vmem:[%s10759_s0 + $0xc0] sm:$0xff] }
 0x779   :  { %v5420_v32 = vpop.eup %5419  ;;  %v2257_v60 = vpack.c.bf16 %v5418_v27, %v9184_v36  ;;  %v2147_v23 = vmul.f32 1.442695, %v2102_v14  ;;  %v3345_v24 = vpack.c.bf16 %v5046_v61, %v5045_v43 }
 0x77a   :  { %5421 = vpow2.f32 %v2153_v46  ;;  %v2258_v1 = vpack.c.bf16 %v5420_v32, %v9190_v49  ;;  %v9200_v20 = vadd.f32 %v5420_v32, %v5418_v27 }
 0x77b   :  { %3691 = vmatpush.bf16.xpose.msrb.mxu0 %v3641_v13  ;;  %5423 = vpow2.f32 %v2155_v17  ;;  %v1741_v47 = vpop.f32.mrf.mxu2  ;;  %5092 = vmatmul.msk.bf16.gmra.mxu3 %vm92_vm0, %v3345_v24 }
 0x77c   :  { %11111 = vst [vmem:[#allocation31_spill] sm:$0xff] %v9200_v20  ;;  %2334 = vmatmul.bf16.gmra.mxu0 %v2257_v60  ;;  %v9202_v50 = vadd.f32 %v1741_v47, %v1687_v11  ;;  %2388 = vmatmul.bf16.gmra.mxu2 %v2258_v1  ;;  %v3638_v47 = vsel %vm1171_vm9, %v9067_v59, 0  ;;  %5425 = vpow2.f32 %v2145_v4  ;;  %v9215_v32 = vpop.f32.mrf.mxu0 }
 0x77d   :  { %v2062_v13 = vpop.xlane.xlu0 %2061  ;;  %5427 = vpow2.f32 %v2147_v23  ;;  %11113 = vst [vmem:[#allocation64_spill] sm:$0xff] %v9215_v32 }
 0x77e   :  { %11112 = vst [vmem:[#allocation24_spill] sm:$0xff] %v9202_v50  ;;  %v2107_v27 = vsub.f32 %v8925_v56, %v2062_v13  ;;  %v2108_v46 = vsub.f32 %v8937_v12, %v2062_v13 }
 0x780   :  { %v5422_v1 = vpop.eup %5421  ;;  %v2157_v11 = vmul.f32 1.442695, %v2107_v27  ;;  %v2159_v6 = vmul.f32 1.442695, %v2108_v46 }
 0x781   :  { %v5424_v17 = vpop.eup %5423 }
 0x782   :  { %5429 = vpow2.f32 %v2157_v11  ;;  %v9217_v19 = vadd.f32 %v5424_v17, %v5422_v1  ;;  %v9221_v14 = vpop.eup %5425 }
 0x783   :  { %3692 = vmatpush.bf16.xpose.msrb.mxu0 %v3638_v47  ;;  %5431 = vpow2.f32 %v2159_v6  ;;  %v9219_v56 = vpop.f32.mrf.mxu2  ;;  %11116 = vst [vmem:[#allocation67_spill] sm:$0xff] %v9221_v14  ;;  %v9225_v43 = vpop.eup %5427  ;;  %v2259_v27 = vpack.c.bf16 %v9063_v21, %v9221_v14  ;;  %v5047_v6 = vld [vmem:[%s10759_s0 + $0xd0] sm:$0xff]  ;;  %v5048_v21 = vld [vmem:[%s10759_s0 + $0xd8] sm:$0xff] }
 0x784   :  { %11114 = vst [vmem:[#allocation65_spill] sm:$0xff] %v9217_v19  ;;  %v2260_v46 = vpack.c.bf16 %v9071_v52, %v9225_v43  ;;  %v1692_v11 = vpop.f32.mrf.mxu0 }
 0x785   :  { %11115 = vst [vmem:[#allocation66_spill] sm:$0xff] %v9219_v56  ;;  %v2068_v12 = vpop.xlane.xlu0 %2067 }
 0x786   :  { %v2111_v60 = vsub.f32 %v8959_v57, %v2068_v12  ;;  %v2112_v4 = vsub.f32 %v8969_v29, %v2068_v12  ;;  %11117 = vst [vmem:[#allocation68_spill] sm:$0xff] %v9225_v43 }
 0x788   :  { %v5430_v61 = vpop.eup %5429  ;;  %v2165_v13 = vmul.f32 1.442695, %v2111_v60  ;;  %v2167_v23 = vmul.f32 1.442695, %v2112_v4  ;;  %v3346_v60 = vpack.c.bf16 %v5048_v21, %v5047_v6 }
 0x789   :  { %v5432_v24 = vpop.eup %5431 }
 0x78a   :  { %5433 = vpow2.f32 %v2165_v13  ;;  %v9231_v47 = vadd.f32 %v5432_v24, %v5430_v61 }
 0x78b   :  { %5435 = vpow2.f32 %v2167_v23  ;;  %v1746_v57 = vpop.f32.mrf.mxu2  ;;  %5093 = vmatmul.msk.bf16.gmra.mxu3 %vm92_vm0, %v3346_v60  ;;  %v2109_v60 = vsub.f32 %v8639_v45, %v8867_v42  ;;  %v5050_v45 = vld [vmem:[%s10759_s0 + $0xe8] sm:$0xff] }
 0x78c   :  { %11118 = vst [vmem:[#allocation69_spill] sm:$0xff] %v9231_v47  ;;  %2339 = vmatmul.bf16.gmra.mxu0 %v2259_v27  ;;  %v9233_v29 = vadd.f32 %v1746_v57, %v1692_v11  ;;  %2393 = vmatmul.bf16.gmra.mxu2 %v2260_v46 }
 0x78d   :  { %v2077_v12 = vpop.xlane.xlu0 %2076 }
 0x78e   :  { %11119 = vst [vmem:[#allocation70_spill] sm:$0xff] %v9233_v29  ;;  %v2117_v52 = vsub.f32 %v8979_v62, %v2077_v12  ;;  %v2118_v4 = vsub.f32 %v8987_v3, %v2077_v12  ;;  %v2261_v12 = vpack.c.bf16 %v5430_v61, %v5422_v1  ;;  %v2161_v1 = vmul.f32 1.442695, %v2109_v60 }
 0x790   :  { %v5434_v13 = vpop.eup %5433  ;;  %v2177_v23 = vmul.f32 1.442695, %v2117_v52  ;;  %v2179_v27 = vmul.f32 1.442695, %v2118_v4  ;;  %v2262_v52 = vpack.c.bf16 %v5432_v24, %v5424_v17 }
 0x791   :  { %v5436_v46 = vpop.eup %5435 }
 0x792   :  { %5437 = vpow2.f32 %v2177_v23  ;;  %v9244_v11 = vadd.f32 %v5436_v46, %v5434_v13 }
 0x793   :  { %5439 = vpow2.f32 %v2179_v27 }
 0x794   :  { %11120 = vst [vmem:[#allocation71_spill] sm:$0xff] %v9244_v11 }
 0x795   :  { %v2086_v57 = vpop.xlane.xlu0 %2085 }
 0x796   :  { %v2123_v29 = vsub.f32 %v9007_v48, %v2086_v57  ;;  %v2124_v50 = vsub.f32 %v9017_v58, %v2086_v57  ;;  %v2110_v48 = vsub.f32 %v8647_v0, %v8867_v42  ;;  %v5049_v58 = vld [vmem:[%s10759_s0 + $0xe0] sm:$0xff]  ;;  %v9282_v57 = vpop.f32.mrf.mxu0 }
 0x797   :  { %11125 = vst [vmem:[#allocation76_spill] sm:$0xff] %v9282_v57 }
 0x798   :  { %v9248_v6 = vpop.eup %5437  ;;  %v2189_v62 = vmul.f32 1.442695, %v2123_v29  ;;  %v2191_v21 = vmul.f32 1.442695, %v2124_v50  ;;  %v3347_v50 = vpack.c.bf16 %v5050_v45, %v5049_v58  ;;  %v2163_v17 = vmul.f32 1.442695, %v2110_v48 }
 0x799   :  { %v9250_v3 = vpop.eup %5439  ;;  %v2265_v45 = vpack.c.bf16 %v9093_v18, %v8933_v22 }
 0x79a   :  { %5441 = vpow2.f32 %v2189_v62  ;;  %v9256_v4 = vadd.f32 %v9250_v3, %v9248_v6 }
 0x79b   :  { %5443 = vpow2.f32 %v2191_v21  ;;  %5094 = vmatmul.msk.bf16.gmra.mxu3 %vm92_vm0, %v3347_v50  ;;  %v5051_v21 = vld [vmem:[%s10759_s0 + $0xf0] sm:$0xff]  ;;  %v2119_v50 = vsub.f32 %v8679_v54, %v8919_v39 }
 0x79c   :  { %11121 = vst [vmem:[#allocation72_spill] sm:$0xff] %v9256_v4  ;;  %2344 = vmatmul.bf16.gmra.mxu0 %v2261_v12  ;;  %2398 = vmatmul.bf16.gmra.mxu2 %v2262_v52  ;;  %5445 = vpow2.f32 %v2161_v1  ;;  %v5052_v12 = vld [vmem:[%s10759_s0 + $0xf8] sm:$0xff] }
 0x79d   :  { %5447 = vpow2.f32 %v2163_v17  ;;  %v3348_v60 = vpack.c.bf16 %v5052_v12, %v5051_v21  ;;  %v2266_v17 = vpack.c.bf16 %v9095_v28, %v8945_v10  ;;  %v2181_v12 = vmul.f32 1.442695, %v2119_v50 }
 0x79e   :  { %v2121_v28 = vsub.f32 %v8808_v53, %v9081_v31  ;;  %v2122_v50 = vsub.f32 %v8812_v37, %v9081_v31 }
 0x79f   :  { %5449 = vpow2.f32 %v2181_v12 }
 0x7a0   :  { %v9267_v61 = vpop.eup %5441  ;;  %v2185_v53 = vmul.f32 1.442695, %v2121_v28  ;;  %v2187_v12 = vmul.f32 1.442695, %v2122_v50 }
 0x7a1   :  { %v9269_v24 = vpop.eup %5443 }
 0x7a2   :  { %v9273_v0 = vadd.f32 %v9269_v24, %v9267_v61  ;;  %v9275_v42 = vpop.eup %5445 }
 0x7a3   :  { %11123 = vst [vmem:[#allocation74_spill] sm:$0xff] %v9275_v42  ;;  %v9279_v23 = vpop.eup %5447  ;;  %v2263_v27 = vpack.c.bf16 %v5434_v13, %v9275_v42  ;;  %v9294_v13 = vpop.f32.mrf.mxu2 }
 0x7a4   :  { %11122 = vst [vmem:[#allocation73_spill] sm:$0xff] %v9273_v0  ;;  %v2264_v62 = vpack.c.bf16 %v5436_v46, %v9279_v23 }
 0x7a5   :  { %11124 = vst [vmem:[#allocation75_spill] sm:$0xff] %v9279_v23  ;;  %v9312_v22 = vpop.eup %5449 }
 0x7a6   :  { %11126 = vst [vmem:[#allocation77_spill] sm:$0xff] %v9294_v13 }
 0x7a7   :  { %11131 = vst [vmem:[#allocation80_spill] sm:$0xff] %v9312_v22 }
 0x7a8   :  { %v9277_v29 = vpop.permute.xlu0 %4045 }
 0x7ab   :  { %5095 = vmatmul.msk.bf16.gmra.mxu3 %vm92_vm0, %v3348_v60 }
 0x7ac   :  { %2349 = vmatmul.bf16.gmra.mxu0 %v2263_v27  ;;  %2403 = vmatmul.bf16.gmra.mxu2 %v2264_v62  ;;  %v11128_v27 = vld [vmem:[#allocation3_spill] sm:$0xff] }
 0x7ad   :  { %v2120_v62 = vsub.f32 %v11128_v27, %v8919_v39  ;;  %v2267_v39 = vpack.c.bf16 %v9312_v22, %v9248_v6  ;;  %v5053_v27 = vld [vmem:[%s10759_s0 + $0x100] sm:$0xff]  ;;  %v5054_v6 = vld [vmem:[%s10759_s0 + $0x108] sm:$0xff] }
 0x7af   :  { %v2183_v60 = vmul.f32 1.442695, %v2120_v62  ;;  %v3349_v62 = vpack.c.bf16 %v5054_v6, %v5053_v27 }
 0x7b0   :  { %v9292_v52 = vpop.permute.xlu0 %4043 }
 0x7b1   :  { %5451 = vpow2.f32 %v2183_v60 }
 0x7b2   :  { %v1697_v48 = vpop.f32.mrf.mxu0  ;;  %5453 = vpow2.f32 %v2185_v53 }
 0x7b3   :  { %5455 = vpow2.f32 %v2187_v12 }
 0x7b8   :  { %v9296_v58 = vpop.permute.xlu0 %4047 }
 0x7b9   :  { %v1751_v46 = vpop.f32.mrf.mxu2 }
 0x7ba   :  { %v9302_v1 = vadd.f32 %v1751_v46, %v1697_v48  ;;  %v9308_v21 = vpop.f32.mrf.mxu0  ;;  %v9314_v48 = vpop.eup %5451 }
 0x7bb   :  { %11129 = vst [vmem:[#allocation3_spill] sm:$0xff] %v9308_v21  ;;  %5096 = vmatmul.msk.bf16.gmra.mxu3 %vm92_vm0, %v3349_v62 }
 0x7bc   :  { %11127 = vst [vmem:[#allocation78_spill] sm:$0xff] %v9302_v1  ;;  %2354 = vmatmul.bf16.gmra.mxu0 %v2265_v45  ;;  %2408 = vmatmul.bf16.gmra.mxu2 %v2266_v17  ;;  %v2268_v45 = vpack.c.bf16 %v9314_v48, %v9250_v3  ;;  %v4054_v17 = vpop.permute.xlu2 %4053 }
 0x7bd   :  { %11132 = vst [vmem:[#allocation81_spill] sm:$0xff] %v9314_v48 }
 0x7c0   :  { %v4050_v13 = vpop.permute.xlu0 %4049 }
 0x7c1   :  { %v9310_v57 = vpop.f32.mrf.mxu2 }
 0x7c2   :  { %11130 = vst [vmem:[#allocation79_spill] sm:$0xff] %v9310_v57  ;;  %v1702_v54 = vpop.f32.mrf.mxu0 }
 0x7c8   :  { %v4052_v18 = vpop.permute.xlu0 %4051 }
 0x7c9   :  { %v1756_v10 = vpop.f32.mrf.mxu2 }
 0x7ca   :  { %v9320_v46 = vadd.f32 %v1756_v10, %v1702_v54  ;;  %v9332_v60 = vpop.f32.mrf.mxu0  ;;  %v3387_v54 = vpop.f32.mrf.mxu3 }
 0x7cb   :  { %11134 = vst [vmem:[#allocation83_spill] sm:$0xff] %v9332_v60  ;;  %v4273_v10 = vpop.permute.xlu2 %4272 }
 0x7cc   :  { %11133 = vst [vmem:[#allocation82_spill] sm:$0xff] %v9320_v46  ;;  %2359 = vmatmul.bf16.gmra.mxu0 %v2267_v39  ;;  %2413 = vmatmul.bf16.gmra.mxu2 %v2268_v45  ;;  %v9338_v39 = vpop.eup %5453  ;;  %v4337_v50 = vsel %vm1171_vm9, %v4273_v10, 0 }
 0x7cd   :  { %11136 = vst [vmem:[#allocation85_spill] sm:$0xff] %v9338_v39  ;;  %v9340_v28 = vpop.eup %5455  ;;  %v2269_v62 = vpack.c.bf16 %v9267_v61, %v9338_v39  ;;  %v5056_v61 = vld [vmem:[%s10759_s0 + $0x118] sm:$0xff] }
 0x7ce   :  { %11137 = vst [vmem:[#allocation86_spill] sm:$0xff] %v9340_v28  ;;  %v2270_v53 = vpack.c.bf16 %v9269_v24, %v9340_v28 }
 0x7d0   :  { %v4275_v3 = vpop.permute.xlu0 %4274 }
 0x7d1   :  { %v9335_v37 = vpop.f32.mrf.mxu2  ;;  %v4340_v31 = vsel %vm1171_vm9, %v4275_v3, 0 }
 0x7d2   :  { %11135 = vst [vmem:[#allocation84_spill] sm:$0xff] %v9335_v37  ;;  %4370 = vmatpush.bf16.xpose.msrb.mxu2 %v4340_v31  ;;  %v2330_v27 = vpop.f32.mrf.mxu0  ;;  %v3389_v12 = vpop.f32.mrf.mxu3  ;;  %v5055_v31 = vld [vmem:[%s10759_s0 + $0x110] sm:$0xff] }
 0x7d8   :  { %v4058_v45 = vpop.permute.xlu0 %4057 }
 0x7d9   :  { %v2384_v6 = vpop.f32.mrf.mxu2  ;;  %4091 = vmatpush.bf16.msra.mxu3 %v4058_v45  ;;  %v3350_v45 = vpack.c.bf16 %v5056_v61, %v5055_v31 }
 0x7da   :  { %v9345_v46 = vadd.f32 %v2384_v6, %v2330_v27  ;;  %4371 = vmatpush.bf16.xpose.msrb.mxu2 %v4337_v50  ;;  %v3392_v24 = vpop.f32.mrf.mxu3  ;;  %v2272_v50 = vpack.c.bf16 %v9129_v44, %v8993_v5  ;;  %v4293_v6 = vpop.permute.xlu2 %4292  ;;  %v9370_v5 = vpack.c.bf16 %v3389_v12, %v3387_v54 }
 0x7db   :  { %5097 = vmatmul.msk.bf16.gmra.mxu3 %vm92_vm0, %v3350_v45  ;;  %v4291_v44 = vpop.permute.xlu1 %4290 }
 0x7dc   :  { %11138 = vst [vmem:[#allocation87_spill] sm:$0xff] %v9345_v46  ;;  %2364 = vmatmul.bf16.gmra.mxu0 %v2269_v62  ;;  %2418 = vmatmul.bf16.gmra.mxu2 %v2270_v53  ;;  %v4367_v62 = vsel %vm1171_vm9, %v4293_v6, 0 }
 0x7dd   :  { %4092 = vmatpush.bf16.msra.mxu3 %v9117_v16  ;;  %v2271_v16 = vpack.c.bf16 %v9127_v38, %v8983_v26 }
 0x7e0   :  { %v4271_v3 = vpop.permute.xlu0 %4270 }
 0x7e1   :  { %4093 = vmatpush.bf16.msra.mxu3 %v4054_v17  ;;  %v4334_v10 = vsel %vm1171_vm9, %v4271_v3, 0  ;;  %v9363_v17 = vpop.f32.mrf.mxu0  ;;  %v9368_v26 = vpop.f32.mrf.mxu2 }
 0x7e2   :  { %4372 = vmatpush.bf16.xpose.msrb.mxu2 %v4334_v10  ;;  %v3394_v27 = vpop.f32.mrf.mxu3  ;;  %11139 = vst [vmem:[#allocation88_spill] sm:$0xff] %v9363_v17 }
 0x7e3   :  { %11140 = vst [vmem:[#allocation89_spill] sm:$0xff] %v9368_v26  ;;  %v9379_v31 = vpack.c.bf16 %v3394_v27, %v3392_v24 }
 0x7e5   :  { %4094 = vmatpush.bf16.msra.mxu3 %v4052_v18 }
 0x7e8   :  { %v4287_v49 = vpop.permute.xlu0 %4286 }
 0x7e9   :  { %4095 = vmatpush.bf16.msra.mxu3 %v4050_v13 }
 0x7ea   :  { %v3397_v13 = vpop.f32.mrf.mxu3 }
 0x7ec   :  { %2369 = vmatmul.bf16.gmra.mxu0 %v2271_v16  ;;  %2423 = vmatmul.bf16.gmra.mxu2 %v2272_v50 }
 0x7ed   :  { %4096 = vmatpush.bf16.msra.mxu3 %v9296_v58 }
 0x7f1   :  { %4097 = vmatpush.bf16.msra.mxu3 %v9277_v29  ;;  %v4364_v29 = vsel %vm1171_vm9, %v4291_v44, 0 }
 0x7f2   :  { %v3399_v18 = vpop.f32.mrf.mxu3 }
 0x7f5   :  { %4098 = vmatpush.bf16.msra.mxu3 %v9292_v52 }
 0x7f9   :  { %4423 = vmatpush.bf16.xpose.msrb.mxu3 %v4367_v62  ;;  %v2335_v38 = vpop.f32.mrf.mxu0  ;;  %v9389_v62 = vpack.c.bf16 %v3399_v18, %v3397_v13 }
 0x7fc   :  { %5114 = vmatmul.msk.bf16.vlgmr.msrb.gmra.mxu0 %vm1171_vm9, %v9370_v5  ;;  %5123 = vmatmul.msk.bf16.vlgmr.msra.gmra.mxu2 %vm1171_vm9, %v9370_v5 }
 0x7fe   :  { %v3402_v61 = vpop.f32.mrf.mxu3 }
 0x7ff   :  { %v2389_v58 = vpop.f32.mrf.mxu2 }
 0x800   :  { %v9377_v52 = vadd.f32 %v2389_v58, %v2335_v38 }
 0x801   :  { %4424 = vmatpush.bf16.xpose.msrb.mxu3 %v4364_v29  ;;  %v2337_v53 = vpop.f32.mrf.mxu0 }
 0x802   :  { %11141 = vst [vmem:[#allocation90_spill] sm:$0xff] %v9377_v52 }
 0x806   :  { %v3404_v50 = vpop.f32.mrf.mxu3 }
 0x807   :  { %v2391_v3 = vpop.f32.mrf.mxu2 }
 0x808   :  { %v9381_v54 = vadd.f32 %v2391_v3, %v2337_v53  ;;  %v9399_v3 = vpack.c.bf16 %v3404_v50, %v3402_v61 }
 0x809   :  { %v2340_v12 = vpop.f32.mrf.mxu0 }
 0x80a   :  { %11142 = vst [vmem:[#allocation91_spill] sm:$0xff] %v9381_v54 }
 0x80c   :  { %5115 = vmatmul.msk.bf16.gmra.mxu0 %vm1171_vm9, %v9379_v31  ;;  %5124 = vmatmul.msk.bf16.gmra.mxu2 %vm1171_vm9, %v9379_v31 }
 0x80e   :  { %v3407_v38 = vpop.f32.mrf.mxu3 }
 0x80f   :  { %v2394_v10 = vpop.f32.mrf.mxu2 }
 0x810   :  { %v9387_v45 = vadd.f32 %v2394_v10, %v2340_v12 }
 0x811   :  { %v2342_v16 = vpop.f32.mrf.mxu0 }
 0x812   :  { %11143 = vst [vmem:[#allocation92_spill] sm:$0xff] %v9387_v45 }
 0x816   :  { %v3409_v12 = vpop.f32.mrf.mxu3 }
 0x817   :  { %v2396_v6 = vpop.f32.mrf.mxu2  ;;  %v9409_v57 = vpack.c.bf16 %v3409_v12, %v3407_v38 }
 0x818   :  { %v9391_v24 = vadd.f32 %v2396_v6, %v2342_v16 }
 0x819   :  { %v2345_v27 = vpop.f32.mrf.mxu0 }
 0x81a   :  { %11144 = vst [vmem:[#allocation93_spill] sm:$0xff] %v9391_v24 }
 0x81c   :  { %5116 = vmatmul.msk.bf16.gmra.mxu0 %vm1171_vm9, %v9389_v62  ;;  %5125 = vmatmul.msk.bf16.gmra.mxu2 %vm1171_vm9, %v9389_v62 }
 0x81f   :  { %v2399_v44 = vpop.f32.mrf.mxu2 }
 0x820   :  { %v9397_v29 = vadd.f32 %v2399_v44, %v2345_v27  ;;  %v3412_v27 = vpop.f32.mrf.mxu3 }
 0x821   :  { %v2347_v58 = vpop.f32.mrf.mxu0 }
 0x822   :  { %11145 = vst [vmem:[#allocation94_spill] sm:$0xff] %v9397_v29 }
 0x827   :  { %v2401_v53 = vpop.f32.mrf.mxu2 }
 0x828   :  { %v9401_v13 = vadd.f32 %v2401_v53, %v2347_v58  ;;  %v3414_v58 = vpop.f32.mrf.mxu3 }
 0x829   :  { %v2350_v18 = vpop.f32.mrf.mxu0  ;;  %v9419_v60 = vpack.c.bf16 %v3414_v58, %v3412_v27 }
 0x82a   :  { %11146 = vst [vmem:[#allocation95_spill] sm:$0xff] %v9401_v13 }
 0x82c   :  { %5117 = vmatmul.msk.bf16.gmra.mxu0 %vm1171_vm9, %v9399_v3  ;;  %5126 = vmatmul.msk.bf16.gmra.mxu2 %vm1171_vm9, %v9399_v3 }
 0x82f   :  { %v2404_v10 = vpop.f32.mrf.mxu2 }
 0x830   :  { %v9407_v16 = vadd.f32 %v2404_v10, %v2350_v18  ;;  %v3417_v10 = vpop.f32.mrf.mxu3 }
 0x831   :  { %v2352_v6 = vpop.f32.mrf.mxu0 }
 0x832   :  { %11147 = vst [vmem:[#allocation96_spill] sm:$0xff] %v9407_v16  ;;  %v11161_v16 = vld [vmem:[#allocation7_spill] sm:$0xff] }
 0x837   :  { %v2406_v44 = vpop.f32.mrf.mxu2 }
 0x838   :  { %v9411_v61 = vadd.f32 %v2406_v44, %v2352_v6  ;;  %v3419_v44 = vpop.f32.mrf.mxu3 }
 0x839   :  { %v2355_v50 = vpop.f32.mrf.mxu0 }
 0x83a   :  { %11148 = vst [vmem:[#allocation97_spill] sm:$0xff] %v9411_v61  ;;  %v9433_v61 = vpack.c.bf16 %v3419_v44, %v3417_v10 }
 0x83c   :  { %5118 = vmatmul.msk.bf16.gmra.mxu0 %vm1171_vm9, %v9409_v57  ;;  %5127 = vmatmul.msk.bf16.gmra.mxu2 %vm1171_vm9, %v9409_v57 }
 0x83f   :  { %v2409_v53 = vpop.f32.mrf.mxu2 }
 0x840   :  { %v9417_v21 = vadd.f32 %v2409_v53, %v2355_v50  ;;  %v3422_v27 = vpop.f32.mrf.mxu3 }
 0x841   :  { %v2357_v18 = vpop.f32.mrf.mxu0 }
 0x842   :  { %11149 = vst [vmem:[#allocation98_spill] sm:$0xff] %v9417_v21 }
 0x847   :  { %v2411_v37 = vpop.f32.mrf.mxu2 }
 0x848   :  { %v9421_v38 = vadd.f32 %v2411_v37, %v2357_v18 }
 0x849   :  { %v2360_v12 = vpop.f32.mrf.mxu0 }
 0x84a   :  { %11150 = vst [vmem:[#allocation99_spill] sm:$0xff] %v9421_v38 }
 0x84c   :  { %5119 = vmatmul.msk.bf16.gmra.mxu0 %vm1171_vm9, %v9419_v60  ;;  %5128 = vmatmul.msk.bf16.gmra.mxu2 %vm1171_vm9, %v9419_v60 }
 0x84f   :  { %v2414_v6 = vpop.f32.mrf.mxu2 }
 0x850   :  { %v9427_v1 = vadd.f32 %v2414_v6, %v2360_v12  ;;  %v3424_v12 = vpop.f32.mrf.mxu3 }
 0x851   :  { %v9429_v50 = vpop.f32.mrf.mxu0 }
 0x852   :  { %11151 = vst [vmem:[#allocation100_spill] sm:$0xff] %v9427_v1 }
 0x853   :  { %11152 = vst [vmem:[#allocation101_spill] sm:$0xff] %v9429_v50 }
 0x857   :  { %v9431_v53 = vpop.f32.mrf.mxu2 }
 0x858   :  { %11153 = vst [vmem:[#allocation102_spill] sm:$0xff] %v9431_v53  ;;  %v9445_v53 = vpack.c.bf16 %v3424_v12, %v3422_v27 }
 0x859   :  { %v2365_v37 = vpop.f32.mrf.mxu0 }
 0x85c   :  { %5120 = vmatmul.msk.bf16.gmra.mxu0 %vm1171_vm9, %v9433_v61  ;;  %5129 = vmatmul.msk.bf16.gmra.mxu2 %vm1171_vm9, %v9433_v61 }
 0x85e   :  { %v3427_v10 = vpop.f32.mrf.mxu3 }
 0x85f   :  { %v2419_v58 = vpop.f32.mrf.mxu2 }
 0x860   :  { %v9439_v18 = vadd.f32 %v2419_v58, %v2365_v37 }
 0x861   :  { %v9441_v38 = vpop.f32.mrf.mxu0 }
 0x862   :  { %11154 = vst [vmem:[#allocation103_spill] sm:$0xff] %v9439_v18 }
 0x863   :  { %11155 = vst [vmem:[#allocation104_spill] sm:$0xff] %v9441_v38 }
 0x866   :  { %v3429_v58 = vpop.f32.mrf.mxu3 }
 0x867   :  { %v9443_v6 = vpop.f32.mrf.mxu2 }
 0x868   :  { %11156 = vst [vmem:[#allocation105_spill] sm:$0xff] %v9443_v6  ;;  %v9457_v6 = vpack.c.bf16 %v3429_v58, %v3427_v10 }
 0x869   :  { %v2370_v1 = vpop.f32.mrf.mxu0 }
 0x86c   :  { %5121 = vmatmul.msk.bf16.gmra.mxu0 %vm1171_vm9, %v9445_v53  ;;  %5130 = vmatmul.msk.bf16.gmra.mxu2 %vm1171_vm9, %v9445_v53 }
 0x86f   :  { %v2424_v44 = vpop.f32.mrf.mxu2 }
 0x870   :  { %v9451_v50 = vadd.f32 %v2424_v44, %v2370_v1  ;;  %v11160_v1 = vld [vmem:[#allocation19_spill] sm:$0xff] }
 0x871   :  { %v9453_v37 = vpop.f32.mrf.mxu0 }
 0x872   :  { %11157 = vst [vmem:[#allocation106_spill] sm:$0xff] %v9451_v50 }
 0x873   :  { %11158 = vst [vmem:[#allocation107_spill] sm:$0xff] %v9453_v37 }
 0x877   :  { %v9455_v38 = vpop.f32.mrf.mxu2 }
 0x878   :  { %11159 = vst [vmem:[#allocation108_spill] sm:$0xff] %v9455_v38 }
 0x879   :  { %v3694_v18 = vpop.f32.mrf.mxu0 }
 0x87a   :  { %v9464_v12 = vadd.f32 %v3694_v18, %v8096_v33 }
 0x87c   :  { %5122 = vmatmul.msk.bf16.gmra.mxu0 %vm1171_vm9, %v9457_v6  ;;  %5131 = vmatmul.msk.bf16.gmra.mxu2 %vm1171_vm9, %v9457_v6 }
 0x87f   :  { %v3748_v27 = vpop.f32.mrf.mxu2 }
 0x880   :  { %v9467_v44 = vadd.f32 %v3748_v27, %v11160_v1 }
 0x881   :  { %v3696_v50 = vpop.f32.mrf.mxu0 }
 0x882   :  { %v3793_v38 = vmax.f32 %v9464_v12, %v9467_v44  ;;  %v9472_v58 = vadd.f32 %v3696_v50, %v8096_v33 }
 0x884   :  { %3794 = vmax.xlane.f32.xlu1 %v3793_v38 }
 0x887   :  { %v3750_v10 = vpop.f32.mrf.mxu2 }
 0x888   :  { %v9475_v37 = vadd.f32 %v3750_v10, %v11160_v1 }
 0x889   :  { %v3699_v21 = vpop.f32.mrf.mxu0 }
 0x88a   :  { %v3796_v18 = vmax.f32 %v9472_v58, %v9475_v37  ;;  %v9480_v27 = vadd.f32 %v3699_v21, %v8096_v33 }
 0x88c   :  { %3797 = vmax.xlane.f32.xlu2 %v3796_v18 }
 0x88f   :  { %v3753_v56 = vpop.f32.mrf.mxu2 }
 0x890   :  { %v9483_v32 = vadd.f32 %v3753_v56, %v11160_v1 }
 0x891   :  { %v3701_v38 = vpop.f32.mrf.mxu0 }
 0x892   :  { %v3799_v50 = vmax.f32 %v9480_v27, %v9483_v32  ;;  %v9519_v39 = vadd.f32 %v3701_v38, %v8096_v33 }
 0x894   :  { %3800 = vmax.xlane.f32.xlu0 %v3799_v50 }
 0x897   :  { %v3755_v29 = vpop.f32.mrf.mxu2 }
 0x898   :  { %v9514_v28 = vadd.f32 %v3755_v29, %v11160_v1 }
 0x899   :  { %v3704_v10 = vpop.f32.mrf.mxu0 }
 0x89a   :  { %v9490_v13 = vadd.f32 %v3704_v10, %v8096_v33 }
 0x89d   :  { %4288 = vrot.lane.b32.xlu1 %v11161_v16, %s5756_s11 }
 0x89f   :  { %v3758_v18 = vpop.f32.mrf.mxu2 }
 0x8a0   :  { %v9493_v21 = vadd.f32 %v3758_v18, %v11160_v1 }
 0x8a1   :  { %v3706_v54 = vpop.f32.mrf.mxu0 }
 0x8a2   :  { %v3805_v56 = vmax.f32 %v9490_v13, %v9493_v21  ;;  %v9527_v22 = vadd.f32 %v3706_v54, %v8096_v33 }
 0x8a4   :  { %3806 = vmax.xlane.f32.xlu2 %v3805_v56 }
 0x8a7   :  { %v3760_v24 = vpop.f32.mrf.mxu2 }
 0x8a8   :  { %4268 = vrot.lane.b32.xlu0 %v9121_v51, %s5756_s11 }
 0x8a9   :  { %v3709_v50 = vpop.f32.mrf.mxu0 }
 0x8aa   :  { %v9500_v45 = vadd.f32 %v3709_v50, %v8096_v33 }
 0x8af   :  { %v3763_v46 = vpop.f32.mrf.mxu2 }
 0x8b0   :  { %v9503_v10 = vadd.f32 %v3763_v46, %v11160_v1 }
 0x8b1   :  { %v3711_v52 = vpop.f32.mrf.mxu0 }
 0x8b2   :  { %v3811_v18 = vmax.f32 %v9500_v45, %v9503_v10  ;;  %v9543_v54 = vadd.f32 %v3711_v52, %v8096_v33 }
 0x8b4   :  { %3812 = vmax.xlane.f32.xlu2 %v3811_v18  ;;  %v3802_v18 = vmax.f32 %v9519_v39, %v9514_v28 }
 0x8b7   :  { %v3765_v26 = vpop.f32.mrf.mxu2 }
 0x8b9   :  { %v3714_v17 = vpop.f32.mrf.mxu0 }
 0x8ba   :  { %v9508_v56 = vadd.f32 %v3714_v17, %v8096_v33 }
 0x8bf   :  { %v3768_v0 = vpop.f32.mrf.mxu2 }
 0x8c0   :  { %v9511_v4 = vadd.f32 %v3768_v0, %v11160_v1  ;;  %v9524_v0 = vadd.f32 %v3760_v24, %v11160_v1 }
 0x8c1   :  { %v3716_v50 = vpop.f32.mrf.mxu0 }
 0x8c2   :  { %v3817_v46 = vmax.f32 %v9508_v56, %v9511_v4  ;;  %v3808_v29 = vmax.f32 %v9527_v22, %v9524_v0  ;;  %v9559_v52 = vadd.f32 %v3716_v50, %v8096_v33 }
 0x8c4   :  { %3818 = vmax.xlane.f32.xlu2 %v3817_v46 }
 0x8c7   :  { %v3770_v17 = vpop.f32.mrf.mxu2  ;;  %3803 = vmax.xlane.f32.xlu1 %v3802_v18  ;;  %v9538_v18 = vadd.f32 %v3765_v26, %v11160_v1 }
 0x8c8   :  { %v9554_v26 = vadd.f32 %v3770_v17, %v11160_v1 }
 0x8c9   :  { %v3719_v48 = vpop.f32.mrf.mxu0 }
 0x8ca   :  { %v9532_v11 = vadd.f32 %v3719_v48, %v8096_v33  ;;  %v3814_v48 = vmax.f32 %v9543_v54, %v9538_v18 }
 0x8cf   :  { %v3773_v38 = vpop.f32.mrf.mxu2  ;;  %3809 = vmax.xlane.f32.xlu1 %v3808_v29 }
 0x8d0   :  { %v9535_v46 = vadd.f32 %v3773_v38, %v11160_v1 }
 0x8d1   :  { %v3721_v19 = vpop.f32.mrf.mxu0 }
 0x8d2   :  { %v3823_v24 = vmax.f32 %v9532_v11, %v9535_v46  ;;  %v9548_v29 = vadd.f32 %v3721_v19, %v8096_v33 }
 0x8d4   :  { %3824 = vmax.xlane.f32.xlu2 %v3823_v24 }
 0x8d7   :  { %v3775_v47 = vpop.f32.mrf.mxu2  ;;  %3815 = vmax.xlane.f32.xlu1 %v3814_v48  ;;  %v3820_v48 = vmax.f32 %v9559_v52, %v9554_v26 }
 0x8d8   :  { %v9551_v38 = vadd.f32 %v3775_v47, %v11160_v1 }
 0x8d9   :  { %v3724_v24 = vpop.f32.mrf.mxu0 }
 0x8da   :  { %v3826_v23 = vmax.f32 %v9548_v29, %v9551_v38  ;;  %v9564_v19 = vadd.f32 %v3724_v24, %v8096_v33 }
 0x8dc   :  { %3827 = vmax.xlane.f32.xlu0 %v3826_v23 }
 0x8df   :  { %v3778_v42 = vpop.f32.mrf.mxu2  ;;  %3821 = vmax.xlane.f32.xlu1 %v3820_v48  ;;  %v11162_v48 = vld [vmem:[#allocation56_spill] sm:$0xff] }
 0x8e0   :  { %v9567_v47 = vadd.f32 %v3778_v42, %v11160_v1 }
 0x8e1   :  { %v3726_v20 = vpop.f32.mrf.mxu0 }
 0x8e2   :  { %v3829_v17 = vmax.f32 %v9564_v19, %v9567_v47  ;;  %v9572_v43 = vadd.f32 %v3726_v20, %v8096_v33 }
 0x8e4   :  { %3830 = vmax.xlane.f32.xlu0 %v3829_v17 }
 0x8e7   :  { %v3780_v50 = vpop.f32.mrf.mxu2 }
 0x8e8   :  { %v9575_v23 = vadd.f32 %v3780_v50, %v11160_v1 }
 0x8e9   :  { %v3729_v2 = vpop.f32.mrf.mxu0 }
 0x8ea   :  { %v3832_v24 = vmax.f32 %v9572_v43, %v9575_v23 }
 0x8ec   :  { %3833 = vmax.xlane.f32.xlu0 %v3832_v24  ;;  %4282 = vrot.lane.b32.xlu2 %v11162_v48, %s5756_s11 }
 0x8f4   :  { %4264 = vrot.lane.b32.xlu2 %v9050_v63, %s5756_s11 }
 0x8f7   :  { %v3795_v42 = vpop.xlane.xlu1 %3794 }
 0x8f8   :  { %v3847_v17 = vsub.f32 %v9464_v12, %v3795_v42  ;;  %v3848_v14 = vsub.f32 %v9467_v44, %v3795_v42  ;;  %4266 = vrot.lane.b32.xlu1 %v9101_v41, %s5756_s11  ;;  %v11164_v12 = vld [vmem:[#allocation54_spill] sm:$0xff] }
 0x8fa   :  { %v3883_v20 = vmul.f32 1.442695, %v3847_v17  ;;  %v3885_v50 = vmul.f32 1.442695, %v3848_v14  ;;  %v3783_v14 = vpop.f32.mrf.mxu2 }
 0x8fc   :  { %5457 = vpow2.f32 %v3883_v20 }
 0x8fd   :  { %5459 = vpow2.f32 %v3885_v50 }
 0x8ff   :  { %v3798_v24 = vpop.xlane.xlu2 %3797 }
 0x900   :  { %v3849_v36 = vsub.f32 %v9472_v58, %v3798_v24  ;;  %v3850_v9 = vsub.f32 %v9475_v37, %v3798_v24  ;;  %4284 = vrot.lane.b32.xlu0 %v11163_v7, %s5756_s11  ;;  %4280 = vrot.lane.b32.xlu1 %v11164_v12, %s5756_s11 }
 0x902   :  { %v5458_v44 = vpop.eup %5457  ;;  %v3887_v42 = vmul.f32 1.442695, %v3849_v36  ;;  %v3889_v15 = vmul.f32 1.442695, %v3850_v9  ;;  %v3731_v36 = vpop.f32.mrf.mxu0 }
 0x903   :  { %v9593_v17 = vpop.eup %5459 }
 0x904   :  { %5461 = vpow2.f32 %v3887_v42  ;;  %v9596_v20 = vadd.f32 %v9593_v17, %v5458_v44  ;;  %v3785_v42 = vpop.f32.mrf.mxu2 }
 0x905   :  { %5463 = vpow2.f32 %v3889_v15 }
 0x906   :  { %11165 = vst [vmem:[#allocation7_spill] sm:$0xff] %v9596_v20 }
 0x907   :  { %v3801_v58 = vpop.xlane.xlu0 %3800 }
 0x908   :  { %v3851_v37 = vsub.f32 %v9480_v27, %v3801_v58  ;;  %v3852_v50 = vsub.f32 %v9483_v32, %v3801_v58 }
 0x90a   :  { %v5462_v24 = vpop.eup %5461  ;;  %v3891_v25 = vmul.f32 1.442695, %v3851_v37  ;;  %v3893_v8 = vmul.f32 1.442695, %v3852_v50 }
 0x90b   :  { %v9600_v63 = vpop.eup %5463  ;;  %v4009_v9 = vpack.c.bf16 %v5462_v24, %v5458_v44  ;;  %v9615_v44 = vadd.f32 %v3729_v2, %v8096_v33 }
 0x90c   :  { %5465 = vpow2.f32 %v3891_v25  ;;  %v9603_v51 = vadd.f32 %v9600_v63, %v5462_v24  ;;  %v3734_v25 = vpop.f32.mrf.mxu0  ;;  %v3788_v37 = vpop.f32.mrf.mxu2 }
 0x90d   :  { %5467 = vpow2.f32 %v3893_v8  ;;  %4099 = vmatmul.bf16.vlgmr.msra.gmra.mxu3 %v4009_v9  ;;  %v9618_v8 = vadd.f32 %v3783_v14, %v11160_v1  ;;  %v4358_v9 = vsel %vm1171_vm9, %v4287_v49, 0  ;;  %v9627_v14 = vadd.f32 %v3734_v25, %v8096_v33 }
 0x90e   :  { %11166 = vst [vmem:[#allocation56_spill] sm:$0xff] %v9603_v51  ;;  %v9642_v25 = vadd.f32 %v3785_v42, %v11160_v1 }
 0x90f   :  { %v4289_v15 = vpop.permute.xlu1 %4288 }
 0x910   :  { %v4361_v20 = vsel %vm1171_vm9, %v4289_v15, 0 }
 0x911   :  { %4425 = vmatpush.bf16.xpose.msrb.mxu3 %v4361_v20 }
 0x912   :  { %v9606_v27 = vpop.eup %5465 }
 0x913   :  { %v9608_v32 = vpop.eup %5467 }
 0x914   :  { %11167 = vst [vmem:[#allocation9_spill] sm:$0xff] %v9608_v32  ;;  %v9612_v58 = vadd.f32 %v9608_v32, %v9606_v27 }
 0x916   :  { %11168 = vst [vmem:[#allocation54_spill] sm:$0xff] %v9612_v58  ;;  %v3835_v58 = vmax.f32 %v9615_v44, %v9618_v8 }
 0x917   :  { %v3807_v50 = vpop.xlane.xlu2 %3806 }
 0x918   :  { %v3855_v24 = vsub.f32 %v9490_v13, %v3807_v50  ;;  %v3856_v20 = vsub.f32 %v9493_v21, %v3807_v50  ;;  %v9630_v13 = vadd.f32 %v3788_v37, %v11160_v1  ;;  %v3736_v21 = vpop.f32.mrf.mxu0  ;;  %v3790_v50 = vpop.f32.mrf.mxu2 }
 0x919   :  { %4426 = vmatpush.bf16.xpose.msrb.mxu3 %v4358_v9  ;;  %v9645_v37 = vadd.f32 %v3736_v21, %v8096_v33 }
 0x91a   :  { %v3899_v15 = vmul.f32 1.442695, %v3855_v24  ;;  %v3901_v51 = vmul.f32 1.442695, %v3856_v20  ;;  %v4269_v32 = vpop.permute.xlu0 %4268  ;;  %v3841_v49 = vmax.f32 %v9627_v14, %v9630_v13 }
 0x91b   :  { %v4331_v2 = vsel %vm1171_vm9, %v4269_v32, 0  ;;  %v9639_v32 = vadd.f32 %v3731_v36, %v8096_v33 }
 0x91c   :  { %5469 = vpow2.f32 %v3899_v15  ;;  %4373 = vmatpush.bf16.xpose.msrb.mxu2 %v4331_v2 }
 0x91d   :  { %5471 = vpow2.f32 %v3901_v51  ;;  %3836 = vmax.xlane.f32.xlu2 %v3835_v58  ;;  %v9648_v51 = vadd.f32 %v3790_v50, %v11160_v1  ;;  %v3838_v15 = vmax.f32 %v9639_v32, %v9642_v25 }
 0x91f   :  { %v3844_v36 = vmax.f32 %v9645_v37, %v9648_v51 }
 0x922   :  { %v9634_v24 = vpop.eup %5469 }
 0x923   :  { %v9636_v20 = vpop.eup %5471 }
 0x924   :  { %11169 = vst [vmem:[#allocation109_spill] sm:$0xff] %v9636_v20  ;;  %v9652_v58 = vadd.f32 %v9636_v20, %v9634_v24 }
 0x925   :  { %3842 = vmax.xlane.f32.xlu2 %v3841_v49 }
 0x926   :  { %11170 = vst [vmem:[#allocation110_spill] sm:$0xff] %v9652_v58 }
 0x927   :  { %v3813_v9 = vpop.xlane.xlu2 %3812 }
 0x928   :  { %v3859_v42 = vsub.f32 %v9500_v45, %v3813_v9  ;;  %v3860_v2 = vsub.f32 %v9503_v10, %v3813_v9 }
 0x92a   :  { %v3907_v21 = vmul.f32 1.442695, %v3859_v42  ;;  %v3909_v33 = vmul.f32 1.442695, %v3860_v2  ;;  %3845 = vmax.xlane.f32.xlu0 %v3844_v36  ;;  %3839 = vmax.xlane.f32.xlu1 %v3838_v15 }
 0x92c   :  { %5473 = vpow2.f32 %v3907_v21 }
 0x92d   :  { %5475 = vpow2.f32 %v3909_v33 }
 0x932   :  { %v9660_v50 = vpop.eup %5473 }
 0x933   :  { %v9662_v49 = vpop.eup %5475 }
 0x934   :  { %v9666_v58 = vadd.f32 %v9662_v49, %v9660_v50 }
 0x937   :  { %v3819_v1 = vpop.xlane.xlu2 %3818 }
 0x938   :  { %v3863_v20 = vsub.f32 %v9508_v56, %v3819_v1  ;;  %v3864_v45 = vsub.f32 %v9511_v4, %v3819_v1 }
 0x93a   :  { %v3915_v10 = vmul.f32 1.442695, %v3863_v20  ;;  %v3917_v9 = vmul.f32 1.442695, %v3864_v45  ;;  %v3804_v42 = vpop.xlane.xlu1 %3803  ;;  %v11171_v20 = vld [vmem:[#allocation38_spill] sm:$0xff] }
 0x93b   :  { %v3853_v15 = vsub.f32 %v9519_v39, %v3804_v42  ;;  %v3854_v33 = vsub.f32 %v9514_v28, %v3804_v42 }
 0x93c   :  { %5477 = vpow2.f32 %v3915_v10 }
 0x93d   :  { %5479 = vpow2.f32 %v3917_v9  ;;  %v3895_v36 = vmul.f32 1.442695, %v3853_v15  ;;  %v3897_v2 = vmul.f32 1.442695, %v3854_v33  ;;  %4262 = vrot.lane.b32.xlu2 %v9067_v59, %s5756_s11 }
 0x93e   :  { %4244 = vrot.lane.b32.xlu0 %v9370_v5, %s5756_s11 }
 0x93f   :  { %5481 = vpow2.f32 %v3895_v36 }
 0x940   :  { %5483 = vpow2.f32 %v3897_v2 }
 0x942   :  { %v9676_v4 = vpop.eup %5477  ;;  %v3810_v1 = vpop.xlane.xlu1 %3809 }
 0x943   :  { %v9678_v56 = vpop.eup %5479  ;;  %v3857_v39 = vsub.f32 %v9527_v22, %v3810_v1  ;;  %v3858_v28 = vsub.f32 %v9524_v0, %v3810_v1  ;;  %4278 = vrot.lane.b32.xlu1 %v11171_v20, %s5756_s11 }
 0x944   :  { %v9686_v21 = vadd.f32 %v9678_v56, %v9676_v4 }
 0x945   :  { %v5482_v45 = vpop.eup %5481  ;;  %v3903_v5 = vmul.f32 1.442695, %v3857_v39  ;;  %v3905_v10 = vmul.f32 1.442695, %v3858_v28  ;;  %4246 = vrot.lane.b32.xlu2 %v9379_v31, %s5756_s11 }
 0x946   :  { %v9690_v9 = vpop.eup %5483  ;;  %4248 = vrot.lane.b32.xlu0 %v9389_v62, %s5756_s11  ;;  %v4011_v22 = vpack.c.bf16 %v5482_v45, %v9606_v27  ;;  %v11172_v27 = vld [vmem:[#allocation8_spill] sm:$0xff] }
 0x947   :  { %5485 = vpow2.f32 %v3903_v5  ;;  %v3825_v0 = vpop.xlane.xlu2 %3824  ;;  %v9696_v42 = vadd.f32 %v9690_v9, %v5482_v45 }
 0x948   :  { %5487 = vpow2.f32 %v3905_v10  ;;  %v3867_v15 = vsub.f32 %v9532_v11, %v3825_v0  ;;  %v3868_v33 = vsub.f32 %v9535_v46, %v3825_v0  ;;  %4104 = vmatmul.bf16.gmra.mxu3 %v4011_v22  ;;  %v11173_v11 = vld [vmem:[#allocation43_spill] sm:$0xff] }
 0x94a   :  { %v3923_v36 = vmul.f32 1.442695, %v3867_v15  ;;  %v3925_v31 = vmul.f32 1.442695, %v3868_v33  ;;  %v3816_v2 = vpop.xlane.xlu1 %3815 }
 0x94b   :  { %v3861_v1 = vsub.f32 %v9543_v54, %v3816_v2  ;;  %v3862_v62 = vsub.f32 %v9538_v18, %v3816_v2  ;;  %4073 = vrot.lane.b32.xlu1 %v11172_v27, %s5757_s23 }
 0x94c   :  { %5489 = vpow2.f32 %v3923_v36 }
 0x94d   :  { %v5486_v39 = vpop.eup %5485  ;;  %5491 = vpow2.f32 %v3925_v31  ;;  %v3911_v28 = vmul.f32 1.442695, %v3861_v1  ;;  %v3913_v45 = vmul.f32 1.442695, %v3862_v62  ;;  %4071 = vrot.lane.b32.xlu2 %v11173_v11, %s5757_s23 }
 0x94e   :  { %v9706_v46 = vpop.eup %5487  ;;  %4063 = vrot.lane.b32.xlu0 %v11162_v48, %s5757_s23 }
 0x94f   :  { %5493 = vpow2.f32 %v3911_v28  ;;  %v3828_v54 = vpop.xlane.xlu0 %3827  ;;  %v9711_v18 = vadd.f32 %v9706_v46, %v5486_v39 }
 0x950   :  { %5495 = vpow2.f32 %v3913_v45  ;;  %v3869_v5 = vsub.f32 %v9548_v29, %v3828_v54  ;;  %v3870_v10 = vsub.f32 %v9551_v38, %v3828_v54 }
 0x952   :  { %v9715_v22 = vpop.eup %5489  ;;  %v3927_v0 = vmul.f32 1.442695, %v3869_v5  ;;  %v3929_v15 = vmul.f32 1.442695, %v3870_v10  ;;  %v3822_v33 = vpop.xlane.xlu1 %3821 }
 0x953   :  { %v9717_v36 = vpop.eup %5491  ;;  %v3865_v31 = vsub.f32 %v9559_v52, %v3822_v33  ;;  %v3866_v2 = vsub.f32 %v9554_v26, %v3822_v33  ;;  %4069 = vrot.lane.b32.xlu1 %v11161_v16, %s5757_s23  ;;  %v4013_v26 = vpack.c.bf16 %v5486_v39, %v9634_v24  ;;  %v4283_v24 = vpop.permute.xlu2 %4282 }
 0x954   :  { %5497 = vpow2.f32 %v3927_v0  ;;  %v9725_v29 = vadd.f32 %v9717_v36, %v9715_v22 }
 0x955   :  { %v5494_v38 = vpop.eup %5493  ;;  %5499 = vpow2.f32 %v3929_v15  ;;  %v3919_v1 = vmul.f32 1.442695, %v3865_v31  ;;  %v3921_v62 = vmul.f32 1.442695, %v3866_v2  ;;  %4067 = vrot.lane.b32.xlu2 %v8897_v30, %s5757_s23 }
 0x956   :  { %v9729_v28 = vpop.eup %5495  ;;  %4059 = vrot.lane.b32.xlu0 %v11171_v20, %s5757_s23 }
 0x957   :  { %5501 = vpow2.f32 %v3919_v1  ;;  %v3831_v52 = vpop.xlane.xlu0 %3830  ;;  %v4016_v45 = vpack.c.bf16 %v9729_v28, %v9662_v49  ;;  %v9737_v54 = vadd.f32 %v9729_v28, %v5494_v38 }
 0x958   :  { %5503 = vpow2.f32 %v3921_v62  ;;  %v3871_v5 = vsub.f32 %v9564_v19, %v3831_v52  ;;  %v3872_v10 = vsub.f32 %v9567_v47, %v3831_v52  ;;  %4109 = vmatmul.bf16.gmra.mxu3 %v4013_v26 }
 0x95a   :  { %v9741_v0 = vpop.eup %5497  ;;  %v3931_v15 = vmul.f32 1.442695, %v3871_v5  ;;  %v3933_v33 = vmul.f32 1.442695, %v3872_v10 }
 0x95b   :  { %v9743_v31 = vpop.eup %5499  ;;  %4065 = vrot.lane.b32.xlu1 %v11163_v7, %s5757_s23 }
 0x95c   :  { %5505 = vpow2.f32 %v3931_v15  ;;  %v9751_v39 = vadd.f32 %v9743_v31, %v9741_v0  ;;  %v11192_v28 = vpack.c.bf16 %v9743_v31, %v9717_v36 }
 0x95d   :  { %v5502_v19 = vpop.eup %5501  ;;  %5507 = vpow2.f32 %v3933_v33  ;;  %4061 = vrot.lane.b32.xlu2 %v11164_v12, %s5757_s23 }
 0x95e   :  { %v9755_v47 = vpop.eup %5503  ;;  %4256 = vrot.lane.b32.xlu0 %v9433_v61, %s5756_s11 }
 0x95f   :  { %v3834_v2 = vpop.xlane.xlu0 %3833  ;;  %v4018_v1 = vpack.c.bf16 %v9755_v47, %v9678_v56  ;;  %v9762_v62 = vadd.f32 %v9755_v47, %v5502_v19 }
 0x960   :  { %v3873_v26 = vsub.f32 %v9572_v43, %v3834_v2  ;;  %v3874_v52 = vsub.f32 %v9575_v23, %v3834_v2  ;;  %v4015_v43 = vpack.c.bf16 %v5494_v38, %v9660_v50 }
 0x962   :  { %v5506_v5 = vpop.eup %5505  ;;  %v3935_v10 = vmul.f32 1.442695, %v3873_v26  ;;  %v3937_v15 = vmul.f32 1.442695, %v3874_v52 }
 0x963   :  { %v9766_v33 = vpop.eup %5507  ;;  %4250 = vrot.lane.b32.xlu1 %v9399_v3, %s5756_s11 }
 0x964   :  { %5509 = vpow2.f32 %v3935_v10  ;;  %v9771_v61 = vadd.f32 %v9766_v33, %v5506_v5 }
 0x965   :  { %5511 = vpow2.f32 %v3937_v15  ;;  %4252 = vrot.lane.b32.xlu2 %v9409_v57, %s5756_s11 }
 0x966   :  { %4725 = vrot.lane.b32.xlu0 %v8768_v35, %s5758_s2  ;;  %v4265_v35 = vpop.permute.xlu2 %4264 }
 0x967   :  { %v4325_v38 = vsel %vm1171_vm9, %v4265_v35, 0 }
 0x968   :  { %4114 = vmatmul.bf16.gmra.mxu3 %v4015_v43 }
 0x96a   :  { %v5510_v23 = vpop.eup %5509  ;;  %v4267_v2 = vpop.permute.xlu1 %4266 }
 0x96b   :  { %v9778_v26 = vpop.eup %5511  ;;  %v4328_v3 = vsel %vm1171_vm9, %v4267_v2, 0  ;;  %4254 = vrot.lane.b32.xlu1 %v9419_v60, %s5756_s11  ;;  %v4017_v60 = vpack.c.bf16 %v5502_v19, %v9676_v4 }
 0x96c   :  { %4374 = vmatpush.bf16.xpose.msrb.mxu2 %v4328_v3  ;;  %v4022_v57 = vpack.c.bf16 %v9778_v26, %v9766_v33  ;;  %v9786_v52 = vadd.f32 %v9778_v26, %v5510_v23 }
 0x96d   :  { %4258 = vrot.lane.b32.xlu2 %v9445_v53, %s5756_s11  ;;  %v4352_v53 = vsel %vm1171_vm9, %v4283_v24, 0 }
 0x96e   :  { %4739 = vrot.lane.b32.xlu0 %v11173_v11, %s5758_s2  ;;  %v4021_v11 = vpack.c.bf16 %v5510_v23, %v5506_v5 }
 0x972   :  { %v4285_v50 = vpop.permute.xlu0 %4284 }
 0x973   :  { %v4355_v10 = vsel %vm1171_vm9, %v4285_v50, 0  ;;  %4260 = vrot.lane.b32.xlu1 %v9457_v6, %s5756_s11  ;;  %v4281_v6 = vpop.permute.xlu1 %4280 }
 0x974   :  { %4375 = vmatpush.bf16.xpose.msrb.mxu2 %v4325_v38  ;;  %4427 = vmatpush.bf16.xpose.msrb.mxu3 %v4355_v10 }
 0x975   :  { %4741 = vrot.lane.b32.xlu2 %v11172_v27, %s5758_s2  ;;  %v4349_v27 = vsel %vm1171_vm9, %v4281_v6, 0 }
 0x976   :  { %4719 = vrot.lane.b32.xlu0 %v9135_v34, %s5758_s2 }
 0x978   :  { %4119 = vmatmul.bf16.gmra.mxu3 %v4017_v60 }
 0x97b   :  { %4723 = vrot.lane.b32.xlu1 %v8734_v55, %s5758_s2  ;;  %v4019_v55 = vpack.c.bf16 %v9741_v0, %v9715_v22 }
 0x97c   :  { %4428 = vmatpush.bf16.xpose.msrb.mxu3 %v4352_v53 }
 0x97d   :  { %4721 = vrot.lane.b32.xlu2 %v8845_v40, %s5758_s2  ;;  %v11174_v40 = vld [vmem:[#allocation39_spill] sm:$0xff] }
 0x97e   :  { %4733 = vrot.lane.b32.xlu0 %v11163_v7, %s5758_s2 }
 0x983   :  { %4737 = vrot.lane.b32.xlu1 %v11161_v16, %s5758_s2 }
 0x984   :  { %4429 = vmatpush.bf16.xpose.msrb.mxu3 %v4349_v27 }
 0x985   :  { %4735 = vrot.lane.b32.xlu2 %v8897_v30, %s5758_s2 }
 0x986   :  { %4715 = vrot.lane.b32.xlu0 %v9101_v41, %s5758_s2  ;;  %v11175_v41 = vld [vmem:[#allocation50_spill] sm:$0xff] }
 0x988   :  { %4124 = vmatmul.bf16.gmra.mxu3 %v4019_v55 }
 0x98b   :  { %4717 = vrot.lane.b32.xlu1 %v11174_v40, %s5758_s2 }
 0x98e   :  { %4731 = vrot.lane.b32.xlu0 %v11162_v48, %s5758_s2 }
 0x990   :  { %v3837_v7 = vpop.xlane.xlu2 %3836 }
 0x991   :  { %v3875_v34 = vsub.f32 %v9615_v44, %v3837_v7  ;;  %v3876_v16 = vsub.f32 %v9618_v8, %v3837_v7 }
 0x993   :  { %v3939_v4 = vmul.f32 1.442695, %v3875_v34  ;;  %v3941_v30 = vmul.f32 1.442695, %v3876_v16 }
 0x995   :  { %5513 = vpow2.f32 %v3939_v4 }
 0x996   :  { %5515 = vpow2.f32 %v3941_v30  ;;  %4713 = vrot.lane.b32.xlu0 %v11175_v41, %s5758_s2 }
 0x998   :  { %4129 = vmatmul.bf16.gmra.mxu3 %v4021_v11  ;;  %v3843_v22 = vpop.xlane.xlu2 %3842 }
 0x999   :  { %v3879_v0 = vsub.f32 %v9627_v14, %v3843_v22  ;;  %v3880_v24 = vsub.f32 %v9630_v13, %v3843_v22 }
 0x99b   :  { %v5514_v48 = vpop.eup %5513  ;;  %v3947_v19 = vmul.f32 1.442695, %v3879_v0  ;;  %v3949_v15 = vmul.f32 1.442695, %v3880_v24  ;;  %v9862_v0 = vpop.f32.mrf.mxu3 }
 0x99c   :  { %v9827_v44 = vpop.eup %5515  ;;  %11176 = vst [vmem:[#allocation38_spill] sm:$0xff] %v9862_v0 }
 0x99d   :  { %5517 = vpow2.f32 %v3947_v19  ;;  %v3846_v8 = vpop.xlane.xlu0 %3845  ;;  %v3840_v43 = vpop.xlane.xlu1 %3839  ;;  %v9830_v2 = vadd.f32 %v9827_v44, %v5514_v48 }
 0x99e   :  { %5519 = vpow2.f32 %v3949_v15  ;;  %v3881_v5 = vsub.f32 %v9645_v37, %v3846_v8  ;;  %v3882_v23 = vsub.f32 %v9648_v51, %v3846_v8  ;;  %v3877_v14 = vsub.f32 %v9639_v32, %v3840_v43  ;;  %4729 = vrot.lane.b32.xlu0 %v11164_v12, %s5758_s2 }
 0x99f   :  { %v3878_v13 = vsub.f32 %v9642_v25, %v3840_v43 }
 0x9a0   :  { %v3951_v3 = vmul.f32 1.442695, %v3881_v5  ;;  %v3953_v35 = vmul.f32 1.442695, %v3882_v23  ;;  %v3943_v50 = vmul.f32 1.442695, %v3877_v14  ;;  %v4263_v38 = vpop.permute.xlu2 %4262 }
 0x9a1   :  { %v3945_v10 = vmul.f32 1.442695, %v3878_v13  ;;  %v4322_v60 = vsel %vm1171_vm9, %v4263_v38, 0 }
 0x9a2   :  { %5521 = vpow2.f32 %v3951_v3  ;;  %4376 = vmatpush.bf16.xpose.msrb.mxu2 %v4322_v60 }
 0x9a3   :  { %v5518_v53 = vpop.eup %5517  ;;  %5523 = vpow2.f32 %v3953_v35  ;;  %v9865_v8 = vpop.f32.mrf.mxu3 }
 0x9a4   :  { %v9839_v37 = vpop.eup %5519  ;;  %5525 = vpow2.f32 %v3943_v50  ;;  %11177 = vst [vmem:[#allocation8_spill] sm:$0xff] %v9865_v8  ;;  %v11225_v8 = vld [vmem:[#allocation22_spill] sm:$0xff] }
 0x9a5   :  { %5527 = vpow2.f32 %v3945_v10  ;;  %v9842_v32 = vadd.f32 %v9839_v37, %v5518_v53 }
 0x9a6   :  { %4711 = vrot.lane.b32.xlu0 %v9067_v59, %s5758_s2 }
 0x9a8   :  { %v5522_v12 = vpop.eup %5521  ;;  %v4247_v25 = vpop.permute.xlu2 %4246 }
 0x9a9   :  { %v9846_v51 = vpop.eup %5523  ;;  %v4025_v24 = vpack.c.bf16 %v5522_v12, %v5518_v53  ;;  %v4010_v53 = vpack.c.bf16 %v9600_v63, %v9593_v17 }
 0x9aa   :  { %v5526_v6 = vpop.eup %5525  ;;  %v4026_v27 = vpack.c.bf16 %v9846_v51, %v9839_v37  ;;  %v9851_v55 = vadd.f32 %v9846_v51, %v5522_v12 }
 0x9ab   :  { %v9853_v40 = vpop.eup %5527  ;;  %v4023_v7 = vpack.c.bf16 %v5526_v6, %v5514_v48 }
 0x9ac   :  { %v4024_v34 = vpack.c.bf16 %v9853_v40, %v9827_v44  ;;  %v9858_v16 = vadd.f32 %v9853_v40, %v5526_v6 }
 0x9ad   :  { %4134 = vmatmul.bf16.gmra.mxu3 %v4023_v7 }
 0x9b0   :  { %v4245_v59 = vpop.permute.xlu0 %4244  ;;  %v4072_v4 = vpop.permute.xlu2 %4071 }
 0x9b1   :  { %5132 = vmatmul.msk.bf16.vlgmr.msrb.gmra.mxu2 %vm1171_vm9, %v4245_v59 }
 0x9b5   :  { %v4279_v30 = vpop.permute.xlu1 %4278 }
 0x9b6   :  { %v4346_v41 = vsel %vm1171_vm9, %v4279_v30, 0 }
 0x9b7   :  { %4430 = vmatpush.bf16.xpose.msrb.mxu3 %v4346_v41 }
 0x9b8   :  { %v4249_v11 = vpop.permute.xlu0 %4248  ;;  %v4068_v22 = vpop.permute.xlu2 %4067 }
 0x9bd   :  { %4139 = vmatmul.bf16.gmra.mxu3 %v4025_v24  ;;  %v4074_v48 = vpop.permute.xlu1 %4073 }
 0x9be   :  { %4145 = vmatpush.bf16.msra.mxu0 %v4074_v48 }
 0x9c0   :  { %v4064_v19 = vpop.permute.xlu0 %4063  ;;  %v4062_v15 = vpop.permute.xlu2 %4061 }
 0x9c1   :  { %5133 = vmatmul.msk.bf16.gmra.mxu2 %vm1171_vm9, %v4247_v25 }
 0x9c2   :  { %4146 = vmatpush.bf16.msra.mxu0 %v4072_v4 }
 0x9c5   :  { %v4070_v43 = vpop.permute.xlu1 %4069 }
 0x9c6   :  { %4147 = vmatpush.bf16.msra.mxu0 %v4070_v43 }
 0x9c8   :  { %v4060_v5 = vpop.permute.xlu0 %4059  ;;  %v4253_v23 = vpop.permute.xlu2 %4252 }
 0x9ca   :  { %4148 = vmatpush.bf16.msra.mxu0 %v4068_v22  ;;  %v11183_v22 = vld [vmem:[#allocation9_spill] sm:$0xff] }
 0x9cb   :  { %v9867_v14 = vpop.f32.mrf.mxu3  ;;  %v4012_v63 = vpack.c.bf16 %v9690_v9, %v11183_v22  ;;  %v11186_v9 = vld [vmem:[#allocation109_spill] sm:$0xff] }
 0x9cc   :  { %11178 = vst [vmem:[#allocation43_spill] sm:$0xff] %v9867_v14  ;;  %v11222_v14 = vld [vmem:[#allocation29_spill] sm:$0xff] }
 0x9cd   :  { %5141 = vmatmul.msk.bf16.vlgmr.msrb.gmra.mxu3 %vm1171_vm9, %v4245_v59  ;;  %v4066_v13 = vpop.permute.xlu1 %4065 }
 0x9ce   :  { %4149 = vmatpush.bf16.msra.mxu0 %v4066_v13 }
 0x9d0   :  { %v9870_v3 = vpop.permute.xlu0 %4256  ;;  %v9872_v35 = vpop.permute.xlu2 %4258 }
 0x9d1   :  { %5134 = vmatmul.msk.bf16.gmra.mxu2 %vm1171_vm9, %v4249_v11 }
 0x9d2   :  { %4150 = vmatpush.bf16.msra.mxu0 %v4064_v19 }
 0x9d3   :  { %v9875_v50 = vpop.f32.mrf.mxu3 }
 0x9d4   :  { %11179 = vst [vmem:[#allocation39_spill] sm:$0xff] %v9875_v50 }
 0x9d5   :  { %v4251_v38 = vpop.permute.xlu1 %4250 }
 0x9d6   :  { %4151 = vmatpush.bf16.msra.mxu0 %v4062_v15 }
 0x9d8   :  { %v4726_v10 = vpop.permute.xlu0 %4725  ;;  %v4742_v60 = vpop.permute.xlu2 %4741 }
 0x9d9   :  { %4759 = vmatpush.bf16.msrb.mxu1 %v4726_v10 }
 0x9da   :  { %4152 = vmatpush.bf16.msra.mxu0 %v4060_v5 }
 0x9db   :  { %v9879_v12 = vpop.f32.mrf.mxu3 }
 0x9dc   :  { %11180 = vst [vmem:[#allocation50_spill] sm:$0xff] %v9879_v12 }
 0x9dd   :  { %5142 = vmatmul.msk.bf16.gmra.mxu3 %vm1171_vm9, %v4247_v25  ;;  %v4255_v6 = vpop.permute.xlu1 %4254  ;;  %4153 = vmatmul.bf16.vlgmr.msra.gmra.mxu0 %v4010_v53 }
 0x9de   :  { %4813 = vmatpush.bf16.msrb.mxu0 %v4742_v60 }
 0x9e0   :  { %v4740_v7 = vpop.permute.xlu0 %4739  ;;  %v4722_v25 = vpop.permute.xlu2 %4721 }
 0x9e1   :  { %5135 = vmatmul.msk.bf16.gmra.mxu2 %vm1171_vm9, %v4251_v38 }
 0x9e2   :  { %4814 = vmatpush.bf16.msrb.mxu0 %v4740_v7 }
 0x9e3   :  { %v9883_v59 = vpop.f32.mrf.mxu3 }
 0x9e4   :  { %11181 = vst [vmem:[#allocation111_spill] sm:$0xff] %v9883_v59 }
 0x9e5   :  { %v4261_v4 = vpop.permute.xlu1 %4260 }
 0x9e8   :  { %v4720_v30 = vpop.permute.xlu0 %4719  ;;  %v4736_v43 = vpop.permute.xlu2 %4735 }
 0x9eb   :  { %v9885_v41 = vpop.f32.mrf.mxu3 }
 0x9ec   :  { %11182 = vst [vmem:[#allocation112_spill] sm:$0xff] %v9885_v41  ;;  %v11216_v41 = vld [vmem:[#allocation15_spill] sm:$0xff] }
 0x9ed   :  { %5143 = vmatmul.msk.bf16.gmra.mxu3 %vm1171_vm9, %v4249_v11  ;;  %v4724_v17 = vpop.permute.xlu1 %4723  ;;  %4158 = vmatmul.bf16.gmra.mxu0 %v4012_v63  ;;  %v4014_v11 = vpack.c.bf16 %v9706_v46, %v11186_v9  ;;  %v11197_v63 = vld [vmem:[#allocation20_spill] sm:$0xff] }
 0x9ee   :  { %4760 = vmatpush.bf16.msrb.mxu1 %v4724_v17 }
 0x9f0   :  { %v4734_v24 = vpop.permute.xlu0 %4733 }
 0x9f1   :  { %5136 = vmatmul.msk.bf16.gmra.mxu2 %vm1171_vm9, %v4253_v23 }
 0x9f2   :  { %4761 = vmatpush.bf16.msrb.mxu1 %v4722_v25 }
 0x9f3   :  { %v9891_v48 = vpop.f32.mrf.mxu3 }
 0x9f4   :  { %11184 = vst [vmem:[#allocation9_spill] sm:$0xff] %v9891_v48 }
 0x9f5   :  { %v4738_v19 = vpop.permute.xlu1 %4737 }
 0x9f6   :  { %4762 = vmatpush.bf16.msrb.mxu1 %v4720_v30  ;;  %4815 = vmatpush.bf16.msrb.mxu0 %v4738_v19 }
 0x9f8   :  { %v4716_v15 = vpop.permute.xlu0 %4715 }
 0x9fa   :  { %4816 = vmatpush.bf16.msrb.mxu0 %v4736_v43 }
 0x9fb   :  { %v9893_v5 = vpop.f32.mrf.mxu3 }
 0x9fc   :  { %11185 = vst [vmem:[#allocation113_spill] sm:$0xff] %v9893_v5  ;;  %v11215_v5 = vld [vmem:[#allocation13_spill] sm:$0xff] }
 0x9fd   :  { %5144 = vmatmul.msk.bf16.gmra.mxu3 %vm1171_vm9, %v4251_v38  ;;  %v4718_v13 = vpop.permute.xlu1 %4717  ;;  %4163 = vmatmul.bf16.gmra.mxu0 %v4014_v11  ;;  %v1547_v48 = vadd.f32 %v11216_v41, %v11215_v5 }
 0x9fe   :  { %4763 = vmatpush.bf16.msrb.mxu1 %v4718_v13  ;;  %4817 = vmatpush.bf16.msrb.mxu0 %v4734_v24 }
 0xa00   :  { %v4732_v10 = vpop.permute.xlu0 %4731 }
 0xa01   :  { %5137 = vmatmul.msk.bf16.gmra.mxu2 %vm1171_vm9, %v4255_v6 }
 0xa02   :  { %4764 = vmatpush.bf16.msrb.mxu1 %v4716_v15  ;;  %4818 = vmatpush.bf16.msrb.mxu0 %v4732_v10 }
 0xa03   :  { %v9899_v60 = vpop.f32.mrf.mxu3 }
 0xa04   :  { %11187 = vst [vmem:[#allocation109_spill] sm:$0xff] %v9899_v60  ;;  %v11211_v60 = vld [vmem:[#allocation57_spill] sm:$0xff] }
 0xa08   :  { %v4714_v53 = vpop.permute.xlu0 %4713 }
 0xa09   :  { %4765 = vmatpush.bf16.msrb.mxu1 %v4714_v53 }
 0xa0b   :  { %v9901_v7 = vpop.f32.mrf.mxu3 }
 0xa0c   :  { %11188 = vst [vmem:[#allocation114_spill] sm:$0xff] %v9901_v7  ;;  %v11214_v7 = vld [vmem:[#allocation4_spill] sm:$0xff] }
 0xa0d   :  { %5145 = vmatmul.msk.bf16.gmra.mxu3 %vm1171_vm9, %v4253_v23  ;;  %4168 = vmatmul.bf16.gmra.mxu0 %v4016_v45 }
 0xa10   :  { %v4730_v46 = vpop.permute.xlu0 %4729 }
 0xa11   :  { %5138 = vmatmul.msk.bf16.gmra.mxu2 %vm1171_vm9, %v9870_v3  ;;  %4819 = vmatpush.bf16.msrb.mxu0 %v4730_v46 }
 0xa13   :  { %v9909_v38 = vpop.f32.mrf.mxu3 }
 0xa14   :  { %11189 = vst [vmem:[#allocation115_spill] sm:$0xff] %v9909_v38 }
 0xa18   :  { %v4712_v30 = vpop.permute.xlu0 %4711 }
 0xa19   :  { %4766 = vmatpush.bf16.msrb.mxu1 %v4712_v30 }
 0xa1b   :  { %v9915_v23 = vpop.f32.mrf.mxu3 }
 0xa1c   :  { %11190 = vst [vmem:[#allocation116_spill] sm:$0xff] %v9915_v23 }
 0xa1d   :  { %5146 = vmatmul.msk.bf16.gmra.mxu3 %vm1171_vm9, %v4255_v6  ;;  %4173 = vmatmul.bf16.gmra.mxu0 %v4018_v1 }
 0xa21   :  { %5139 = vmatmul.msk.bf16.gmra.mxu2 %vm1171_vm9, %v9872_v35 }
 0xa23   :  { %v9919_v49 = vpop.f32.mrf.mxu3 }
 0xa24   :  { %11191 = vst [vmem:[#allocation117_spill] sm:$0xff] %v9919_v49 }
 0xa2d   :  { %5147 = vmatmul.msk.bf16.gmra.mxu3 %vm1171_vm9, %v9870_v3  ;;  %4178 = vmatmul.bf16.gmra.mxu0 %v11192_v28  ;;  %v11199_v28 = vld [vmem:[#allocation55_spill] sm:$0xff] }
 0xa30   :  { %v9926_v45 = vpop.f32.mrf.mxu3 }
 0xa31   :  { %11193 = vst [vmem:[#allocation118_spill] sm:$0xff] %v9926_v45  ;;  %5140 = vmatmul.msk.bf16.gmra.mxu2 %vm1171_vm9, %v4261_v4 }
 0xa34   :  { %v4378_v56 = vpop.f32.mrf.mxu2 }
 0xa35   :  { %v9945_v17 = vadd.f32 %v4378_v56, %v11197_v63 }
 0xa38   :  { %v9929_v47 = vpop.f32.mrf.mxu3 }
 0xa39   :  { %11194 = vst [vmem:[#allocation119_spill] sm:$0xff] %v9929_v47  ;;  %v11204_v47 = vld [vmem:[#allocation37_spill] sm:$0xff] }
 0xa3c   :  { %v4380_v1 = vpop.f32.mrf.mxu2 }
 0xa3d   :  { %5148 = vmatmul.msk.bf16.gmra.mxu3 %vm1171_vm9, %v9872_v35  ;;  %4183 = vmatmul.bf16.gmra.mxu0 %v4022_v57  ;;  %v11198_v35 = vld [vmem:[#allocation19_spill] sm:$0xff]  ;;  %v9953_v24 = vadd.f32 %v4380_v1, %v11197_v63 }
 0xa40   :  { %v9936_v3 = vpop.f32.mrf.mxu3 }
 0xa41   :  { %11195 = vst [vmem:[#allocation120_spill] sm:$0xff] %v9936_v3  ;;  %v11205_v3 = vld [vmem:[#allocation11_spill] sm:$0xff] }
 0xa44   :  { %v4383_v6 = vpop.f32.mrf.mxu2 }
 0xa45   :  { %v9964_v19 = vadd.f32 %v4383_v6, %v11197_v63 }
 0xa48   :  { %v9938_v36 = vpop.f32.mrf.mxu3 }
 0xa49   :  { %11196 = vst [vmem:[#allocation121_spill] sm:$0xff] %v9938_v36 }
 0xa4c   :  { %v4385_v31 = vpop.f32.mrf.mxu2 }
 0xa4d   :  { %5149 = vmatmul.msk.bf16.gmra.mxu3 %vm1171_vm9, %v4261_v4  ;;  %4188 = vmatmul.bf16.gmra.mxu0 %v4024_v34  ;;  %v9972_v13 = vadd.f32 %v4385_v31, %v11197_v63 }
 0xa50   :  { %v4432_v22 = vpop.f32.mrf.mxu3 }
 0xa51   :  { %v9948_v25 = vadd.f32 %v4432_v22, %v11198_v35  ;;  %v11200_v22 = vld [vmem:[#allocation58_spill] sm:$0xff] }
 0xa53   :  { %v4477_v33 = vmax.f32 %v9945_v17, %v9948_v25 }
 0xa54   :  { %v4388_v26 = vpop.f32.mrf.mxu2 }
 0xa55   :  { %4478 = vmax.xlane.f32.xlu2 %v4477_v33  ;;  %v9982_v10 = vadd.f32 %v4388_v26, %v11197_v63  ;;  %v11201_v26 = vld [vmem:[#allocation25_spill] sm:$0xff] }
 0xa58   :  { %v4434_v57 = vpop.f32.mrf.mxu3 }
 0xa59   :  { %v9956_v4 = vadd.f32 %v4434_v57, %v11198_v35 }
 0xa5b   :  { %v4480_v44 = vmax.f32 %v9953_v24, %v9956_v4 }
 0xa5c   :  { %v4390_v40 = vpop.f32.mrf.mxu2 }
 0xa5d   :  { %4481 = vmax.xlane.f32.xlu1 %v4480_v44  ;;  %4193 = vmatmul.bf16.gmra.mxu0 %v4026_v27  ;;  %v9991_v1 = vadd.f32 %v4390_v40, %v11197_v63 }
 0xa60   :  { %v4437_v34 = vpop.f32.mrf.mxu3 }
 0xa61   :  { %v9967_v15 = vadd.f32 %v4437_v34, %v11198_v35 }
 0xa63   :  { %v4483_v43 = vmax.f32 %v9964_v19, %v9967_v15 }
 0xa64   :  { %v4393_v9 = vpop.f32.mrf.mxu2 }
 0xa65   :  { %4484 = vmax.xlane.f32.xlu1 %v4483_v43 }
 0xa68   :  { %v4439_v11 = vpop.f32.mrf.mxu3 }
 0xa69   :  { %v9975_v37 = vadd.f32 %v4439_v11, %v11198_v35 }
 0xa6b   :  { %v4486_v51 = vmax.f32 %v9972_v13, %v9975_v37 }
 0xa6c   :  { %v4395_v46 = vpop.f32.mrf.mxu2 }
 0xa6d   :  { %4727 = vrot.lane.b32.xlu2 %v11171_v20, %s5758_s2  ;;  %4487 = vmax.xlane.f32.xlu0 %v4486_v51  ;;  %v10001_v34 = vadd.f32 %v4395_v46, %v11197_v63  ;;  %v10018_v46 = vadd.f32 %v4393_v9, %v11197_v63 }
 0xa70   :  { %v4442_v27 = vpop.f32.mrf.mxu3 }
 0xa71   :  { %v9985_v53 = vadd.f32 %v4442_v27, %v11198_v35 }
 0xa73   :  { %v4489_v30 = vmax.f32 %v9982_v10, %v9985_v53 }
 0xa74   :  { %v4398_v31 = vpop.f32.mrf.mxu2 }
 0xa75   :  { %1524 = vadd.xlane.f32.xlu0 %v11199_v28  ;;  %4490 = vmax.xlane.f32.xlu1 %v4489_v30  ;;  %v10012_v30 = vadd.f32 %v4398_v31, %v11197_v63 }
 0xa78   :  { %v4444_v56 = vpop.f32.mrf.mxu3 }
 0xa79   :  { %v9994_v20 = vadd.f32 %v4444_v56, %v11198_v35 }
 0xa7b   :  { %v4492_v6 = vmax.f32 %v9991_v1, %v9994_v20 }
 0xa7c   :  { %v4400_v57 = vpop.f32.mrf.mxu2 }
 0xa7d   :  { %1533 = vadd.xlane.f32.xlu0 %v11200_v22  ;;  %4493 = vmax.xlane.f32.xlu1 %v4492_v6 }
 0xa80   :  { %v4447_v33 = vpop.f32.mrf.mxu3 }
 0xa81   :  { %v10009_v11 = vadd.f32 %v4447_v33, %v11198_v35  ;;  %v10025_v33 = vadd.f32 %v4400_v57, %v11197_v63 }
 0xa83   :  { %v4495_v6 = vmax.f32 %v10018_v46, %v10009_v11 }
 0xa84   :  { %v4403_v51 = vpop.f32.mrf.mxu2 }
 0xa85   :  { %1521 = vadd.xlane.f32.xlu1 %v11201_v26 }
 0xa88   :  { %v4449_v44 = vpop.f32.mrf.mxu3 }
 0xa89   :  { %v10004_v40 = vadd.f32 %v4449_v44, %v11198_v35  ;;  %v11202_v44 = vld [vmem:[#allocation14_spill] sm:$0xff] }
 0xa8b   :  { %v4498_v43 = vmax.f32 %v10001_v34, %v10004_v40 }
 0xa8c   :  { %v4405_v26 = vpop.f32.mrf.mxu2 }
 0xa8d   :  { %4499 = vmax.xlane.f32.xlu1 %v4498_v43  ;;  %v11203_v43 = vld [vmem:[#allocation27_spill] sm:$0xff] }
 0xa90   :  { %v4452_v27 = vpop.f32.mrf.mxu3 }
 0xa91   :  { %v10015_v28 = vadd.f32 %v4452_v27, %v11198_v35  ;;  %v1517_v27 = vadd.f32 %v11203_v43, %v11202_v44  ;;  %v10044_v44 = vpop.f32.mrf.mxu0  ;;  %v11207_v43 = vld [vmem:[#allocation41_spill] sm:$0xff] }
 0xa92   :  { %11206 = vst [vmem:[#allocation20_spill] sm:$0xff] %v10044_v44 }
 0xa93   :  { %v4501_v56 = vmax.f32 %v10012_v30, %v10015_v28 }
 0xa95   :  { %4502 = vmax.xlane.f32.xlu1 %v4501_v56  ;;  %v10035_v56 = vadd.f32 %v4403_v51, %v11197_v63 }
 0xa96   :  { %4496 = vmax.xlane.f32.xlu2 %v4495_v6 }
 0xa98   :  { %v4454_v22 = vpop.f32.mrf.mxu3 }
 0xa99   :  { %v10028_v31 = vadd.f32 %v4454_v22, %v11198_v35  ;;  %v4408_v22 = vpop.f32.mrf.mxu2 }
 0xa9a   :  { %v10058_v49 = vadd.f32 %v4408_v22, %v11197_v63 }
 0xa9b   :  { %v4504_v9 = vmax.f32 %v10025_v33, %v10028_v31 }
 0xa9d   :  { %4505 = vmax.xlane.f32.xlu1 %v4504_v9  ;;  %v10047_v9 = vadd.f32 %v4405_v26, %v11197_v63 }
 0xa9e   :  { %1518 = vadd.xlane.f32.xlu2 %v1517_v27  ;;  %v11208_v27 = vld [vmem:[#allocation45_spill] sm:$0xff] }
 0xa9f   :  { %v1541_v23 = vadd.f32 %v11208_v27, %v11207_v43 }
 0xaa0   :  { %v4457_v36 = vpop.f32.mrf.mxu3 }
 0xaa1   :  { %v10038_v6 = vadd.f32 %v4457_v36, %v11198_v35 }
 0xaa3   :  { %v4507_v57 = vmax.f32 %v10035_v56, %v10038_v6 }
 0xaa5   :  { %4508 = vmax.xlane.f32.xlu0 %v4507_v57  ;;  %1530 = vadd.xlane.f32.xlu1 %v11204_v47  ;;  %v4410_v47 = vpop.f32.mrf.mxu2  ;;  %v11209_v57 = vld [vmem:[#allocation6_spill] sm:$0xff] }
 0xaa6   :  { %1527 = vadd.xlane.f32.xlu2 %v11205_v3  ;;  %v10070_v27 = vadd.f32 %v4410_v47, %v11197_v63 }
 0xaa8   :  { %v4459_v45 = vpop.f32.mrf.mxu3 }
 0xaa9   :  { %v10050_v51 = vadd.f32 %v4459_v45, %v11198_v35  ;;  %v10063_v45 = vpop.f32.mrf.mxu0 }
 0xaaa   :  { %11210 = vst [vmem:[#allocation19_spill] sm:$0xff] %v10063_v45  ;;  %v11224_v45 = vld [vmem:[#allocation62_spill] sm:$0xff] }
 0xaab   :  { %v4510_v36 = vmax.f32 %v10047_v9, %v10050_v51 }
 0xaad   :  { %1542 = vadd.xlane.f32.xlu0 %v1541_v23  ;;  %4511 = vmax.xlane.f32.xlu1 %v4510_v36  ;;  %v11212_v23 = vld [vmem:[#allocation5_spill] sm:$0xff]  ;;  %v4413_v36 = vpop.f32.mrf.mxu2 }
 0xaae   :  { %1536 = vadd.xlane.f32.xlu2 %v11209_v57 }
 0xab0   :  { %v4462_v3 = vpop.f32.mrf.mxu3 }
 0xab1   :  { %v10061_v26 = vadd.f32 %v4462_v3, %v11198_v35  ;;  %v10077_v3 = vpop.f32.mrf.mxu0 }
 0xab2   :  { %11213 = vst [vmem:[#allocation55_spill] sm:$0xff] %v10077_v3 }
 0xab3   :  { %v4513_v38 = vmax.f32 %v10058_v49, %v10061_v26 }
 0xab5   :  { %4514 = vmax.xlane.f32.xlu0 %v4513_v38  ;;  %1539 = vadd.xlane.f32.xlu1 %v11211_v60  ;;  %v10081_v60 = vadd.f32 %v4413_v36, %v11197_v63  ;;  %v4415_v47 = vpop.f32.mrf.mxu2 }
 0xab6   :  { %1545 = vadd.xlane.f32.xlu2 %v11212_v23  ;;  %v10093_v59 = vadd.f32 %v4415_v47, %v11197_v63  ;;  %v11219_v47 = vld [vmem:[#allocation49_spill] sm:$0xff] }
 0xab8   :  { %v4464_v43 = vpop.f32.mrf.mxu3 }
 0xab9   :  { %v10073_v22 = vadd.f32 %v4464_v43, %v11198_v35  ;;  %v10090_v50 = vpop.f32.mrf.mxu0 }
 0xaba   :  { %11217 = vst [vmem:[#allocation58_spill] sm:$0xff] %v10090_v50 }
 0xabb   :  { %v4516_v57 = vmax.f32 %v10070_v27, %v10073_v22 }
 0xabd   :  { %1551 = vadd.xlane.f32.xlu0 %v11214_v7  ;;  %4517 = vmax.xlane.f32.xlu1 %v4516_v57  ;;  %v4418_v5 = vpop.f32.mrf.mxu2 }
 0xac0   :  { %v4467_v38 = vpop.f32.mrf.mxu3 }
 0xac1   :  { %v10084_v23 = vadd.f32 %v4467_v38, %v11198_v35  ;;  %v10104_v0 = vpop.f32.mrf.mxu0 }
 0xac2   :  { %11220 = vst [vmem:[#allocation25_spill] sm:$0xff] %v10104_v0 }
 0xac3   :  { %v4519_v43 = vmax.f32 %v10081_v60, %v10084_v23 }
 0xac5   :  { %1548 = vadd.xlane.f32.xlu1 %v1547_v48  ;;  %4520 = vmax.xlane.f32.xlu0 %v4519_v43  ;;  %v11218_v43 = vld [vmem:[#allocation28_spill] sm:$0xff] }
 0xac8   :  { %v4469_v7 = vpop.f32.mrf.mxu3  ;;  %v4479_v57 = vpop.xlane.xlu2 %4478 }
 0xac9   :  { %v10096_v36 = vadd.f32 %v4469_v7, %v11198_v35  ;;  %v4531_v38 = vsub.f32 %v9945_v17, %v4479_v57  ;;  %v4532_v12 = vsub.f32 %v9948_v25, %v4479_v57 }
 0xacb   :  { %v4522_v44 = vmax.f32 %v10093_v59, %v10096_v36  ;;  %v4567_v41 = vmul.f32 1.442695, %v4531_v38  ;;  %v4569_v48 = vmul.f32 1.442695, %v4532_v12 }
 0xacd   :  { %5529 = vpow2.f32 %v4567_v41  ;;  %1557 = vadd.xlane.f32.xlu1 %v11218_v43  ;;  %4523 = vmax.xlane.f32.xlu2 %v4522_v44  ;;  %v11221_v41 = vld [vmem:[#allocation26_spill] sm:$0xff] }
 0xace   :  { %5531 = vpow2.f32 %v4569_v48  ;;  %1560 = vadd.xlane.f32.xlu0 %v11219_v47  ;;  %v1553_v43 = vadd.f32 %v11222_v14, %v11221_v41  ;;  %v11223_v48 = vld [vmem:[#allocation61_spill] sm:$0xff] }
 0xacf   :  { %v1568_v47 = vadd.f32 %v11224_v45, %v11223_v48 }
 0xad0   :  { %v4482_v50 = vpop.xlane.xlu1 %4481  ;;  %v4472_v7 = vpop.f32.mrf.mxu3 }
 0xad1   :  { %v4533_v17 = vsub.f32 %v9953_v24, %v4482_v50  ;;  %v4534_v25 = vsub.f32 %v9956_v4, %v4482_v50  ;;  %v4728_v57 = vpop.permute.xlu2 %4727  ;;  %v4420_v24 = vpop.f32.mrf.mxu2  ;;  %v10116_v50 = vadd.f32 %v4472_v7, %v11198_v35  ;;  %v10119_v4 = vadd.f32 %v4418_v5, %v11197_v63 }
 0xad2   :  { %4820 = vmatpush.bf16.msrb.mxu0 %v4728_v57 }
 0xad3   :  { %v5530_v38 = vpop.eup %5529  ;;  %v4571_v12 = vmul.f32 1.442695, %v4533_v17  ;;  %v4573_v3 = vmul.f32 1.442695, %v4534_v25  ;;  %v10122_v25 = vadd.f32 %v4420_v24, %v11197_v63  ;;  %v4525_v5 = vmax.f32 %v10119_v4, %v10116_v50 }
 0xad4   :  { %v5532_v44 = vpop.eup %5531 }
 0xad5   :  { %5533 = vpow2.f32 %v4571_v12  ;;  %1566 = vadd.xlane.f32.xlu1 %v11225_v8  ;;  %1554 = vadd.xlane.f32.xlu2 %v1553_v43  ;;  %v10113_v0 = vadd.f32 %v5532_v44, %v5530_v38  ;;  %v11227_v12 = vld [vmem:[#allocation2_spill] sm:$0xff]  ;;  %v10131_v43 = vpop.f32.mrf.mxu0 }
 0xad6   :  { %5535 = vpow2.f32 %v4573_v3  ;;  %1569 = vadd.xlane.f32.xlu0 %v1568_v47  ;;  %v11226_v3 = vld [vmem:[#allocation47_spill] sm:$0xff]  ;;  %11228 = vst [vmem:[#allocation14_spill] sm:$0xff] %v10131_v43 }
 0xad7   :  { %v1562_v41 = vadd.f32 %v11227_v12, %v11226_v3 }
 0xad8   :  { %v4485_v14 = vpop.xlane.xlu1 %4484  ;;  %v4474_v17 = vpop.f32.mrf.mxu3 }
 0xad9   :  { %v4535_v45 = vsub.f32 %v9964_v19, %v4485_v14  ;;  %v4536_v8 = vsub.f32 %v9967_v15, %v4485_v14  ;;  %v10127_v57 = vadd.f32 %v4474_v17, %v11198_v35 }
 0xadb   :  { %v5534_v7 = vpop.eup %5533  ;;  %v4575_v48 = vmul.f32 1.442695, %v4535_v45  ;;  %v4577_v47 = vmul.f32 1.442695, %v4536_v8  ;;  %v4528_v63 = vmax.f32 %v10122_v25, %v10127_v57 }
 0xadc   :  { %v5536_v19 = vpop.eup %5535  ;;  %v4693_v24 = vpack.c.bf16 %v5534_v7, %v5530_v38  ;;  %v11229_v38 = vld [vmem:[#allocation16_spill] sm:$0xff] }
 0xadd   :  { %v4694_v15 = vpack.c.bf16 %v5536_v19, %v5532_v44  ;;  %5537 = vpow2.f32 %v4575_v48  ;;  %4526 = vmax.xlane.f32.xlu1 %v4525_v5  ;;  %1563 = vadd.xlane.f32.xlu2 %v1562_v41  ;;  %v10137_v35 = vadd.f32 %v5536_v19, %v5534_v7  ;;  %v11230_v44 = vld [vmem:[#allocation63_spill] sm:$0xff]  ;;  %v10143_v5 = vpop.f32.mrf.mxu0  ;;  %v11231_v41 = vld [vmem:[#allocation17_spill] sm:$0xff]  ;;  %v11232_v7 = vld [vmem:[#allocation18_spill] sm:$0xff] }
 0xade   :  { %5539 = vpow2.f32 %v4577_v47  ;;  %4529 = vmax.xlane.f32.xlu0 %v4528_v63  ;;  %4767 = vmatmul.bf16.vlgmr.msrb.gmra.mxu1 %v4693_v24  ;;  %v2207_v48 = vadd.f32 %v11230_v44, %v11229_v38 }
 0xadf   :  { %4821 = vmatmul.bf16.vlgmr.msrb.gmra.mxu0 %v4694_v15 }
 0xae0   :  { %v4488_v14 = vpop.xlane.xlu0 %4487 }
 0xae1   :  { %v4537_v17 = vsub.f32 %v9972_v13, %v4488_v14  ;;  %v4538_v45 = vsub.f32 %v9975_v37, %v4488_v14 }
 0xae3   :  { %v5538_v8 = vpop.eup %5537  ;;  %v4579_v3 = vmul.f32 1.442695, %v4537_v17  ;;  %v4581_v12 = vmul.f32 1.442695, %v4538_v45  ;;  %v11233_v17 = vld [vmem:[#allocation67_spill] sm:$0xff]  ;;  %v11234_v45 = vld [vmem:[#allocation68_spill] sm:$0xff] }
 0xae4   :  { %v5540_v43 = vpop.eup %5539 }
 0xae5   :  { %5541 = vpow2.f32 %v4579_v3  ;;  %2205 = vadd.xlane.f32.xlu1 %v11231_v41  ;;  %2202 = vadd.xlane.f32.xlu2 %v11232_v7  ;;  %v10147_v47 = vadd.f32 %v5540_v43, %v5538_v8  ;;  %v2213_v3 = vadd.f32 %v11234_v45, %v11233_v17  ;;  %v11235_v41 = vld [vmem:[#allocation31_spill] sm:$0xff]  ;;  %v11236_v7 = vld [vmem:[#allocation60_spill] sm:$0xff] }
 0xae6   :  { %5543 = vpow2.f32 %v4581_v12  ;;  %2208 = vadd.xlane.f32.xlu0 %v2207_v48  ;;  %v11239_v45 = vld [vmem:[#allocation75_spill] sm:$0xff] }
 0xae8   :  { %v1525_v13 = vpop.xlane.xlu0 %1524  ;;  %v4491_v37 = vpop.xlane.xlu1 %4490 }
 0xae9   :  { %5545 = vrcp.f32 %v1525_v13  ;;  %v4539_v63 = vsub.f32 %v9982_v10, %v4491_v37  ;;  %v4540_v19 = vsub.f32 %v9985_v53, %v4491_v37  ;;  %v10157_v53 = vpop.f32.mrf.mxu0  ;;  %v11237_v13 = vld [vmem:[#allocation10_spill] sm:$0xff] }
 0xaeb   :  { %v5542_v24 = vpop.eup %5541  ;;  %v4583_v15 = vmul.f32 1.442695, %v4539_v63  ;;  %v4585_v14 = vmul.f32 1.442695, %v4540_v19 }
 0xaec   :  { %v5544_v38 = vpop.eup %5543  ;;  %v4695_v44 = vpack.c.bf16 %v5542_v24, %v5538_v8 }
 0xaed   :  { %5547 = vpow2.f32 %v4583_v15  ;;  %2214 = vadd.xlane.f32.xlu1 %v2213_v3  ;;  %2211 = vadd.xlane.f32.xlu2 %v11235_v41  ;;  %v4696_v12 = vpack.c.bf16 %v5544_v38, %v5540_v43  ;;  %v10154_v48 = vadd.f32 %v5544_v38, %v5542_v24  ;;  %v11240_v38 = vld [vmem:[#allocation69_spill] sm:$0xff] }
 0xaee   :  { %5549 = vpow2.f32 %v4585_v14  ;;  %2217 = vadd.xlane.f32.xlu0 %v11236_v7  ;;  %4772 = vmatmul.bf16.gmra.mxu1 %v4695_v44  ;;  %v11238_v14 = vld [vmem:[#allocation74_spill] sm:$0xff]  ;;  %v11241_v44 = vld [vmem:[#allocation65_spill] sm:$0xff] }
 0xaef   :  { %v5546_v10 = vpop.eup %5545  ;;  %4826 = vmatmul.bf16.gmra.mxu0 %v4696_v12  ;;  %v2225_v3 = vadd.f32 %v11239_v45, %v11238_v14 }
 0xaf0   :  { %v10160_v37 = vmul.f32 %v5546_v10, %v11237_v13  ;;  %v4494_v63 = vpop.xlane.xlu1 %4493  ;;  %v11243_v13 = vld [vmem:[#allocation59_spill] sm:$0xff] }
 0xaf1   :  { %v4541_v8 = vsub.f32 %v9991_v1, %v4494_v63  ;;  %v4542_v19 = vsub.f32 %v9994_v20, %v4494_v63  ;;  %v10172_v1 = vpop.f32.mrf.mxu0  ;;  %v11244_v63 = vld [vmem:[#allocation71_spill] sm:$0xff] }
 0xaf2   :  { %11242 = vst [vmem:[#allocation27_spill] sm:$0xff] %v10172_v1 }
 0xaf3   :  { %v5548_v15 = vpop.eup %5547  ;;  %v4587_v43 = vmul.f32 1.442695, %v4541_v8  ;;  %v4589_v24 = vmul.f32 1.442695, %v4542_v19 }
 0xaf4   :  { %v5550_v17 = vpop.eup %5549 }
 0xaf5   :  { %5551 = vpow2.f32 %v4587_v43  ;;  %2223 = vadd.xlane.f32.xlu1 %v11240_v38  ;;  %2220 = vadd.xlane.f32.xlu2 %v11241_v44  ;;  %v10168_v41 = vadd.f32 %v5550_v17, %v5548_v15  ;;  %v11245_v43 = vld [vmem:[#allocation35_spill] sm:$0xff]  ;;  %v11247_v44 = vld [vmem:[#allocation80_spill] sm:$0xff] }
 0xaf6   :  { %5553 = vpow2.f32 %v4589_v24  ;;  %2226 = vadd.xlane.f32.xlu0 %v2225_v3 }
 0xaf8   :  { %v10170_v12 = vpop.xlane.xlu1 %1521 }
 0xaf9   :  { %v10181_v3 = vpop.f32.mrf.mxu0 }
 0xafa   :  { %11246 = vst [vmem:[#allocation37_spill] sm:$0xff] %v10181_v3 }
 0xafb   :  { %v5552_v20 = vpop.eup %5551 }
 0xafc   :  { %v5554_v7 = vpop.eup %5553  ;;  %v4697_v10 = vpack.c.bf16 %v5552_v20, %v5548_v15 }
 0xafd   :  { %2232 = vadd.xlane.f32.xlu1 %v11243_v13  ;;  %2229 = vadd.xlane.f32.xlu2 %v11244_v63  ;;  %v4698_v8 = vpack.c.bf16 %v5554_v7, %v5550_v17  ;;  %v10176_v19 = vadd.f32 %v5554_v7, %v5552_v20  ;;  %v11248_v13 = vld [vmem:[#allocation81_spill] sm:$0xff]  ;;  %v11250_v17 = vld [vmem:[#allocation86_spill] sm:$0xff]  ;;  %v11251_v7 = vld [vmem:[#allocation72_spill] sm:$0xff] }
 0xafe   :  { %2235 = vadd.xlane.f32.xlu0 %v11245_v43  ;;  %4777 = vmatmul.bf16.gmra.mxu1 %v4697_v10  ;;  %v2240_v1 = vadd.f32 %v11248_v13, %v11247_v44  ;;  %v11249_v63 = vld [vmem:[#allocation85_spill] sm:$0xff] }
 0xaff   :  { %4831 = vmatmul.bf16.gmra.mxu0 %v4698_v8  ;;  %v2243_v20 = vadd.f32 %v11250_v17, %v11249_v63  ;;  %v11253_v13 = vld [vmem:[#allocation53_spill] sm:$0xff]  ;;  %v10197_v63 = vpop.xlane.xlu0 %1533 }
 0xb00   :  { %v4500_v24 = vpop.xlane.xlu1 %4499 }
 0xb01   :  { %v4545_v14 = vsub.f32 %v10001_v34, %v4500_v24  ;;  %v4546_v45 = vsub.f32 %v10004_v40, %v4500_v24  ;;  %v10190_v44 = vpop.f32.mrf.mxu0 }
 0xb02   :  { %11252 = vst [vmem:[#allocation11_spill] sm:$0xff] %v10190_v44 }
 0xb03   :  { %v4595_v38 = vmul.f32 1.442695, %v4545_v14  ;;  %v4597_v15 = vmul.f32 1.442695, %v4546_v45 }
 0xb05   :  { %5555 = vpow2.f32 %v4595_v38  ;;  %2241 = vadd.xlane.f32.xlu1 %v2240_v1  ;;  %2238 = vadd.xlane.f32.xlu2 %v11251_v7  ;;  %v11254_v38 = vld [vmem:[#allocation73_spill] sm:$0xff]  ;;  %v11257_v7 = vld [vmem:[#allocation7_spill] sm:$0xff] }
 0xb06   :  { %5557 = vpow2.f32 %v4597_v15  ;;  %2244 = vadd.xlane.f32.xlu0 %v2243_v20  ;;  %v11255_v15 = vld [vmem:[#allocation42_spill] sm:$0xff]  ;;  %v11256_v20 = vld [vmem:[#allocation56_spill] sm:$0xff] }
 0xb08   :  { %v4503_v10 = vpop.xlane.xlu1 %4502 }
 0xb09   :  { %v4497_v34 = vpop.xlane.xlu2 %4496  ;;  %v4548_v3 = vsub.f32 %v10015_v28, %v4503_v10  ;;  %v11260_v28 = vld [vmem:[#allocation48_spill] sm:$0xff] }
 0xb0a   :  { %v4543_v40 = vsub.f32 %v10018_v46, %v4497_v34  ;;  %v4544_v8 = vsub.f32 %v10009_v11, %v4497_v34 }
 0xb0b   :  { %v5556_v43 = vpop.eup %5555 }
 0xb0c   :  { %v5558_v24 = vpop.eup %5557  ;;  %v4591_v14 = vmul.f32 1.442695, %v4543_v40  ;;  %v4593_v45 = vmul.f32 1.442695, %v4544_v8  ;;  %v11258_v8 = vld [vmem:[#allocation54_spill] sm:$0xff] }
 0xb0d   :  { %2250 = vadd.xlane.f32.xlu1 %v11253_v13  ;;  %2247 = vadd.xlane.f32.xlu2 %v11254_v38  ;;  %v10194_v1 = vadd.f32 %v5558_v24, %v5556_v43  ;;  %v10204_v38 = vpop.f32.mrf.mxu0 }
 0xb0e   :  { %2253 = vadd.xlane.f32.xlu0 %v11255_v15  ;;  %5559 = vpow2.f32 %v4591_v14  ;;  %v4547_v14 = vsub.f32 %v10012_v30, %v4503_v10 }
 0xb0f   :  { %5561 = vpow2.f32 %v4593_v45 }
 0xb10   :  { %v4506_v46 = vpop.xlane.xlu1 %4505 }
 0xb11   :  { %v4549_v17 = vsub.f32 %v10025_v33, %v4506_v46  ;;  %v4550_v40 = vsub.f32 %v10028_v31, %v4506_v46  ;;  %v4599_v46 = vmul.f32 1.442695, %v4547_v14 }
 0xb13   :  { %v4603_v44 = vmul.f32 1.442695, %v4549_v17  ;;  %v4605_v31 = vmul.f32 1.442695, %v4550_v40 }
 0xb14   :  { %v5560_v11 = vpop.eup %5559 }
 0xb15   :  { %3959 = vadd.xlane.f32.xlu1 %v11256_v20  ;;  %3956 = vadd.xlane.f32.xlu2 %v11257_v7  ;;  %v5562_v34 = vpop.eup %5561  ;;  %v4699_v13 = vpack.c.bf16 %v5556_v43, %v5560_v11  ;;  %v10210_v7 = vpop.xlane.xlu2 %1518  ;;  %v4601_v43 = vmul.f32 1.442695, %v4548_v3 }
 0xb16   :  { %3962 = vadd.xlane.f32.xlu0 %v11258_v8  ;;  %v4700_v15 = vpack.c.bf16 %v5558_v24, %v5562_v34  ;;  %v10207_v45 = vadd.f32 %v5562_v34, %v5560_v11  ;;  %v11259_v8 = vld [vmem:[#allocation110_spill] sm:$0xff]  ;;  %v10218_v17 = vpop.f32.mrf.mxu0 }
 0xb17   :  { %4782 = vmatmul.bf16.gmra.mxu1 %v4699_v13 }
 0xb18   :  { %v4509_v33 = vpop.xlane.xlu0 %4508  ;;  %v1531_v20 = vpop.xlane.xlu1 %1530  ;;  %4836 = vmatmul.bf16.gmra.mxu0 %v4700_v15 }
 0xb19   :  { %5563 = vrcp.f32 %v1531_v20  ;;  %v4551_v20 = vsub.f32 %v10035_v56, %v4509_v33 }
 0xb1a   :  { %5565 = vpow2.f32 %v4603_v44 }
 0xb1b   :  { %5567 = vpow2.f32 %v4605_v31 }
 0xb1c   :  { %5569 = vpow2.f32 %v4599_v46 }
 0xb1d   :  { %3968 = vadd.xlane.f32.xlu1 %v11259_v8  ;;  %3965 = vadd.xlane.f32.xlu2 %v9696_v42  ;;  %5571 = vpow2.f32 %v4601_v43  ;;  %v10222_v44 = vpop.xlane.xlu2 %1527 }
 0xb1e   :  { %3971 = vadd.xlane.f32.xlu0 %v9711_v18  ;;  %v10246_v8 = vpop.f32.mrf.mxu0 }
 0xb1f   :  { %v5564_v30 = vpop.eup %5563 }
 0xb20   :  { %v10216_v10 = vmul.f32 %v5564_v30, %v11260_v28  ;;  %v1543_v24 = vpop.xlane.xlu0 %1542  ;;  %v4512_v11 = vpop.xlane.xlu1 %4511  ;;  %v4607_v30 = vmul.f32 1.442695, %v4551_v20 }
 0xb21   :  { %5573 = vrcp.f32 %v1543_v24  ;;  %v10220_v3 = vpop.eup %5565  ;;  %v4553_v18 = vsub.f32 %v10047_v9, %v4512_v11  ;;  %v4554_v13 = vsub.f32 %v10050_v51, %v4512_v11  ;;  %v4552_v9 = vsub.f32 %v10038_v6, %v4509_v33 }
 0xb22   :  { %v10224_v34 = vpop.eup %5567 }
 0xb23   :  { %v10226_v42 = vpop.eup %5569  ;;  %v4611_v51 = vmul.f32 1.442695, %v4553_v18  ;;  %v4609_v28 = vmul.f32 1.442695, %v4552_v9 }
 0xb24   :  { %v10231_v40 = vpop.eup %5571  ;;  %v4701_v14 = vpack.c.bf16 %v10220_v3, %v10226_v42 }
 0xb25   :  { %3977 = vadd.xlane.f32.xlu1 %v9737_v54  ;;  %3974 = vadd.xlane.f32.xlu2 %v9666_v58  ;;  %v4702_v31 = vpack.c.bf16 %v10224_v34, %v10231_v40  ;;  %v11261_v54 = vld [vmem:[#allocation36_spill] sm:$0xff]  ;;  %5575 = vpow2.f32 %v4611_v51  ;;  %v10248_v56 = vpop.xlane.xlu2 %1536 }
 0xb26   :  { %3980 = vadd.xlane.f32.xlu0 %v9686_v21  ;;  %v4613_v21 = vmul.f32 1.442695, %v4554_v13  ;;  %v10261_v13 = vpop.f32.mrf.mxu0 }
 0xb27   :  { %v5574_v15 = vpop.eup %5573  ;;  %4787 = vmatmul.bf16.gmra.mxu1 %v4701_v14 }
 0xb28   :  { %v10242_v46 = vmul.f32 %v5574_v15, %v11261_v54  ;;  %v4515_v58 = vpop.xlane.xlu0 %4514  ;;  %v10244_v43 = vpop.xlane.xlu1 %1539  ;;  %4841 = vmatmul.bf16.gmra.mxu0 %v4702_v31  ;;  %5577 = vpow2.f32 %v4613_v21 }
 0xb29   :  { %5579 = vpow2.f32 %v4607_v30  ;;  %v4555_v15 = vsub.f32 %v10058_v49, %v4515_v58 }
 0xb2a   :  { %5581 = vpow2.f32 %v4609_v28 }
 0xb2b   :  { %v10255_v24 = vpop.eup %5575 }
 0xb2d   :  { %3986 = vadd.xlane.f32.xlu1 %v9725_v29  ;;  %3983 = vadd.xlane.f32.xlu2 %v9762_v62  ;;  %v10273_v20 = vpop.xlane.xlu2 %1545 }
 0xb2e   :  { %3989 = vadd.xlane.f32.xlu0 %v9751_v39  ;;  %v10257_v11 = vpop.eup %5577  ;;  %v10283_v49 = vpop.f32.mrf.mxu0 }
 0xb2f   :  { %v10259_v18 = vpop.eup %5579 }
 0xb30   :  { %v10253_v6 = vpop.xlane.xlu0 %1551  ;;  %v4518_v33 = vpop.xlane.xlu1 %4517  ;;  %v4703_v14 = vpack.c.bf16 %v10255_v24, %v10259_v18 }
 0xb31   :  { %v4557_v29 = vsub.f32 %v10070_v27, %v4518_v33  ;;  %v10266_v39 = vpop.eup %5581  ;;  %v4558_v62 = vsub.f32 %v10073_v22, %v4518_v33 }
 0xb32   :  { %v4704_v27 = vpack.c.bf16 %v10257_v11, %v10266_v39 }
 0xb33   :  { %v4619_v9 = vmul.f32 1.442695, %v4557_v29  ;;  %v4621_v22 = vmul.f32 1.442695, %v4558_v62 }
 0xb35   :  { %3995 = vadd.xlane.f32.xlu1 %v9786_v52  ;;  %3992 = vadd.xlane.f32.xlu2 %v9771_v61  ;;  %v4556_v52 = vsub.f32 %v10061_v26, %v4515_v58  ;;  %5583 = vpow2.f32 %v4619_v9 }
 0xb36   :  { %3998 = vadd.xlane.f32.xlu0 %v9830_v2  ;;  %v4615_v2 = vmul.f32 1.442695, %v4555_v15  ;;  %5585 = vpow2.f32 %v4621_v22 }
 0xb37   :  { %4792 = vmatmul.bf16.gmra.mxu1 %v4703_v14  ;;  %v4617_v54 = vmul.f32 1.442695, %v4556_v52 }
 0xb38   :  { %v10278_v61 = vpop.xlane.xlu1 %1548  ;;  %v4521_v31 = vpop.xlane.xlu0 %4520  ;;  %4846 = vmatmul.bf16.gmra.mxu0 %v4704_v27  ;;  %5587 = vpow2.f32 %v4615_v2 }
 0xb39   :  { %5589 = vpow2.f32 %v4617_v54  ;;  %v4559_v29 = vsub.f32 %v10081_v60, %v4521_v31 }
 0xb3b   :  { %v10289_v21 = vpop.eup %5583  ;;  %v4623_v27 = vmul.f32 1.442695, %v4559_v29  ;;  %v4669_v29 = vadd.f32 %v10266_v39, %v10259_v18  ;;  %v11265_v39 = vld [vmem:[#allocation88_spill] sm:$0xff] }
 0xb3c   :  { %v10291_v30 = vpop.eup %5585 }
 0xb3d   :  { %4004 = vadd.xlane.f32.xlu1 %v9842_v32  ;;  %4001 = vadd.xlane.f32.xlu2 %v9858_v16 }
 0xb3e   :  { %4007 = vadd.xlane.f32.xlu0 %v9851_v55  ;;  %v10293_v28 = vpop.eup %5587 }
 0xb3f   :  { %v10298_v55 = vpop.eup %5589  ;;  %v4705_v33 = vpack.c.bf16 %v10289_v21, %v10293_v28 }
 0xb40   :  { %v10285_v26 = vpop.xlane.xlu1 %1557  ;;  %v4524_v58 = vpop.xlane.xlu2 %4523  ;;  %v4706_v62 = vpack.c.bf16 %v10291_v30, %v10298_v55 }
 0xb41   :  { %v10287_v51 = vpop.xlane.xlu0 %1560  ;;  %v4561_v32 = vsub.f32 %v10093_v59, %v4524_v58  ;;  %v4562_v16 = vsub.f32 %v10096_v36, %v4524_v58  ;;  %v4560_v59 = vsub.f32 %v10084_v23, %v4521_v31 }
 0xb43   :  { %v4627_v14 = vmul.f32 1.442695, %v4561_v32  ;;  %v4629_v15 = vmul.f32 1.442695, %v4562_v16  ;;  %v4625_v52 = vmul.f32 1.442695, %v4560_v59 }
 0xb45   :  { %4643 = vadd.xlane.f32.xlu1 %v10137_v35  ;;  %4640 = vadd.xlane.f32.xlu2 %v10113_v0  ;;  %5591 = vpow2.f32 %v4627_v14  ;;  %v4672_v14 = vadd.f32 %v10257_v11, %v10255_v24 }
 0xb46   :  { %4646 = vadd.xlane.f32.xlu0 %v10147_v47  ;;  %v10314_v47 = vpop.f32.mrf.mxu0  ;;  %5593 = vpow2.f32 %v4629_v15 }
 0xb47   :  { %4797 = vmatmul.bf16.gmra.mxu1 %v4705_v33  ;;  %5595 = vpow2.f32 %v4623_v27 }
 0xb48   :  { %v10308_v35 = vpop.xlane.xlu1 %1566  ;;  %v10310_v0 = vpop.xlane.xlu2 %1554  ;;  %4851 = vmatmul.bf16.gmra.mxu0 %v4706_v62  ;;  %5597 = vpow2.f32 %v4625_v52 }
 0xb49   :  { %v10312_v36 = vpop.xlane.xlu0 %1569  ;;  %5599 = vrcp.f32 %v10170_v12 }
 0xb4a   :  { %5601 = vrcp.f32 %v10210_v7  ;;  %v4666_v7 = vadd.f32 %v10224_v34, %v10220_v3 }
 0xb4b   :  { %v10322_v22 = vpop.eup %5591 }
 0xb4c   :  { %v10324_v2 = vpop.eup %5593 }
 0xb4d   :  { %4652 = vadd.xlane.f32.xlu1 %v10168_v41  ;;  %4649 = vadd.xlane.f32.xlu2 %v10154_v48  ;;  %v10331_v58 = vpop.eup %5595 }
 0xb4e   :  { %4655 = vadd.xlane.f32.xlu0 %v10176_v19  ;;  %v10326_v54 = vpop.f32.mrf.mxu0  ;;  %v4663_v19 = vadd.f32 %v10231_v40, %v10226_v42 }
 0xb4f   :  { %11262 = vst [vmem:[#allocation41_spill] sm:$0xff] %v10326_v54 }
 0xb50   :  { %v4527_v60 = vpop.xlane.xlu1 %4526  ;;  %v10319_v23 = vpop.xlane.xlu2 %1563 }
 0xb51   :  { %v4563_v31 = vsub.f32 %v10119_v4, %v4527_v60  ;;  %v4530_v9 = vpop.xlane.xlu0 %4529  ;;  %v4564_v41 = vsub.f32 %v10116_v50, %v4527_v60  ;;  %v10336_v4 = vpop.eup %5597  ;;  %v4707_v50 = vpack.c.bf16 %v10322_v22, %v10331_v58  ;;  %v11263_v60 = vld [vmem:[#allocation30_spill] sm:$0xff] }
 0xb52   :  { %v4565_v32 = vsub.f32 %v10122_v25, %v4530_v9  ;;  %v4566_v16 = vsub.f32 %v10127_v57, %v4530_v9  ;;  %v4708_v42 = vpack.c.bf16 %v10324_v2, %v10336_v4  ;;  %v5600_v62 = vpop.eup %5599  ;;  %v11266_v9 = vld [vmem:[#allocation89_spill] sm:$0xff] }
 0xb53   :  { %v4631_v48 = vmul.f32 1.442695, %v4563_v31  ;;  %v4633_v25 = vmul.f32 1.442695, %v4564_v41  ;;  %v5602_v15 = vpop.eup %5601  ;;  %v11264_v31 = vld [vmem:[#allocation40_spill] sm:$0xff]  ;;  %v2387_v3 = vadd.f32 %v11266_v9, %v11265_v39 }
 0xb54   :  { %v4635_v40 = vmul.f32 1.442695, %v4565_v32  ;;  %v4637_v33 = vmul.f32 1.442695, %v4566_v16  ;;  %v1719_v18 = vadd.f32 %v11264_v31, %v11263_v60  ;;  %v10364_v41 = vld [vmem:[%s10761_s7] ss:$0 sm:$0xff]  ;;  %v4681_v31 = vadd.f32 %v10336_v4, %v10331_v58 }
 0xb55   :  { %4661 = vadd.xlane.f32.xlu1 %v10194_v1  ;;  %4658 = vadd.xlane.f32.xlu2 %v10207_v45  ;;  %5603 = vpow2.f32 %v4631_v48  ;;  %v11271_v58 = vld [vmem:[#allocation32_spill] sm:$0xff] }
 0xb56   :  { %4664 = vadd.xlane.f32.xlu0 %v4663_v19  ;;  %v1780_v11 = vmul.f32 %v5600_v62, %v1719_v18  ;;  %v4675_v62 = vadd.f32 %v10298_v55, %v10293_v28  ;;  %v11270_v55 = vld [vmem:[#allocation51_spill] sm:$0xff] }
 0xb57   :  { %4802 = vmatmul.bf16.gmra.mxu1 %v4707_v50  ;;  %v11267_v50 = vld [vmem:[#allocation90_spill] sm:$0xff]  ;;  %v1729_v4 = vadd.f32 %v11271_v58, %v11270_v55 }
 0xb58   :  { %v2206_v1 = vpop.xlane.xlu1 %2205  ;;  %v2203_v45 = vpop.xlane.xlu2 %2202  ;;  %4856 = vmatmul.bf16.gmra.mxu0 %v4708_v42 }
 0xb59   :  { %5605 = vrcp.f32 %v2206_v1  ;;  %v2209_v12 = vpop.xlane.xlu0 %2208 }
 0xb5a   :  { %5607 = vrcp.f32 %v2209_v12  ;;  %v11269_v12 = vld [vmem:[#allocation87_spill] sm:$0xff] }
 0xb5b   :  { %5609 = vrcp.f32 %v2203_v45  ;;  %v4768_v57 = vpop.f32.mrf.mxu1  ;;  %v10353_v52 = vpop.eup %5603  ;;  %v11268_v45 = vld [vmem:[#allocation23_spill] sm:$0xff] }
 0xb5c   :  { %5611 = vpow2.f32 %v4633_v25  ;;  %v4822_v59 = vpop.f32.mrf.mxu0 }
 0xb5d   :  { %5613 = vpow2.f32 %v4635_v40  ;;  %v10351_v27 = vadd.f32 %v4822_v59, %v4768_v57  ;;  %4670 = vadd.xlane.f32.xlu1 %v4669_v29  ;;  %4667 = vadd.xlane.f32.xlu2 %v4666_v7  ;;  %v4678_v7 = vadd.f32 %v10291_v30, %v10289_v21 }
 0xb5e   :  { %5615 = vpow2.f32 %v4637_v33  ;;  %4673 = vadd.xlane.f32.xlu0 %v4672_v14 }
 0xb5f   :  { %v5606_v34 = vpop.eup %5605  ;;  %5617 = vrcp.f32 %v10197_v63  ;;  %v1779_v63 = vmul.f32 %v5602_v15, %v11268_v45 }
 0xb60   :  { %v5608_v24 = vpop.eup %5607  ;;  %5619 = vrcp.f32 %v10222_v44  ;;  %v2448_v48 = vmul.f32 %v5606_v34, %v2387_v3  ;;  %v2215_v19 = vpop.xlane.xlu1 %2214 }
 0xb61   :  { %v2212_v32 = vpop.xlane.xlu2 %2211  ;;  %v5610_v16 = vpop.eup %5609  ;;  %v2449_v42 = vmul.f32 %v5608_v24, %v11267_v50  ;;  %5621 = vrcp.f32 %v2215_v19  ;;  %v11272_v24 = vld [vmem:[#allocation52_spill] sm:$0xff] }
 0xb62   :  { %v2218_v25 = vpop.xlane.xlu0 %2217  ;;  %v5612_v1 = vpop.eup %5611  ;;  %v2466_v40 = vadd.f32 %v2448_v48, %v1780_v11  ;;  %v2447_v33 = vmul.f32 %v5610_v16, %v11269_v12  ;;  %v11273_v11 = vld [vmem:[#allocation12_spill] sm:$0xff]  ;;  %v11276_v12 = vld [vmem:[#allocation91_spill] sm:$0xff] }
 0xb63   :  { %5623 = vrcp.f32 %v2218_v25  ;;  %v5614_v44 = vpop.eup %5613  ;;  %v2467_v57 = vadd.f32 %v2449_v42, %v10160_v37  ;;  %v4770_v29 = vpop.f32.mrf.mxu1  ;;  %v1724_v48 = vadd.f32 %v11273_v11, %v11272_v24  ;;  %v11274_v19 = vld [vmem:[#allocation92_spill] sm:$0xff]  ;;  %v11275_v25 = vld [vmem:[#allocation93_spill] sm:$0xff] }
 0xb64   :  { %5625 = vrcp.f32 %v2212_v32  ;;  %v5616_v59 = vpop.eup %5615  ;;  %v2487_v14 = vadd.f32 %v10364_v41, %v2466_v40  ;;  %v2465_v60 = vadd.f32 %v2447_v33, %v1779_v63  ;;  %v4824_v15 = vpop.f32.mrf.mxu0  ;;  %v4709_v30 = vpack.c.bf16 %v5614_v44, %v10353_v52 }
 0xb65   :  { %v5618_v18 = vpop.eup %5617  ;;  %v2488_v39 = vadd.f32 %v10364_v41, %v2467_v57  ;;  %v10378_v37 = vadd.f32 %v4824_v15, %v4770_v29  ;;  %4679 = vadd.xlane.f32.xlu1 %v4678_v7  ;;  %4676 = vadd.xlane.f32.xlu2 %v4675_v62  ;;  %5627 = vrcp.f32 %v10244_v43  ;;  %v4710_v3 = vpack.c.bf16 %v5616_v59, %v5612_v1 }
 0xb66   :  { %v5620_v9 = vpop.eup %5619  ;;  %2505 = vst.msk [vmem:[%s10762_s8 + $0x8] sm:$0xff] %vm92_vm0, %v2487_v14  ;;  %v2486_v21 = vadd.f32 %v10364_v41, %v2465_v60  ;;  %4682 = vadd.xlane.f32.xlu0 %v4681_v31  ;;  %5629 = vrcp.f32 %v10248_v56  ;;  %v1784_v42 = vmul.f32 %v5618_v18, %v1729_v4  ;;  %v4687_v7 = vadd.f32 %v5612_v1, %v10353_v52 }
 0xb67   :  { %v5622_v28 = vpop.eup %5621  ;;  %2506 = vst.msk [vmem:[%s10762_s8 + $0x10] sm:$0xff] %vm92_vm0, %v2488_v39  ;;  %4807 = vmatmul.bf16.gmra.mxu1 %v4709_v30  ;;  %v1782_v40 = vmul.f32 %v5620_v9, %v1724_v48  ;;  %v4684_v62 = vadd.f32 %v10324_v2, %v10322_v22  ;;  %v4690_v31 = vadd.f32 %v5616_v59, %v5614_v44  ;;  %v11278_v30 = vld [vmem:[#allocation21_spill] sm:$0xff]  ;;  %v11282_v48 = vld [vmem:[#allocation94_spill] sm:$0xff] }
 0xb68   :  { %2504 = vst.msk [vmem:[%s10762_s8] sm:$0xff] %vm92_vm0, %v2486_v21  ;;  %v2451_v32 = vmul.f32 %v5622_v28, %v11274_v19  ;;  %v2224_v43 = vpop.xlane.xlu1 %2223  ;;  %4861 = vmatmul.bf16.gmra.mxu0 %v4710_v3  ;;  %v11277_v21 = vld [vmem:[#allocation34_spill] sm:$0xff] }
 0xb69   :  { %v5624_v34 = vpop.eup %5623  ;;  %v2221_v16 = vpop.xlane.xlu2 %2220  ;;  %5631 = vrcp.f32 %v2224_v43  ;;  %v1734_v28 = vadd.f32 %v11278_v30, %v11277_v21  ;;  %v11289_v21 = vld [vmem:[#allocation99_spill] sm:$0xff] }
 0xb6a   :  { %v5626_v50 = vpop.eup %5625  ;;  %v2452_v45 = vmul.f32 %v5624_v34, %v11275_v25  ;;  %v2227_v63 = vpop.xlane.xlu0 %2226  ;;  %v2469_v56 = vadd.f32 %v2451_v32, %v10216_v10  ;;  %v11281_v34 = vld [vmem:[#allocation33_spill] sm:$0xff] }
 0xb6b   :  { %v2450_v33 = vmul.f32 %v5626_v50, %v11276_v12  ;;  %5633 = vrcp.f32 %v2227_v63  ;;  %v4773_v29 = vpop.f32.mrf.mxu1  ;;  %v5628_v18 = vpop.eup %5627  ;;  %v11283_v12 = vld [vmem:[#allocation64_spill] sm:$0xff] }
 0xb6c   :  { %v2470_v57 = vadd.f32 %v2452_v45, %v1784_v42  ;;  %5635 = vrcp.f32 %v2221_v16  ;;  %v2490_v14 = vadd.f32 %v10364_v41, %v2469_v56  ;;  %v4827_v15 = vpop.f32.mrf.mxu0  ;;  %v5630_v9 = vpop.eup %5629  ;;  %v1786_v1 = vmul.f32 %v5628_v18, %v1734_v28 }
 0xb6d   :  { %v2468_v60 = vadd.f32 %v2450_v33, %v1782_v40  ;;  %v10409_v10 = vadd.f32 %v4827_v15, %v4773_v29  ;;  %4688 = vadd.xlane.f32.xlu1 %v4687_v7  ;;  %4685 = vadd.xlane.f32.xlu2 %v4684_v62  ;;  %5637 = vrcp.f32 %v10273_v20  ;;  %v11279_v20 = vld [vmem:[#allocation95_spill] sm:$0xff]  ;;  %v1785_v24 = vmul.f32 %v5630_v9, %v11281_v34  ;;  %v11284_v33 = vld [vmem:[#allocation66_spill] sm:$0xff] }
 0xb6e   :  { %v2491_v39 = vadd.f32 %v10364_v41, %v2470_v57  ;;  %2508 = vst.msk [vmem:[%s10762_s8 + $0x20] sm:$0xff] %vm92_vm0, %v2490_v14  ;;  %4691 = vadd.xlane.f32.xlu0 %v4690_v31  ;;  %5639 = vrcp.f32 %v10278_v61  ;;  %v11280_v61 = vld [vmem:[#allocation96_spill] sm:$0xff]  ;;  %v1744_v57 = vadd.f32 %v11284_v33, %v11283_v12  ;;  %v11286_v7 = vld [vmem:[#allocation46_spill] sm:$0xff] }
 0xb6f   :  { %v2489_v22 = vadd.f32 %v10364_v41, %v2468_v60  ;;  %v5632_v2 = vpop.eup %5631  ;;  %5641 = vrcp.f32 %v10253_v6  ;;  %v11287_v14 = vld [vmem:[#allocation24_spill] sm:$0xff]  ;;  %v11288_v15 = vld [vmem:[#allocation98_spill] sm:$0xff] }
 0xb70   :  { %2509 = vst.msk [vmem:[%s10762_s8 + $0x28] sm:$0xff] %vm92_vm0, %v2491_v39  ;;  %v2454_v44 = vmul.f32 %v5632_v2, %v11279_v20  ;;  %v2233_v59 = vpop.xlane.xlu1 %2232 }
 0xb71   :  { %v5634_v52 = vpop.eup %5633  ;;  %2507 = vst.msk [vmem:[%s10762_s8 + $0x18] sm:$0xff] %vm92_vm0, %v2489_v22  ;;  %v2230_v55 = vpop.xlane.xlu2 %2229  ;;  %5643 = vrcp.f32 %v2233_v59 }
 0xb72   :  { %v5636_v58 = vpop.eup %5635  ;;  %v2455_v4 = vmul.f32 %v5634_v52, %v11280_v61  ;;  %v2236_v3 = vpop.xlane.xlu0 %2235  ;;  %v2472_v11 = vadd.f32 %v2454_v44, %v1786_v1  ;;  %v11290_v52 = vld [vmem:[#allocation97_spill] sm:$0xff] }
 0xb73   :  { %v2453_v19 = vmul.f32 %v5636_v58, %v11282_v48  ;;  %5645 = vrcp.f32 %v2236_v3  ;;  %v4775_v32 = vpop.f32.mrf.mxu1  ;;  %v5638_v43 = vpop.eup %5637  ;;  %v11292_v3 = vld [vmem:[#allocation77_spill] sm:$0xff] }
 0xb74   :  { %v2473_v6 = vadd.f32 %v2455_v4, %v10242_v46  ;;  %5647 = vrcp.f32 %v2230_v55  ;;  %v2493_v16 = vadd.f32 %v10364_v41, %v2472_v11  ;;  %v4829_v42 = vpop.f32.mrf.mxu0  ;;  %v5640_v25 = vpop.eup %5639  ;;  %v11291_v4 = vld [vmem:[#allocation76_spill] sm:$0xff]  ;;  %v11294_v11 = vld [vmem:[#allocation102_spill] sm:$0xff] }
 0xb75   :  { %v2471_v50 = vadd.f32 %v2453_v19, %v1785_v24  ;;  %v10436_v63 = vadd.f32 %v4829_v42, %v4775_v32  ;;  %v5642_v40 = vpop.eup %5641  ;;  %5649 = vrcp.f32 %v10285_v26  ;;  %v11285_v26 = vld [vmem:[#allocation44_spill] sm:$0xff]  ;;  %v1789_v60 = vmul.f32 %v5640_v25, %v11287_v14  ;;  %v11293_v24 = vld [vmem:[#allocation101_spill] sm:$0xff]  ;;  %v11295_v25 = vld [vmem:[#allocation78_spill] sm:$0xff] }
 0xb76   :  { %v2494_v45 = vadd.f32 %v10364_v41, %v2473_v6  ;;  %2511 = vst.msk [vmem:[%s10762_s8 + $0x38] sm:$0xff] %vm92_vm0, %v2493_v16  ;;  %5651 = vrcp.f32 %v10287_v51  ;;  %v1739_v62 = vadd.f32 %v11286_v7, %v11285_v26  ;;  %v1790_v9 = vmul.f32 %v5642_v40, %v1744_v57  ;;  %v11298_v57 = vld [vmem:[#allocation100_spill] sm:$0xff] }
 0xb77   :  { %v2492_v46 = vadd.f32 %v10364_v41, %v2471_v50  ;;  %v5644_v56 = vpop.eup %5643  ;;  %5653 = vrcp.f32 %v10310_v0  ;;  %v1749_v34 = vadd.f32 %v11292_v3, %v11291_v4  ;;  %v2417_v48 = vadd.f32 %v11294_v11, %v11293_v24  ;;  %v11308_v4 = vld [vmem:[#allocation106_spill] sm:$0xff] }
 0xb78   :  { %2512 = vst.msk [vmem:[%s10762_s8 + $0x40] sm:$0xff] %vm92_vm0, %v2494_v45  ;;  %v2457_v51 = vmul.f32 %v5644_v56, %v11288_v15  ;;  %v2242_v31 = vpop.xlane.xlu1 %2241  ;;  %v1788_v22 = vmul.f32 %v5638_v43, %v1739_v62  ;;  %v11296_v45 = vld [vmem:[#allocation103_spill] sm:$0xff]  ;;  %v11297_v56 = vld [vmem:[#allocation70_spill] sm:$0xff] }
 0xb79   :  { %v5646_v29 = vpop.eup %5645  ;;  %2510 = vst.msk [vmem:[%s10762_s8 + $0x30] sm:$0xff] %vm92_vm0, %v2492_v46  ;;  %v2239_v18 = vpop.xlane.xlu2 %2238  ;;  %5655 = vrcp.f32 %v2242_v31 }
 0xb7a   :  { %v5648_v39 = vpop.eup %5647  ;;  %v2458_v30 = vmul.f32 %v5646_v29, %v11289_v21  ;;  %v2245_v28 = vpop.xlane.xlu0 %2244  ;;  %v2475_v2 = vadd.f32 %v2457_v51, %v1789_v60  ;;  %v11300_v21 = vld [vmem:[#allocation84_spill] sm:$0xff] }
 0xb7b   :  { %v2456_v1 = vmul.f32 %v5648_v39, %v11290_v52  ;;  %5657 = vrcp.f32 %v2245_v28  ;;  %v5650_v20 = vpop.eup %5649  ;;  %v10488_v26 = vpop.f32.mrf.mxu1  ;;  %v11301_v28 = vld [vmem:[#allocation107_spill] sm:$0xff] }
 0xb7c   :  { %v2476_v0 = vadd.f32 %v2458_v30, %v1790_v9  ;;  %5659 = vrcp.f32 %v2239_v18  ;;  %v2496_v44 = vadd.f32 %v10364_v41, %v2475_v2  ;;  %v5652_v55 = vpop.eup %5651  ;;  %v1792_v43 = vmul.f32 %v5650_v20, %v1749_v34  ;;  %v10491_v60 = vpop.f32.mrf.mxu0  ;;  %v11299_v9 = vld [vmem:[#allocation83_spill] sm:$0xff] }
 0xb7d   :  { %v2474_v59 = vadd.f32 %v2456_v1, %v1788_v22  ;;  %v5654_v61 = vpop.eup %5653  ;;  %5661 = vrcp.f32 %v10308_v35  ;;  %v1759_v30 = vadd.f32 %v11300_v21, %v11299_v9  ;;  %v11302_v22 = vld [vmem:[#allocation108_spill] sm:$0xff]  ;;  %v11303_v1 = vld [vmem:[#allocation3_spill] sm:$0xff] }
 0xb7e   :  { %v2497_v58 = vadd.f32 %v10364_v41, %v2476_v0  ;;  %2514 = vst.msk [vmem:[%s10762_s8 + $0x50] sm:$0xff] %vm92_vm0, %v2496_v44  ;;  %5663 = vrcp.f32 %v10312_v36  ;;  %v1793_v36 = vmul.f32 %v5652_v55, %v11295_v25  ;;  %v1791_v12 = vmul.f32 %v5654_v61, %v11297_v56  ;;  %v11304_v0 = vld [vmem:[#allocation79_spill] sm:$0xff]  ;;  %v11305_v44 = vld [vmem:[#allocation104_spill] sm:$0xff] }
 0xb7f   :  { %v2495_v19 = vadd.f32 %v10364_v41, %v2474_v59  ;;  %v5656_v6 = vpop.eup %5655  ;;  %5665 = vrcp.f32 %v10319_v23  ;;  %v2427_v2 = vadd.f32 %v11302_v22, %v11301_v28  ;;  %v1754_v20 = vadd.f32 %v11304_v0, %v11303_v1  ;;  %v11306_v59 = vld [vmem:[#allocation105_spill] sm:$0xff] }
 0xb80   :  { %2515 = vst.msk [vmem:[%s10762_s8 + $0x58] sm:$0xff] %vm92_vm0, %v2497_v58  ;;  %v2460_v35 = vmul.f32 %v5656_v6, %v2417_v48  ;;  %v2251_v16 = vpop.xlane.xlu1 %2250  ;;  %v2422_v55 = vadd.f32 %v11306_v59, %v11305_v44  ;;  %v11307_v58 = vld [vmem:[#allocation82_spill] sm:$0xff] }
 0xb81   :  { %v5658_v32 = vpop.eup %5657  ;;  %2513 = vst.msk [vmem:[%s10762_s8 + $0x48] sm:$0xff] %vm92_vm0, %v2495_v19  ;;  %v2248_v50 = vpop.xlane.xlu2 %2247  ;;  %5667 = vrcp.f32 %v2251_v16 }
 0xb82   :  { %v5660_v42 = vpop.eup %5659  ;;  %v2461_v40 = vmul.f32 %v5658_v32, %v11296_v45  ;;  %v2254_v46 = vpop.xlane.xlu0 %2253  ;;  %v2478_v33 = vadd.f32 %v2460_v35, %v1792_v43 }
 0xb83   :  { %v2459_v23 = vmul.f32 %v5660_v42, %v11298_v57  ;;  %5669 = vrcp.f32 %v2254_v46  ;;  %v5662_v7 = vpop.eup %5661 }
 0xb84   :  { %v2479_v29 = vadd.f32 %v2461_v40, %v1793_v36  ;;  %5671 = vrcp.f32 %v2248_v50  ;;  %v2499_v62 = vadd.f32 %v10364_v41, %v2478_v33  ;;  %v5664_v15 = vpop.eup %5663  ;;  %v1795_v61 = vmul.f32 %v5662_v7, %v11307_v58  ;;  %v10519_v36 = vpop.f32.mrf.mxu1 }
 0xb85   :  { %v2477_v14 = vadd.f32 %v2459_v23, %v1791_v12  ;;  %v5666_v31 = vpop.eup %5665  ;;  %v1796_v48 = vmul.f32 %v5664_v15, %v1759_v30  ;;  %v10526_v40 = vpop.f32.mrf.mxu0 }
 0xb86   :  { %v2500_v51 = vadd.f32 %v10364_v41, %v2479_v29  ;;  %2517 = vst.msk [vmem:[%s10762_s8 + $0x68] sm:$0xff] %vm92_vm0, %v2499_v62  ;;  %v1794_v32 = vmul.f32 %v5666_v31, %v1754_v20 }
 0xb87   :  { %v2498_v18 = vadd.f32 %v10364_v41, %v2477_v14  ;;  %v5668_v39 = vpop.eup %5667 }
 0xb88   :  { %2518 = vst.msk [vmem:[%s10762_s8 + $0x70] sm:$0xff] %vm92_vm0, %v2500_v51  ;;  %v2463_v3 = vmul.f32 %v5668_v39, %v11308_v4  ;;  %v3960_v34 = vpop.xlane.xlu1 %3959 }
 0xb89   :  { %v5670_v52 = vpop.eup %5669  ;;  %2516 = vst.msk [vmem:[%s10762_s8 + $0x60] sm:$0xff] %vm92_vm0, %v2498_v18  ;;  %v3957_v24 = vpop.xlane.xlu2 %3956  ;;  %5673 = vrcp.f32 %v3960_v34 }
 0xb8a   :  { %v5672_v11 = vpop.eup %5671  ;;  %v2464_v19 = vmul.f32 %v5670_v52, %v2427_v2  ;;  %v3963_v6 = vpop.xlane.xlu0 %3962  ;;  %v2481_v43 = vadd.f32 %v2463_v3, %v1795_v61 }
 0xb8b   :  { %v2462_v35 = vmul.f32 %v5672_v11, %v2422_v55  ;;  %5675 = vrcp.f32 %v3963_v6  ;;  %v11310_v11 = vld [vmem:[#allocation8_spill] sm:$0xff]  ;;  %v11312_v6 = vld [vmem:[#allocation43_spill] sm:$0xff] }
 0xb8c   :  { %v2482_v16 = vadd.f32 %v2464_v19, %v1796_v48  ;;  %v2502_v50 = vadd.f32 %v10364_v41, %v2481_v43  ;;  %5677 = vrcp.f32 %v3957_v24  ;;  %v11311_v48 = vld [vmem:[#allocation19_spill] sm:$0xff] }
 0xb8d   :  { %v2480_v42 = vadd.f32 %v2462_v35, %v1794_v32  ;;  %v4157_v19 = vadd.f32 %v11311_v48, %v11310_v11  ;;  %v11313_v24 = vld [vmem:[#allocation55_spill] sm:$0xff] }
 0xb8e   :  { %v2503_v25 = vadd.f32 %v10364_v41, %v2482_v16  ;;  %2520 = vst.msk [vmem:[%s10762_s8 + $0x80] sm:$0xff] %vm92_vm0, %v2502_v50  ;;  %v4160_v43 = vadd.f32 %v11313_v24, %v11312_v6  ;;  %v11314_v16 = vld [vmem:[#allocation38_spill] sm:$0xff]  ;;  %v11315_v50 = vld [vmem:[#allocation20_spill] sm:$0xff] }
 0xb8f   :  { %v2501_v45 = vadd.f32 %v10364_v41, %v2480_v42  ;;  %v5674_v58 = vpop.eup %5673  ;;  %v4155_v42 = vadd.f32 %v11315_v50, %v11314_v16  ;;  %v11318_v16 = vld [vmem:[#allocation111_spill] sm:$0xff]  ;;  %v11319_v50 = vld [vmem:[#allocation14_spill] sm:$0xff] }
 0xb90   :  { %2521 = vst.msk [vmem:[%s10762_s8 + $0x88] sm:$0xff] %vm92_vm0, %v2503_v25  ;;  %v3969_v46 = vpop.xlane.xlu1 %3968  ;;  %v4218_v25 = vmul.f32 %v5674_v58, %v4157_v19 }
 0xb91   :  { %2519 = vst.msk [vmem:[%s10762_s8 + $0x78] sm:$0xff] %vm92_vm0, %v2501_v45  ;;  %v3966_v56 = vpop.xlane.xlu2 %3965  ;;  %v5676_v61 = vpop.eup %5675 }
 0xb92   :  { %v3972_v12 = vpop.xlane.xlu0 %3971  ;;  %v5678_v3 = vpop.eup %5677  ;;  %v4219_v11 = vmul.f32 %v5676_v61, %v4160_v43  ;;  %v11317_v43 = vld [vmem:[#allocation25_spill] sm:$0xff] }
 0xb93   :  { %v4217_v54 = vmul.f32 %v5678_v3, %v4155_v42  ;;  %v4833_v3 = vadd.f32 %v10491_v60, %v10488_v26  ;;  %v4167_v42 = vadd.f32 %v11319_v50, %v11318_v16  ;;  %v11320_v60 = vld [vmem:[#allocation39_spill] sm:$0xff]  ;;  %v11323_v16 = vld [vmem:[#allocation112_spill] sm:$0xff] }
 0xb94   :  { %v10536_v33 = vpop.f32.mrf.mxu1  ;;  %v4170_v50 = vadd.f32 %v10143_v5, %v11323_v16 }
 0xb95   :  { %v10538_v57 = vpop.f32.mrf.mxu0 }
 0xb98   :  { %v10540_v23 = vpop.xlane.xlu1 %3977 }
 0xb99   :  { %v10542_v29 = vpop.xlane.xlu2 %3974 }
 0xb9a   :  { %v10544_v7 = vpop.xlane.xlu0 %3980 }
 0xb9c   :  { %v10546_v62 = vpop.f32.mrf.mxu1 }
 0xb9d   :  { %v10548_v14 = vpop.f32.mrf.mxu0 }
 0xba0   :  { %v10550_v15 = vpop.xlane.xlu1 %3986 }
 0xba1   :  { %v10552_v51 = vpop.xlane.xlu2 %3983 }
 0xba2   :  { %v10554_v31 = vpop.xlane.xlu0 %3989 }
 0xba4   :  { %v10556_v18 = vpop.f32.mrf.mxu1 }
 0xba5   :  { %v10558_v39 = vpop.f32.mrf.mxu0 }
 0xba8   :  { %v10560_v9 = vpop.xlane.xlu1 %3995 }
 0xba9   :  { %v10562_v21 = vpop.xlane.xlu2 %3992 }
 0xbaa   :  { %v10564_v30 = vpop.xlane.xlu0 %3998 }
 0xbac   :  { %v10566_v28 = vpop.f32.mrf.mxu1 }
 0xbad   :  { %v10568_v22 = vpop.f32.mrf.mxu0 }
 0xbb0   :  { %v10570_v2 = vpop.xlane.xlu1 %4004 }
 0xbb1   :  { %v10572_v52 = vpop.xlane.xlu2 %4001 }
 0xbb2   :  { %v10574_v1 = vpop.xlane.xlu0 %4007 }
 0xbb3   :  { %11309 = vst [vmem:[#allocation45_spill] sm:$0xff] %v10574_v1 }
 0xbb4   :  { %v10576_v0 = vpop.f32.mrf.mxu1 }
 0xbb5   :  { %v10578_v20 = vpop.f32.mrf.mxu0 }
 0xbb8   :  { %v4644_v44 = vpop.xlane.xlu1 %4643 }
 0xbb9   :  { %v4641_v59 = vpop.xlane.xlu2 %4640  ;;  %5679 = vrcp.f32 %v4644_v44 }
 0xbba   :  { %v4647_v55 = vpop.xlane.xlu0 %4646 }
 0xbbb   :  { %5681 = vrcp.f32 %v4647_v55 }
 0xbbc   :  { %5683 = vrcp.f32 %v4641_v59  ;;  %v10580_v4 = vpop.f32.mrf.mxu1 }
 0xbbd   :  { %5685 = vrcp.f32 %v3969_v46  ;;  %v10584_v34 = vpop.f32.mrf.mxu0 }
 0xbbe   :  { %5687 = vrcp.f32 %v3972_v12 }
 0xbbf   :  { %v5680_v32 = vpop.eup %5679  ;;  %5689 = vrcp.f32 %v3966_v56 }
 0xbc0   :  { %v4886_v45 = vmul.f32 %v5680_v32, %v10378_v37  ;;  %v4653_v44 = vpop.xlane.xlu1 %4652 }
 0xbc1   :  { %v5682_v35 = vpop.eup %5681  ;;  %v4650_v59 = vpop.xlane.xlu2 %4649  ;;  %5691 = vrcp.f32 %v4653_v44 }
 0xbc2   :  { %v5684_v55 = vpop.eup %5683  ;;  %v4887_v46 = vmul.f32 %v5682_v35, %v10409_v10  ;;  %v4656_v48 = vpop.xlane.xlu0 %4655  ;;  %v4904_v1 = vadd.f32 %v4886_v45, %v4218_v25  ;;  %v11316_v10 = vld [vmem:[#allocation50_spill] sm:$0xff]  ;;  %v4835_v25 = vadd.f32 %v10526_v40, %v10519_v36 }
 0xbc3   :  { %v4885_v12 = vmul.f32 %v5684_v55, %v10351_v27  ;;  %5693 = vrcp.f32 %v4656_v48  ;;  %v5686_v24 = vpop.eup %5685  ;;  %v4165_v35 = vadd.f32 %v11317_v43, %v11316_v10 }
 0xbc4   :  { %v4905_v6 = vadd.f32 %v4887_v46, %v4219_v11  ;;  %5695 = vrcp.f32 %v4650_v59  ;;  %v4922_v56 = vadd.f32 %v10364_v41, %v4904_v1  ;;  %v5688_v37 = vpop.eup %5687  ;;  %v10595_v32 = vpop.f32.mrf.mxu1 }
 0xbc5   :  { %v4903_v58 = vadd.f32 %v4885_v12, %v4217_v54  ;;  %v5690_v61 = vpop.eup %5689  ;;  %5697 = vrcp.f32 %v10540_v23  ;;  %v10607_v27 = vpop.f32.mrf.mxu0  ;;  %v11321_v23 = vld [vmem:[#allocation58_spill] sm:$0xff]  ;;  %v4221_v44 = vmul.f32 %v5686_v24, %v4165_v35  ;;  %v4222_v55 = vmul.f32 %v5688_v37, %v4167_v42  ;;  %v11322_v35 = vld [vmem:[#allocation9_spill] sm:$0xff] }
 0xbc6   :  { %v4923_v19 = vadd.f32 %v10364_v41, %v4905_v6  ;;  %5151 = vst.msk [vmem:[%s10762_s8 + $0x98] sm:$0xff] %vm92_vm0, %v4922_v56  ;;  %5699 = vrcp.f32 %v10544_v7  ;;  %v4162_v45 = vadd.f32 %v11321_v23, %v11320_v60  ;;  %v11324_v42 = vld [vmem:[#allocation113_spill] sm:$0xff] }
 0xbc7   :  { %v4921_v54 = vadd.f32 %v10364_v41, %v4903_v58  ;;  %v5692_v1 = vpop.eup %5691  ;;  %5701 = vrcp.f32 %v10542_v29 }
 0xbc8   :  { %5152 = vst.msk [vmem:[%s10762_s8 + $0xa0] sm:$0xff] %vm92_vm0, %v4923_v19  ;;  %v4889_v36 = vmul.f32 %v5692_v1, %v4833_v3  ;;  %v4662_v40 = vpop.xlane.xlu1 %4661  ;;  %v4220_v48 = vmul.f32 %v5690_v61, %v4162_v45  ;;  %v4172_v3 = vadd.f32 %v10157_v53, %v11322_v35  ;;  %v4840_v61 = vadd.f32 %v10548_v14, %v10546_v62  ;;  %v11325_v53 = vld [vmem:[#allocation27_spill] sm:$0xff] }
 0xbc9   :  { %v5694_v26 = vpop.eup %5693  ;;  %5150 = vst.msk [vmem:[%s10762_s8 + $0x90] sm:$0xff] %vm92_vm0, %v4921_v54  ;;  %v4659_v7 = vpop.xlane.xlu2 %4658  ;;  %5703 = vrcp.f32 %v4662_v40  ;;  %v4843_v62 = vadd.f32 %v10558_v39, %v10556_v18  ;;  %v11330_v35 = vld [vmem:[#allocation115_spill] sm:$0xff] }
 0xbca   :  { %v5696_v59 = vpop.eup %5695  ;;  %v4890_v11 = vmul.f32 %v5694_v26, %v4835_v25  ;;  %v4665_v46 = vpop.xlane.xlu0 %4664  ;;  %v4907_v12 = vadd.f32 %v4889_v36, %v4221_v44  ;;  %v4175_v25 = vadd.f32 %v11325_v53, %v11324_v42 }
 0xbcb   :  { %v4888_v6 = vmul.f32 %v5696_v59, %v10436_v63  ;;  %5705 = vrcp.f32 %v4665_v46  ;;  %v5698_v29 = vpop.eup %5697 }
 0xbcc   :  { %v4908_v24 = vadd.f32 %v4890_v11, %v4222_v55  ;;  %5707 = vrcp.f32 %v4659_v7  ;;  %v4925_v56 = vadd.f32 %v10364_v41, %v4907_v12  ;;  %v5700_v19 = vpop.eup %5699  ;;  %v10628_v43 = vpop.f32.mrf.mxu1  ;;  %v4224_v26 = vmul.f32 %v5698_v29, %v4172_v3  ;;  %v11327_v12 = vld [vmem:[#allocation11_spill] sm:$0xff] }
 0xbcd   :  { %v4906_v58 = vadd.f32 %v4888_v6, %v4220_v48  ;;  %v5702_v37 = vpop.eup %5701  ;;  %5709 = vrcp.f32 %v10550_v15  ;;  %v10640_v54 = vpop.f32.mrf.mxu0  ;;  %v4838_v15 = vadd.f32 %v10538_v57, %v10536_v33  ;;  %v4225_v60 = vmul.f32 %v5700_v19, %v4175_v25  ;;  %v11326_v48 = vld [vmem:[#allocation114_spill] sm:$0xff]  ;;  %v11328_v19 = vld [vmem:[#allocation109_spill] sm:$0xff] }
 0xbce   :  { %v4926_v10 = vadd.f32 %v10364_v41, %v4908_v24  ;;  %5154 = vst.msk [vmem:[%s10762_s8 + $0xb0] sm:$0xff] %vm92_vm0, %v4925_v56  ;;  %5711 = vrcp.f32 %v10554_v31  ;;  %v4223_v44 = vmul.f32 %v5702_v37, %v4170_v50  ;;  %v4180_v6 = vadd.f32 %v11327_v12, %v11326_v48 }
 0xbcf   :  { %v4924_v63 = vadd.f32 %v10364_v41, %v4906_v58  ;;  %v5704_v1 = vpop.eup %5703  ;;  %5713 = vrcp.f32 %v10552_v51  ;;  %v4848_v24 = vadd.f32 %v10578_v20, %v10576_v0  ;;  %v4182_v3 = vadd.f32 %v10204_v38, %v11330_v35  ;;  %v11335_v35 = vld [vmem:[#allocation119_spill] sm:$0xff] }
 0xbd0   :  { %5155 = vst.msk [vmem:[%s10762_s8 + $0xb8] sm:$0xff] %vm92_vm0, %v4926_v10  ;;  %v4892_v5 = vmul.f32 %v5704_v1, %v4840_v61  ;;  %v4671_v31 = vpop.xlane.xlu1 %4670  ;;  %v11329_v10 = vld [vmem:[#allocation37_spill] sm:$0xff]  ;;  %v4845_v61 = vadd.f32 %v10568_v22, %v10566_v28 }
 0xbd1   :  { %v5706_v14 = vpop.eup %5705  ;;  %5153 = vst.msk [vmem:[%s10762_s8 + $0xa8] sm:$0xff] %vm92_vm0, %v4924_v63  ;;  %v4668_v18 = vpop.xlane.xlu2 %4667  ;;  %5715 = vrcp.f32 %v4671_v31  ;;  %v4177_v37 = vadd.f32 %v11329_v10, %v11328_v19 }
 0xbd2   :  { %v5708_v39 = vpop.eup %5707  ;;  %v4893_v23 = vmul.f32 %v5706_v14, %v4843_v62  ;;  %v4674_v45 = vpop.xlane.xlu0 %4673  ;;  %v4910_v36 = vadd.f32 %v4892_v5, %v4224_v26  ;;  %v11331_v5 = vld [vmem:[#allocation117_spill] sm:$0xff] }
 0xbd3   :  { %v4891_v40 = vmul.f32 %v5708_v39, %v4838_v15  ;;  %5717 = vrcp.f32 %v4674_v45  ;;  %v5710_v57 = vpop.eup %5709  ;;  %v4187_v31 = vadd.f32 %v10246_v8, %v11331_v5  ;;  %v11332_v45 = vld [vmem:[#allocation116_spill] sm:$0xff] }
 0xbd4   :  { %v4911_v33 = vadd.f32 %v4893_v23, %v4225_v60  ;;  %5719 = vrcp.f32 %v4668_v18  ;;  %v4928_v51 = vadd.f32 %v10364_v41, %v4910_v36  ;;  %v5712_v59 = vpop.eup %5711  ;;  %v4803_v11 = vpop.f32.mrf.mxu1  ;;  %v4227_v20 = vmul.f32 %v5710_v57, %v4180_v6  ;;  %v11333_v36 = vld [vmem:[#allocation118_spill] sm:$0xff] }
 0xbd5   :  { %v4909_v7 = vadd.f32 %v4891_v40, %v4223_v44  ;;  %v5714_v46 = vpop.eup %5713  ;;  %5721 = vrcp.f32 %v10560_v9  ;;  %v4857_v56 = vpop.f32.mrf.mxu0  ;;  %v4850_v9 = vadd.f32 %v10584_v34, %v10580_v4  ;;  %v4228_v63 = vmul.f32 %v5712_v59, %v4182_v3 }
 0xbd6   :  { %v4929_v55 = vadd.f32 %v10364_v41, %v4911_v33  ;;  %5157 = vst.msk [vmem:[%s10762_s8 + $0xc8] sm:$0xff] %vm92_vm0, %v4928_v51  ;;  %5723 = vrcp.f32 %v10564_v30  ;;  %v4226_v50 = vmul.f32 %v5714_v46, %v4177_v37  ;;  %v4855_v18 = vadd.f32 %v10640_v54, %v10628_v43 }
 0xbd7   :  { %v4927_v29 = vadd.f32 %v10364_v41, %v4909_v7  ;;  %v5716_v58 = vpop.eup %5715  ;;  %5725 = vrcp.f32 %v10562_v21  ;;  %v4185_v44 = vadd.f32 %v10218_v17, %v11332_v45  ;;  %v4190_v40 = vadd.f32 %v10261_v13, %v11333_v36 }
 0xbd8   :  { %5158 = vst.msk [vmem:[%s10762_s8 + $0xd0] sm:$0xff] %vm92_vm0, %v4929_v55  ;;  %v4895_v38 = vmul.f32 %v5716_v58, %v4848_v24  ;;  %v4680_v30 = vpop.xlane.xlu1 %4679  ;;  %v4858_v8 = vadd.f32 %v4857_v56, %v4803_v11  ;;  %v4853_v33 = vadd.f32 %v10607_v27, %v10595_v32  ;;  %v11334_v58 = vld [vmem:[#allocation120_spill] sm:$0xff]  ;;  %v4192_v3 = vadd.f32 %v10283_v49, %v11335_v35 }
 0xbd9   :  { %v5718_v0 = vpop.eup %5717  ;;  %5156 = vst.msk [vmem:[%s10762_s8 + $0xc0] sm:$0xff] %vm92_vm0, %v4927_v29  ;;  %v4677_v4 = vpop.xlane.xlu2 %4676  ;;  %5727 = vrcp.f32 %v4680_v30  ;;  %v4195_v19 = vadd.f32 %v10314_v47, %v11334_v58 }
 0xbda   :  { %v5720_v34 = vpop.eup %5719  ;;  %v4896_v1 = vmul.f32 %v5718_v0, %v4850_v9  ;;  %v4683_v16 = vpop.xlane.xlu0 %4682  ;;  %v4913_v42 = vadd.f32 %v4895_v38, %v4227_v20  ;;  %v11336_v9 = vld [vmem:[#allocation45_spill] sm:$0xff] }
 0xbdb   :  { %v4894_v53 = vmul.f32 %v5720_v34, %v4845_v61  ;;  %5729 = vrcp.f32 %v4683_v16  ;;  %v5722_v28 = vpop.eup %5721 }
 0xbdc   :  { %v4914_v21 = vadd.f32 %v4896_v1, %v4228_v63  ;;  %5731 = vrcp.f32 %v4677_v4  ;;  %v4931_v22 = vadd.f32 %v10364_v41, %v4913_v42  ;;  %v5724_v62 = vpop.eup %5723  ;;  %v4805_v15 = vpop.f32.mrf.mxu1  ;;  %v4230_v54 = vmul.f32 %v5722_v28, %v4187_v31  ;;  %v11337_v42 = vld [vmem:[#allocation121_spill] sm:$0xff] }
 0xbdd   :  { %v4912_v25 = vadd.f32 %v4894_v53, %v4226_v50  ;;  %v5726_v26 = vpop.eup %5725  ;;  %v4859_v60 = vpop.f32.mrf.mxu0  ;;  %5733 = vrcp.f32 %v10570_v2  ;;  %v4231_v51 = vmul.f32 %v5724_v62, %v4190_v40  ;;  %v11338_v53 = vld [vmem:[#allocation41_spill] sm:$0xff] }
 0xbde   :  { %v4932_v14 = vadd.f32 %v10364_v41, %v4914_v21  ;;  %5160 = vst.msk [vmem:[%s10762_s8 + $0xe0] sm:$0xff] %vm92_vm0, %v4931_v22  ;;  %5735 = vrcp.f32 %v10572_v52  ;;  %v4229_v59 = vmul.f32 %v5726_v26, %v4185_v44  ;;  %v4860_v0 = vadd.f32 %v4859_v60, %v4805_v15 }
 0xbdf   :  { %v4930_v39 = vadd.f32 %v10364_v41, %v4912_v25  ;;  %v5728_v23 = vpop.eup %5727  ;;  %v4197_v21 = vadd.f32 %v11338_v53, %v11337_v42 }
 0xbe0   :  { %5161 = vst.msk [vmem:[%s10762_s8 + $0xe8] sm:$0xff] %vm92_vm0, %v4932_v14  ;;  %v4898_v17 = vmul.f32 %v5728_v23, %v4855_v18  ;;  %v4689_v13 = vpop.xlane.xlu1 %4688 }
 0xbe1   :  { %v5730_v43 = vpop.eup %5729  ;;  %5159 = vst.msk [vmem:[%s10762_s8 + $0xd8] sm:$0xff] %vm92_vm0, %v4930_v39  ;;  %v4686_v2 = vpop.xlane.xlu2 %4685  ;;  %5737 = vrcp.f32 %v4689_v13 }
 0xbe2   :  { %v5732_v57 = vpop.eup %5731  ;;  %v4899_v7 = vmul.f32 %v5730_v43, %v4858_v8  ;;  %v4916_v55 = vadd.f32 %v4898_v17, %v4230_v54  ;;  %5739 = vrcp.f32 %v4686_v2  ;;  %v4692_v10 = vpop.xlane.xlu0 %4691 }
 0xbe3   :  { %v4897_v11 = vmul.f32 %v5732_v57, %v4853_v33  ;;  %v5734_v27 = vpop.eup %5733  ;;  %5741 = vrcp.f32 %v11336_v9 }
 0xbe4   :  { %v4917_v46 = vadd.f32 %v4899_v7, %v4231_v51  ;;  %v4934_v52 = vadd.f32 %v10364_v41, %v4916_v55  ;;  %v4808_v12 = vpop.f32.mrf.mxu1  ;;  %v5736_v6 = vpop.eup %5735  ;;  %v4233_v47 = vmul.f32 %v5734_v27, %v4195_v19  ;;  %5743 = vrcp.f32 %v4692_v10 }
 0xbe5   :  { %v4915_v32 = vadd.f32 %v4897_v11, %v4229_v59  ;;  %v4862_v29 = vpop.f32.mrf.mxu0  ;;  %v4232_v38 = vmul.f32 %v5736_v6, %v4192_v3 }
 0xbe6   :  { %v4935_v48 = vadd.f32 %v10364_v41, %v4917_v46  ;;  %5163 = vst.msk [vmem:[%s10762_s8 + $0xf8] sm:$0xff] %vm92_vm0, %v4934_v52  ;;  %v4863_v37 = vadd.f32 %v4862_v29, %v4808_v12 }
 0xbe7   :  { %v4933_v24 = vadd.f32 %v10364_v41, %v4915_v32  ;;  %v5738_v56 = vpop.eup %5737 }
 0xbe8   :  { %5164 = vst.msk [vmem:[%s10762_s8 + $0x100] sm:$0xff] %vm92_vm0, %v4935_v48  ;;  %v5740_v20 = vpop.eup %5739  ;;  %v4901_v61 = vmul.f32 %v5738_v56, %v4863_v37 }
 0xbe9   :  { %5162 = vst.msk [vmem:[%s10762_s8 + $0xf0] sm:$0xff] %vm92_vm0, %v4933_v24  ;;  %v4900_v30 = vmul.f32 %v5740_v20, %v4860_v0  ;;  %v5742_v49 = vpop.eup %5741 }
 0xbea   :  { %v4919_v4 = vadd.f32 %v4901_v61, %v4233_v47  ;;  %v5744_v22 = vpop.eup %5743  ;;  %v4234_v25 = vmul.f32 %v5742_v49, %v4197_v21 }
 0xbeb   :  { %v4918_v34 = vadd.f32 %v4900_v30, %v4232_v38 }
 0xbec   :  { %v4937_v63 = vadd.f32 %v10364_v41, %v4919_v4  ;;  %v4810_v1 = vpop.f32.mrf.mxu1 }
 0xbed   :  { %v4936_v16 = vadd.f32 %v10364_v41, %v4918_v34  ;;  %v4864_v50 = vpop.f32.mrf.mxu0 }
 0xbee   :  { %5166 = vst.msk [vmem:[%s10762_s8 + $0x110] sm:$0xff] %vm92_vm0, %v4937_v63  ;;  %v4865_v28 = vadd.f32 %v4864_v50, %v4810_v1 }
 0xbef   :  { %5165 = vst.msk [vmem:[%s10762_s8 + $0x108] sm:$0xff] %vm92_vm0, %v4936_v16 }
 0xbf0   :  { %v4902_v62 = vmul.f32 %v5744_v22, %v4865_v28 }
 0xbf2   :  { %v4920_v14 = vadd.f32 %v4902_v62, %v4234_v25 }
 0xbf4   :  { %v4938_v15 = vadd.f32 %v10364_v41, %v4920_v14 }
 0xbf6   :  { %5167 = vst.msk [vmem:[%s10762_s8 + $0x118] sm:$0xff] %vm92_vm0, %v4938_v15 }

</bundles_post_ra>
